<compile_context>
chip_gen: v5e
topology: v5e:2x2
jax: 0.10.0
libtpu: 0.0.40
codegen_flags: <defaults>
</compile_context>

<pallas_src>
import functools

import jax
import jax.numpy as jnp
import numpy as np
from jax.experimental import pallas as pl
from jax.experimental.pallas import tpu as pltpu

# VMEM budget derived from the actual part: 3/4 of physical, capped at 96 MiB
# (=> ~96 MiB on v5e/v6e with 128 MiB VMEM, ~48 MiB on v7x with 64 MiB VMEM).
try:
    _VMEM_LIMIT = int(min(pltpu.get_tpu_info().vmem_capacity_bytes * 3 // 4,
                          96 * 1024 * 1024))
except Exception:  # pragma: no cover - conservative fallback
    _VMEM_LIMIT = 48 * 1024 * 1024


# -----------------------------------------------------------------------------
# Kernel 1: fused relation transform, one lane-dense MXU pass per node tile:
#   Y = X @ [ W_0 .. W_{R-1} | W_loop | (W_0 a_l) .. (W_{R-1} a_l) ]
# Outputs split into a lane-dense bf16 y_rel slab and a small f32 side slab.
# -----------------------------------------------------------------------------
def _transform_kernel(rel_cols, x_ref, w_ref, yrel_ref, side_ref):
    y = jnp.dot(x_ref[...], w_ref[...], preferred_element_type=jnp.float32)
    yrel_ref[...] = y[:, :rel_cols].astype(jnp.bfloat16)   # (TN, R*D_out) lane-dense bf16
    side_ref[...] = y[:, rel_cols:]                         # (TN, D_out + R) f32


def fused_transform(x_bf16, w_cat_bf16, rel_cols, tile_n):
    n, d_in = x_bf16.shape
    total_cols = w_cat_bf16.shape[1]
    side_cols = total_cols - rel_cols
    assert n % tile_n == 0
    return pl.pallas_call(
        functools.partial(_transform_kernel, rel_cols),
        out_shape=(
            jax.ShapeDtypeStruct((n, rel_cols), jnp.bfloat16),
            jax.ShapeDtypeStruct((n, side_cols), jnp.float32),
        ),
        grid=(n // tile_n,),
        in_specs=[
            pl.BlockSpec((tile_n, d_in), lambda i: (i, 0)),
            pl.BlockSpec((d_in, total_cols), lambda i: (0, 0)),
        ],
        out_specs=(
            pl.BlockSpec((tile_n, rel_cols), lambda i: (i, 0)),
            pl.BlockSpec((tile_n, side_cols), lambda i: (i, 0)),
        ),
        compiler_params=pltpu.CompilerParams(
            dimension_semantics=("parallel",),
            vmem_limit_bytes=_VMEM_LIMIT),
    )(x_bf16, w_cat_bf16)


# -----------------------------------------------------------------------------
# Kernel 2: per-node-tile leaky_relu + softmax over the mailbox, norm-folded
# weighted reduce + loop message, plus (2, D_out) BatchNorm partial sums per tile.
# (w_bias is intentionally NOT added here: a per-feature constant before
#  training-mode BatchNorm cancels exactly in the mean subtraction.)
# -----------------------------------------------------------------------------
def _edge_reduce_kernel(att_ref, src_r_ref, loop_ref, norm_ref, h_ref, stats_ref):
    att = att_ref[...]                                       # (TN, K) attention logits
    a = jnp.where(att > 0, att, 0.01 * att)                  # leaky_relu (slope 0.01)
    a = a - jnp.max(a, axis=1, keepdims=True)                # stable softmax over mailbox
    p = jnp.exp(a)
    e = p * (norm_ref[...] / jnp.sum(p, axis=1, keepdims=True))   # softmax * graph norm
    accum = jnp.sum(e[:, :, None] * src_r_ref[...].astype(jnp.float32), axis=1)
    h = accum + loop_ref[...]                                # + loop_message
    h_ref[...] = h
    # BatchNorm partials: row 0 = sum(h), row 1 = sum(h*h).
    s1 = jnp.sum(h, axis=0, keepdims=True)
    s2 = jnp.sum(h * h, axis=0, keepdims=True)
    stats_ref[...] = jnp.concatenate([s1, s2], axis=0)[None]


def edge_reduce(att_edge, src_node_r, loop_msg, norm, tile_n):
    n, k = att_edge.shape
    d_out = src_node_r.shape[-1]
    assert n % tile_n == 0
    n_tiles = n // tile_n
    return pl.pallas_call(
        _edge_reduce_kernel,
        out_shape=(
            jax.ShapeDtypeStruct((n, d_out), jnp.float32),
            jax.ShapeDtypeStruct((n_tiles, 2, d_out), jnp.float32),
        ),
        grid=(n_tiles,),
        in_specs=[
            pl.BlockSpec((tile_n, k), lambda i: (i, 0)),
            pl.BlockSpec((tile_n, k, d_out), lambda i: (i, 0, 0)),
            pl.BlockSpec((tile_n, d_out), lambda i: (i, 0)),
            pl.BlockSpec((tile_n, 1), lambda i: (i, 0)),
        ],
        out_specs=(
            pl.BlockSpec((tile_n, d_out), lambda i: (i, 0)),
            pl.BlockSpec((1, 2, d_out), lambda i: (i, 0, 0)),
        ),
        compiler_params=pltpu.CompilerParams(
            dimension_semantics=("parallel",),
            vmem_limit_bytes=_VMEM_LIMIT),
    )(att_edge, src_node_r, loop_msg, norm)


# -----------------------------------------------------------------------------
# Kernel 3: BatchNorm normalize (precomputed global scale/shift) + ReLU.
# -----------------------------------------------------------------------------
def _bn_relu_kernel(h_ref, scale_ref, shift_ref, out_ref):
    out_ref[...] = jnp.maximum(h_ref[...] * scale_ref[...] + shift_ref[...], 0.0)


def bn_relu(h, scale_2d, shift_2d, tile_n):
    n, d_out = h.shape
    assert n % tile_n == 0
    return pl.pallas_call(
        _bn_relu_kernel,
        out_shape=jax.ShapeDtypeStruct((n, d_out), jnp.float32),
        grid=(n // tile_n,),
        in_specs=[
            pl.BlockSpec((tile_n, d_out), lambda i: (i, 0)),
            pl.BlockSpec((1, d_out), lambda i: (0, 0)),
            pl.BlockSpec((1, d_out), lambda i: (0, 0)),
        ],
        out_specs=pl.BlockSpec((tile_n, d_out), lambda i: (i, 0)),
        compiler_params=pltpu.CompilerParams(
            dimension_semantics=("parallel",),
            vmem_limit_bytes=_VMEM_LIMIT),
    )(h, scale_2d, shift_2d)


# -----------------------------------------------------------------------------
# Full forward pass.  Weight folding and the flattened mailbox gather are XLA glue.
# -----------------------------------------------------------------------------
@functools.partial(jax.jit, static_argnames=("tile_n",))
def rgat_forward(x, src_idx, rel_id, norm, w_loop, w_rel, a_l, w_bias, gamma, beta,
                 *, tile_n=256):
    n, d_in = x.shape
    r, _, d_out = w_rel.shape
    k = src_idx.shape[1]

    # Fold the attention vector into the relation weights -> one lane-dense weight slab:
    #   [ W_0 .. W_{R-1} | W_loop | W_0 a_l .. W_{R-1} a_l ]  of shape (D_in, R*D_out + D_out + R)
    att_cols = jnp.einsum('rio,o->ir', w_rel, a_l[:, 0])               # (D_in, R): W_r @ a_l
    w_cat = jnp.concatenate(
        [jnp.transpose(w_rel, (1, 0, 2)).reshape(d_in, r * d_out),
         w_loop,
         att_cols], axis=1)

    y_rel, side = fused_transform(x.astype(jnp.bfloat16),
                                  w_cat.astype(jnp.bfloat16),
                                  r * d_out, tile_n)
    loop_message = side[:, :d_out]                                      # (N, D_out) = X @ w_loop
    att_all = side[:, d_out:]                                           # (N, R) = (X W_r) a_l

    # Mailbox build (DGL message gather): one flattened contiguous-row take in bf16,
    # destination attention term via take_along_axis (no full (N, K) gather).
    # TODO(synk): fuse this gather into kernel 2 via scalar-prefetched indices + DMA gather.
    flat_idx = (src_idx * r + rel_id).reshape(-1)                       # (N*K,)
    src_node_r = jnp.take(y_rel.reshape(n * r, d_out), flat_idx, axis=0
                          ).reshape(n, k, d_out)                        # (N, K, D_out) bf16
    att_src = jnp.take(att_all.reshape(-1), flat_idx, axis=0).reshape(n, k)
    att_dst = jnp.take_along_axis(att_all, rel_id, axis=1)              # (N, K)
    att_edge = att_src + att_dst

    h, stats = edge_reduce(att_edge, src_node_r, loop_message, norm, tile_n)

    # BatchNorm1d (training-mode batch statistics) from per-tile partial sums, eps=1e-5.
    # w_bias (a constant per feature added before BN) cancels in the mean subtraction,
    # so it is folded away entirely.
    count = jnp.float32(n)
    mean = jnp.sum(stats[:, 0, :], axis=0) / count
    var = jnp.maximum(jnp.sum(stats[:, 1, :], axis=0) / count - mean * mean, 0.0)
    scale = gamma * jax.lax.rsqrt(var + 1e-5)
    shift = beta - mean * scale
    return bn_relu(h, scale[None, :], shift[None, :], tile_n)


# Pure-JAX (f32) reference for validation.
def rgat_reference(x, src_idx, rel_id, norm, w_loop, w_rel, a_l, w_bias, gamma, beta):
    n, d_in = x.shape
    k = src_idx.shape[1]
    loop_message = x @ w_loop
    w_e = w_rel[rel_id]                                                 # (N, K, D_in, D_out)
    src_ft = x[src_idx]                                                 # (N, K, D_in)
    dst_ft = jnp.broadcast_to(x[:, None, :], (n, k, d_in))
    src_node_r = jnp.einsum('nki,nkio->nko', src_ft, w_e)
    dst_node_r = jnp.einsum('nki,nkio->nko', dst_ft, w_e)
    att_l_src = jnp.einsum('nko,o->nk', src_node_r, a_l[:, 0])
    att_l_dst = jnp.einsum('nko,o->nk', dst_node_r, a_l[:, 0])
    att = att_l_src + att_l_dst
    a = jnp.where(att > 0, att, 0.01 * att)
    e = jax.nn.softmax(a, axis=1)
    accum = jnp.sum(e[:, :, None] * src_node_r, axis=1)
    h = accum * norm + w_bias + loop_message
    mean = jnp.mean(h, axis=0, keepdims=True)
    var = jnp.mean((h - mean) ** 2, axis=0, keepdims=True)
    hn = (h - mean) / jnp.sqrt(var + 1e-5) * gamma + beta
    return jnp.maximum(hn, 0.0)


if __name__ == "__main__":
    # Small synthetic configuration (fixed in-degree K per destination node).
    N, K = 1024, 8               # nodes, mailbox size
    D_IN, D_OUT = 32, 32         # input_dim, output_dim
    R = 4                        # rel_num (base_num = 0)
    TILE_N = 256                 # node tile (>=256 per perf review; N//TILE_N = 4 grid steps)

    key = jax.random.PRNGKey(0)
    k_x, k_src, k_rel, k_wl, k_wr, k_al = jax.random.split(key, 6)

    x = jax.random.normal(k_x, (N, D_IN), dtype=jnp.float32)
    src_idx = jax.random.randint(k_src, (N, K), 0, N)
    rel_id = jax.random.randint(k_rel, (N, K), 0, R)
    norm = jnp.full((N, 1), 1.0 / K, dtype=jnp.float32)                 # graph.ndata['norm']

    # Deterministic Xavier-uniform-style init (gain = sqrt(2)).
    gain = float(np.sqrt(2.0))
    lim_2d = gain * np.sqrt(6.0 / (D_IN + D_OUT))
    w_loop = jax.random.uniform(k_wl, (D_IN, D_OUT), jnp.float32, -lim_2d, lim_2d)
    w_rel = jax.random.uniform(k_wr, (R, D_IN, D_OUT), jnp.float32, -lim_2d, lim_2d)
    lim_a = gain * np.sqrt(6.0 / (D_OUT + 1))
    a_l = jax.random.uniform(k_al, (D_OUT, 1), jnp.float32, -lim_a, lim_a)  # attention_l.weight.T
    w_bias = jnp.zeros((D_OUT,), jnp.float32)                           # zeros_(w_bias)
    gamma = jnp.ones((D_OUT,), jnp.float32)                             # BN weight
    beta = jnp.zeros((D_OUT,), jnp.float32)                             # BN bias

    out = rgat_forward(x, src_idx, rel_id, norm, w_loop, w_rel, a_l,
                       w_bias, gamma, beta, tile_n=TILE_N)
    out = jax.block_until_ready(out)

    ref = rgat_reference(x, src_idx, rel_id, norm, w_loop, w_rel, a_l,
                         w_bias, gamma, beta)
    np.testing.assert_allclose(np.asarray(out), np.asarray(ref), rtol=2e-2, atol=2e-2)

    print("KERNEL_OK")
</pallas_src>

<mosaic_0001>
module attributes {stable_mosaic.version = 11 : i64} {
  func.func @_transform_kernel(%arg0: i32, %arg1: memref<256x32xbf16, #tpu.memory_space<vmem>>, %arg2: memref<32x164xbf16, #tpu.memory_space<vmem>>, %arg3: memref<256x128xbf16, #tpu.memory_space<vmem>>, %arg4: memref<256x36xf32, #tpu.memory_space<vmem>>) attributes {dimension_semantics = [#tpu.dimension_semantics<parallel>], iteration_bounds = array<i64: 4>, scalar_prefetch = 0 : i64, scratch_operands = 0 : i64, tpu.core_type = #tpu.core_type<tc>, window_params = [{transform_indices = @transform_0, window_bounds = array<i64: 256, 32>}, {pipeline_mode = #tpu.pipeline_mode<synchronous>, transform_indices = @transform_1, window_bounds = array<i64: 32, 164>}, {transform_indices = @transform_2, window_bounds = array<i64: 256, 128>}, {transform_indices = @transform_3, window_bounds = array<i64: 256, 36>}]} {
    %c0 = arith.constant 0 : index
    %c0_0 = arith.constant 0 : index
    %0 = vector.load %arg1[%c0, %c0_0] : memref<256x32xbf16, #tpu.memory_space<vmem>>, vector<256x32xbf16>
    %c0_1 = arith.constant 0 : index
    %c0_2 = arith.constant 0 : index
    %1 = vector.load %arg2[%c0_1, %c0_2] : memref<32x164xbf16, #tpu.memory_space<vmem>>, vector<32x164xbf16>
    %cst = arith.constant dense<0.000000e+00> : vector<256x164xf32>
    %2 = tpu.matmul %0, %1, %cst {dimension_numbers = #tpu.dot_dimension_numbers<[1], [0], [0], [1], [0, 0, 1, 1], [], []>} : vector<256x32xbf16>, vector<32x164xbf16>, vector<256x164xf32> -> vector<256x164xf32>
    %3 = vector.extract_strided_slice %2 {offsets = [0, 0], sizes = [256, 128], strides = [1, 1]} : vector<256x164xf32> to vector<256x128xf32>
    %4 = arith.truncf %3 : vector<256x128xf32> to vector<256x128xbf16>
    %c0_3 = arith.constant 0 : index
    %c0_4 = arith.constant 0 : index
    %5 = vector.load %arg3[%c0_3, %c0_4] : memref<256x128xbf16, #tpu.memory_space<vmem>>, vector<256x128xbf16>
    tpu.vector_store %arg3[%c0_3, %c0_4], %4 {strides = array<i32>} : memref<256x128xbf16, #tpu.memory_space<vmem>>, vector<256x128xbf16>,
    %6 = vector.extract_strided_slice %2 {offsets = [0, 128], sizes = [256, 36], strides = [1, 1]} : vector<256x164xf32> to vector<256x36xf32>
    %c0_5 = arith.constant 0 : index
    %c0_6 = arith.constant 0 : index
    %7 = vector.load %arg4[%c0_5, %c0_6] : memref<256x36xf32, #tpu.memory_space<vmem>>, vector<256x36xf32>
    tpu.vector_store %arg4[%c0_5, %c0_6], %6 {strides = array<i32>} : memref<256x36xf32, #tpu.memory_space<vmem>>, vector<256x36xf32>,
    return
  }
  func.func @transform_0(%arg0: i32) -> (i32, i32) {
    %c0_i32 = arith.constant 0 : i32
    %c0_i32_0 = arith.constant 0 : i32
    return %arg0, %c0_i32 : i32, i32
  }
  func.func @transform_1(%arg0: i32) -> (i32, i32) {
    %c0_i32 = arith.constant 0 : i32
    %c0_i32_0 = arith.constant 0 : i32
    %c0_i32_1 = arith.constant 0 : i32
    return %c0_i32, %c0_i32_0 : i32, i32
  }
  func.func @transform_2(%arg0: i32) -> (i32, i32) {
    %c0_i32 = arith.constant 0 : i32
    %c0_i32_0 = arith.constant 0 : i32
    return %arg0, %c0_i32 : i32, i32
  }
  func.func @transform_3(%arg0: i32) -> (i32, i32) {
    %c0_i32 = arith.constant 0 : i32
    %c0_i32_0 = arith.constant 0 : i32
    return %arg0, %c0_i32 : i32, i32
  }
}

module attributes {stable_mosaic.version = 11 : i64} {
  func.func @_edge_reduce_kernel(%arg0: i32, %arg1: memref<256x8xf32, #tpu.memory_space<vmem>>, %arg2: memref<256x8x32xbf16, #tpu.memory_space<vmem>>, %arg3: memref<256x32xf32, #tpu.memory_space<vmem>>, %arg4: memref<256x1xf32, #tpu.memory_space<vmem>>, %arg5: memref<256x32xf32, #tpu.memory_space<vmem>>, %arg6: memref<1x2x32xf32, #tpu.memory_space<vmem>>) attributes {dimension_semantics = [#tpu.dimension_semantics<parallel>], iteration_bounds = array<i64: 4>, scalar_prefetch = 0 : i64, scratch_operands = 0 : i64, tpu.core_type = #tpu.core_type<tc>, window_params = [{transform_indices = @transform_0, window_bounds = array<i64: 256, 8>}, {transform_indices = @transform_1, window_bounds = array<i64: 256, 8, 32>}, {transform_indices = @transform_2, window_bounds = array<i64: 256, 32>}, {transform_indices = @transform_3, window_bounds = array<i64: 256, 1>}, {transform_indices = @transform_4, window_bounds = array<i64: 256, 32>}, {transform_indices = @transform_5, window_bounds = array<i64: 1, 2, 32>}]} {
    %c0 = arith.constant 0 : index
    %c0_0 = arith.constant 0 : index
    %0 = vector.load %arg1[%c0, %c0_0] : memref<256x8xf32, #tpu.memory_space<vmem>>, vector<256x8xf32>
    %cst = arith.constant 0.000000e+00 : f32
    %1 = vector.broadcast %cst : f32 to vector<256x8xf32>
    %2 = arith.cmpf ogt, %0, %1 : vector<256x8xf32>
    %cst_1 = arith.constant 0.00999999977 : f32
    %3 = vector.broadcast %cst_1 : f32 to vector<256x8xf32>
    %4 = arith.mulf %3, %0 : vector<256x8xf32>
    %5 = arith.select %2, %0, %4 : vector<256x8xi1>, vector<256x8xf32>
    %cst_2 = arith.constant dense<0xFF800000> : vector<256xf32>
    %6 = vector.multi_reduction <maximumf>, %5, %cst_2 [1] : vector<256x8xf32> to vector<256xf32>
    %7 = vector.shape_cast %6 : vector<256xf32> to vector<256x1xf32>
    %8 = vector.broadcast %7 : vector<256x1xf32> to vector<256x8xf32>
    %9 = arith.subf %5, %8 : vector<256x8xf32>
    %10 = math.exp %9 : vector<256x8xf32>
    %c0_3 = arith.constant 0 : index
    %c0_4 = arith.constant 0 : index
    %11 = vector.load %arg4[%c0_3, %c0_4] : memref<256x1xf32, #tpu.memory_space<vmem>>, vector<256x1xf32>
    %cst_5 = arith.constant dense<0.000000e+00> : vector<256xf32>
    %12 = vector.multi_reduction <add>, %10, %cst_5 [1] : vector<256x8xf32> to vector<256xf32>
    %13 = vector.shape_cast %12 : vector<256xf32> to vector<256x1xf32>
    %14 = arith.divf %11, %13 : vector<256x1xf32>
    %15 = vector.broadcast %14 : vector<256x1xf32> to vector<256x8xf32>
    %16 = arith.mulf %10, %15 : vector<256x8xf32>
    %17 = vector.shape_cast %16 : vector<256x8xf32> to vector<256x8x1xf32>
    %c0_6 = arith.constant 0 : index
    %c0_7 = arith.constant 0 : index
    %c0_8 = arith.constant 0 : index
    %18 = vector.load %arg2[%c0_6, %c0_7, %c0_8] : memref<256x8x32xbf16, #tpu.memory_space<vmem>>, vector<256x8x32xbf16>
    %19 = arith.extf %18 : vector<256x8x32xbf16> to vector<256x8x32xf32>
    %20 = vector.broadcast %17 : vector<256x8x1xf32> to vector<256x8x32xf32>
    %21 = arith.mulf %20, %19 : vector<256x8x32xf32>
    %cst_9 = arith.constant dense<0.000000e+00> : vector<256x32xf32>
    %22 = vector.multi_reduction <add>, %21, %cst_9 [1] : vector<256x8x32xf32> to vector<256x32xf32>
    %c0_10 = arith.constant 0 : index
    %c0_11 = arith.constant 0 : index
    %23 = vector.load %arg3[%c0_10, %c0_11] : memref<256x32xf32, #tpu.memory_space<vmem>>, vector<256x32xf32>
    %24 = arith.addf %22, %23 : vector<256x32xf32>
    %c0_12 = arith.constant 0 : index
    %c0_13 = arith.constant 0 : index
    %25 = vector.load %arg5[%c0_12, %c0_13] : memref<256x32xf32, #tpu.memory_space<vmem>>, vector<256x32xf32>
    tpu.vector_store %arg5[%c0_12, %c0_13], %24 {strides = array<i32>} : memref<256x32xf32, #tpu.memory_space<vmem>>, vector<256x32xf32>,
    %cst_14 = arith.constant dense<0.000000e+00> : vector<32xf32>
    %26 = vector.multi_reduction <add>, %24, %cst_14 [0] : vector<256x32xf32> to vector<32xf32>
    %27 = vector.shape_cast %26 : vector<32xf32> to vector<1x32xf32>
    %28 = arith.mulf %24, %24 : vector<256x32xf32>
    %cst_15 = arith.constant dense<0.000000e+00> : vector<32xf32>
    %29 = vector.multi_reduction <add>, %28, %cst_15 [0] : vector<256x32xf32> to vector<32xf32>
    %30 = vector.shape_cast %29 : vector<32xf32> to vector<1x32xf32>
    %31 = tpu.concatenate %27, %30 in 0 : vector<1x32xf32>, vector<1x32xf32> -> vector<2x32xf32>
    %32 = vector.shape_cast %31 : vector<2x32xf32> to vector<1x2x32xf32>
    %c0_16 = arith.constant 0 : index
    %c0_17 = arith.constant 0 : index
    %c0_18 = arith.constant 0 : index
    %33 = vector.load %arg6[%c0_16, %c0_17, %c0_18] : memref<1x2x32xf32, #tpu.memory_space<vmem>>, vector<1x2x32xf32>
    tpu.vector_store %arg6[%c0_16, %c0_17, %c0_18], %32 {strides = array<i32>} : memref<1x2x32xf32, #tpu.memory_space<vmem>>, vector<1x2x32xf32>,
    return
  }
  func.func @transform_0(%arg0: i32) -> (i32, i32) {
    %c0_i32 = arith.constant 0 : i32
    %c0_i32_0 = arith.constant 0 : i32
    return %arg0, %c0_i32 : i32, i32
  }
  func.func @transform_1(%arg0: i32) -> (i32, i32, i32) {
    %c0_i32 = arith.constant 0 : i32
    %c0_i32_0 = arith.constant 0 : i32
    %c0_i32_1 = arith.constant 0 : i32
    return %arg0, %c0_i32, %c0_i32_0 : i32, i32, i32
  }
  func.func @transform_2(%arg0: i32) -> (i32, i32) {
    %c0_i32 = arith.constant 0 : i32
    %c0_i32_0 = arith.constant 0 : i32
    return %arg0, %c0_i32 : i32, i32
  }
  func.func @transform_3(%arg0: i32) -> (i32, i32) {
    %c0_i32 = arith.constant 0 : i32
    %c0_i32_0 = arith.constant 0 : i32
    return %arg0, %c0_i32 : i32, i32
  }
  func.func @transform_4(%arg0: i32) -> (i32, i32) {
    %c0_i32 = arith.constant 0 : i32
    %c0_i32_0 = arith.constant 0 : i32
    return %arg0, %c0_i32 : i32, i32
  }
  func.func @transform_5(%arg0: i32) -> (i32, i32, i32) {
    %c0_i32 = arith.constant 0 : i32
    %c0_i32_0 = arith.constant 0 : i32
    %c0_i32_1 = arith.constant 0 : i32
    return %arg0, %c0_i32, %c0_i32_0 : i32, i32, i32
  }
}

module attributes {stable_mosaic.version = 11 : i64} {
  func.func @_bn_relu_kernel(%arg0: i32, %arg1: memref<256x32xf32, #tpu.memory_space<vmem>>, %arg2: memref<1x32xf32, #tpu.memory_space<vmem>>, %arg3: memref<1x32xf32, #tpu.memory_space<vmem>>, %arg4: memref<256x32xf32, #tpu.memory_space<vmem>>) attributes {dimension_semantics = [#tpu.dimension_semantics<parallel>], iteration_bounds = array<i64: 4>, scalar_prefetch = 0 : i64, scratch_operands = 0 : i64, tpu.core_type = #tpu.core_type<tc>, window_params = [{transform_indices = @transform_0, window_bounds = array<i64: 256, 32>}, {pipeline_mode = #tpu.pipeline_mode<synchronous>, transform_indices = @transform_1, window_bounds = array<i64: 1, 32>}, {pipeline_mode = #tpu.pipeline_mode<synchronous>, transform_indices = @transform_2, window_bounds = array<i64: 1, 32>}, {transform_indices = @transform_3, window_bounds = array<i64: 256, 32>}]} {
    %c0 = arith.constant 0 : index
    %c0_0 = arith.constant 0 : index
    %0 = vector.load %arg1[%c0, %c0_0] : memref<256x32xf32, #tpu.memory_space<vmem>>, vector<256x32xf32>
    %c0_1 = arith.constant 0 : index
    %c0_2 = arith.constant 0 : index
    %1 = vector.load %arg2[%c0_1, %c0_2] : memref<1x32xf32, #tpu.memory_space<vmem>>, vector<1x32xf32>
    %2 = vector.broadcast %1 : vector<1x32xf32> to vector<256x32xf32>
    %3 = arith.mulf %0, %2 : vector<256x32xf32>
    %c0_3 = arith.constant 0 : index
    %c0_4 = arith.constant 0 : index
    %4 = vector.load %arg3[%c0_3, %c0_4] : memref<1x32xf32, #tpu.memory_space<vmem>>, vector<1x32xf32>
    %5 = vector.broadcast %4 : vector<1x32xf32> to vector<256x32xf32>
    %6 = arith.addf %3, %5 : vector<256x32xf32>
    %cst = arith.constant 0.000000e+00 : f32
    %7 = vector.broadcast %cst : f32 to vector<256x32xf32>
    %8 = arith.maximumf %6, %7 : vector<256x32xf32>
    %c0_5 = arith.constant 0 : index
    %c0_6 = arith.constant 0 : index
    %9 = vector.load %arg4[%c0_5, %c0_6] : memref<256x32xf32, #tpu.memory_space<vmem>>, vector<256x32xf32>
    tpu.vector_store %arg4[%c0_5, %c0_6], %8 {strides = array<i32>} : memref<256x32xf32, #tpu.memory_space<vmem>>, vector<256x32xf32>,
    return
  }
  func.func @transform_0(%arg0: i32) -> (i32, i32) {
    %c0_i32 = arith.constant 0 : i32
    %c0_i32_0 = arith.constant 0 : i32
    return %arg0, %c0_i32 : i32, i32
  }
  func.func @transform_1(%arg0: i32) -> (i32, i32) {
    %c0_i32 = arith.constant 0 : i32
    %c0_i32_0 = arith.constant 0 : i32
    %c0_i32_1 = arith.constant 0 : i32
    return %c0_i32, %c0_i32_0 : i32, i32
  }
  func.func @transform_2(%arg0: i32) -> (i32, i32) {
    %c0_i32 = arith.constant 0 : i32
    %c0_i32_0 = arith.constant 0 : i32
    %c0_i32_1 = arith.constant 0 : i32
    return %c0_i32, %c0_i32_0 : i32, i32
  }
  func.func @transform_3(%arg0: i32) -> (i32, i32) {
    %c0_i32 = arith.constant 0 : i32
    %c0_i32_0 = arith.constant 0 : i32
    return %arg0, %c0_i32 : i32, i32
  }
}

</mosaic_0001>

<bundles_post_ra>
// kernel: rgat_forward.3
= control target key start
LH: loop header
LB: loop body
LE: loop exit
PB: predicated region body
PF: predicated region fallthrough
CT: control target
= control target key end

     0   :  { %s1019_s12 = smov 0   ;;  %s1205_s0 = inlined_call_operand.vmem [shape: bf16[1024,32], index: 0, kind: input, shape index: {}]   ;;  %s1206_s1 = inlined_call_operand.vmem [shape: bf16[32,164], index: 1, kind: input, shape index: {}]   ;;  %s1207_s2 = inlined_call_operand.vmem [shape: bf16[1024,128], index: 2, kind: output, shape index: {0}]   ;;  %s1208_s3 = inlined_call_operand.vmem [shape: f32[1024,36], index: 3, kind: output, shape index: {1}]  }
   0x1 LB: > { %s739_s13 = sadd.s32 4294967295, %s997_s12   ;;  %p743_p0 = scmp.ge.s32.totalorder %s997_s12, 1  ;;  %s997_s12 = sphi %s1019_s12, %s14_s12  }
   0x2   : > { %p141_p1 = scmp.lt.s32.totalorder %s997_s12, 5 }
   0x4   : > { %p142_p2 = pnand %p743_p0, %p141_p1 }
   0x5   : > { %s744_s30 = sshll.u32 (!%p142_p2), %s739_s13, 5 }
   0x6   : > { %145 = sbr.rel (%p142_p2) target bundleno = 276 (0x114), region = 28  ;;  %p171_p3 = scmp.lt.s32.totalorder (!%p142_p2), %s744_s30, 127 }
   0xb   : > { %v824_v0 = vld [vmem:[%s1206_s1 + $0x10] sm:$0xf]  ;;  %v883_v1 = vld [vmem:[%s1206_s1 + $0x14] sm:$0xf0]  ;;  %v882_v2 = vld [vmem:[%s1206_s1 + $0x14] sm:$0xf] }
   0xc   : > { %v825_v3 = vor.u32 %v883_v1, %v824_v0  ;;  %v826_v4 = vld [vmem:[%s1206_s1 + $0x18] sm:$0xf0]  ;;  %v816_v5 = vld [vmem:[%s1206_s1] sm:$0xf]  ;;  %v881_v6 = vld [vmem:[%s1206_s1 + $0x4] sm:$0xf0] }
   0xd   : > { %v829_v7 = vor.u32 %v882_v2, %v826_v4  ;;  %v880_v8 = vld [vmem:[%s1206_s1 + $0x4] sm:$0xf]  ;;  %v818_v9 = vld [vmem:[%s1206_s1 + $0x8] sm:$0xf0]  ;;  %v817_v10 = vor.u32 %v881_v6, %v816_v5  ;;  %s1210_s30 = smov (!%p171_p3, %s744_s30), 127  ;;  %vm325_vm0 = vcmask 261120  }
   0xe   : > { %380 = vmatpush.bf16.msra.mxu0 %v825_v3  ;;  %979 = vmatpush.bf16.msra.mxu2 %v825_v3  ;;  %v821_v11 = vor.u32 %v880_v8, %v818_v9  ;;  %s745_s4 = sshll.u32 %s1210_s30, 2  ;;  %s749_s8 = sshll.u32 %s1210_s30, 3  ;;  %vm616_vm1 = vcmask 293888  }
   0xf   : > { %469 = vmatpush.bf16.msra.mxu1 %v829_v7  ;;  %981 = vmatpush.bf16.msra.mxu3 %v829_v7  ;;  %s1059_s7 = scalar_lea.vmem %s1205_s0, %s745_s4  ;;  %s1113_s11 = scalar_lea.vmem %s1208_s3, %s749_s8 }
  0x10   : > { %v864_v12 = vld [vmem:[%s1059_s7] sm:$0xff]  ;;  %v865_v14 = vld [vmem:[%s1059_s7 + $0x8] sm:$0xff]  ;;  %v866_v16 = vld [vmem:[%s1059_s7 + $0x10] sm:$0xff]  ;;  %s1124_s15 = scalar_lea.vmem %s1207_s2, %s745_s4 }
  0x11   : > { %v872_v13 = vld [vmem:[%s1059_s7 + $0x40] sm:$0xff]  ;;  %v873_v15 = vld [vmem:[%s1059_s7 + $0x48] sm:$0xff]  ;;  %v874_v17 = vld [vmem:[%s1059_s7 + $0x50] sm:$0xff] }
  0x12   : > { %381 = vmatpush.bf16.msra.mxu0 %v817_v10  ;;  %980 = vmatpush.bf16.msra.mxu2 %v817_v10  ;;  %v867_v18 = vld [vmem:[%s1059_s7 + $0x18] sm:$0xff]  ;;  %v868_v20 = vld [vmem:[%s1059_s7 + $0x20] sm:$0xff]  ;;  %v869_v22 = vld [vmem:[%s1059_s7 + $0x28] sm:$0xff] }
  0x13   : > { %470 = vmatpush.bf16.msra.mxu1 %v821_v11  ;;  %982 = vmatpush.bf16.msra.mxu3 %v821_v11  ;;  %v875_v19 = vld [vmem:[%s1059_s7 + $0x58] sm:$0xff]  ;;  %v876_v21 = vld [vmem:[%s1059_s7 + $0x60] sm:$0xff]  ;;  %v877_v23 = vld [vmem:[%s1059_s7 + $0x68] sm:$0xff] }
  0x14   : > { %v870_v24 = vld [vmem:[%s1059_s7 + $0x30] sm:$0xff]  ;;  %v871_v26 = vld [vmem:[%s1059_s7 + $0x38] sm:$0xff] }
  0x15   : > { %830 = vmatmul.msk.bf16.vlgmr.msra.gmra.mxu0 %vm325_vm0, %v864_v12  ;;  %838 = vmatmul.msk.bf16.vlgmr.msra.gmra.mxu2 %vm325_vm0, %v872_v13  ;;  %v878_v25 = vld [vmem:[%s1059_s7 + $0x70] sm:$0xff]  ;;  %v879_v27 = vld [vmem:[%s1059_s7 + $0x78] sm:$0xff] }
  0x16   : > { %846 = vmatmul.msk.bf16.vlgmr.msra.gmra.mxu1 %vm325_vm0, %v864_v12  ;;  %854 = vmatmul.msk.bf16.vlgmr.msra.gmra.mxu3 %vm325_vm0, %v872_v13 }
  0x25   : > { %831 = vmatmul.msk.bf16.gmra.mxu0 %vm325_vm0, %v865_v14  ;;  %839 = vmatmul.msk.bf16.gmra.mxu2 %vm325_vm0, %v873_v15 }
  0x26   : > { %847 = vmatmul.msk.bf16.gmra.mxu1 %vm325_vm0, %v865_v14  ;;  %855 = vmatmul.msk.bf16.gmra.mxu3 %vm325_vm0, %v873_v15 }
  0x35   : > { %832 = vmatmul.msk.bf16.gmra.mxu0 %vm325_vm0, %v866_v16  ;;  %840 = vmatmul.msk.bf16.gmra.mxu2 %vm325_vm0, %v874_v17 }
  0x36   : > { %848 = vmatmul.msk.bf16.gmra.mxu1 %vm325_vm0, %v866_v16  ;;  %856 = vmatmul.msk.bf16.gmra.mxu3 %vm325_vm0, %v874_v17 }
  0x45   : > { %833 = vmatmul.msk.bf16.gmra.mxu0 %vm325_vm0, %v867_v18  ;;  %841 = vmatmul.msk.bf16.gmra.mxu2 %vm325_vm0, %v875_v19 }
  0x46   : > { %849 = vmatmul.msk.bf16.gmra.mxu1 %vm325_vm0, %v867_v18  ;;  %857 = vmatmul.msk.bf16.gmra.mxu3 %vm325_vm0, %v875_v19 }
  0x55   : > { %834 = vmatmul.msk.bf16.gmra.mxu0 %vm325_vm0, %v868_v20  ;;  %842 = vmatmul.msk.bf16.gmra.mxu2 %vm325_vm0, %v876_v21 }
  0x56   : > { %850 = vmatmul.msk.bf16.gmra.mxu1 %vm325_vm0, %v868_v20  ;;  %858 = vmatmul.msk.bf16.gmra.mxu3 %vm325_vm0, %v876_v21 }
  0x65   : > { %835 = vmatmul.msk.bf16.gmra.mxu0 %vm325_vm0, %v869_v22  ;;  %843 = vmatmul.msk.bf16.gmra.mxu2 %vm325_vm0, %v877_v23 }
  0x66   : > { %851 = vmatmul.msk.bf16.gmra.mxu1 %vm325_vm0, %v869_v22  ;;  %859 = vmatmul.msk.bf16.gmra.mxu3 %vm325_vm0, %v877_v23 }
  0x75   : > { %836 = vmatmul.msk.bf16.gmra.mxu0 %vm325_vm0, %v870_v24  ;;  %844 = vmatmul.msk.bf16.gmra.mxu2 %vm325_vm0, %v878_v25 }
  0x76   : > { %852 = vmatmul.msk.bf16.gmra.mxu1 %vm325_vm0, %v870_v24  ;;  %860 = vmatmul.msk.bf16.gmra.mxu3 %vm325_vm0, %v878_v25 }
  0x85   : > { %837 = vmatmul.msk.bf16.gmra.mxu0 %vm325_vm0, %v871_v26  ;;  %845 = vmatmul.msk.bf16.gmra.mxu2 %vm325_vm0, %v879_v27 }
  0x86   : > { %853 = vmatmul.msk.bf16.gmra.mxu1 %vm325_vm0, %v871_v26  ;;  %861 = vmatmul.msk.bf16.gmra.mxu3 %vm325_vm0, %v879_v27 }
  0x92   : > { %v383_v28 = vpop.f32.mrf.mxu0 }
  0x93   : > { %v472_v29 = vpop.f32.mrf.mxu1 }
  0x94   : > { %617 = vst.msk [vmem:[%s1113_s11] sm:$0xff] %vm616_vm1, %v472_v29 }
  0x98   : > { %v423_v30 = vpop.f32.mrf.mxu2 }
  0x99   : > { %v512_v31 = vpop.f32.mrf.mxu3 }
  0x9a   : > { %633 = vst.msk [vmem:[%s1113_s11 + $0x80] sm:$0xff] %vm616_vm1, %v512_v31  ;;  %v385_v32 = vpop.f32.mrf.mxu0 }
  0x9b   : > { %v887_v33 = vpack.c.bf16 %v385_v32, %v383_v28  ;;  %v474_v34 = vpop.f32.mrf.mxu1 }
  0x9c   : > { %618 = vst.msk [vmem:[%s1113_s11 + $0x8] sm:$0xff] %vm616_vm1, %v474_v34 }
  0x9d   : > { %888 = vst [vmem:[%s1124_s15] sm:$0xff] %v887_v33  }
  0xa0   : > { %v425_v35 = vpop.f32.mrf.mxu2 }
  0xa1   : > { %v927_v36 = vpack.c.bf16 %v425_v35, %v423_v30  ;;  %v514_v37 = vpop.f32.mrf.mxu3 }
  0xa2   : > { %634 = vst.msk [vmem:[%s1113_s11 + $0x88] sm:$0xff] %vm616_vm1, %v514_v37  ;;  %v388_v38 = vpop.f32.mrf.mxu0 }
  0xa3   : > { %971 = vst [vmem:[%s1124_s15 + $0x40] sm:$0xff] %v927_v36   ;;  %v477_v39 = vpop.f32.mrf.mxu1 }
  0xa4   : > { %619 = vst.msk [vmem:[%s1113_s11 + $0x10] sm:$0xff] %vm616_vm1, %v477_v39 }
  0xa8   : > { %v428_v40 = vpop.f32.mrf.mxu2 }
  0xa9   : > { %v517_v41 = vpop.f32.mrf.mxu3 }
  0xaa   : > { %635 = vst.msk [vmem:[%s1113_s11 + $0x90] sm:$0xff] %vm616_vm1, %v517_v41  ;;  %v390_v42 = vpop.f32.mrf.mxu0 }
  0xab   : > { %v892_v43 = vpack.c.bf16 %v390_v42, %v388_v38  ;;  %v479_v44 = vpop.f32.mrf.mxu1 }
  0xac   : > { %620 = vst.msk [vmem:[%s1113_s11 + $0x18] sm:$0xff] %vm616_vm1, %v479_v44 }
  0xad   : > { %964 = vst [vmem:[%s1124_s15 + $0x8] sm:$0xff] %v892_v43  }
  0xb0   : > { %v430_v45 = vpop.f32.mrf.mxu2 }
  0xb1   : > { %v932_v46 = vpack.c.bf16 %v430_v45, %v428_v40  ;;  %v519_v47 = vpop.f32.mrf.mxu3 }
  0xb2   : > { %636 = vst.msk [vmem:[%s1113_s11 + $0x98] sm:$0xff] %vm616_vm1, %v519_v47  ;;  %v393_v48 = vpop.f32.mrf.mxu0 }
  0xb3   : > { %972 = vst [vmem:[%s1124_s15 + $0x48] sm:$0xff] %v932_v46   ;;  %v482_v49 = vpop.f32.mrf.mxu1 }
  0xb4   : > { %621 = vst.msk [vmem:[%s1113_s11 + $0x20] sm:$0xff] %vm616_vm1, %v482_v49 }
  0xb8   : > { %v433_v50 = vpop.f32.mrf.mxu2 }
  0xb9   : > { %v522_v51 = vpop.f32.mrf.mxu3 }
  0xba   : > { %637 = vst.msk [vmem:[%s1113_s11 + $0xa0] sm:$0xff] %vm616_vm1, %v522_v51  ;;  %v395_v52 = vpop.f32.mrf.mxu0 }
  0xbb   : > { %v897_v53 = vpack.c.bf16 %v395_v52, %v393_v48  ;;  %v484_v54 = vpop.f32.mrf.mxu1 }
  0xbc   : > { %622 = vst.msk [vmem:[%s1113_s11 + $0x28] sm:$0xff] %vm616_vm1, %v484_v54 }
  0xbd   : > { %965 = vst [vmem:[%s1124_s15 + $0x10] sm:$0xff] %v897_v53  }
  0xc0   : > { %v435_v55 = vpop.f32.mrf.mxu2 }
  0xc1   : > { %v937_v56 = vpack.c.bf16 %v435_v55, %v433_v50  ;;  %v524_v57 = vpop.f32.mrf.mxu3 }
  0xc2   : > { %638 = vst.msk [vmem:[%s1113_s11 + $0xa8] sm:$0xff] %vm616_vm1, %v524_v57  ;;  %v398_v58 = vpop.f32.mrf.mxu0 }
  0xc3   : > { %973 = vst [vmem:[%s1124_s15 + $0x50] sm:$0xff] %v937_v56   ;;  %v487_v59 = vpop.f32.mrf.mxu1 }
  0xc4   : > { %623 = vst.msk [vmem:[%s1113_s11 + $0x30] sm:$0xff] %vm616_vm1, %v487_v59 }
  0xc8   : > { %v438_v60 = vpop.f32.mrf.mxu2 }
  0xc9   : > { %v527_v61 = vpop.f32.mrf.mxu3 }
  0xca   : > { %639 = vst.msk [vmem:[%s1113_s11 + $0xb0] sm:$0xff] %vm616_vm1, %v527_v61  ;;  %v400_v62 = vpop.f32.mrf.mxu0 }
  0xcb   : > { %v902_v63 = vpack.c.bf16 %v400_v62, %v398_v58  ;;  %v489_v0 = vpop.f32.mrf.mxu1 }
  0xcc   : > { %624 = vst.msk [vmem:[%s1113_s11 + $0x38] sm:$0xff] %vm616_vm1, %v489_v0 }
  0xcd   : > { %966 = vst [vmem:[%s1124_s15 + $0x18] sm:$0xff] %v902_v63  }
  0xd0   : > { %v440_v1 = vpop.f32.mrf.mxu2 }
  0xd1   : > { %v942_v2 = vpack.c.bf16 %v440_v1, %v438_v60  ;;  %v529_v3 = vpop.f32.mrf.mxu3 }
  0xd2   : > { %640 = vst.msk [vmem:[%s1113_s11 + $0xb8] sm:$0xff] %vm616_vm1, %v529_v3  ;;  %v403_v4 = vpop.f32.mrf.mxu0 }
  0xd3   : > { %974 = vst [vmem:[%s1124_s15 + $0x58] sm:$0xff] %v942_v2   ;;  %v492_v5 = vpop.f32.mrf.mxu1 }
  0xd4   : > { %625 = vst.msk [vmem:[%s1113_s11 + $0x40] sm:$0xff] %vm616_vm1, %v492_v5 }
  0xd8   : > { %v443_v6 = vpop.f32.mrf.mxu2 }
  0xd9   : > { %v532_v7 = vpop.f32.mrf.mxu3 }
  0xda   : > { %641 = vst.msk [vmem:[%s1113_s11 + $0xc0] sm:$0xff] %vm616_vm1, %v532_v7  ;;  %v405_v8 = vpop.f32.mrf.mxu0 }
  0xdb   : > { %v907_v9 = vpack.c.bf16 %v405_v8, %v403_v4  ;;  %v494_v10 = vpop.f32.mrf.mxu1 }
  0xdc   : > { %626 = vst.msk [vmem:[%s1113_s11 + $0x48] sm:$0xff] %vm616_vm1, %v494_v10 }
  0xdd   : > { %967 = vst [vmem:[%s1124_s15 + $0x20] sm:$0xff] %v907_v9  }
  0xe0   : > { %v445_v11 = vpop.f32.mrf.mxu2 }
  0xe1   : > { %v947_v12 = vpack.c.bf16 %v445_v11, %v443_v6  ;;  %v534_v13 = vpop.f32.mrf.mxu3 }
  0xe2   : > { %642 = vst.msk [vmem:[%s1113_s11 + $0xc8] sm:$0xff] %vm616_vm1, %v534_v13  ;;  %v408_v14 = vpop.f32.mrf.mxu0 }
  0xe3   : > { %975 = vst [vmem:[%s1124_s15 + $0x60] sm:$0xff] %v947_v12   ;;  %v497_v15 = vpop.f32.mrf.mxu1 }
  0xe4   : > { %627 = vst.msk [vmem:[%s1113_s11 + $0x50] sm:$0xff] %vm616_vm1, %v497_v15 }
  0xe8   : > { %v448_v16 = vpop.f32.mrf.mxu2 }
  0xe9   : > { %v537_v17 = vpop.f32.mrf.mxu3 }
  0xea   : > { %643 = vst.msk [vmem:[%s1113_s11 + $0xd0] sm:$0xff] %vm616_vm1, %v537_v17  ;;  %v410_v18 = vpop.f32.mrf.mxu0 }
  0xeb   : > { %v912_v19 = vpack.c.bf16 %v410_v18, %v408_v14  ;;  %v499_v20 = vpop.f32.mrf.mxu1 }
  0xec   : > { %628 = vst.msk [vmem:[%s1113_s11 + $0x58] sm:$0xff] %vm616_vm1, %v499_v20 }
  0xed   : > { %968 = vst [vmem:[%s1124_s15 + $0x28] sm:$0xff] %v912_v19  }
  0xf0   : > { %v450_v21 = vpop.f32.mrf.mxu2 }
  0xf1   : > { %v952_v22 = vpack.c.bf16 %v450_v21, %v448_v16  ;;  %v539_v23 = vpop.f32.mrf.mxu3 }
  0xf2   : > { %644 = vst.msk [vmem:[%s1113_s11 + $0xd8] sm:$0xff] %vm616_vm1, %v539_v23  ;;  %v413_v24 = vpop.f32.mrf.mxu0 }
  0xf3   : > { %976 = vst [vmem:[%s1124_s15 + $0x68] sm:$0xff] %v952_v22   ;;  %v502_v25 = vpop.f32.mrf.mxu1 }
  0xf4   : > { %629 = vst.msk [vmem:[%s1113_s11 + $0x60] sm:$0xff] %vm616_vm1, %v502_v25 }
  0xf8   : > { %v453_v26 = vpop.f32.mrf.mxu2 }
  0xf9   : > { %v542_v27 = vpop.f32.mrf.mxu3 }
  0xfa   : > { %645 = vst.msk [vmem:[%s1113_s11 + $0xe0] sm:$0xff] %vm616_vm1, %v542_v27  ;;  %v415_v28 = vpop.f32.mrf.mxu0 }
  0xfb   : > { %v917_v29 = vpack.c.bf16 %v415_v28, %v413_v24  ;;  %v504_v30 = vpop.f32.mrf.mxu1 }
  0xfc   : > { %630 = vst.msk [vmem:[%s1113_s11 + $0x68] sm:$0xff] %vm616_vm1, %v504_v30 }
  0xfd   : > { %969 = vst [vmem:[%s1124_s15 + $0x30] sm:$0xff] %v917_v29  }
 0x100   : > { %v455_v31 = vpop.f32.mrf.mxu2 }
 0x101   : > { %v957_v32 = vpack.c.bf16 %v455_v31, %v453_v26  ;;  %v544_v33 = vpop.f32.mrf.mxu3 }
 0x102   : > { %646 = vst.msk [vmem:[%s1113_s11 + $0xe8] sm:$0xff] %vm616_vm1, %v544_v33  ;;  %v418_v34 = vpop.f32.mrf.mxu0 }
 0x103   : > { %977 = vst [vmem:[%s1124_s15 + $0x70] sm:$0xff] %v957_v32   ;;  %v507_v35 = vpop.f32.mrf.mxu1 }
 0x104   : > { %631 = vst.msk [vmem:[%s1113_s11 + $0x70] sm:$0xff] %vm616_vm1, %v507_v35 }
 0x108   : > { %v458_v36 = vpop.f32.mrf.mxu2 }
 0x109   : > { %v547_v37 = vpop.f32.mrf.mxu3 }
 0x10a   : > { %647 = vst.msk [vmem:[%s1113_s11 + $0xf0] sm:$0xff] %vm616_vm1, %v547_v37  ;;  %v420_v38 = vpop.f32.mrf.mxu0 }
 0x10b   : > { %v922_v39 = vpack.c.bf16 %v420_v38, %v418_v34  ;;  %v509_v40 = vpop.f32.mrf.mxu1 }
 0x10c   : > { %632 = vst.msk [vmem:[%s1113_s11 + $0x78] sm:$0xff] %vm616_vm1, %v509_v40 }
 0x10d   : > { %970 = vst [vmem:[%s1124_s15 + $0x38] sm:$0xff] %v922_v39  }
 0x110   : > { %v460_v41 = vpop.f32.mrf.mxu2 }
 0x111   : > { %v962_v42 = vpack.c.bf16 %v460_v41, %v458_v36  ;;  %v549_v43 = vpop.f32.mrf.mxu3 }
 0x112   : > { %648 = vst.msk [vmem:[%s1113_s11 + $0xf8] sm:$0xff] %vm616_vm1, %v549_v43 }
 0x113   : > { %978 = vst [vmem:[%s1124_s15 + $0x78] sm:$0xff] %v962_v42  }
 0x114 PF: > { %s14_s12 = sadd.s32 1, %s997_s12  }
 0x115   : > { %p11_p4 = scmp.ge.s32.totalorder %s14_s12, 6  }
 0x117   :  { %13 = sbr.rel (!%p11_p4) target bundleno = 1 (0x1), region = 70 }

// kernel: rgat_forward.5
= control target key start
LH: loop header
LB: loop body
LE: loop exit
PB: predicated region body
PF: predicated region fallthrough
CT: control target
= control target key end

     0   :  { %s448_s12 = smov 0   ;;  %s639_s0 = inlined_call_operand.vmem [shape: f32[1024,32], index: 0, kind: input, shape index: {}]   ;;  %s640_s1 = inlined_call_operand.vmem [shape: f32[1,32], index: 1, kind: input, shape index: {}]   ;;  %s641_s2 = inlined_call_operand.vmem [shape: f32[1,32], index: 2, kind: input, shape index: {}]   ;;  %s642_s3 = inlined_call_operand.vmem [shape: f32[1024,32], index: 3, kind: output, shape index: {}]  }
   0x1 LB: > { %s399_s13 = sadd.s32 4294967295, %s426_s12   ;;  %p403_p0 = scmp.ge.s32.totalorder %s426_s12, 1  ;;  %s426_s12 = sphi %s448_s12, %s13_s12  }
   0x2   : > { %p138_p1 = scmp.lt.s32.totalorder %s426_s12, 5 }
   0x4   : > { %p139_p2 = pnand %p403_p0, %p138_p1 }
   0x5   : > { %s404_s14 = sshll.u32 (!%p139_p2), %s399_s13, 5 }
   0x6   : > { %142 = sbr.rel (%p139_p2) target bundleno = 53 (0x35), region = 32  ;;  %p163_p3 = scmp.lt.s32.totalorder (!%p139_p2), %s404_s14, 127 }
   0xb   : > { %s644_s14 = smov (!%p163_p3, %s404_s14), 127  ;;  %v459_v0 = vld [vmem:[%s640_s1] ss:$0 sm:$0xff]  ;;  %vm310_vm0 = vcmask 261120  }
   0xc   : > { %s405_s17 = sshll.u32 %s644_s14, 3  ;;  %v469_v1 = vld [vmem:[%s641_s2] ss:$0 sm:$0xff] }
   0xd   : > { %s464_s20 = scalar_lea.vmem %s639_s0, %s405_s17  ;;  %s492_s25 = scalar_lea.vmem %s642_s3, %s405_s17 }
   0xe   : > { %v174_v2 = vld [vmem:[%s464_s20] sm:$0xff]  ;;  %v175_v3 = vld [vmem:[%s464_s20 + $0x8] sm:$0xff]  ;;  %v176_v4 = vld [vmem:[%s464_s20 + $0x10] sm:$0xff] }
   0xf   : > { %v210_v5 = vmul.f32 %v459_v0, %v174_v2  ;;  %v211_v6 = vmul.f32 %v459_v0, %v175_v3  ;;  %v212_v7 = vmul.f32 %v459_v0, %v176_v4  ;;  %v177_v8 = vld [vmem:[%s464_s20 + $0x18] sm:$0xff]  ;;  %v178_v9 = vld [vmem:[%s464_s20 + $0x20] sm:$0xff]  ;;  %v179_v10 = vld [vmem:[%s464_s20 + $0x28] sm:$0xff] }
  0x10   : > { %v213_v11 = vmul.f32 %v459_v0, %v177_v8  ;;  %v214_v12 = vmul.f32 %v459_v0, %v178_v9  ;;  %v215_v13 = vmul.f32 %v459_v0, %v179_v10  ;;  %v180_v14 = vld [vmem:[%s464_s20 + $0x30] sm:$0xff]  ;;  %v181_v15 = vld [vmem:[%s464_s20 + $0x38] sm:$0xff]  ;;  %v182_v24 = vld [vmem:[%s464_s20 + $0x40] sm:$0xff] }
  0x11   : > { %v246_v16 = vadd.f32 %v469_v1, %v210_v5  ;;  %v247_v17 = vadd.f32 %v469_v1, %v211_v6  ;;  %v248_v18 = vadd.f32 %v469_v1, %v212_v7  ;;  %v216_v19 = vmul.f32 %v459_v0, %v180_v14  ;;  %v183_v25 = vld [vmem:[%s464_s20 + $0x48] sm:$0xff]  ;;  %v184_v26 = vld [vmem:[%s464_s20 + $0x50] sm:$0xff]  ;;  %v185_v31 = vld [vmem:[%s464_s20 + $0x58] sm:$0xff] }
  0x12   : > { %v249_v20 = vadd.f32 %v469_v1, %v213_v11  ;;  %v250_v21 = vadd.f32 %v469_v1, %v214_v12  ;;  %v251_v22 = vadd.f32 %v469_v1, %v215_v13  ;;  %v217_v23 = vmul.f32 %v459_v0, %v181_v15  ;;  %v186_v32 = vld [vmem:[%s464_s20 + $0x60] sm:$0xff]  ;;  %v187_v33 = vld [vmem:[%s464_s20 + $0x68] sm:$0xff]  ;;  %v188_v37 = vld [vmem:[%s464_s20 + $0x70] sm:$0xff] }
  0x13   : > { %v278_v27 = vmax.f32 %v246_v16, 0.0  ;;  %v279_v28 = vmax.f32 %v247_v17, 0.0  ;;  %v280_v29 = vmax.f32 %v248_v18, 0.0  ;;  %v252_v30 = vadd.f32 %v469_v1, %v216_v19  ;;  %v189_v42 = vld [vmem:[%s464_s20 + $0x78] sm:$0xff]  ;;  %v190_v54 = vld [vmem:[%s464_s20 + $0x80] sm:$0xff]  ;;  %v191_v55 = vld [vmem:[%s464_s20 + $0x88] sm:$0xff] }
  0x14   : > { %v281_v34 = vmax.f32 %v249_v20, 0.0  ;;  %v282_v35 = vmax.f32 %v250_v21, 0.0  ;;  %v253_v36 = vadd.f32 %v469_v1, %v217_v23  ;;  %v283_v38 = vmax.f32 %v251_v22, 0.0  ;;  %v192_v56 = vld [vmem:[%s464_s20 + $0x90] sm:$0xff]  ;;  %v193_v59 = vld [vmem:[%s464_s20 + $0x98] sm:$0xff]  ;;  %v194_v63 = vld [vmem:[%s464_s20 + $0xa0] sm:$0xff] }
  0x15   : > { %311 = vst.msk [vmem:[%s492_s25] sm:$0xff] %vm310_vm0, %v278_v27  ;;  %v218_v39 = vmul.f32 %v459_v0, %v182_v24  ;;  %v219_v40 = vmul.f32 %v459_v0, %v183_v25  ;;  %v220_v41 = vmul.f32 %v459_v0, %v184_v26  ;;  %v284_v43 = vmax.f32 %v252_v30, 0.0  ;;  %v195_v6 = vld [vmem:[%s464_s20 + $0xa8] sm:$0xff]  ;;  %v196_v10 = vld [vmem:[%s464_s20 + $0xb0] sm:$0xff]  ;;  %v197_v14 = vld [vmem:[%s464_s20 + $0xb8] sm:$0xff] }
  0x16   : > { %312 = vst.msk [vmem:[%s492_s25 + $0x8] sm:$0xff] %vm310_vm0, %v279_v28  ;;  %v221_v44 = vmul.f32 %v459_v0, %v185_v31  ;;  %v222_v45 = vmul.f32 %v459_v0, %v186_v32  ;;  %v223_v46 = vmul.f32 %v459_v0, %v187_v33  ;;  %v224_v50 = vmul.f32 %v459_v0, %v188_v37  ;;  %v198_v18 = vld [vmem:[%s464_s20 + $0xc0] sm:$0xff]  ;;  %v199_v22 = vld [vmem:[%s464_s20 + $0xc8] sm:$0xff]  ;;  %v200_v26 = vld [vmem:[%s464_s20 + $0xd0] sm:$0xff] }
  0x17   : > { %313 = vst.msk [vmem:[%s492_s25 + $0x10] sm:$0xff] %vm310_vm0, %v280_v29  ;;  %v254_v47 = vadd.f32 %v469_v1, %v218_v39  ;;  %v255_v48 = vadd.f32 %v469_v1, %v219_v40  ;;  %v256_v49 = vadd.f32 %v469_v1, %v220_v41  ;;  %v285_v51 = vmax.f32 %v253_v36, 0.0  ;;  %v201_v30 = vld [vmem:[%s464_s20 + $0xd8] sm:$0xff] }
  0x18   : > { %314 = vst.msk [vmem:[%s492_s25 + $0x18] sm:$0xff] %vm310_vm0, %v281_v34  ;;  %v257_v52 = vadd.f32 %v469_v1, %v221_v44  ;;  %v225_v53 = vmul.f32 %v459_v0, %v189_v42  ;;  %v258_v58 = vadd.f32 %v469_v1, %v222_v45  ;;  %v259_v62 = vadd.f32 %v469_v1, %v223_v46  ;;  %v202_v34 = vld [vmem:[%s464_s20 + $0xe0] sm:$0xff]  ;;  %v204_v42 = vld [vmem:[%s464_s20 + $0xf0] sm:$0xff]  ;;  %v205_v46 = vld [vmem:[%s464_s20 + $0xf8] sm:$0xff] }
  0x19   : > { %315 = vst.msk [vmem:[%s492_s25 + $0x20] sm:$0xff] %vm310_vm0, %v282_v35  ;;  %v286_v57 = vmax.f32 %v254_v47, 0.0  ;;  %v287_v60 = vmax.f32 %v255_v48, 0.0  ;;  %v288_v61 = vmax.f32 %v256_v49, 0.0  ;;  %v260_v2 = vadd.f32 %v469_v1, %v224_v50 }
  0x1a   : > { %316 = vst.msk [vmem:[%s492_s25 + $0x28] sm:$0xff] %vm310_vm0, %v283_v38  ;;  %v226_v3 = vmul.f32 %v459_v0, %v190_v54  ;;  %v227_v4 = vmul.f32 %v459_v0, %v191_v55  ;;  %v228_v5 = vmul.f32 %v459_v0, %v192_v56  ;;  %v289_v7 = vmax.f32 %v257_v52, 0.0  ;;  %v203_v38 = vld [vmem:[%s464_s20 + $0xe8] sm:$0xff] }
  0x1b   : > { %317 = vst.msk [vmem:[%s492_s25 + $0x30] sm:$0xff] %vm310_vm0, %v284_v43  ;;  %v261_v8 = vadd.f32 %v469_v1, %v225_v53  ;;  %v229_v9 = vmul.f32 %v459_v0, %v193_v59  ;;  %v290_v11 = vmax.f32 %v258_v58, 0.0  ;;  %v230_v13 = vmul.f32 %v459_v0, %v194_v63 }
  0x1c   : > { %318 = vst.msk [vmem:[%s492_s25 + $0x38] sm:$0xff] %vm310_vm0, %v285_v51  ;;  %v262_v12 = vadd.f32 %v469_v1, %v226_v3  ;;  %v291_v15 = vmax.f32 %v259_v62, 0.0  ;;  %v263_v16 = vadd.f32 %v469_v1, %v227_v4  ;;  %v231_v17 = vmul.f32 %v459_v0, %v195_v6 }
  0x1d   : > { %319 = vst.msk [vmem:[%s492_s25 + $0x40] sm:$0xff] %vm310_vm0, %v286_v57  ;;  %v292_v19 = vmax.f32 %v260_v2, 0.0  ;;  %v264_v20 = vadd.f32 %v469_v1, %v228_v5  ;;  %v232_v21 = vmul.f32 %v459_v0, %v196_v10  ;;  %v293_v23 = vmax.f32 %v261_v8, 0.0 }
  0x1e   : > { %320 = vst.msk [vmem:[%s492_s25 + $0x48] sm:$0xff] %vm310_vm0, %v287_v60  ;;  %v265_v24 = vadd.f32 %v469_v1, %v229_v9  ;;  %v233_v25 = vmul.f32 %v459_v0, %v197_v14  ;;  %v294_v27 = vmax.f32 %v262_v12, 0.0  ;;  %v266_v28 = vadd.f32 %v469_v1, %v230_v13 }
  0x1f   : > { %321 = vst.msk [vmem:[%s492_s25 + $0x50] sm:$0xff] %vm310_vm0, %v288_v61  ;;  %v234_v29 = vmul.f32 %v459_v0, %v198_v18  ;;  %v295_v31 = vmax.f32 %v263_v16, 0.0  ;;  %v267_v32 = vadd.f32 %v469_v1, %v231_v17  ;;  %v235_v33 = vmul.f32 %v459_v0, %v199_v22 }
  0x20   : > { %322 = vst.msk [vmem:[%s492_s25 + $0x58] sm:$0xff] %vm310_vm0, %v289_v7  ;;  %v296_v35 = vmax.f32 %v264_v20, 0.0  ;;  %v268_v36 = vadd.f32 %v469_v1, %v232_v21  ;;  %v236_v37 = vmul.f32 %v459_v0, %v200_v26  ;;  %v297_v39 = vmax.f32 %v265_v24, 0.0 }
  0x21   : > { %323 = vst.msk [vmem:[%s492_s25 + $0x60] sm:$0xff] %vm310_vm0, %v290_v11  ;;  %v269_v40 = vadd.f32 %v469_v1, %v233_v25  ;;  %v237_v41 = vmul.f32 %v459_v0, %v201_v30  ;;  %v298_v43 = vmax.f32 %v266_v28, 0.0  ;;  %v270_v44 = vadd.f32 %v469_v1, %v234_v29 }
  0x22   : > { %324 = vst.msk [vmem:[%s492_s25 + $0x68] sm:$0xff] %vm310_vm0, %v291_v15  ;;  %v238_v45 = vmul.f32 %v459_v0, %v202_v34  ;;  %v299_v47 = vmax.f32 %v267_v32, 0.0  ;;  %v271_v48 = vadd.f32 %v469_v1, %v235_v33  ;;  %v239_v49 = vmul.f32 %v459_v0, %v203_v38 }
  0x23   : > { %325 = vst.msk [vmem:[%s492_s25 + $0x70] sm:$0xff] %vm310_vm0, %v292_v19  ;;  %v300_v50 = vmax.f32 %v268_v36, 0.0  ;;  %v272_v51 = vadd.f32 %v469_v1, %v236_v37  ;;  %v240_v52 = vmul.f32 %v459_v0, %v204_v42  ;;  %v301_v53 = vmax.f32 %v269_v40, 0.0 }
  0x24   : > { %326 = vst.msk [vmem:[%s492_s25 + $0x78] sm:$0xff] %vm310_vm0, %v293_v23  ;;  %v273_v54 = vadd.f32 %v469_v1, %v237_v41  ;;  %v241_v55 = vmul.f32 %v459_v0, %v205_v46  ;;  %v302_v56 = vmax.f32 %v270_v44, 0.0  ;;  %v274_v57 = vadd.f32 %v469_v1, %v238_v45 }
  0x25   : > { %327 = vst.msk [vmem:[%s492_s25 + $0x80] sm:$0xff] %vm310_vm0, %v294_v27  ;;  %v303_v58 = vmax.f32 %v271_v48, 0.0  ;;  %v275_v59 = vadd.f32 %v469_v1, %v239_v49  ;;  %v304_v60 = vmax.f32 %v272_v51, 0.0  ;;  %v276_v0 = vadd.f32 %v469_v1, %v240_v52 }
  0x26   : > { %328 = vst.msk [vmem:[%s492_s25 + $0x88] sm:$0xff] %vm310_vm0, %v295_v31  ;;  %v305_v61 = vmax.f32 %v273_v54, 0.0  ;;  %v277_v62 = vadd.f32 %v469_v1, %v241_v55  ;;  %v306_v63 = vmax.f32 %v274_v57, 0.0 }
  0x27   : > { %329 = vst.msk [vmem:[%s492_s25 + $0x90] sm:$0xff] %vm310_vm0, %v296_v35  ;;  %v307_v2 = vmax.f32 %v275_v59, 0.0  ;;  %v308_v3 = vmax.f32 %v276_v0, 0.0 }
  0x28   : > { %330 = vst.msk [vmem:[%s492_s25 + $0x98] sm:$0xff] %vm310_vm0, %v297_v39  ;;  %v309_v4 = vmax.f32 %v277_v62, 0.0 }
  0x29   : > { %331 = vst.msk [vmem:[%s492_s25 + $0xa0] sm:$0xff] %vm310_vm0, %v298_v43 }
  0x2a   : > { %332 = vst.msk [vmem:[%s492_s25 + $0xa8] sm:$0xff] %vm310_vm0, %v299_v47 }
  0x2b   : > { %333 = vst.msk [vmem:[%s492_s25 + $0xb0] sm:$0xff] %vm310_vm0, %v300_v50 }
  0x2c   : > { %334 = vst.msk [vmem:[%s492_s25 + $0xb8] sm:$0xff] %vm310_vm0, %v301_v53 }
  0x2d   : > { %335 = vst.msk [vmem:[%s492_s25 + $0xc0] sm:$0xff] %vm310_vm0, %v302_v56 }
  0x2e   : > { %336 = vst.msk [vmem:[%s492_s25 + $0xc8] sm:$0xff] %vm310_vm0, %v303_v58 }
  0x2f   : > { %337 = vst.msk [vmem:[%s492_s25 + $0xd0] sm:$0xff] %vm310_vm0, %v304_v60 }
  0x30   : > { %338 = vst.msk [vmem:[%s492_s25 + $0xd8] sm:$0xff] %vm310_vm0, %v305_v61 }
  0x31   : > { %339 = vst.msk [vmem:[%s492_s25 + $0xe0] sm:$0xff] %vm310_vm0, %v306_v63 }
  0x32   : > { %340 = vst.msk [vmem:[%s492_s25 + $0xe8] sm:$0xff] %vm310_vm0, %v307_v2 }
  0x33   : > { %341 = vst.msk [vmem:[%s492_s25 + $0xf0] sm:$0xff] %vm310_vm0, %v308_v3 }
  0x34   : > { %342 = vst.msk [vmem:[%s492_s25 + $0xf8] sm:$0xff] %vm310_vm0, %v309_v4 }
  0x35 PF: > { %s13_s12 = sadd.s32 1, %s426_s12  }
  0x36   : > { %p10_p4 = scmp.ge.s32.totalorder %s13_s12, 6  }
  0x38   :  { %12 = sbr.rel (!%p10_p4) target bundleno = 1 (0x1), region = 62 }

// kernel: rgat_forward.4
= control target key start
LH: loop header
LB: loop body
LE: loop exit
PB: predicated region body
PF: predicated region fallthrough
CT: control target
= control target key end

     0   :  { %s9453_s18 = smov 0   ;;  %s14373_s0 = inlined_call_operand.vmem [shape: f32[1024,8], index: 0, kind: input, shape index: {}]   ;;  %s14374_s1 = inlined_call_operand.vmem [shape: bf16[1024,8,32], index: 1, kind: input, shape index: {}]   ;;  %s14375_s2 = inlined_call_operand.vmem [shape: f32[1024,32], index: 2, kind: input, shape index: {}]   ;;  %s14376_s3 = inlined_call_operand.vmem [shape: f32[1024,1], index: 3, kind: input, shape index: {}]   ;;  %s14377_s4 = inlined_call_operand.vmem [shape: f32[1024,32], index: 4, kind: output, shape index: {0}]   ;;  %s14378_s5 = inlined_call_operand.vmem [shape: f32[4,2,32], index: 5, kind: output, shape index: {1}]  }
   0x1 LB: > { %s9459_s19 = sadd.s32 4294967295, %s9420_s18   ;;  %p8618_p0 = scmp.ge.s32.totalorder %s9420_s18, 1  ;;  %s9420_s18 = sphi %s9453_s18, %s16_s18  }
   0x2   : > { %p224_p1 = scmp.lt.s32.totalorder %s9420_s18, 5 }
   0x4   : > { %p225_p2 = pnand %p8618_p0, %p224_p1 }
   0x6   : > { %228 = sbr.rel (%p225_p2) target bundleno = 1606 (0x646), region = 36 }
   0xb   : > { %s8619_s20 = sshll.u32 %s9459_s19, 5  ;;  %vm433_vm0 = vcmask 64512   ;;  %s8621_s28 = sshll.u32 %s9459_s19, 8 }
   0xc   : > { %p272_p3 = scmp.lt.s32.totalorder %s8619_s20, 127  ;;  %p278_p4 = scmp.lt.s32.totalorder %s8621_s28, 1023 }
   0xd   : > { %p301_p5 = scmp.lt.s32.totalorder %s9459_s19, 3 }
   0xe   : > { %s14618_s20 = smov (!%p272_p3, %s8619_s20), 127  ;;  %s14620_s28 = smov (!%p278_p4, %s8621_s28), 1023 }
   0xf   : > { %s9464_s21 = sshll.u32 %s14618_s20, 3  ;;  %s8622_s29 = sshll.u32 %s14620_s28, 2 }
  0x10   : > { %s9470_s24 = scalar_lea.vmem %s14373_s0, %s9464_s21  ;;  %s9802_s27 = scalar_lea.vmem %s14376_s3, %s9464_s21 }
  0x11   : > { %v307_v0 = vld [vmem:[%s9470_s24 + $0x10] sm:$0xff]  ;;  %v305_v1 = vld [vmem:[%s9470_s24] sm:$0xff]  ;;  %v308_v2 = vld [vmem:[%s9470_s24 + $0x18] sm:$0xff]  ;;  %s10704_s7 = scalar_lea.vmem %s14374_s1, %s8622_s29  ;;  %s10785_s10 = scalar_lea.vmem %s14375_s2, %s9464_s21 }
  0x12   : > { %vm339_vm1 = vcmp.gt.f32.partialorder %v307_v0, 0.0  ;;  %v371_v3 = vmul.f32 0.01, %v307_v0  ;;  %vm337_vm2 = vcmp.gt.f32.partialorder %v305_v1, 0.0  ;;  %v369_v4 = vmul.f32 0.01, %v305_v1  ;;  %s11055_s13 = scalar_lea.vmem %s14377_s4, %s9464_s21 }
  0x13   : > { %vm340_vm3 = vcmp.gt.f32.partialorder %v308_v2, 0.0  ;;  %v306_v5 = vld [vmem:[%s9470_s24 + $0x8] sm:$0xff]  ;;  %v309_v6 = vld [vmem:[%s9470_s24 + $0x20] sm:$0xff]  ;;  %v372_v9 = vmul.f32 0.01, %v308_v2  ;;  %v311_v20 = vld [vmem:[%s9470_s24 + $0x30] sm:$0xff] }
  0x14   : > { %v9477_v7 = vsel %vm339_vm1, %v307_v0, %v371_v3  ;;  %v9479_v8 = vsel %vm337_vm2, %v305_v1, %v369_v4  ;;  %v370_v10 = vmul.f32 0.01, %v306_v5  ;;  %vm338_vm4 = vcmp.gt.f32.partialorder %v306_v5, 0.0  ;;  %v310_v13 = vld [vmem:[%s9470_s24 + $0x28] sm:$0xff]  ;;  %v312_v21 = vld [vmem:[%s9470_s24 + $0x38] sm:$0xff]  ;;  %v313_v27 = vld [vmem:[%s9470_s24 + $0x40] sm:$0xff] }
  0x15   : > { %v440_v11 = vsel %vm433_vm0, %v9477_v7, -inf  ;;  %v434_v12 = vsel %vm433_vm0, %v9479_v8, -inf  ;;  %vm341_vm5 = vcmp.gt.f32.partialorder %v309_v6, 0.0  ;;  %v373_v14 = vmul.f32 0.01, %v309_v6  ;;  %v314_v32 = vld [vmem:[%s9470_s24 + $0x48] sm:$0xff] }
  0x16   : > { %441 = vmax.xlane.f32.xlu1 %v440_v11  ;;  %435 = vmax.xlane.f32.xlu0 %v434_v12  ;;  %v9486_v15 = vsel %vm340_vm3, %v308_v2, %v372_v9  ;;  %v9488_v16 = vsel %vm338_vm4, %v306_v5, %v370_v10  ;;  %v374_v18 = vmul.f32 0.01, %v310_v13  ;;  %vm342_vm6 = vcmp.gt.f32.partialorder %v310_v13, 0.0  ;;  %v315_v33 = vld [vmem:[%s9470_s24 + $0x50] sm:$0xff]  ;;  %v316_v39 = vld [vmem:[%s9470_s24 + $0x58] sm:$0xff]  ;;  %v317_v44 = vld [vmem:[%s9470_s24 + $0x60] sm:$0xff] }
  0x17   : > { %v9490_v17 = vsel %vm341_vm5, %v309_v6, %v373_v14  ;;  %v443_v22 = vsel %vm433_vm0, %v9486_v15, -inf  ;;  %v437_v23 = vsel %vm433_vm0, %v9488_v16, -inf  ;;  %v375_v24 = vmul.f32 0.01, %v311_v20  ;;  %v318_v45 = vld [vmem:[%s9470_s24 + $0x68] sm:$0xff]  ;;  %v319_v51 = vld [vmem:[%s9470_s24 + $0x70] sm:$0xff] }
  0x18   : > { %v446_v19 = vsel %vm433_vm0, %v9490_v17, -inf  ;;  %v9500_v25 = vsel %vm342_vm6, %v310_v13, %v374_v18  ;;  %v376_v26 = vmul.f32 0.01, %v312_v21  ;;  %vm343_vm7 = vcmp.gt.f32.partialorder %v311_v20, 0.0  ;;  %v320_v56 = vld [vmem:[%s9470_s24 + $0x78] sm:$0xff]  ;;  %v321_v57 = vld [vmem:[%s9470_s24 + $0x80] sm:$0xff] }
  0x19   : > { %447 = vmax.xlane.f32.xlu2 %v446_v19  ;;  %vm344_vm8 = vcmp.gt.f32.partialorder %v312_v21, 0.0  ;;  %v449_v28 = vsel %vm433_vm0, %v9500_v25, -inf  ;;  %v9505_v29 = vsel %vm343_vm7, %v311_v20, %v375_v24  ;;  %v377_v30 = vmul.f32 0.01, %v313_v27  ;;  %v322_v63 = vld [vmem:[%s9470_s24 + $0x88] sm:$0xff]  ;;  %v323_v4 = vld [vmem:[%s9470_s24 + $0x90] sm:$0xff] }
  0x1a   : > { %v9507_v31 = vsel %vm344_vm8, %v312_v21, %v376_v26  ;;  %vm345_vm9 = vcmp.gt.f32.partialorder %v313_v27, 0.0  ;;  %v452_v34 = vsel %vm433_vm0, %v9505_v29, -inf  ;;  %v378_v36 = vmul.f32 0.01, %v314_v32  ;;  %v324_v5 = vld [vmem:[%s9470_s24 + $0x98] sm:$0xff]  ;;  %v325_v13 = vld [vmem:[%s9470_s24 + $0xa0] sm:$0xff] }
  0x1b   : > { %v455_v35 = vsel %vm433_vm0, %v9507_v31, -inf  ;;  %v9515_v37 = vsel %vm345_vm9, %v313_v27, %v377_v30  ;;  %v379_v38 = vmul.f32 0.01, %v315_v33  ;;  %vm346_vm10 = vcmp.gt.f32.partialorder %v314_v32, 0.0  ;;  %v326_v21 = vld [vmem:[%s9470_s24 + $0xa8] sm:$0xff]  ;;  %v328_v30 = vld [vmem:[%s9470_s24 + $0xb8] sm:$0xff] }
  0x1c   : > { %vm347_vm11 = vcmp.gt.f32.partialorder %v315_v33, 0.0  ;;  %v458_v40 = vsel %vm433_vm0, %v9515_v37, -inf  ;;  %v9520_v41 = vsel %vm346_vm10, %v314_v32, %v378_v36  ;;  %v380_v42 = vmul.f32 0.01, %v316_v39  ;;  %v329_v36 = vld [vmem:[%s9470_s24 + $0xc0] sm:$0xff]  ;;  %s14622_s19 = smov (!%p301_p5, %s9459_s19), 3 }
  0x1d   : > { %v9522_v43 = vsel %vm347_vm11, %v315_v33, %v379_v38  ;;  %vm348_vm12 = vcmp.gt.f32.partialorder %v316_v39, 0.0  ;;  %v461_v46 = vsel %vm433_vm0, %v9520_v41, -inf  ;;  %v381_v48 = vmul.f32 0.01, %v317_v44  ;;  %v330_v38 = vld [vmem:[%s9470_s24 + $0xc8] sm:$0xff]  ;;  %s8629_s14 = sshll.u32 %s14622_s19, 1 }
  0x1e   : > { %444 = vmax.xlane.f32.xlu1 %v443_v22  ;;  %438 = vmax.xlane.f32.xlu0 %v437_v23  ;;  %v464_v47 = vsel %vm433_vm0, %v9522_v43, -inf  ;;  %v9530_v49 = vsel %vm348_vm12, %v316_v39, %v380_v42  ;;  %v382_v50 = vmul.f32 0.01, %v318_v45  ;;  %vm349_vm13 = vcmp.gt.f32.partialorder %v317_v44, 0.0  ;;  %v327_v22 = vld [vmem:[%s9470_s24 + $0xb0] sm:$0xff]  ;;  %s304_s17 = scalar_lea.vmem %s14378_s5, %s8629_s14 }
  0x1f   : > { %vm350_vm14 = vcmp.gt.f32.partialorder %v318_v45, 0.0  ;;  %v467_v52 = vsel %vm433_vm0, %v9530_v49, -inf  ;;  %v9535_v53 = vsel %vm349_vm13, %v317_v44, %v381_v48  ;;  %v383_v54 = vmul.f32 0.01, %v319_v51 }
  0x20   : > { %v9537_v55 = vsel %vm350_vm14, %v318_v45, %v382_v50  ;;  %vm351_vm15 = vcmp.gt.f32.partialorder %v319_v51, 0.0  ;;  %v470_v58 = vsel %vm433_vm0, %v9535_v53, -inf  ;;  %v384_v60 = vmul.f32 0.01, %v320_v56 }
  0x21   : > { %450 = vmax.xlane.f32.xlu2 %v449_v28  ;;  %v473_v59 = vsel %vm433_vm0, %v9537_v55, -inf  ;;  %v9545_v61 = vsel %vm351_vm15, %v319_v51, %v383_v54  ;;  %v385_v62 = vmul.f32 0.01, %v321_v57  ;;  %vm352_vm1 = vcmp.gt.f32.partialorder %v320_v56, 0.0  ;;  %v333_v54 = vld [vmem:[%s9470_s24 + $0xe0] sm:$0xff] }
  0x22   : > { %vm353_vm2 = vcmp.gt.f32.partialorder %v321_v57, 0.0  ;;  %v476_v0 = vsel %vm433_vm0, %v9545_v61, -inf  ;;  %v9550_v1 = vsel %vm352_vm1, %v320_v56, %v384_v60  ;;  %v386_v2 = vmul.f32 0.01, %v322_v63 }
  0x23   : > { %v9552_v3 = vsel %vm353_vm2, %v321_v57, %v385_v62  ;;  %vm354_vm3 = vcmp.gt.f32.partialorder %v322_v63, 0.0  ;;  %v479_v6 = vsel %vm433_vm0, %v9550_v1, -inf  ;;  %v387_v10 = vmul.f32 0.01, %v323_v4  ;;  %v334_v62 = vld [vmem:[%s9470_s24 + $0xe8] sm:$0xff] }
  0x24   : > { %v482_v9 = vsel %vm433_vm0, %v9552_v3, -inf  ;;  %v9560_v11 = vsel %vm354_vm3, %v322_v63, %v386_v2  ;;  %v388_v12 = vmul.f32 0.01, %v324_v5  ;;  %vm355_vm4 = vcmp.gt.f32.partialorder %v323_v4, 0.0 }
  0x25   : > { %vm356_vm5 = vcmp.gt.f32.partialorder %v324_v5, 0.0  ;;  %v485_v14 = vsel %vm433_vm0, %v9560_v11, -inf  ;;  %v9565_v18 = vsel %vm355_vm4, %v323_v4, %v387_v10  ;;  %v389_v19 = vmul.f32 0.01, %v325_v13 }
  0x26   : > { %453 = vmax.xlane.f32.xlu0 %v452_v34  ;;  %456 = vmax.xlane.f32.xlu1 %v455_v35  ;;  %v9567_v20 = vsel %vm356_vm5, %v324_v5, %v388_v12  ;;  %vm357_vm6 = vcmp.gt.f32.partialorder %v325_v13, 0.0  ;;  %v488_v23 = vsel %vm433_vm0, %v9565_v18, -inf  ;;  %v390_v26 = vmul.f32 0.01, %v326_v21  ;;  %v335_v5 = vld [vmem:[%s9470_s24 + $0xf0] sm:$0xff] }
  0x27   : > { %v491_v24 = vsel %vm433_vm0, %v9567_v20, -inf  ;;  %v9575_v27 = vsel %vm357_vm6, %v325_v13, %v389_v19  ;;  %v391_v28 = vmul.f32 0.01, %v327_v22  ;;  %vm358_vm7 = vcmp.gt.f32.partialorder %v326_v21, 0.0 }
  0x28   : > { %vm359_vm8 = vcmp.gt.f32.partialorder %v327_v22, 0.0  ;;  %v494_v32 = vsel %vm433_vm0, %v9575_v27, -inf  ;;  %v9580_v33 = vsel %vm358_vm7, %v326_v21, %v390_v26  ;;  %v392_v34 = vmul.f32 0.01, %v328_v30 }
  0x29   : > { %459 = vmax.xlane.f32.xlu2 %v458_v40  ;;  %v9582_v35 = vsel %vm359_vm8, %v327_v22, %v391_v28  ;;  %vm360_vm9 = vcmp.gt.f32.partialorder %v328_v30, 0.0  ;;  %v497_v39 = vsel %vm433_vm0, %v9580_v33, -inf  ;;  %v393_v42 = vmul.f32 0.01, %v329_v36 }
  0x2a   : > { %v500_v40 = vsel %vm433_vm0, %v9582_v35, -inf  ;;  %v9590_v44 = vsel %vm360_vm9, %v328_v30, %v392_v34  ;;  %v394_v45 = vmul.f32 0.01, %v330_v38  ;;  %vm361_vm10 = vcmp.gt.f32.partialorder %v329_v36, 0.0 }
  0x2b   : > { %vm362_vm11 = vcmp.gt.f32.partialorder %v330_v38, 0.0  ;;  %v9595_v48 = vsel %vm361_vm10, %v329_v36, %v393_v42  ;;  %v397_v60 = vmul.f32 0.01, %v333_v54  ;;  %vm365_vm14 = vcmp.gt.f32.partialorder %v333_v54, 0.0 }
  0x2c   : > { %v9597_v51 = vsel %vm362_vm11, %v330_v38, %v394_v45  ;;  %v506_v56 = vsel %vm433_vm0, %v9595_v48, -inf  ;;  %v398_v2 = vmul.f32 0.01, %v334_v62  ;;  %vm366_vm15 = vcmp.gt.f32.partialorder %v334_v62, 0.0 }
  0x2d   : > { %v509_v57 = vsel %vm433_vm0, %v9597_v51, -inf  ;;  %v9612_v4 = vsel %vm365_vm14, %v333_v54, %v397_v60  ;;  %v399_v12 = vmul.f32 0.01, %v335_v5  ;;  %vm367_vm1 = vcmp.gt.f32.partialorder %v335_v5, 0.0 }
  0x2e   : > { %462 = vmax.xlane.f32.xlu0 %v461_v46  ;;  %465 = vmax.xlane.f32.xlu1 %v464_v47  ;;  %v331_v46 = vld [vmem:[%s9470_s24 + $0xd0] sm:$0xff]  ;;  %v503_v47 = vsel %vm433_vm0, %v9590_v44, -inf  ;;  %v518_v10 = vsel %vm433_vm0, %v9612_v4, -inf  ;;  %v9620_v13 = vsel %vm366_vm15, %v334_v62, %v398_v2 }
  0x2f   : > { %v395_v50 = vmul.f32 0.01, %v331_v46  ;;  %vm363_vm12 = vcmp.gt.f32.partialorder %v331_v46, 0.0  ;;  %v521_v19 = vsel %vm433_vm0, %v9620_v13, -inf  ;;  %v9624_v21 = vsel %vm367_vm1, %v335_v5, %v399_v12 }
  0x31   : > { %468 = vmax.xlane.f32.xlu2 %v467_v52  ;;  %v332_v52 = vld [vmem:[%s9470_s24 + $0xd8] sm:$0xff] }
  0x32   : > { %vm364_vm13 = vcmp.gt.f32.partialorder %v332_v52, 0.0 }
  0x36   : > { %471 = vmax.xlane.f32.xlu0 %v470_v58  ;;  %474 = vmax.xlane.f32.xlu1 %v473_v59  ;;  %v396_v58 = vmul.f32 0.01, %v332_v52  ;;  %v9605_v59 = vsel %vm363_vm12, %v331_v46, %v395_v50 }
  0x37   : > { %v512_v63 = vsel %vm433_vm0, %v9605_v59, -inf }
  0x39   : > { %477 = vmax.xlane.f32.xlu2 %v476_v0  ;;  %v9610_v0 = vsel %vm364_vm13, %v332_v52, %v396_v58 }
  0x3e   : > { %480 = vmax.xlane.f32.xlu0 %v479_v6  ;;  %483 = vmax.xlane.f32.xlu1 %v482_v9  ;;  %v336_v6 = vld [vmem:[%s9470_s24 + $0xf8] sm:$0xff]  ;;  %v515_v9 = vsel %vm433_vm0, %v9610_v0, -inf }
  0x3f   : > { %vm368_vm2 = vcmp.gt.f32.partialorder %v336_v6, 0.0 }
  0x41   : > { %486 = vmax.xlane.f32.xlu2 %v485_v14  ;;  %v400_v14 = vmul.f32 0.01, %v336_v6 }
  0x43   : > { %v9626_v22 = vsel %vm368_vm2, %v336_v6, %v400_v14 }
  0x46   : > { %489 = vmax.xlane.f32.xlu0 %v488_v23  ;;  %492 = vmax.xlane.f32.xlu1 %v491_v24  ;;  %v524_v23 = vsel %vm433_vm0, %v9624_v21, -inf  ;;  %v527_v24 = vsel %vm433_vm0, %v9626_v22, -inf }
  0x49   : > { %495 = vmax.xlane.f32.xlu2 %v494_v32 }
  0x4e   : > { %498 = vmax.xlane.f32.xlu0 %v497_v39  ;;  %501 = vmax.xlane.f32.xlu1 %v500_v40 }
  0x51   : > { %504 = vmax.xlane.f32.xlu2 %v503_v47 }
  0x56   : > { %507 = vmax.xlane.f32.xlu0 %v506_v56  ;;  %510 = vmax.xlane.f32.xlu1 %v509_v57 }
  0x59   : > { %513 = vmax.xlane.f32.xlu2 %v512_v63 }
  0x5e   : > { %516 = vmax.xlane.f32.xlu0 %v515_v9  ;;  %519 = vmax.xlane.f32.xlu1 %v518_v10 }
  0x61   : > { %522 = vmax.xlane.f32.xlu2 %v521_v19 }
  0x66   : > { %525 = vmax.xlane.f32.xlu0 %v524_v23  ;;  %528 = vmax.xlane.f32.xlu1 %v527_v24 }
  0x89   : > { %v442_v26 = vpop.xlane.xlu1 %441  ;;  %v436_v28 = vpop.xlane.xlu0 %435 }
  0x8a   : > { %v532_v30 = vsub.f32 %v9477_v7, %v442_v26  ;;  %v530_v32 = vsub.f32 %v9479_v8, %v436_v28 }
  0x8c   : > { %v566_v34 = vmul.f32 1.442695, %v532_v30  ;;  %v562_v36 = vmul.f32 1.442695, %v530_v32  ;;  %v448_v38 = vpop.xlane.xlu2 %447 }
  0x8d   : > { %v534_v46 = vsub.f32 %v9490_v17, %v448_v38 }
  0x8e   : > { %9286 = vpow2.f32 %v566_v34 }
  0x8f   : > { %9288 = vpow2.f32 %v562_v36 }
  0x91   : > { %v445_v39 = vpop.xlane.xlu1 %444  ;;  %v439_v40 = vpop.xlane.xlu0 %438 }
  0x92   : > { %v533_v42 = vsub.f32 %v9486_v15, %v445_v39  ;;  %v531_v45 = vsub.f32 %v9488_v16, %v439_v40  ;;  %v570_v16 = vmul.f32 1.442695, %v534_v46 }
  0x94   : > { %v9637_v47 = vpop.eup %9286  ;;  %v568_v50 = vmul.f32 1.442695, %v533_v42  ;;  %v564_v52 = vmul.f32 1.442695, %v531_v45  ;;  %v451_v54 = vpop.xlane.xlu2 %450 }
  0x95   : > { %v9639_v7 = vpop.eup %9288  ;;  %v664_v8 = vsel %vm433_vm0, %v9637_v47, 0.0  ;;  %v535_v15 = vsub.f32 %v9500_v25, %v451_v54 }
  0x96   : > { %9290 = vpow2.f32 %v568_v50  ;;  %665 = vadd.xlane.f32.xlu1 %v664_v8  ;;  %v658_v56 = vsel %vm433_vm0, %v9639_v7, 0.0 }
  0x97   : > { %9292 = vpow2.f32 %v564_v52  ;;  %659 = vadd.xlane.f32.xlu2 %v658_v56  ;;  %v572_v17 = vmul.f32 1.442695, %v535_v15 }
  0x99   : > { %v454_v57 = vpop.xlane.xlu0 %453  ;;  %v457_v58 = vpop.xlane.xlu1 %456  ;;  %9294 = vpow2.f32 %v572_v17 }
  0x9a   : > { %v536_v60 = vsub.f32 %v9505_v29, %v454_v57  ;;  %9296 = vpow2.f32 %v570_v16  ;;  %v537_v62 = vsub.f32 %v9507_v31, %v457_v58 }
  0x9c   : > { %v9648_v63 = vpop.eup %9290  ;;  %v574_v2 = vmul.f32 1.442695, %v536_v60  ;;  %v460_v6 = vpop.xlane.xlu2 %459  ;;  %v576_v29 = vmul.f32 1.442695, %v537_v62 }
  0x9d   : > { %v9650_v5 = vpop.eup %9292  ;;  %v667_v25 = vsel %vm433_vm0, %v9648_v63, 0.0  ;;  %v538_v10 = vsub.f32 %v9515_v37, %v460_v6 }
  0x9e   : > { %9298 = vpow2.f32 %v574_v2  ;;  %v661_v9 = vsel %vm433_vm0, %v9650_v5, 0.0 }
  0x9f   : > { %668 = vadd.xlane.f32.xlu2 %v667_v25  ;;  %662 = vadd.xlane.f32.xlu0 %v661_v9  ;;  %v9657_v12 = vpop.eup %9294  ;;  %v578_v31 = vmul.f32 1.442695, %v538_v10 }
  0xa0   : > { %v9659_v14 = vpop.eup %9296  ;;  %v673_v23 = vsel %vm433_vm0, %v9657_v12, 0.0 }
  0xa1   : > { %v463_v19 = vpop.xlane.xlu0 %462  ;;  %v466_v24 = vpop.xlane.xlu1 %465  ;;  %9300 = vpow2.f32 %v578_v31  ;;  %674 = vadd.xlane.f32.xlu1 %v673_v23  ;;  %v670_v32 = vsel %vm433_vm0, %v9659_v14, 0.0 }
  0xa2   : > { %v539_v26 = vsub.f32 %v9520_v41, %v463_v19  ;;  %9302 = vpow2.f32 %v576_v29  ;;  %v540_v37 = vsub.f32 %v9522_v43, %v466_v24 }
  0xa4   : > { %v9665_v28 = vpop.eup %9298  ;;  %v580_v30 = vmul.f32 1.442695, %v539_v26  ;;  %v469_v36 = vpop.xlane.xlu2 %468  ;;  %v582_v41 = vmul.f32 1.442695, %v540_v37 }
  0xa5   : > { %v676_v34 = vsel %vm433_vm0, %v9665_v28, 0.0  ;;  %v541_v38 = vsub.f32 %v9530_v49, %v469_v36 }
  0xa6   : > { %9304 = vpow2.f32 %v580_v30 }
  0xa7   : > { %671 = vadd.xlane.f32.xlu0 %v670_v32  ;;  %677 = vadd.xlane.f32.xlu2 %v676_v34  ;;  %v9672_v39 = vpop.eup %9300  ;;  %v584_v40 = vmul.f32 1.442695, %v541_v38 }
  0xa8   : > { %v9674_v43 = vpop.eup %9302  ;;  %v682_v45 = vsel %vm433_vm0, %v9672_v39, 0.0 }
  0xa9   : > { %v472_v42 = vpop.xlane.xlu0 %471  ;;  %v475_v46 = vpop.xlane.xlu1 %474  ;;  %9306 = vpow2.f32 %v584_v40  ;;  %683 = vadd.xlane.f32.xlu1 %v682_v45  ;;  %v679_v54 = vsel %vm433_vm0, %v9674_v43, 0.0 }
  0xaa   : > { %v542_v50 = vsub.f32 %v9535_v53, %v472_v42  ;;  %9308 = vpow2.f32 %v582_v41  ;;  %v543_v49 = vsub.f32 %v9537_v55, %v475_v46 }
  0xac   : > { %v9680_v52 = vpop.eup %9304  ;;  %v586_v8 = vmul.f32 1.442695, %v542_v50  ;;  %v478_v15 = vpop.xlane.xlu2 %477  ;;  %v588_v53 = vmul.f32 1.442695, %v543_v49 }
  0xad   : > { %v685_v56 = vsel %vm433_vm0, %v9680_v52, 0.0  ;;  %v544_v16 = vsub.f32 %v9545_v61, %v478_v15 }
  0xae   : > { %9310 = vpow2.f32 %v586_v8 }
  0xaf   : > { %686 = vadd.xlane.f32.xlu2 %v685_v56  ;;  %680 = vadd.xlane.f32.xlu0 %v679_v54  ;;  %v9687_v17 = vpop.eup %9306  ;;  %v590_v57 = vmul.f32 1.442695, %v544_v16 }
  0xb0   : > { %v9689_v55 = vpop.eup %9308  ;;  %v691_v60 = vsel %vm433_vm0, %v9687_v17, 0.0 }
  0xb1   : > { %v481_v58 = vpop.xlane.xlu0 %480  ;;  %v484_v62 = vpop.xlane.xlu1 %483  ;;  %9312 = vpow2.f32 %v590_v57  ;;  %692 = vadd.xlane.f32.xlu1 %v691_v60  ;;  %v688_v9 = vsel %vm433_vm0, %v9689_v55, 0.0 }
  0xb2   : > { %v545_v2 = vsub.f32 %v9550_v1, %v481_v58  ;;  %9314 = vpow2.f32 %v588_v53  ;;  %v546_v61 = vsub.f32 %v9552_v3, %v484_v62 }
  0xb4   : > { %v9695_v25 = vpop.eup %9310  ;;  %v592_v6 = vmul.f32 1.442695, %v545_v2  ;;  %v487_v29 = vpop.xlane.xlu2 %486  ;;  %v594_v1 = vmul.f32 1.442695, %v546_v61 }
  0xb5   : > { %v694_v10 = vsel %vm433_vm0, %v9695_v25, 0.0  ;;  %v547_v31 = vsub.f32 %v9560_v11, %v487_v29 }
  0xb6   : > { %9316 = vpow2.f32 %v592_v6 }
  0xb7   : > { %695 = vadd.xlane.f32.xlu2 %v694_v10  ;;  %689 = vadd.xlane.f32.xlu0 %v688_v9  ;;  %v9702_v19 = vpop.eup %9312  ;;  %v596_v23 = vmul.f32 1.442695, %v547_v31 }
  0xb8   : > { %v9704_v3 = vpop.eup %9314  ;;  %v700_v26 = vsel %vm433_vm0, %v9702_v19, 0.0 }
  0xb9   : > { %v490_v24 = vpop.xlane.xlu0 %489  ;;  %v493_v37 = vpop.xlane.xlu1 %492  ;;  %9318 = vpow2.f32 %v596_v23  ;;  %701 = vadd.xlane.f32.xlu1 %v700_v26  ;;  %v697_v36 = vsel %vm433_vm0, %v9704_v3, 0.0 }
  0xba   : > { %v548_v30 = vsub.f32 %v9565_v18, %v490_v24  ;;  %9320 = vpow2.f32 %v594_v1  ;;  %v549_v11 = vsub.f32 %v9567_v20, %v493_v37 }
  0xbc   : > { %v9710_v32 = vpop.eup %9316  ;;  %v598_v34 = vmul.f32 1.442695, %v548_v30  ;;  %v496_v41 = vpop.xlane.xlu2 %495  ;;  %v600_v18 = vmul.f32 1.442695, %v549_v11 }
  0xbd   : > { %v703_v38 = vsel %vm433_vm0, %v9710_v32, 0.0  ;;  %v550_v40 = vsub.f32 %v9575_v27, %v496_v41 }
  0xbe   : > { %9322 = vpow2.f32 %v598_v34 }
  0xbf   : > { %704 = vadd.xlane.f32.xlu2 %v703_v38  ;;  %698 = vadd.xlane.f32.xlu0 %v697_v36  ;;  %v9717_v42 = vpop.eup %9318  ;;  %v602_v45 = vmul.f32 1.442695, %v550_v40 }
  0xc0   : > { %v9719_v20 = vpop.eup %9320  ;;  %v709_v50 = vsel %vm433_vm0, %v9717_v42, 0.0 }
  0xc1   : > { %v499_v46 = vpop.xlane.xlu0 %498  ;;  %v502_v49 = vpop.xlane.xlu1 %501  ;;  %9324 = vpow2.f32 %v602_v45  ;;  %710 = vadd.xlane.f32.xlu1 %v709_v50  ;;  %v706_v15 = vsel %vm433_vm0, %v9719_v20, 0.0 }
  0xc2   : > { %v551_v8 = vsub.f32 %v9580_v33, %v499_v46  ;;  %9326 = vpow2.f32 %v600_v18  ;;  %v552_v27 = vsub.f32 %v9582_v35, %v502_v49 }
  0xc4   : > { %v9725_v54 = vpop.eup %9322  ;;  %v604_v56 = vmul.f32 1.442695, %v551_v8  ;;  %v505_v53 = vpop.xlane.xlu2 %504  ;;  %v606_v33 = vmul.f32 1.442695, %v552_v27 }
  0xc5   : > { %v712_v16 = vsel %vm433_vm0, %v9725_v54, 0.0  ;;  %v553_v57 = vsub.f32 %v9590_v44, %v505_v53 }
  0xc6   : > { %9328 = vpow2.f32 %v604_v56 }
  0xc7   : > { %713 = vadd.xlane.f32.xlu2 %v712_v16  ;;  %707 = vadd.xlane.f32.xlu0 %v706_v15  ;;  %v9732_v58 = vpop.eup %9324  ;;  %v608_v60 = vmul.f32 1.442695, %v553_v57 }
  0xc8   : > { %v9734_v35 = vpop.eup %9326  ;;  %v718_v2 = vsel %vm433_vm0, %v9732_v58, 0.0 }
  0xc9   : > { %v508_v62 = vpop.xlane.xlu0 %507  ;;  %v511_v61 = vpop.xlane.xlu1 %510  ;;  %9330 = vpow2.f32 %v608_v60  ;;  %719 = vadd.xlane.f32.xlu1 %v718_v2  ;;  %v715_v29 = vsel %vm433_vm0, %v9734_v35, 0.0 }
  0xca   : > { %v554_v6 = vsub.f32 %v9595_v48, %v508_v62  ;;  %9332 = vpow2.f32 %v606_v33  ;;  %v555_v44 = vsub.f32 %v9597_v51, %v511_v61 }
  0xcc   : > { %v9740_v9 = vpop.eup %9328  ;;  %v610_v10 = vmul.f32 1.442695, %v554_v6  ;;  %v514_v1 = vpop.xlane.xlu2 %513  ;;  %v612_v48 = vmul.f32 1.442695, %v555_v44 }
  0xcd   : > { %v721_v31 = vsel %vm433_vm0, %v9740_v9, 0.0  ;;  %v556_v23 = vsub.f32 %v9605_v59, %v514_v1 }
  0xce   : > { %9334 = vpow2.f32 %v610_v10  ;;  %v9422_v10 = vmov 0  }
  0xcf   : > { %722 = vadd.xlane.f32.xlu2 %v721_v31  ;;  %716 = vadd.xlane.f32.xlu0 %v715_v29  ;;  %v9747_v24 = vpop.eup %9330  ;;  %v614_v26 = vmul.f32 1.442695, %v556_v23 }
  0xd0   : > { %14389 = vst [vmem:[#allocation2_spill] sm:$0xff] %v9747_v24  ;;  %v9749_v51 = vpop.eup %9332  ;;  %v727_v30 = vsel %vm433_vm0, %v9747_v24, 0.0  ;;  %9282 = vset.pattern.permute.xlu0 %v9422_v10  ;;  %9280 = vset.pattern.permute.xlu1 %v9422_v10 }
  0xd1   : > { %v517_v37 = vpop.xlane.xlu0 %516  ;;  %v520_v11 = vpop.xlane.xlu1 %519  ;;  %9336 = vpow2.f32 %v614_v26  ;;  %728 = vadd.xlane.f32.xlu1 %v727_v30  ;;  %v724_v41 = vsel %vm433_vm0, %v9749_v51, 0.0  ;;  %9281 = vset.pattern.permute.xlu2 %v9422_v10 }
  0xd2   : > { %v557_v34 = vsub.f32 %v9610_v0, %v517_v37  ;;  %9338 = vpow2.f32 %v612_v48  ;;  %v558_v59 = vsub.f32 %v9612_v4, %v520_v11 }
  0xd4   : > { %v9755_v36 = vpop.eup %9334  ;;  %v616_v38 = vmul.f32 1.442695, %v557_v34  ;;  %v523_v18 = vpop.xlane.xlu2 %522  ;;  %v618_v0 = vmul.f32 1.442695, %v558_v59 }
  0xd5   : > { %v730_v40 = vsel %vm433_vm0, %v9755_v36, 0.0  ;;  %v559_v45 = vsub.f32 %v9620_v13, %v523_v18 }
  0xd6   : > { %9340 = vpow2.f32 %v616_v38 }
  0xd7   : > { %731 = vadd.xlane.f32.xlu2 %v730_v40  ;;  %725 = vadd.xlane.f32.xlu0 %v724_v41  ;;  %v9762_v46 = vpop.eup %9336  ;;  %v620_v50 = vmul.f32 1.442695, %v559_v45 }
  0xd8   : > { %14390 = vst [vmem:[#allocation3_spill] sm:$0xff] %v9762_v46  ;;  %v9764_v4 = vpop.eup %9338  ;;  %v736_v8 = vsel %vm433_vm0, %v9762_v46, 0.0 }
  0xd9   : > { %v526_v49 = vpop.xlane.xlu0 %525  ;;  %v529_v27 = vpop.xlane.xlu1 %528  ;;  %9342 = vpow2.f32 %v620_v50  ;;  %737 = vadd.xlane.f32.xlu1 %v736_v8  ;;  %v733_v53 = vsel %vm433_vm0, %v9764_v4, 0.0 }
  0xda   : > { %v560_v56 = vsub.f32 %v9624_v21, %v526_v49  ;;  %9344 = vpow2.f32 %v618_v0  ;;  %v561_v13 = vsub.f32 %v9626_v22, %v529_v27 }
  0xdc   : > { %v9770_v15 = vpop.eup %9340  ;;  %v622_v16 = vmul.f32 1.442695, %v560_v56  ;;  %v624_v33 = vmul.f32 1.442695, %v561_v13 }
  0xdd   : > { %14391 = vst [vmem:[#allocation4_spill] sm:$0xff] %v9770_v15  ;;  %v739_v57 = vsel %vm433_vm0, %v9770_v15, 0.0 }
  0xde   : > { %9346 = vpow2.f32 %v622_v16 }
  0xdf   : > { %740 = vadd.xlane.f32.xlu2 %v739_v57  ;;  %734 = vadd.xlane.f32.xlu0 %v733_v53  ;;  %v9776_v60 = vpop.eup %9342  ;;  %9348 = vpow2.f32 %v624_v33 }
  0xe0   : > { %14392 = vst [vmem:[#allocation5_spill] sm:$0xff] %v9776_v60  ;;  %v9778_v21 = vpop.eup %9344  ;;  %v745_v22 = vsel %vm433_vm0, %v9776_v60, 0.0 }
  0xe1   : > { %746 = vadd.xlane.f32.xlu1 %v745_v22  ;;  %v742_v2 = vsel %vm433_vm0, %v9778_v21, 0.0  ;;  %v628_v22 = vld [vmem:[%s9802_s27 + $0x10] sm:$0xff] }
  0xe4   : > { %v9782_v62 = vpop.eup %9346 }
  0xe5   : > { %14393 = vst [vmem:[#allocation6_spill] sm:$0xff] %v9782_v62  ;;  %v748_v61 = vsel %vm433_vm0, %v9782_v62, 0.0  ;;  %v9788_v6 = vpop.eup %9348 }
  0xe6   : > { %14394 = vst [vmem:[#allocation7_spill] sm:$0xff] %v9788_v6  ;;  %v751_v44 = vsel %vm433_vm0, %v9788_v6, 0.0 }
  0xe7   : > { %749 = vadd.xlane.f32.xlu2 %v748_v61  ;;  %743 = vadd.xlane.f32.xlu0 %v742_v2 }
  0xef   : > { %752 = vadd.xlane.f32.xlu0 %v751_v44  ;;  %v626_v44 = vld [vmem:[%s9802_s27] sm:$0xff] }
 0x109   : > { %v666_v29 = vpop.xlane.xlu1 %665 }
 0x10a   : > { %9350 = vrcp.f32 %v666_v29  ;;  %v660_v31 = vpop.xlane.xlu2 %659  ;;  %vm789_vm3 = vweird.f32 %v666_v29  ;;  %v793_v34 = vand.u32 2147483647, %v666_v29  ;;  %v795_v59 = vand.u32 2147483648, %v666_v29 }
 0x10b   : > { %9352 = vrcp.f32 %v660_v31  ;;  %v763_v11 = vand.u32 2147483647, %v660_v31  ;;  %v765_v41 = vand.u32 2147483648, %v660_v31  ;;  %vm759_vm4 = vweird.f32 %v660_v31 }
 0x10c   : > { %v796_v56 = vor.u32 1.1754944e-38, %v795_v59  ;;  %vm9819_vm8 = vcmp.eq.f32.partialorder %v793_v34, 8.507059e+37 }
 0x10d   : > { %vm9815_vm7 = vcmp.eq.f32.partialorder %v763_v11, 8.507059e+37  ;;  %v766_v16 = vor.u32 1.1754944e-38, %v765_v41 }
 0x110   : > { %v9351_v1 = vpop.eup %9350 }
 0x111   : > { %v9353_v23 = vpop.eup %9352  ;;  %v785_v48 = vmul.f32 %v9351_v1, %v666_v29  ;;  %vm790_vm0 = vweird.f32 %v9351_v1 }
 0x112   : > { %v755_v26 = vmul.f32 %v9353_v23, %v660_v31  ;;  %v9792_v37 = vpop.xlane.xlu2 %668  ;;  %v9794_v30 = vpop.xlane.xlu0 %662  ;;  %vm760_vm5 = vweird.f32 %v9353_v23  ;;  %vm9810_vm6 = vmor %vm789_vm3, %vm790_vm0 }
 0x113   : > { %v786_v38 = vsub.f32 1.0, %v785_v48  ;;  %9354 = vrcp.f32 %v9792_v37  ;;  %v778_v0 = vand.u32 2147483647, %v9794_v30  ;;  %v780_v50 = vand.u32 2147483648, %v9794_v30  ;;  %vm9832_vm11 = vmor %vm759_vm4, %vm760_vm5 }
 0x114   : > { %v756_v40 = vsub.f32 1.0, %v755_v26  ;;  %9356 = vrcp.f32 %v9794_v30  ;;  %v9804_v45 = vpop.xlane.xlu1 %674  ;;  %v808_v49 = vand.u32 2147483647, %v9792_v37  ;;  %vm774_vm9 = vweird.f32 %v9794_v30 }
 0x115   : > { %v787_v18 = vmul.f32 %v9351_v1, %v786_v38  ;;  %9358 = vrcp.f32 %v9804_v45  ;;  %vm804_vm10 = vweird.f32 %v9792_v37  ;;  %v810_v2 = vand.u32 2147483648, %v9792_v37 }
 0x116   : > { %v757_v8 = vmul.f32 %v9353_v23, %v756_v40  ;;  %vm9838_vm12 = vcmp.eq.f32.partialorder %v778_v0, 8.507059e+37  ;;  %v9842_v26 = vor.u32 1.1754944e-38, %v780_v50  ;;  %vm9844_vm13 = vcmp.eq.f32.partialorder %v808_v49, 8.507059e+37 }
 0x117   : > { %v788_v53 = vadd.f32 %v9351_v1, %v787_v18  ;;  %v838_v34 = vand.u32 2147483647, %v9804_v45  ;;  %v840_v18 = vand.u32 2147483648, %v9804_v45  ;;  %vm834_vm14 = vweird.f32 %v9804_v45 }
 0x118   : > { %v758_v33 = vadd.f32 %v9353_v23, %v757_v8 }
 0x119   : > { %v9827_v61 = vpop.eup %9354  ;;  %v792_v29 = vsel %vm9810_vm6, %v9351_v1, %v788_v53  ;;  %vm9890_vm4 = vcmp.eq.f32.partialorder %v838_v34, 8.507059e+37 }
 0x11a   : > { %v9849_v31 = vpop.eup %9356  ;;  %v800_v59 = vmul.f32 %v9827_v61, %v9792_v37  ;;  %v9853_v38 = vpop.xlane.xlu2 %677  ;;  %v762_v41 = vsel %vm9832_vm11, %v9353_v23, %v758_v33  ;;  %v797_v40 = vsel %vm9819_vm8, %v796_v56, %v792_v29  ;;  %vm805_vm15 = vweird.f32 %v9827_v61 }
 0x11b   : > { %v9855_v1 = vpop.xlane.xlu0 %671  ;;  %v770_v0 = vmul.f32 %v9849_v31, %v9794_v30  ;;  %9360 = vrcp.f32 %v9853_v38  ;;  %v767_v50 = vsel %vm9815_vm7, %v766_v16, %v762_v41  ;;  %v798_v49 = vmul.f32 %v797_v40, %v628_v22  ;;  %v9868_v8 = vpop.eup %9358  ;;  %vm9884_vm2 = vmor %vm804_vm10, %vm805_vm15 }
 0x11c   : > { %v801_v27 = vsub.f32 1.0, %v800_v59  ;;  %9362 = vrcp.f32 %v9855_v1  ;;  %v768_v23 = vmul.f32 %v767_v50, %v626_v44  ;;  %v830_v53 = vmul.f32 %v9868_v8, %v9804_v45  ;;  %v9875_v13 = vpop.xlane.xlu1 %683 }
 0x11d   : > { %v771_v56 = vsub.f32 1.0, %v770_v0  ;;  %1246 = vperm.xlu0 %9282, %v798_v49   ;;  %vm775_vm1 = vweird.f32 %v9849_v31  ;;  %v823_v16 = vand.u32 2147483647, %v9855_v1  ;;  %9364 = vrcp.f32 %v9875_v13  ;;  %v629_v49 = vld [vmem:[%s9802_s27 + $0x18] sm:$0xff] }
 0x11e   : > { %1236 = vperm.xlu1 %9280, %v768_v23   ;;  %v802_v57 = vmul.f32 %v9827_v61, %v801_v27  ;;  %v811_v33 = vor.u32 1.1754944e-38, %v810_v2  ;;  %v825_v22 = vand.u32 2147483648, %v9855_v1  ;;  %v831_v44 = vsub.f32 1.0, %v830_v53  ;;  %vm9896_vm5 = vmor %vm774_vm9, %vm775_vm1 }
 0x11f   : > { %v772_v10 = vmul.f32 %v9849_v31, %v771_v56  ;;  %vm819_vm3 = vweird.f32 %v9855_v1  ;;  %vm835_vm0 = vweird.f32 %v9868_v8  ;;  %v841_v40 = vor.u32 1.1754944e-38, %v840_v18 }
 0x120   : > { %v803_v37 = vadd.f32 %v9827_v61, %v802_v57  ;;  %v9901_v41 = vor.u32 1.1754944e-38, %v825_v22  ;;  %v853_v0 = vand.u32 2147483647, %v9853_v38  ;;  %vm9908_vm6 = vcmp.eq.f32.partialorder %v823_v16, 8.507059e+37  ;;  %v627_v57 = vld [vmem:[%s9802_s27 + $0x8] sm:$0xff] }
 0x121   : > { %v9904_v50 = vpop.eup %9360  ;;  %v773_v34 = vadd.f32 %v9849_v31, %v772_v10  ;;  %v832_v30 = vmul.f32 %v9868_v8, %v831_v44  ;;  %vm849_vm7 = vweird.f32 %v9853_v38  ;;  %v855_v23 = vand.u32 2147483648, %v9853_v38 }
 0x122   : > { %v9363_v56 = vpop.eup %9362  ;;  %v845_v18 = vmul.f32 %v9904_v50, %v9853_v38  ;;  %v9917_v53 = vpop.xlane.xlu2 %686  ;;  %v807_v16 = vsel %vm9884_vm2, %v9827_v61, %v803_v37  ;;  %vm850_vm8 = vweird.f32 %v9904_v50  ;;  %vm9926_vm9 = vcmp.eq.f32.partialorder %v853_v0, 8.507059e+37 }
 0x123   : > { %v9920_v22 = vpop.xlane.xlu0 %680  ;;  %v815_v10 = vmul.f32 %v9363_v56, %v9855_v1  ;;  %9366 = vrcp.f32 %v9917_v53  ;;  %v777_v60 = vsel %vm9896_vm5, %v9849_v31, %v773_v34  ;;  %v812_v62 = vsel %vm9844_vm13, %v811_v33, %v807_v16  ;;  %v9938_v61 = vpop.eup %9364  ;;  %vm9986_vm2 = vmor %vm849_vm7, %vm850_vm8 }
 0x124   : > { %vm879_vm10 = vweird.f32 %v9875_v13  ;;  %v846_v29 = vsub.f32 1.0, %v845_v18  ;;  %v782_v37 = vsel %vm9838_vm12, %v9842_v26, %v777_v60  ;;  %9368 = vrcp.f32 %v9920_v22  ;;  %v9946_v11 = vpop.xlane.xlu1 %692  ;;  %vm9956_vm12 = vmor %vm834_vm14, %vm835_vm0 }
 0x125   : > { %v813_v0 = vmul.f32 %v812_v62, %v629_v49  ;;  %v816_v6 = vsub.f32 1.0, %v815_v10  ;;  %v783_v46 = vmul.f32 %v782_v37, %v627_v57  ;;  %v875_v31 = vmul.f32 %v9938_v61, %v9875_v13 }
 0x126   : > { %vm820_vm11 = vweird.f32 %v9363_v56  ;;  %9370 = vrcp.f32 %v9946_v11  ;;  %vm894_vm13 = vweird.f32 %v9917_v53  ;;  %v898_v33 = vand.u32 2147483647, %v9917_v53 }
 0x127   : > { %v900_v60 = vand.u32 2147483648, %v9917_v53  ;;  %1241 = vperm.xlu2 %9281, %v783_v46   ;;  %v876_v48 = vsub.f32 1.0, %v875_v31  ;;  %v817_v26 = vmul.f32 %v9363_v56, %v816_v6  ;;  %v833_v2 = vadd.f32 %v9868_v8, %v832_v30  ;;  %vm9964_vm15 = vmor %vm819_vm3, %vm820_vm11  ;;  %v631_v46 = vld [vmem:[%s9802_s27 + $0x28] sm:$0xff] }
 0x128   : > { %v847_v34 = vmul.f32 %v9904_v50, %v846_v29  ;;  %vm9968_vm1 = vcmp.eq.f32.partialorder %v898_v33, 8.507059e+37  ;;  %v856_v57 = vor.u32 1.1754944e-38, %v855_v23  ;;  %vm880_vm14 = vweird.f32 %v9938_v61 }
 0x129   : > { %v9972_v18 = vor.u32 1.1754944e-38, %v900_v60  ;;  %v9976_v6 = vpop.eup %9366  ;;  %v818_v30 = vadd.f32 %v9363_v56, %v817_v26  ;;  %v837_v1 = vsel %vm9956_vm12, %v9868_v8, %v833_v2  ;;  %v877_v23 = vmul.f32 %v9938_v61, %v876_v48  ;;  %v630_v8 = vld [vmem:[%s9802_s27 + $0x20] sm:$0xff]  ;;  %v632_v2 = vld [vmem:[%s9802_s27 + $0x30] sm:$0xff] }
 0x12a   : > { %v848_v16 = vadd.f32 %v9904_v50, %v847_v34  ;;  %v9991_v29 = vpop.eup %9368  ;;  %v890_v37 = vmul.f32 %v9976_v6, %v9917_v53  ;;  %v9995_v31 = vpop.xlane.xlu2 %695  ;;  %vm895_vm3 = vweird.f32 %v9976_v6  ;;  %v842_v38 = vsel %vm9890_vm4, %v841_v40, %v837_v1  ;;  %vm10034_vm4 = vmor %vm879_vm10, %vm880_vm14 }
 0x12b   : > { %v9998_v33 = vpop.xlane.xlu0 %689  ;;  %v883_v60 = vand.u32 2147483647, %v9875_v13  ;;  %9372 = vrcp.f32 %v9995_v31  ;;  %v860_v62 = vmul.f32 %v9991_v29, %v9920_v22  ;;  %v822_v48 = vsel %vm9964_vm15, %v9363_v56, %v818_v30  ;;  %vm10043_vm5 = vmor %vm894_vm13, %vm895_vm3 }
 0x12c   : > { %v843_v26 = vmul.f32 %v842_v38, %v631_v46  ;;  %v10010_v34 = vpop.eup %9370  ;;  %v891_v24 = vsub.f32 1.0, %v890_v37  ;;  %v827_v59 = vsel %vm9908_vm6, %v9901_v41, %v822_v48  ;;  %9374 = vrcp.f32 %v9998_v33  ;;  %v10025_v46 = vpop.xlane.xlu1 %701 }
 0x12d   : > { %v852_v40 = vsel %vm9986_vm2, %v9904_v50, %v848_v16  ;;  %v861_v1 = vsub.f32 1.0, %v860_v62  ;;  %v828_v15 = vmul.f32 %v827_v59, %v630_v8  ;;  %v10021_v56 = vmul.f32 %v10010_v34, %v9946_v11  ;;  %v635_v8 = vld [vmem:[%s9802_s27 + $0x48] sm:$0xff] }
 0x12e   : > { %v857_v49 = vsel %vm9926_vm9, %v856_v57, %v852_v40  ;;  %v892_v27 = vmul.f32 %v9976_v6, %v891_v24  ;;  %9376 = vrcp.f32 %v10025_v46  ;;  %vm939_vm0 = vweird.f32 %v9995_v31  ;;  %v634_v40 = vld [vmem:[%s9802_s27 + $0x40] sm:$0xff] }
 0x12f   : > { %v858_v41 = vmul.f32 %v857_v49, %v632_v2  ;;  %1251 = vperm.xlu2 %9281, %v813_v0   ;;  %1256 = vperm.xlu1 %9280, %v828_v15   ;;  %v921_v44 = vsub.f32 1.0, %v10021_v56  ;;  %v943_v57 = vand.u32 2147483647, %v9995_v31  ;;  %v945_v30 = vand.u32 2147483648, %v9995_v31 }
 0x130   : > { %v878_v16 = vadd.f32 %v9938_v61, %v877_v23  ;;  %v893_v10 = vadd.f32 %v9976_v6, %v892_v27  ;;  %vm10051_vm6 = vcmp.eq.f32.partialorder %v883_v60, 8.507059e+37  ;;  %v885_v0 = vand.u32 2147483648, %v9875_v13 }
 0x131   : > { %v862_v53 = vmul.f32 %v9991_v29, %v861_v1  ;;  %v10057_v37 = vpop.eup %9372  ;;  %vm10060_vm7 = vcmp.eq.f32.partialorder %v943_v57, 8.507059e+37  ;;  %v946_v62 = vor.u32 1.1754944e-38, %v945_v30  ;;  %vm864_vm8 = vweird.f32 %v9920_v22 }
 0x132   : > { %v882_v23 = vsel %vm10034_vm4, %v9938_v61, %v878_v16  ;;  %v10068_v60 = vpop.eup %9374  ;;  %v935_v13 = vmul.f32 %v10057_v37, %v9995_v31  ;;  %v10072_v48 = vpop.xlane.xlu2 %704  ;;  %v897_v2 = vsel %vm10043_vm5, %v9976_v6, %v893_v10  ;;  %vm940_vm9 = vweird.f32 %v10057_v37 }
 0x133   : > { %v10077_v59 = vpop.xlane.xlu0 %698  ;;  %v886_v1 = vor.u32 1.1754944e-38, %v885_v0  ;;  %9378 = vrcp.f32 %v10072_v48  ;;  %v905_v61 = vmul.f32 %v10068_v60, %v9998_v33  ;;  %v902_v56 = vsel %vm9968_vm1, %v9972_v18, %v897_v2  ;;  %vm10115_vm13 = vmor %vm939_vm0, %vm940_vm9 }
 0x134   : > { %v863_v49 = vadd.f32 %v9991_v29, %v862_v53  ;;  %v10088_v27 = vpop.eup %9376  ;;  %v936_v6 = vsub.f32 1.0, %v935_v13  ;;  %v903_v50 = vmul.f32 %v902_v56, %v635_v8  ;;  %9380 = vrcp.f32 %v10077_v59  ;;  %v10098_v45 = vpop.xlane.xlu1 %710 }
 0x135   : > { %v887_v24 = vsel %vm10051_vm6, %v886_v1, %v882_v23  ;;  %v906_v57 = vsub.f32 1.0, %v905_v61  ;;  %v10095_v30 = vmul.f32 %v10088_v27, %v10025_v46  ;;  %vm865_vm10 = vweird.f32 %v9991_v29 }
 0x136   : > { %v888_v16 = vmul.f32 %v887_v24, %v634_v40  ;;  %1281 = vperm.xlu0 %9282, %v903_v50   ;;  %v937_v18 = vmul.f32 %v10057_v37, %v936_v6  ;;  %vm10103_vm11 = vmor %vm864_vm8, %vm865_vm10  ;;  %v868_v15 = vand.u32 2147483647, %v9920_v22  ;;  %v870_v0 = vand.u32 2147483648, %v9920_v22  ;;  %v638_v40 = vld [vmem:[%s9802_s27 + $0x60] sm:$0xff] }
 0x137   : > { %9382 = vrcp.f32 %v10098_v45  ;;  %1261 = vperm.xlu2 %9281, %v843_v26   ;;  %1266 = vperm.xlu1 %9280, %v858_v41   ;;  %v867_v23 = vsel %vm10103_vm11, %v9991_v29, %v863_v49  ;;  %vm984_vm12 = vweird.f32 %v10072_v48  ;;  %v988_v22 = vand.u32 2147483647, %v10072_v48  ;;  %v633_v41 = vld [vmem:[%s9802_s27 + $0x38] sm:$0xff] }
 0x138   : > { %v938_v26 = vadd.f32 %v10057_v37, %v937_v18  ;;  %vm869_vm15 = vcmp.eq.f32.partialorder %v868_v15, 8.507059e+37  ;;  %v871_v13 = vor.u32 1.1754944e-38, %v870_v0  ;;  %v990_v2 = vand.u32 2147483648, %v10072_v48 }
 0x139   : > { %v10127_v31 = vpop.eup %9378  ;;  %vm10130_vm1 = vcmp.eq.f32.partialorder %v988_v22, 8.507059e+37  ;;  %v922_v29 = vmul.f32 %v10010_v34, %v921_v44  ;;  %vm924_vm14 = vweird.f32 %v9946_v11  ;;  %vm925_vm2 = vweird.f32 %v10010_v34 }
 0x13a   : > { %v10137_v61 = vpop.eup %9380  ;;  %v980_v56 = vmul.f32 %v10127_v31, %v10072_v48  ;;  %v10141_v49 = vpop.xlane.xlu2 %713  ;;  %v942_v6 = vsel %vm10115_vm13, %v10057_v37, %v938_v26  ;;  %v872_v50 = vsel %vm869_vm15, %v871_v13, %v867_v23  ;;  %vm985_vm3 = vweird.f32 %v10127_v31  ;;  %vm10163_vm0 = vmor %vm924_vm14, %vm925_vm2 }
 0x13b   : > { %v10146_v24 = vpop.xlane.xlu0 %707  ;;  %9384 = vrcp.f32 %v10141_v49  ;;  %v10152_v44 = vmul.f32 %v10137_v61, %v10077_v59  ;;  %v947_v18 = vsel %vm10060_vm7, %v946_v62, %v942_v6  ;;  %v873_v10 = vmul.f32 %v872_v50, %v633_v41  ;;  %vm10185_vm5 = vmor %vm984_vm12, %vm985_vm3  ;;  %v637_v6 = vld [vmem:[%s9802_s27 + $0x58] sm:$0xff] }
 0x13c   : > { %v981_v0 = vsub.f32 1.0, %v980_v56  ;;  %v948_v8 = vmul.f32 %v947_v18, %v638_v40  ;;  %9386 = vrcp.f32 %v10146_v24  ;;  %v991_v37 = vor.u32 1.1754944e-38, %v990_v2  ;;  %v10178_v40 = vpop.xlane.xlu1 %719 }
 0x13d   : > { %v10156_v15 = vpop.eup %9382  ;;  %v923_v62 = vadd.f32 %v10010_v34, %v922_v29  ;;  %v928_v26 = vand.u32 2147483647, %v9946_v11  ;;  %v930_v13 = vand.u32 2147483648, %v9946_v11  ;;  %v907_v2 = vmul.f32 %v10068_v60, %v906_v57  ;;  %v636_v57 = vld [vmem:[%s9802_s27 + $0x50] sm:$0xff] }
 0x13e   : > { %v10170_v38 = vmul.f32 %v10156_v15, %v10098_v45  ;;  %1296 = vperm.xlu0 %9282, %v948_v8   ;;  %v982_v41 = vmul.f32 %v10127_v31, %v981_v0  ;;  %vm909_vm4 = vweird.f32 %v9998_v33  ;;  %vm910_vm7 = vweird.f32 %v10068_v60 }
 0x13f   : > { %1276 = vperm.xlu1 %9280, %v888_v16   ;;  %1271 = vperm.xlu2 %9281, %v873_v10   ;;  %v927_v11 = vsel %vm10163_vm0, %v10010_v34, %v923_v62  ;;  %vm10192_vm6 = vcmp.eq.f32.partialorder %v928_v26, 8.507059e+37  ;;  %v931_v50 = vor.u32 1.1754944e-38, %v930_v13  ;;  %v908_v48 = vadd.f32 %v10068_v60, %v907_v2  ;;  %vm10200_vm8 = vmor %vm909_vm4, %vm910_vm7  ;;  %v641_v34 = vld [vmem:[%s9802_s27 + $0x78] sm:$0xff] }
 0x140   : > { %v983_v16 = vadd.f32 %v10127_v31, %v982_v41  ;;  %v913_v10 = vand.u32 2147483647, %v9998_v33  ;;  %v915_v8 = vand.u32 2147483648, %v9998_v33  ;;  %9388 = vrcp.f32 %v10178_v40 }
 0x141   : > { %v9385_v0 = vpop.eup %9384  ;;  %vm1029_vm9 = vweird.f32 %v10141_v49  ;;  %v1033_v23 = vand.u32 2147483647, %v10141_v49  ;;  %v932_v33 = vsel %vm10192_vm6, %v931_v50, %v927_v11  ;;  %v912_v2 = vsel %vm10200_vm8, %v10068_v60, %v908_v48 }
 0x142   : > { %v10210_v62 = vpop.eup %9386  ;;  %v1025_v26 = vmul.f32 %v9385_v0, %v10141_v49  ;;  %v10213_v41 = vpop.xlane.xlu2 %722  ;;  %v987_v13 = vsel %vm10185_vm5, %v10127_v31, %v983_v16  ;;  %v933_v29 = vmul.f32 %v932_v33, %v637_v6  ;;  %vm914_vm10 = vcmp.eq.f32.partialorder %v913_v10, 8.507059e+37 }
 0x143   : > { %v10223_v56 = vpop.xlane.xlu0 %716  ;;  %9390 = vrcp.f32 %v10213_v41  ;;  %v10228_v22 = vmul.f32 %v10210_v62, %v10146_v24  ;;  %v992_v53 = vsel %vm10130_vm1, %v991_v37, %v987_v13  ;;  %v916_v11 = vor.u32 1.1754944e-38, %v915_v8 }
 0x144   : > { %v1026_v31 = vsub.f32 1.0, %v1025_v26  ;;  %v993_v16 = vmul.f32 %v992_v53, %v641_v34  ;;  %9392 = vrcp.f32 %v10223_v56  ;;  %vm1030_vm11 = vweird.f32 %v9385_v0 }
 0x145   : > { %v996_v50 = vsub.f32 1.0, %v10228_v22  ;;  %vm10235_vm13 = vcmp.eq.f32.partialorder %v1033_v23, 8.507059e+37  ;;  %v917_v48 = vsel %vm914_vm10, %v916_v11, %v912_v2  ;;  %v1035_v1 = vand.u32 2147483648, %v10141_v49  ;;  %vm10247_vm12 = vmor %vm1029_vm9, %vm1030_vm11  ;;  %v644_v2 = vld [vmem:[%s9802_s27 + $0x90] sm:$0xff] }
 0x146   : > { %1311 = vperm.xlu0 %9282, %v993_v16   ;;  %v1027_v18 = vmul.f32 %v9385_v0, %v1026_v31  ;;  %v14449_v37 = vsub.f32 1.0, %v10095_v30  ;;  %v10243_v6 = vpop.eup %9388  ;;  %v918_v10 = vmul.f32 %v917_v48, %v636_v57  ;;  %vm969_vm15 = vweird.f32 %v10025_v46 }
 0x147   : > { %1291 = vperm.xlu1 %9280, %v933_v29   ;;  %vm970_vm1 = vweird.f32 %v10088_v27  ;;  %v973_v8 = vand.u32 2147483647, %v10025_v46  ;;  %v10256_v30 = vmul.f32 %v10243_v6, %v10178_v40  ;;  %v1036_v26 = vor.u32 1.1754944e-38, %v1035_v1 }
 0x148   : > { %v967_v53 = vmul.f32 %v10088_v27, %v14449_v37  ;;  %v1028_v23 = vadd.f32 %v9385_v0, %v1027_v18  ;;  %vm10259_vm14 = vmor %vm969_vm15, %vm970_vm1  ;;  %1286 = vperm.xlu2 %9281, %v918_v10   ;;  %v975_v31 = vand.u32 2147483648, %v10025_v46  ;;  %v14456_v16 = vsub.f32 1.0, %v10152_v44  ;;  %v10285_v37 = vpop.xlane.xlu1 %728  ;;  %v640_v10 = vld [vmem:[%s9802_s27 + $0x70] sm:$0xff] }
 0x149   : > { %v10263_v33 = vpop.eup %9390  ;;  %vm10266_vm2 = vcmp.eq.f32.partialorder %v973_v8, 8.507059e+37  ;;  %vm954_vm3 = vweird.f32 %v10077_v59  ;;  %v1056_v48 = vsub.f32 1.0, %v10256_v30  ;;  %vm955_vm0 = vweird.f32 %v10137_v61 }
 0x14a   : > { %v968_v13 = vadd.f32 %v10088_v27, %v967_v53  ;;  %v952_v57 = vmul.f32 %v10137_v61, %v14456_v16  ;;  %v1070_v11 = vmul.f32 %v10263_v33, %v10213_v41  ;;  %v10278_v18 = vpop.xlane.xlu2 %731  ;;  %v1032_v1 = vsel %vm10247_vm12, %v9385_v0, %v1028_v23  ;;  %v10287_v44 = vpop.eup %9392  ;;  %vm10305_vm4 = vmor %vm954_vm3, %vm955_vm0 }
 0x14b   : > { %9394 = vrcp.f32 %v10278_v18  ;;  %v1037_v53 = vsel %vm10235_vm13, %v1036_v26, %v1032_v1  ;;  %v976_v8 = vor.u32 1.1754944e-38, %v975_v31  ;;  %v10294_v34 = vpop.xlane.xlu0 %725  ;;  %v958_v26 = vand.u32 2147483647, %v10077_v59 }
 0x14c   : > { %v972_v46 = vsel %vm10259_vm14, %v10088_v27, %v968_v13  ;;  %v953_v16 = vadd.f32 %v10137_v61, %v952_v57  ;;  %v1071_v0 = vsub.f32 1.0, %v1070_v11  ;;  %v10298_v27 = vmul.f32 %v10287_v44, %v10223_v56  ;;  %v639_v57 = vld [vmem:[%s9802_s27 + $0x68] sm:$0xff] }
 0x14d   : > { %v1038_v23 = vmul.f32 %v1037_v53, %v644_v2  ;;  %v977_v13 = vsel %vm10266_vm2, %v976_v8, %v972_v46  ;;  %v960_v49 = vand.u32 2147483648, %v10077_v59  ;;  %9396 = vrcp.f32 %v10285_v37 }
 0x14e   : > { %v1041_v31 = vsub.f32 1.0, %v10298_v27  ;;  %v978_v2 = vmul.f32 %v977_v13, %v640_v10  ;;  %v957_v29 = vsel %vm10305_vm4, %v10137_v61, %v953_v16  ;;  %9398 = vrcp.f32 %v10294_v34  ;;  %v647_v13 = vld [vmem:[%s9802_s27 + $0xa8] sm:$0xff] }
 0x14f   : > { %1326 = vperm.xlu0 %9282, %v1038_v23   ;;  %vm959_vm5 = vcmp.eq.f32.partialorder %v958_v26, 8.507059e+37  ;;  %v961_v11 = vor.u32 1.1754944e-38, %v960_v49  ;;  %v1072_v1 = vmul.f32 %v10263_v33, %v1071_v0  ;;  %vm1074_vm6 = vweird.f32 %v10213_v41 }
 0x150   : > { %1306 = vperm.xlu1 %9280, %v978_v2   ;;  %vm1075_vm7 = vweird.f32 %v10263_v33  ;;  %v1078_v59 = vand.u32 2147483647, %v10213_v41  ;;  %v1080_v46 = vand.u32 2147483648, %v10213_v41  ;;  %v14459_v53 = vsub.f32 1.0, %v10170_v38 }
 0x151   : > { %v10326_v10 = vpop.eup %9394  ;;  %v962_v8 = vsel %vm959_vm5, %v961_v11, %v957_v29  ;;  %v1073_v16 = vadd.f32 %v10263_v33, %v1072_v1  ;;  %vm10329_vm8 = vmor %vm1074_vm6, %vm1075_vm7  ;;  %vm1014_vm9 = vweird.f32 %v10098_v45  ;;  %vm1015_vm10 = vweird.f32 %v10156_v15 }
 0x152   : > { %v1012_v61 = vmul.f32 %v10156_v15, %v14459_v53  ;;  %v1115_v41 = vmul.f32 %v10326_v10, %v10278_v18  ;;  %v963_v23 = vmul.f32 %v962_v8, %v639_v57  ;;  %v10337_v38 = vpop.xlane.xlu2 %740  ;;  %vm1079_vm11 = vcmp.eq.f32.partialorder %v1078_v59, 8.507059e+37  ;;  %vm10340_vm13 = vmor %vm1014_vm9, %vm1015_vm10 }
 0x153   : > { %v1081_v60 = vor.u32 1.1754944e-38, %v1080_v46  ;;  %v10344_v49 = vpop.eup %9396  ;;  %9400 = vrcp.f32 %v10337_v38  ;;  %v1077_v2 = vsel %vm10329_vm8, %v10263_v33, %v1073_v16  ;;  %v1018_v57 = vand.u32 2147483647, %v10098_v45  ;;  %v10366_v16 = vpop.xlane.xlu1 %737 }
 0x154   : > { %v1013_v29 = vadd.f32 %v10156_v15, %v1012_v61  ;;  %v10352_v11 = vpop.eup %9398  ;;  %v1116_v1 = vsub.f32 1.0, %v1115_v41  ;;  %1301 = vperm.xlu2 %9281, %v963_v23   ;;  %v10356_v59 = vmul.f32 %v10344_v49, %v10285_v37  ;;  %v1020_v53 = vand.u32 2147483648, %v10098_v45  ;;  %v10368_v0 = vpop.xlane.xlu0 %734  ;;  %v643_v23 = vld [vmem:[%s9802_s27 + $0x88] sm:$0xff] }
 0x155   : > { %v1082_v46 = vsel %vm1079_vm11, %v1081_v60, %v1077_v2  ;;  %v10361_v8 = vmul.f32 %v10352_v11, %v10294_v34  ;;  %vm1019_vm12 = vcmp.eq.f32.partialorder %v1018_v57, 8.507059e+37  ;;  %v997_v45 = vmul.f32 %v10210_v62, %v996_v50 }
 0x156   : > { %v1083_v33 = vmul.f32 %v1082_v46, %v647_v13  ;;  %v1017_v61 = vsel %vm10340_vm13, %v10156_v15, %v1013_v29  ;;  %v1101_v41 = vsub.f32 1.0, %v10356_v59  ;;  %v1021_v60 = vor.u32 1.1754944e-38, %v1020_v53  ;;  %v642_v53 = vld [vmem:[%s9802_s27 + $0x80] sm:$0xff] }
 0x157   : > { %vm999_vm15 = vweird.f32 %v10146_v24  ;;  %vm1000_vm1 = vweird.f32 %v10210_v62  ;;  %v1003_v15 = vand.u32 2147483647, %v10146_v24  ;;  %v1005_v26 = vand.u32 2147483648, %v10146_v24  ;;  %v646_v13 = vld [vmem:[%s9802_s27 + $0xa0] sm:$0xff] }
 0x158   : > { %1341 = vperm.xlu0 %9282, %v1083_v33   ;;  %v1022_v2 = vsel %vm1019_vm12, %v1021_v60, %v1017_v61  ;;  %v998_v29 = vadd.f32 %v10210_v62, %v997_v45  ;;  %vm10381_vm14 = vmor %vm999_vm15, %vm1000_vm1  ;;  %9402 = vrcp.f32 %v10366_v16  ;;  %v1117_v22 = vmul.f32 %v10326_v10, %v1116_v1 }
 0x159   : > { %v10387_v50 = vpop.eup %9400  ;;  %v1023_v46 = vmul.f32 %v1022_v2, %v643_v23  ;;  %vm1004_vm2 = vcmp.eq.f32.partialorder %v1003_v15, 8.507059e+37  ;;  %v1006_v33 = vor.u32 1.1754944e-38, %v1005_v26  ;;  %9404 = vrcp.f32 %v10368_v0 }
 0x15a   : > { %v1160_v24 = vmul.f32 %v10387_v50, %v10337_v38  ;;  %v1002_v61 = vsel %vm10381_vm14, %v10210_v62, %v998_v29  ;;  %v10396_v60 = vpop.xlane.xlu2 %749  ;;  %v1118_v45 = vadd.f32 %v10326_v10, %v1117_v22  ;;  %vm1119_vm3 = vweird.f32 %v10278_v18 }
 0x15b   : > { %1321 = vperm.xlu1 %9280, %v1023_v46   ;;  %v1007_v1 = vsel %vm1004_vm2, %v1006_v33, %v1002_v61  ;;  %9406 = vrcp.f32 %v10396_v60  ;;  %vm1120_vm0 = vweird.f32 %v10326_v10  ;;  %v1123_v23 = vand.u32 2147483647, %v10278_v18 }
 0x15c   : > { %v1161_v15 = vsub.f32 1.0, %v1160_v24  ;;  %v1008_v26 = vmul.f32 %v1007_v1, %v642_v53  ;;  %vm10403_vm4 = vmor %vm1119_vm3, %vm1120_vm0  ;;  %v1125_v62 = vand.u32 2147483648, %v10278_v18  ;;  %v1057_v29 = vmul.f32 %v10243_v6, %v1056_v48  ;;  %v650_v18 = vld [vmem:[%s9802_s27 + $0xc0] sm:$0xff]  ;;  %v10441_v1 = vpop.xlane.xlu0 %743 }
 0x15d   : > { %v1122_v57 = vsel %vm10403_vm4, %v10326_v10, %v1118_v45  ;;  %vm10414_vm5 = vcmp.eq.f32.partialorder %v1123_v23, 8.507059e+37  ;;  %vm1059_vm6 = vweird.f32 %v10178_v40  ;;  %vm1060_vm7 = vweird.f32 %v10243_v6 }
 0x15e   : > { %v10420_v46 = vpop.eup %9402  ;;  %1316 = vperm.xlu2 %9281, %v1008_v26   ;;  %v1126_v53 = vor.u32 1.1754944e-38, %v1125_v62  ;;  %v1058_v30 = vadd.f32 %v10243_v6, %v1057_v29  ;;  %vm10424_vm8 = vmor %vm1059_vm6, %vm1060_vm7  ;;  %v1063_v10 = vand.u32 2147483647, %v10178_v40  ;;  %v1065_v33 = vand.u32 2147483648, %v10178_v40 }
 0x15f   : > { %v10430_v24 = vpop.eup %9404  ;;  %v10434_v61 = vmul.f32 %v10420_v46, %v10366_v16  ;;  %v1042_v45 = vmul.f32 %v10287_v44, %v1041_v31  ;;  %vm1044_vm9 = vweird.f32 %v10223_v56  ;;  %vm1045_vm10 = vweird.f32 %v10287_v44  ;;  %v10456_v31 = vpop.xlane.xlu1 %746 }
 0x160   : > { %v10445_v40 = vmul.f32 %v10430_v24, %v10368_v0  ;;  %v1127_v23 = vsel %vm10414_vm5, %v1126_v53, %v1122_v57  ;;  %v1062_v26 = vsel %vm10424_vm8, %v10243_v6, %v1058_v30  ;;  %vm1064_vm11 = vcmp.eq.f32.partialorder %v1063_v10, 8.507059e+37  ;;  %vm10452_vm13 = vmor %vm1044_vm9, %vm1045_vm10 }
 0x161   : > { %v10458_v2 = vpop.eup %9406  ;;  %v1128_v29 = vmul.f32 %v1127_v23, %v650_v18  ;;  %v1066_v22 = vor.u32 1.1754944e-38, %v1065_v33  ;;  %v1043_v57 = vadd.f32 %v10287_v44, %v1042_v45  ;;  %v1048_v30 = vand.u32 2147483647, %v10223_v56  ;;  %v645_v23 = vld [vmem:[%s9802_s27 + $0x98] sm:$0xff] }
 0x162   : > { %v1205_v6 = vmul.f32 %v10458_v2, %v10396_v60  ;;  %v1050_v48 = vand.u32 2147483648, %v10223_v56  ;;  %9408 = vrcp.f32 %v10456_v31  ;;  %v1162_v18 = vmul.f32 %v10387_v50, %v1161_v15 }
 0x163   : > { %1356 = vperm.xlu0 %9282, %v1128_v29   ;;  %v1067_v10 = vsel %vm1064_vm11, %v1066_v22, %v1062_v26  ;;  %v1047_v62 = vsel %vm10452_vm13, %v10287_v44, %v1043_v57  ;;  %vm1049_vm12 = vcmp.eq.f32.partialorder %v1048_v30, 8.507059e+37  ;;  %9410 = vrcp.f32 %v10441_v1 }
 0x164   : > { %v1206_v33 = vsub.f32 1.0, %v1205_v6  ;;  %v1068_v45 = vmul.f32 %v1067_v10, %v646_v13  ;;  %v1051_v53 = vor.u32 1.1754944e-38, %v1050_v48  ;;  %v1163_v56 = vadd.f32 %v10387_v50, %v1162_v18  ;;  %v10507_v48 = vpop.xlane.xlu0 %752 }
 0x165   : > { %vm1164_vm15 = vweird.f32 %v10337_v38  ;;  %vm1165_vm1 = vweird.f32 %v10387_v50  ;;  %v1168_v13 = vand.u32 2147483647, %v10337_v38  ;;  %v1170_v15 = vand.u32 2147483648, %v10337_v38  ;;  %v648_v38 = vld [vmem:[%s9802_s27 + $0xb0] sm:$0xff] }
 0x166   : > { %1336 = vperm.xlu1 %9280, %v1068_v45   ;;  %v1052_v44 = vsel %vm1049_vm12, %v1051_v53, %v1047_v62  ;;  %vm10478_vm14 = vmor %vm1164_vm15, %vm1165_vm1  ;;  %v1102_v27 = vmul.f32 %v10344_v49, %v1101_v41  ;;  %vm1104_vm2 = vweird.f32 %v10285_v37  ;;  %vm1105_vm3 = vweird.f32 %v10344_v49  ;;  %v653_v62 = vld [vmem:[%s9802_s27 + $0xd8] sm:$0xff] }
 0x167   : > { %v1053_v29 = vmul.f32 %v1052_v44, %v645_v23  ;;  %v1167_v22 = vsel %vm10478_vm14, %v10387_v50, %v1163_v56  ;;  %vm1169_vm0 = vcmp.eq.f32.partialorder %v1168_v13, 8.507059e+37  ;;  %v1171_v57 = vor.u32 1.1754944e-38, %v1170_v15  ;;  %vm10494_vm4 = vmor %vm1104_vm2, %vm1105_vm3  ;;  %v649_v56 = vld [vmem:[%s9802_s27 + $0xb8] sm:$0xff] }
 0x168   : > { %v1103_v6 = vadd.f32 %v10344_v49, %v1102_v27  ;;  %v1108_v59 = vand.u32 2147483647, %v10285_v37  ;;  %v10499_v41 = vpop.eup %9408  ;;  %v1110_v50 = vand.u32 2147483648, %v10285_v37  ;;  %v14478_v53 = vsub.f32 1.0, %v10361_v8 }
 0x169   : > { %1331 = vperm.xlu2 %9281, %v1053_v29   ;;  %vm1089_vm5 = vweird.f32 %v10294_v34  ;;  %vm1090_vm6 = vweird.f32 %v10352_v11  ;;  %v10511_v10 = vmul.f32 %v10499_v41, %v10456_v31  ;;  %v1172_v18 = vsel %vm1169_vm0, %v1171_v57, %v1167_v22  ;;  %v10520_v8 = vpop.eup %9410 }
 0x16a   : > { %v1087_v30 = vmul.f32 %v10352_v11, %v14478_v53  ;;  %v1107_v45 = vsel %vm10494_vm4, %v10344_v49, %v1103_v6  ;;  %vm1109_vm7 = vcmp.eq.f32.partialorder %v1108_v59, 8.507059e+37  ;;  %vm10516_vm8 = vmor %vm1089_vm5, %vm1090_vm6  ;;  %v1173_v23 = vmul.f32 %v1172_v18, %v653_v62 }
 0x16b   : > { %v1111_v44 = vor.u32 1.1754944e-38, %v1110_v50  ;;  %v1093_v13 = vand.u32 2147483647, %v10294_v34  ;;  %v1191_v15 = vsub.f32 1.0, %v10511_v10  ;;  %v10528_v49 = vmul.f32 %v10520_v8, %v10441_v1 }
 0x16c   : > { %v1088_v26 = vadd.f32 %v10352_v11, %v1087_v30  ;;  %v1095_v27 = vand.u32 2147483648, %v10294_v34  ;;  %9412 = vrcp.f32 %v10507_v48  ;;  %1371 = vperm.xlu0 %9282, %v1173_v23   ;;  %v1207_v62 = vmul.f32 %v10458_v2, %v1206_v33  ;;  %v655_v23 = vld [vmem:[%s9802_s27 + $0xe8] sm:$0xff] }
 0x16d   : > { %v1112_v29 = vsel %vm1109_vm7, %v1111_v44, %v1107_v45  ;;  %vm1094_vm9 = vcmp.eq.f32.partialorder %v1093_v13, 8.507059e+37  ;;  %v1176_v57 = vsub.f32 1.0, %v10528_v49  ;;  %vm1209_vm10 = vweird.f32 %v10396_v60  ;;  %v656_v45 = vld [vmem:[%s9802_s27 + $0xf0] sm:$0xff] }
 0x16e   : > { %v1092_v22 = vsel %vm10516_vm8, %v10352_v11, %v1088_v26  ;;  %v1113_v6 = vmul.f32 %v1112_v29, %v649_v56  ;;  %v1096_v59 = vor.u32 1.1754944e-38, %v1095_v27  ;;  %v1208_v34 = vadd.f32 %v10458_v2, %v1207_v62 }
 0x16f   : > { %vm1210_vm11 = vweird.f32 %v10458_v2  ;;  %v1213_v50 = vand.u32 2147483647, %v10396_v60  ;;  %v1215_v53 = vand.u32 2147483648, %v10396_v60  ;;  %v14483_v30 = vsub.f32 1.0, %v10434_v61 }
 0x170   : > { %1351 = vperm.xlu1 %9280, %v1113_v6   ;;  %v1097_v11 = vsel %vm1094_vm9, %v1096_v59, %v1092_v22  ;;  %vm10543_vm13 = vmor %vm1209_vm10, %vm1210_vm11  ;;  %vm1149_vm12 = vweird.f32 %v10366_v16  ;;  %vm1150_vm15 = vweird.f32 %v10420_v46  ;;  %v1153_v44 = vand.u32 2147483647, %v10366_v16  ;;  %v652_v22 = vld [vmem:[%s9802_s27 + $0xd0] sm:$0xff] }
 0x171   : > { %v1147_v10 = vmul.f32 %v10420_v46, %v14483_v30  ;;  %v1098_v18 = vmul.f32 %v1097_v11, %v648_v38  ;;  %v1212_v60 = vsel %vm10543_vm13, %v10458_v2, %v1208_v34  ;;  %vm1214_vm1 = vcmp.eq.f32.partialorder %v1213_v50, 8.507059e+37  ;;  %vm10556_vm14 = vmor %vm1149_vm12, %vm1150_vm15  ;;  %v651_v11 = vld [vmem:[%s9802_s27 + $0xc8] sm:$0xff] }
 0x172   : > { %v1216_v37 = vor.u32 1.1754944e-38, %v1215_v53  ;;  %v10560_v61 = vpop.eup %9412  ;;  %v1155_v26 = vand.u32 2147483648, %v10366_v16  ;;  %v14486_v13 = vsub.f32 1.0, %v10445_v40  ;;  %vm1134_vm2 = vweird.f32 %v10368_v0 }
 0x173   : > { %v1148_v56 = vadd.f32 %v10420_v46, %v1147_v10  ;;  %1346 = vperm.xlu2 %9281, %v1098_v18   ;;  %v1220_v2 = vmul.f32 %v10560_v61, %v10507_v48  ;;  %vm1135_vm3 = vweird.f32 %v10430_v24  ;;  %vm1154_vm0 = vcmp.eq.f32.partialorder %v1153_v44, 8.507059e+37 }
 0x174   : > { %v1132_v49 = vmul.f32 %v10430_v24, %v14486_v13  ;;  %v1217_v27 = vsel %vm1214_vm1, %v1216_v37, %v1212_v60  ;;  %v1156_v40 = vor.u32 1.1754944e-38, %v1155_v26  ;;  %vm10576_vm4 = vmor %vm1134_vm2, %vm1135_vm3  ;;  %v1138_v59 = vand.u32 2147483647, %v10368_v0 }
 0x175   : > { %v1218_v29 = vmul.f32 %v1217_v27, %v656_v45  ;;  %v1152_v16 = vsel %vm10556_vm14, %v10420_v46, %v1148_v56  ;;  %v1221_v6 = vsub.f32 1.0, %v1220_v2  ;;  %v1140_v34 = vand.u32 2147483648, %v10368_v0  ;;  %v654_v2 = vld [vmem:[%s9802_s27 + $0xe0] sm:$0xff] }
 0x176   : > { %v1133_v38 = vadd.f32 %v10430_v24, %v1132_v49  ;;  %v1157_v50 = vsel %vm1154_vm0, %v1156_v40, %v1152_v16  ;;  %v1192_v53 = vmul.f32 %v10499_v41, %v1191_v15  ;;  %vm1194_vm5 = vweird.f32 %v10456_v31 }
 0x177   : > { %1386 = vperm.xlu0 %9282, %v1218_v29   ;;  %vm1195_vm6 = vweird.f32 %v10499_v41  ;;  %v1158_v46 = vmul.f32 %v1157_v50, %v652_v22  ;;  %vm1139_vm7 = vcmp.eq.f32.partialorder %v1138_v59, 8.507059e+37  ;;  %v1141_v30 = vor.u32 1.1754944e-38, %v1140_v34 }
 0x178   : > { %v1137_v33 = vsel %vm10576_vm4, %v10430_v24, %v1133_v38  ;;  %vm10590_vm8 = vmor %vm1194_vm5, %vm1195_vm6  ;;  %v1193_v0 = vadd.f32 %v10499_v41, %v1192_v53  ;;  %v1198_v15 = vand.u32 2147483647, %v10456_v31  ;;  %v1200_v18 = vand.u32 2147483648, %v10456_v31 }
 0x179   : > { %v1177_v45 = vmul.f32 %v10520_v8, %v1176_v57  ;;  %1366 = vperm.xlu1 %9280, %v1158_v46   ;;  %v1142_v60 = vsel %vm1139_vm7, %v1141_v30, %v1137_v33  ;;  %vm1179_vm9 = vweird.f32 %v10441_v1  ;;  %vm1180_vm10 = vweird.f32 %v10520_v8 }
 0x17a   : > { %v1183_v24 = vand.u32 2147483647, %v10441_v1  ;;  %v1143_v37 = vmul.f32 %v1142_v60, %v651_v11  ;;  %v1197_v56 = vsel %vm10590_vm8, %v10499_v41, %v1193_v0  ;;  %vm1199_vm11 = vcmp.eq.f32.partialorder %v1198_v15, 8.507059e+37  ;;  %vm10605_vm13 = vmor %vm1179_vm9, %vm1180_vm10 }
 0x17b   : > { %v1201_v44 = vor.u32 1.1754944e-38, %v1200_v18  ;;  %v1178_v57 = vadd.f32 %v10520_v8, %v1177_v45  ;;  %v1185_v26 = vand.u32 2147483648, %v10441_v1  ;;  %v1222_v13 = vmul.f32 %v10560_v61, %v1221_v6 }
 0x17c   : > { %1361 = vperm.xlu2 %9281, %v1143_v37   ;;  %vm1184_vm12 = vcmp.eq.f32.partialorder %v1183_v24, 8.507059e+37  ;;  %vm1224_vm15 = vweird.f32 %v10507_v48  ;;  %vm1225_vm1 = vweird.f32 %v10560_v61  ;;  %v1228_v1 = vand.u32 2147483647, %v10507_v48 }
 0x17d   : > { %v1202_v49 = vsel %vm1199_vm11, %v1201_v44, %v1197_v56  ;;  %v1182_v27 = vsel %vm10605_vm13, %v10520_v8, %v1178_v57  ;;  %v1186_v29 = vor.u32 1.1754944e-38, %v1185_v26  ;;  %v1223_v22 = vadd.f32 %v10560_v61, %v1222_v13  ;;  %vm1226_vm14 = vmor %vm1224_vm15, %vm1225_vm1  ;;  %v657_v8 = vld [vmem:[%s9802_s27 + $0xf8] sm:$0xff] }
 0x17e   : > { %v1203_v41 = vmul.f32 %v1202_v49, %v655_v23  ;;  %v1230_v16 = vand.u32 2147483648, %v10507_v48  ;;  %v1427_v40 = vlaneseq  ;;  %vm1229_vm2 = vcmp.eq.f32.partialorder %v1228_v1, 8.507059e+37 }
 0x17f   : > { %v1187_v62 = vsel %vm1184_vm12, %v1186_v29, %v1182_v27  ;;  %v1227_v50 = vsel %vm1226_vm14, %v10560_v61, %v1223_v22  ;;  %vm3986_vm3 = vcmask 261120   ;;  %vm6836_vm0 = vcmask 1041409  }
 0x180   : > { %v1188_v6 = vmul.f32 %v1187_v62, %v654_v2  ;;  %v1428_v38 = vshrl.u32 %v1427_v40, 7  ;;  %v1231_v59 = vor.u32 1.1754944e-38, %v1230_v16  ;;  %vm6839_vm4 = vcmask 1042434  }
 0x181   : > { %1381 = vperm.xlu1 %9280, %v1203_v41   ;;  %v1242_v34 = vpop.permute.xlu2 %1241  ;;  %vm6842_vm5 = vcmask 1043459   ;;  %vm6845_vm6 = vcmask 1044484   ;;  %vm6848_vm7 = vcmask 1045509   ;;  %vm6851_vm8 = vcmask 1046534  }
 0x182   : > { %9284 = vset.pattern.permute.xlu0 %v1428_v38  ;;  %v1232_v53 = vsel %vm1229_vm2, %v1231_v59, %v1227_v50  ;;  %v1395_v60 = vmul.f32 %v9650_v5, %v1242_v34  ;;  %vm6854_vm9 = vcmask 1047559   ;;  %vm8487_vm10 = vcmask 1040384  }
 0x183   : > { %v1233_v46 = vmul.f32 %v1232_v53, %v657_v8  ;;  %vm8489_vm11 = vcmask 254976  }
 0x184   : > { %1376 = vperm.xlu2 %9281, %v1188_v6   ;;  %v1489_v37 = vperm.slane %v1395_v60, 1  ;;  %v1510_v31 = vperm.slane %v1395_v60, 4  ;;  %v1482_v57 = vperm.slane %v1395_v60, 0  ;;  %v1496_v49 = vperm.slane %v1395_v60, 2 }
 0x185   : > { %v1531_v41 = vperm.slane %v1395_v60, 7  ;;  %v1503_v2 = vperm.slane %v1395_v60, 3  ;;  %v1517_v1 = vperm.slane %v1395_v60, 5  ;;  %v1524_v16 = vperm.slane %v1395_v60, 6 }
 0x189   : > { %9283 = vset.pattern.permute.xlu1 %v1428_v38  ;;  %v1252_v11 = vpop.permute.xlu2 %1251 }
 0x18a   : > { %v1397_v8 = vmul.f32 %v9648_v63, %v1252_v11 }
 0x18c   : > { %1391 = vperm.xlu2 %9281, %v1233_v46   ;;  %v1594_v46 = vperm.slane %v1397_v8, 0 }
 0x18f   : > { %v1247_v13 = vpop.permute.xlu0 %1246 }
 0x190   : > { %v1237_v48 = vpop.permute.xlu1 %1236  ;;  %v1396_v27 = vmul.f32 %v9637_v47, %v1247_v13  ;;  %v1622_v13 = vperm.slane %v1397_v8, 4 }
 0x191   : > { %v1394_v33 = vmul.f32 %v9639_v7, %v1237_v48  ;;  %v10624_v0 = vpop.permute.xlu2 %1261 }
 0x192   : > { %v1552_v40 = vperm.slane %v1396_v27, 2  ;;  %v1538_v6 = vperm.slane %v1396_v27, 0  ;;  %v1573_v34 = vperm.slane %v1396_v27, 5  ;;  %v1545_v50 = vperm.slane %v1396_v27, 1 }
 0x193   : > { %v1433_v30 = vperm.slane %v1394_v33, 1  ;;  %v1426_v10 = vperm.slane %v1394_v33, 0  ;;  %v1440_v61 = vperm.slane %v1394_v33, 2  ;;  %v1468_v15 = vperm.slane %v1394_v33, 6 }
 0x194   : > { %9285 = vset.pattern.permute.xlu2 %v1428_v38  ;;  %v1447_v18 = vperm.slane %v1394_v33, 3  ;;  %v1454_v24 = vperm.slane %v1394_v33, 4  ;;  %v1461_v7 = vperm.slane %v1394_v33, 5  ;;  %v1475_v44 = vperm.slane %v1394_v33, 7 }
 0x195   : > { %1438 = vperm.xlu0 %9284, %v1433_v30   ;;  %1431 = vperm.xlu1 %9283, %v1426_v10   ;;  %v1559_v53 = vperm.slane %v1396_v27, 3  ;;  %v1566_v48 = vperm.slane %v1396_v27, 4 }
 0x199   : > { %v10626_v45 = vpop.permute.xlu2 %1271 }
 0x19c   : > { %1445 = vperm.xlu2 %9285, %v1440_v61   ;;  %v1580_v61 = vperm.slane %v1396_v27, 6 }
 0x19d   : > { %1473 = vperm.xlu0 %9284, %v1468_v15   ;;  %1452 = vperm.xlu1 %9283, %v1447_v18   ;;  %v1615_v15 = vperm.slane %v1397_v8, 3  ;;  %v1587_v18 = vperm.slane %v1396_v27, 7  ;;  %v10677_v27 = vmul.f32 %v9657_v12, %v10624_v0 }
 0x19f   : > { %v1741_v0 = vperm.slane %v10677_v27, 5 }
 0x1a1   : > { %v10629_v23 = vpop.permute.xlu1 %1256 }
 0x1a2   : > { %v10631_v56 = vpop.permute.xlu2 %1286 }
 0x1a4   : > { %1459 = vperm.xlu2 %9285, %v1454_v24   ;;  %v1601_v24 = vperm.slane %v1397_v8, 1 }
 0x1a5   : > { %1494 = vperm.xlu0 %9284, %v1489_v37   ;;  %1466 = vperm.xlu1 %9283, %v1461_v7   ;;  %v1636_v37 = vperm.slane %v1397_v8, 6  ;;  %v1608_v7 = vperm.slane %v1397_v8, 2 }
 0x1a8   : > { %v10638_v29 = vpop.permute.xlu0 %1281 }
 0x1a9   : > { %v10633_v26 = vpop.permute.xlu1 %1266 }
 0x1ac   : > { %1480 = vperm.xlu2 %9285, %v1475_v44   ;;  %v10665_v44 = vmul.f32 %v9659_v14, %v10629_v23  ;;  %v10681_v14 = vmul.f32 %v9674_v43, %v10626_v45  ;;  %v1643_v23 = vperm.slane %v1397_v8, 7  ;;  %v1727_v43 = vperm.slane %v10677_v27, 3 }
 0x1ad   : > { %1515 = vperm.xlu0 %9284, %v1510_v31   ;;  %1487 = vperm.xlu1 %9283, %v1482_v57   ;;  %v1734_v45 = vperm.slane %v10677_v27, 4 }
 0x1ae   : > { %v10635_v5 = vpop.permute.xlu2 %1301  ;;  %v1650_v12 = vperm.slane %v10665_v44, 0 }
 0x1b0   : > { %v10644_v38 = vpop.permute.xlu0 %1296 }
 0x1b1   : > { %v10640_v22 = vpop.permute.xlu1 %1276 }
 0x1b4   : > { %1501 = vperm.xlu2 %9285, %v1496_v49   ;;  %v1657_v49 = vperm.slane %v10665_v44, 1 }
 0x1b5   : > { %1536 = vperm.xlu0 %9284, %v1531_v41   ;;  %1508 = vperm.xlu1 %9283, %v1503_v2   ;;  %v1629_v41 = vperm.slane %v1397_v8, 5 }
 0x1b8   : > { %v10642_v62 = vpop.permute.xlu2 %1316  ;;  %v10651_v33 = vpop.permute.xlu0 %1311 }
 0x1b9   : > { %v10646_v59 = vpop.permute.xlu1 %1291 }
 0x1bc   : > { %1522 = vperm.xlu2 %9285, %v1517_v1   ;;  %v1720_v1 = vperm.slane %v10677_v27, 2 }
 0x1bd   : > { %1529 = vperm.xlu1 %9283, %v1524_v16   ;;  %1557 = vperm.xlu0 %9284, %v1552_v40   ;;  %v1706_v16 = vperm.slane %v10677_v27, 0 }
 0x1c1   : > { %v10657_v63 = vpop.permute.xlu0 %1326 }
 0x1c2   : > { %v10653_v30 = vpop.permute.xlu1 %1306 }
 0x1c3   : > { %v10648_v47 = vpop.permute.xlu2 %1331 }
 0x1c4   : > { %1543 = vperm.xlu2 %9285, %v1538_v6  }
 0x1c5   : > { %1578 = vperm.xlu0 %9284, %v1573_v34   ;;  %1550 = vperm.xlu1 %9283, %v1545_v50   ;;  %v1678_v34 = vperm.slane %v10665_v44, 4  ;;  %v1713_v50 = vperm.slane %v10677_v27, 1 }
 0x1ca   : > { %v10668_v31 = vpop.permute.xlu0 %1341 }
 0x1cc   : > { %1564 = vperm.xlu2 %9285, %v1559_v53   ;;  %v10906_v53 = vld [vmem:[%s10704_s7 + $0x40] sm:$0xff]  }
 0x1cd   : > { %1599 = vperm.xlu0 %9284, %v1594_v46   ;;  %1571 = vperm.xlu1 %9283, %v1566_v48   ;;  %v10655_v10 = vpop.permute.xlu2 %1346  ;;  %v10659_v11 = vpop.permute.xlu1 %1321  ;;  %v10699_v46 = vmul.f32 %v9665_v28, %v10633_v26  ;;  %v1692_v26 = vperm.slane %v10665_v44, 6  ;;  %v10788_v48 = vld [vmem:[%s10704_s7 + $0x10] sm:$0xff]  }
 0x1d4   : > { %1585 = vperm.xlu2 %9285, %v1580_v61  }
 0x1d5   : > { %1620 = vperm.xlu0 %9284, %v1615_v15   ;;  %1592 = vperm.xlu1 %9283, %v1587_v18   ;;  %v10685_v40 = vpop.permute.xlu0 %1356 }
 0x1d6   : > { %v10661_v60 = vpop.permute.xlu2 %1361 }
 0x1d8   : > { %v10670_v57 = vpop.permute.xlu1 %1336 }
 0x1dc   : > { %1606 = vperm.xlu2 %9285, %v1601_v24  }
 0x1dd   : > { %1641 = vperm.xlu0 %9284, %v1636_v37   ;;  %1613 = vperm.xlu1 %9283, %v1608_v7   ;;  %v10717_v7 = vmul.f32 %v9689_v55, %v10631_v56  ;;  %v1685_v37 = vperm.slane %v10665_v44, 5  ;;  %v10734_v55 = vmul.f32 %v9680_v52, %v10638_v29  ;;  %v1762_v56 = vperm.slane %v10699_v46, 0 }
 0x1de   : > { %v10673_v2 = vpop.permute.xlu2 %1376  ;;  %v10749_v52 = vmul.f32 %v9695_v25, %v10644_v38  ;;  %v8642_v38 = vunpack.c.l.bf16 %v10788_v48  ;;  %v10886_v25 = vld [vmem:[%s10704_s7 + $0x30] sm:$0xff]  }
 0x1e2   : > { %v10687_v6 = vpop.permute.xlu1 %1351 }
 0x1e3   : > { %14493 = vst [vmem:[#allocation8_spill] sm:$0xff] %v10687_v6 }
 0x1e4   : > { %1627 = vperm.xlu2 %9285, %v1622_v13   ;;  %v1664_v13 = vperm.slane %v10665_v44, 2 }
 0x1e5   : > { %1662 = vperm.xlu0 %9284, %v1657_v49   ;;  %1634 = vperm.xlu1 %9283, %v1629_v41   ;;  %v1699_v49 = vperm.slane %v10665_v44, 7 }
 0x1e6   : > { %v10709_v18 = vpop.permute.xlu2 %1391 }
 0x1e7   : > { %14494 = vst [vmem:[#allocation9_spill] sm:$0xff] %v10709_v18 }
 0x1ec   : > { %1648 = vperm.xlu2 %9285, %v1643_v23   ;;  %v10724_v23 = vmul.f32 %v9672_v39, %v10640_v22  ;;  %v10757_v39 = vpop.permute.xlu0 %1371 }
 0x1ed   : > { %1683 = vperm.xlu0 %9284, %v1678_v34   ;;  %1655 = vperm.xlu1 %9283, %v1650_v12   ;;  %v10727_v34 = vld [vmem:[%s10704_s7 + $0x8] sm:$0xff]   ;;  %v1671_v12 = vperm.slane %v10665_v44, 3  ;;  %v10745_v44 = vmul.f32 %v9704_v3, %v10635_v5  ;;  %14495 = vst [vmem:[#allocation10_spill] sm:$0xff] %v10757_v39  ;;  %v10759_v3 = vpop.permute.xlu1 %1366 }
 0x1ee   : > { %v8638_v29 = vunpack.c.l.bf16 %v10727_v34  ;;  %14496 = vst [vmem:[#allocation11_spill] sm:$0xff] %v10759_v3 }
 0x1f4   : > { %1669 = vperm.xlu2 %9285, %v1664_v13   ;;  %v10779_v13 = vmul.f32 %v9687_v17, %v10646_v59  ;;  %v10813_v59 = vld [vmem:[%s10785_s10] sm:$0xff] }
 0x1f5   : > { %1704 = vperm.xlu0 %9284, %v1699_v49   ;;  %1676 = vperm.xlu1 %9283, %v1671_v12   ;;  %v10770_v49 = vmul.f32 %v9719_v20, %v10642_v62  ;;  %v10774_v12 = vmul.f32 %v9710_v32, %v10651_v33  ;;  %v10802_v32 = vmul.f32 %v9734_v35, %v10648_v47  ;;  %v8639_v20 = vunpack.c.h.bf16 %v10727_v34 }
 0x1f6   : > { %v1446_v24 = vpop.permute.xlu2 %1445  ;;  %v10810_v62 = vmul.f32 %v9725_v54, %v10657_v63  ;;  %v10825_v54 = vmul.f32 %v9717_v42, %v10659_v11  ;;  %v10829_v47 = vmul.f32 %v9740_v9, %v10668_v31  ;;  %v5844_v63 = vrot.slane %v10813_v59, 2  ;;  %v10841_v11 = vpop.permute.xlu0 %1386 }
 0x1f7   : > { %v3732_v5 = vmul.f32 %v8638_v29, %v1446_v24  ;;  %14497 = vst [vmem:[#allocation12_spill] sm:$0xff] %v10802_v32  ;;  %v10839_v9 = vmul.f32 %v9755_v36, %v10685_v40  ;;  %v10843_v31 = vpop.permute.xlu1 %1381  ;;  %v8633_v40 = vld [vmem:[%s10704_s7] sm:$0xff]  }
 0x1f8   : > { %14499 = vst [vmem:[#allocation14_spill] sm:$0xff] %v10829_v47 }
 0x1f9   : > { %v4001_v33 = vsel %vm3986_vm3, %v3732_v5, 0.0  ;;  %v10806_v5 = vmul.f32 %v9702_v19, %v10653_v30  ;;  %v10821_v19 = vmul.f32 %v9749_v51, %v10655_v10  ;;  %14500 = vst [vmem:[#allocation15_spill] sm:$0xff] %v10839_v9  ;;  %v10848_v30 = vld [vmem:[%s10704_s7 + $0x18] sm:$0xff]   ;;  %v10873_v10 = vld [vmem:[%s10704_s7 + $0x28] sm:$0xff]   ;;  %v14508_v9 = vunpack.c.h.bf16 %v10788_v48 }
 0x1fa   : > { %v4002_v29 = vrot.slane %v4001_v33, 4  ;;  %14501 = vst [vmem:[#allocation16_spill] sm:$0xff] %v10841_v11  ;;  %v8647_v24 = vunpack.c.h.bf16 %v10848_v30  ;;  %v8654_v28 = vunpack.c.l.bf16 %v10873_v10  ;;  %v14512_v48 = vperm.slane %v10699_v46, 2 }
 0x1fb   : > { %14498 = vst [vmem:[#allocation13_spill] sm:$0xff] %v10821_v19 }
 0x1fc   : > { %v4003_v17 = vadd.f32 %v4002_v29, %v4001_v33  ;;  %1690 = vperm.xlu2 %9285, %v1685_v37   ;;  %14502 = vst [vmem:[#allocation17_spill] sm:$0xff] %v10843_v31  ;;  %v10880_v33 = vld [vmem:[%s10785_s10 + $0x8] sm:$0xff] }
 0x1fd   : > { %1725 = vperm.xlu0 %9284, %v1720_v1   ;;  %1697 = vperm.xlu1 %9283, %v1692_v26  }
 0x1fe   : > { %v4004_v37 = vrot.slane %v4003_v17, 2  ;;  %v1460_v51 = vpop.permute.xlu2 %1459 }
 0x1ff   : > { %v3734_v1 = vmul.f32 %v8642_v38, %v1460_v51  ;;  %v8634_v51 = vunpack.c.l.bf16 %v8633_v40 }
 0x200   : > { %v4005_v29 = vadd.f32 %v4004_v37, %v4003_v17  ;;  %v8635_v37 = vunpack.c.h.bf16 %v8633_v40 }
 0x201   : > { %v4015_v36 = vsel %vm3986_vm3, %v3734_v1, 0.0 }
 0x202   : > { %v4016_v26 = vrot.slane %v4015_v36, 4  ;;  %v4006_v42 = vrot.slane %v4005_v29, 1 }
 0x204   : > { %v4017_v35 = vadd.f32 %v4016_v26, %v4015_v36  ;;  %1711 = vperm.xlu2 %9285, %v1706_v16   ;;  %v4007_v22 = vadd.f32 %v4006_v42, %v4005_v29  ;;  %v5843_v16 = vrot.slane %v10813_v59, 1 }
 0x205   : > { %1746 = vperm.xlu0 %9284, %v1741_v0   ;;  %1718 = vperm.xlu1 %9283, %v1713_v50  }
 0x206   : > { %v4018_v1 = vrot.slane %v4017_v35, 2  ;;  %v1481_v17 = vpop.permute.xlu2 %1480 }
 0x207   : > { %v3737_v40 = vmul.f32 %v8647_v24, %v1481_v17  ;;  %v1432_v15 = vpop.permute.xlu1 %1431  ;;  %v1439_v26 = vpop.permute.xlu0 %1438 }
 0x208   : > { %v4019_v36 = vadd.f32 %v4018_v1, %v4017_v35  ;;  %v3730_v61 = vmul.f32 %v8634_v51, %v1432_v15  ;;  %v3731_v29 = vmul.f32 %v8635_v37, %v1439_v26  ;;  %v10899_v35 = vadd.f32 %v5844_v63, %v4007_v22  ;;  %v10915_v22 = vld [vmem:[%s10704_s7 + $0x20] sm:$0xff]  }
 0x209   : > { %v4036_v0 = vsel %vm3986_vm3, %v3737_v40, 0.0  ;;  %v8646_v40 = vunpack.c.l.bf16 %v10848_v30  ;;  %v8651_v8 = vunpack.c.h.bf16 %v10915_v22 }
 0x20a   : > { %v4037_v17 = vrot.slane %v4036_v0, 4  ;;  %v3987_v50 = vsel %vm3986_vm3, %v3730_v61, 0.0  ;;  %v3994_v1 = vsel %vm3986_vm3, %v3731_v29, 0.0  ;;  %v4020_v37 = vrot.slane %v4019_v36, 1 }
 0x20b   : > { %v3988_v51 = vrot.slane %v3987_v50, 4  ;;  %v3995_v61 = vrot.slane %v3994_v1, 4 }
 0x20c   : > { %v4038_v26 = vadd.f32 %v4037_v17, %v4036_v0  ;;  %1732 = vperm.xlu2 %9285, %v1727_v43   ;;  %v4021_v30 = vadd.f32 %v4020_v37, %v4019_v36 }
 0x20d   : > { %v3989_v24 = vadd.f32 %v3988_v51, %v3987_v50  ;;  %1767 = vperm.xlu0 %9284, %v1762_v56   ;;  %1739 = vperm.xlu1 %9283, %v1734_v45   ;;  %v3996_v29 = vadd.f32 %v3995_v61, %v3994_v1  ;;  %v10923_v51 = vmul.f32 %v10899_v35, %v10899_v35 }
 0x20e   : > { %v4039_v63 = vrot.slane %v4038_v26, 2  ;;  %v1502_v0 = vpop.permute.xlu2 %1501 }
 0x20f   : > { %v3990_v56 = vrot.slane %v3989_v24, 2  ;;  %v3740_v34 = vmul.f32 %v8654_v28, %v1502_v0  ;;  %v1453_v45 = vpop.permute.xlu1 %1452  ;;  %v1474_v42 = vpop.permute.xlu0 %1473  ;;  %v3997_v43 = vrot.slane %v3996_v29, 2  ;;  %v14507_v28 = vunpack.c.h.bf16 %v10886_v25 }
 0x210   : > { %v4040_v41 = vadd.f32 %v4039_v63, %v4038_v26  ;;  %v3733_v17 = vmul.f32 %v8639_v20, %v1453_v45  ;;  %v3736_v50 = vmul.f32 %v8646_v40, %v1474_v42  ;;  %v14504_v42 = vperm.slane %v10677_v27, 6 }
 0x211   : > { %v3991_v1 = vadd.f32 %v3990_v56, %v3989_v24  ;;  %v4057_v61 = vsel %vm3986_vm3, %v3740_v34, 0.0  ;;  %v3998_v11 = vadd.f32 %v3997_v43, %v3996_v29  ;;  %v14503_v24 = vrot.slane %v10813_v59, 4  ;;  %v10940_v43 = vld [vmem:[%s10704_s7 + $0x48] sm:$0xff]  }
 0x212   : > { %v4058_v31 = vrot.slane %v4057_v61, 4  ;;  %v4008_v36 = vsel %vm3986_vm3, %v3733_v17, 0.0  ;;  %v4029_v37 = vsel %vm3986_vm3, %v3736_v50, 0.0  ;;  %v4041_v63 = vrot.slane %v4040_v41, 1 }
 0x213   : > { %v3992_v15 = vrot.slane %v3991_v1, 1  ;;  %v10935_v26 = vadd.f32 %v14503_v24, %v4021_v30  ;;  %v3999_v20 = vrot.slane %v3998_v11, 1  ;;  %v4009_v40 = vrot.slane %v4008_v36, 4 }
 0x214   : > { %v4059_v34 = vadd.f32 %v4058_v31, %v4057_v61  ;;  %1753 = vperm.xlu2 %9285, %v14504_v42   ;;  %v4030_v17 = vrot.slane %v4029_v37, 4  ;;  %v14505_v50 = vperm.slane %v10699_v46, 3  ;;  %v14506_v30 = vperm.slane %v10677_v27, 7 }
 0x215   : > { %v3993_v29 = vadd.f32 %v3992_v15, %v3991_v1  ;;  %v4000_v45 = vadd.f32 %v3999_v20, %v3998_v11  ;;  %v4010_v61 = vadd.f32 %v4009_v40, %v4008_v36  ;;  %v8650_v56 = vunpack.c.l.bf16 %v10915_v22 }
 0x216   : > { %1788 = vperm.xlu0 %9284, %v14505_v50   ;;  %1760 = vperm.xlu1 %9283, %v14506_v30   ;;  %v4060_v31 = vrot.slane %v4059_v34, 2  ;;  %v1523_v24 = vpop.permute.xlu2 %1522  ;;  %v4031_v1 = vadd.f32 %v4030_v17, %v4029_v37  ;;  %v10954_v27 = vmul.f32 %v10935_v26, %v10935_v26  ;;  %v4042_v40 = vadd.f32 %v4041_v63, %v4040_v41 }
 0x217   : > { %v3743_v15 = vmul.f32 %v14507_v28, %v1523_v24  ;;  %v1467_v38 = vpop.permute.xlu1 %1466  ;;  %v6323_v11 = vadd.f32 %v10813_v59, %v3993_v29  ;;  %v6324_v36 = vadd.f32 %v5843_v16, %v4000_v45  ;;  %v4011_v50 = vrot.slane %v4010_v61, 2  ;;  %v1495_v28 = vpop.permute.xlu0 %1494 }
 0x218   : > { %v4061_v20 = vadd.f32 %v4060_v31, %v4059_v34  ;;  %v4032_v42 = vrot.slane %v4031_v1, 2  ;;  %v3735_v29 = vmul.f32 %v14508_v9, %v1467_v38  ;;  %v14509_v63 = vperm.slane %v10699_v46, 1 }
 0x219   : > { %v4078_v30 = vsel %vm3986_vm3, %v3743_v15, 0.0  ;;  %v7424_v22 = vmul.f32 %v6324_v36, %v6324_v36  ;;  %v4012_v0 = vadd.f32 %v4011_v50, %v4010_v61  ;;  %v7423_v41 = vmul.f32 %v6323_v11, %v6323_v11 }
 0x21a   : > { %v4062_v17 = vrot.slane %v4061_v20, 1  ;;  %v4079_v18 = vrot.slane %v4078_v30, 4  ;;  %v4033_v3 = vadd.f32 %v4032_v42, %v4031_v1  ;;  %v3739_v31 = vmul.f32 %v8651_v8, %v1495_v28  ;;  %v10977_v28 = vld [vmem:[%s10704_s7 + $0x58] sm:$0xff]  }
 0x21b   : > { %v7935_v34 = vrot.slane %v7424_v22, 7  ;;  %v14510_v45 = vrot.slane %v10813_v59, 7  ;;  %v4013_v61 = vrot.slane %v4012_v0, 1  ;;  %v14511_v42 = vperm.slane %v10699_v46, 6 }
 0x21c   : > { %1774 = vperm.xlu2 %9285, %v14509_v63   ;;  %v4063_v37 = vadd.f32 %v4062_v17, %v4061_v20  ;;  %v4080_v50 = vadd.f32 %v4079_v18, %v4078_v30  ;;  %v4034_v38 = vrot.slane %v4033_v3, 1  ;;  %v4022_v8 = vsel %vm3986_vm3, %v3735_v29, 0.0 }
 0x21d   : > { %v10967_v15 = vadd.f32 %v14510_v45, %v4042_v40  ;;  %v7936_v9 = vsel %vm6836_vm0, %v7935_v34, %v7423_v41  ;;  %v4050_v40 = vsel %vm3986_vm3, %v3739_v31, 0.0  ;;  %v4014_v20 = vadd.f32 %v4013_v61, %v4012_v0  ;;  %v10987_v31 = vld [vmem:[%s10704_s7 + $0x38] sm:$0xff]  }
 0x21e   : > { %1809 = vperm.xlu0 %9284, %v14511_v42   ;;  %1781 = vperm.xlu1 %9283, %v14512_v48   ;;  %v1544_v1 = vpop.permute.xlu2 %1543  ;;  %v14513_v18 = vrot.slane %v10923_v51, 6  ;;  %v4081_v17 = vrot.slane %v4080_v50, 2  ;;  %v6835_v34 = vrot.slane %v6324_v36, 7  ;;  %v4023_v63 = vrot.slane %v4022_v8, 4 }
 0x21f   : > { %v1488_v41 = vpop.permute.xlu1 %1487  ;;  %v14514_v45 = vunpack.c.l.bf16 %v10906_v53  ;;  %v14515_v0 = vrot.slane %v10880_v33, 2  ;;  %v14516_v51 = vrot.slane %v10813_v59, 3  ;;  %v10998_v36 = vmul.f32 %v10967_v15, %v10967_v15 }
 0x220   : > { %v7938_v30 = vsel %vm6839_vm4, %v14513_v18, %v7936_v9  ;;  %v4051_v9 = vrot.slane %v4050_v40, 4  ;;  %v4035_v22 = vadd.f32 %v4034_v38, %v4033_v3  ;;  %v4082_v24 = vadd.f32 %v4081_v17, %v4080_v50 }
 0x221   : > { %v3746_v29 = vmul.f32 %v14514_v45, %v1544_v1  ;;  %v10991_v61 = vadd.f32 %v14515_v0, %v4063_v37  ;;  %v6326_v48 = vadd.f32 %v14516_v51, %v4014_v20  ;;  %v4024_v1 = vadd.f32 %v4023_v63, %v4022_v8 }
 0x222   : > { %v3738_v45 = vmul.f32 %v8650_v56, %v1488_v41  ;;  %v6837_v20 = vsel %vm6836_vm0, %v6835_v34, %v6323_v11  ;;  %v4052_v6 = vadd.f32 %v4051_v9, %v4050_v40  ;;  %v14517_v18 = vperm.slane %v10699_v46, 4 }
 0x223   : > { %v7426_v42 = vmul.f32 %v6326_v48, %v6326_v48  ;;  %v4099_v16 = vsel %vm3986_vm3, %v3746_v29, 0.0  ;;  %v4025_v51 = vrot.slane %v4024_v1, 2  ;;  %v11008_v3 = vmul.f32 %v10991_v61, %v10991_v61 }
 0x224   : > { %1795 = vperm.xlu2 %9285, %v14517_v18   ;;  %v6841_v56 = vrot.slane %v6326_v48, 5  ;;  %v4043_v50 = vsel %vm3986_vm3, %v3738_v45, 0.0  ;;  %v14518_v8 = vperm.slane %v10681_v14, 1  ;;  %v14519_v17 = vperm.slane %v10699_v46, 5 }
 0x225   : > { %v7939_v38 = vrot.slane %v7426_v42, 5  ;;  %v14520_v40 = vrot.slane %v10813_v59, 6  ;;  %v4026_v34 = vadd.f32 %v4025_v51, %v4024_v1  ;;  %v4100_v63 = vrot.slane %v4099_v16, 4  ;;  %v1516_v1 = vpop.permute.xlu0 %1515 }
 0x226   : > { %1830 = vperm.xlu0 %9284, %v14518_v8   ;;  %1802 = vperm.xlu1 %9283, %v14519_v17   ;;  %v4083_v42 = vrot.slane %v4082_v24, 1  ;;  %v4053_v48 = vrot.slane %v4052_v6, 2  ;;  %v4044_v9 = vrot.slane %v4043_v50, 4  ;;  %v1565_v18 = vpop.permute.xlu2 %1564  ;;  %v14521_v8 = vrot.slane %v10899_v35, 6 }
 0x227   : > { %v6329_v41 = vadd.f32 %v14520_v40, %v4035_v22  ;;  %v7940_v29 = vsel %vm6842_vm5, %v7939_v38, %v7938_v30  ;;  %v4027_v37 = vrot.slane %v4026_v34, 1  ;;  %v14522_v11 = vrot.slane %v10954_v27, 4 }
 0x228   : > { %v6840_v17 = vsel %vm6839_vm4, %v14521_v8, %v6837_v20  ;;  %v4054_v38 = vadd.f32 %v4053_v48, %v4052_v6  ;;  %v4045_v40 = vadd.f32 %v4044_v9, %v4043_v50  ;;  %v4101_v19 = vadd.f32 %v4100_v63, %v4099_v16  ;;  %v1509_v63 = vpop.permute.xlu1 %1508 }
 0x229   : > { %v7942_v22 = vsel %vm6845_vm6, %v14522_v11, %v7940_v29  ;;  %v6843_v30 = vsel %vm6842_vm5, %v6841_v56, %v6840_v17  ;;  %v6850_v0 = vrot.slane %v6329_v41, 2  ;;  %v4028_v39 = vadd.f32 %v4027_v37, %v4026_v34 }
 0x22a   : > { %v14523_v45 = vunpack.c.h.bf16 %v10940_v43  ;;  %v4084_v47 = vadd.f32 %v4083_v42, %v4082_v24  ;;  %v4055_v20 = vrot.slane %v4054_v38, 1  ;;  %v4046_v8 = vrot.slane %v4045_v40, 2 }
 0x22b   : > { %v14524_v27 = vunpack.c.l.bf16 %v10886_v25  ;;  %v7429_v11 = vmul.f32 %v6329_v41, %v6329_v41  ;;  %v14525_v29 = vrot.slane %v10813_v59, 5  ;;  %v14526_v56 = vrot.slane %v10935_v26, 4 }
 0x22c   : > { %v3749_v35 = vmul.f32 %v14523_v45, %v1565_v18  ;;  %v14527_v16 = vperm.slane %v10699_v46, 7  ;;  %v4056_v24 = vadd.f32 %v4055_v20, %v4054_v38  ;;  %v4047_v50 = vadd.f32 %v4046_v8, %v4045_v40 }
 0x22d   : > { %v3742_v32 = vmul.f32 %v14524_v27, %v1516_v1  ;;  %v6328_v51 = vadd.f32 %v14525_v29, %v4028_v39  ;;  %v6846_v6 = vsel %vm6845_vm6, %v14526_v56, %v6843_v30  ;;  %v14528_v41 = vperm.slane %v10681_v14, 4 }
 0x22e   : > { %v4120_v37 = vsel %vm3986_vm3, %v3749_v35, 0.0  ;;  %1816 = vperm.xlu2 %9285, %v14527_v16   ;;  %v14529_v39 = vperm.slane %v10681_v14, 0  ;;  %v4102_v42 = vrot.slane %v4101_v19, 2  ;;  %v14530_v46 = vrot.slane %v10880_v33, 5 }
 0x22f   : > { %v4121_v34 = vrot.slane %v4120_v37, 4  ;;  %v4071_v25 = vsel %vm3986_vm3, %v3742_v32, 0.0  ;;  %1851 = vperm.xlu0 %9284, %v14528_v41   ;;  %v6847_v59 = vrot.slane %v6328_v51, 3  ;;  %v7428_v26 = vmul.f32 %v6328_v51, %v6328_v51 }
 0x230   : > { %1823 = vperm.xlu1 %9283, %v14529_v39   ;;  %v4072_v48 = vrot.slane %v4071_v25, 4  ;;  %v11047_v9 = vadd.f32 %v14530_v46, %v4084_v47  ;;  %v14531_v18 = vrot.slane %v10880_v33, 1  ;;  %v4048_v32 = vrot.slane %v4047_v50, 1 }
 0x231   : > { %v4122_v17 = vadd.f32 %v4121_v34, %v4120_v37  ;;  %v6849_v1 = vsel %vm6848_vm7, %v6847_v59, %v6846_v6  ;;  %v7943_v51 = vrot.slane %v7428_v26, 3  ;;  %v14532_v38 = vunpack.c.h.bf16 %v10873_v10  ;;  %v11068_v37 = vld [vmem:[%s10785_s10 + $0x10] sm:$0xff] }
 0x232   : > { %v6332_v45 = vadd.f32 %v14531_v18, %v4056_v24  ;;  %v4073_v30 = vadd.f32 %v4072_v48, %v4071_v25  ;;  %v7945_v47 = vrot.slane %v7429_v11, 2  ;;  %v6852_v35 = vsel %vm6851_vm8, %v6850_v0, %v6849_v1  ;;  %v1586_v24 = vpop.permute.xlu2 %1585 }
 0x233   : > { %v3741_v40 = vmul.f32 %v14532_v38, %v1509_v63  ;;  %v4049_v8 = vadd.f32 %v4048_v32, %v4047_v50  ;;  %v14533_v27 = vrot.slane %v10967_v15, 1  ;;  %v7944_v56 = vsel %vm6848_vm7, %v7943_v51, %v7942_v22  ;;  %v1537_v63 = vpop.permute.xlu0 %1536 }
 0x234   : > { %v7432_v20 = vmul.f32 %v6332_v45, %v6332_v45  ;;  %v4103_v6 = vadd.f32 %v4102_v42, %v4101_v19  ;;  %v4123_v16 = vrot.slane %v4122_v17, 2  ;;  %v7946_v10 = vsel %vm6851_vm8, %v7945_v47, %v7944_v56 }
 0x235   : > { %v11064_v29 = vsel %vm6854_vm9, %v14533_v27, %v6852_v35  ;;  %v6331_v0 = vadd.f32 %v10880_v33, %v4049_v8  ;;  %v5859_v11 = vrot.slane %v11068_v37, 3  ;;  %v4074_v15 = vrot.slane %v4073_v30, 2  ;;  %v1530_v35 = vpop.permute.xlu1 %1529 }
 0x236   : > { %7322 = vst.msk [vmem:[%s11055_s13] sm:$0xff] %vm3986_vm3, %v11064_v29  ;;  %v11078_v50 = vmul.f32 %v11047_v9, %v11047_v9  ;;  %v14534_v22 = vrot.slane %v10998_v36, 1  ;;  %v4124_v34 = vadd.f32 %v4123_v16, %v4122_v17  ;;  %v4064_v25 = vsel %vm3986_vm3, %v3741_v40, 0.0  ;;  %v11106_v16 = vld [vmem:[%s10704_s7 + $0x60] sm:$0xff]  }
 0x237   : > { %v14535_v41 = vperm.slane %v10681_v14, 2  ;;  %v7949_v39 = vrot.slane %v7432_v20, 7  ;;  %v7431_v59 = vmul.f32 %v6331_v0, %v6331_v0  ;;  %v4075_v26 = vadd.f32 %v4074_v15, %v4073_v30 }
 0x238   : > { %v11083_v19 = vsel %vm6854_vm9, %v14534_v22, %v7946_v10  ;;  %v4065_v42 = vrot.slane %v4064_v25, 4  ;;  %v14536_v48 = vperm.slane %v10681_v14, 7  ;;  %v14537_v36 = vperm.slane %v10681_v14, 3 }
 0x239   : > { %1837 = vperm.xlu2 %9285, %v14535_v41   ;;  %v4104_v46 = vrot.slane %v4103_v6, 1  ;;  %v6856_v18 = vrot.slane %v6332_v45, 7  ;;  %v5853_v32 = vrot.slane %v10880_v33, 4  ;;  %v14538_v17 = vunpack.c.l.bf16 %v10977_v28 }
 0x23a   : > { %1872 = vperm.xlu0 %9284, %v14536_v48   ;;  %1844 = vperm.xlu1 %9283, %v14537_v36   ;;  %v7950_v51 = vsel %vm6836_vm0, %v7949_v39, %v7431_v59  ;;  %v4076_v38 = vrot.slane %v4075_v26, 1  ;;  %v4066_v40 = vadd.f32 %v4065_v42, %v4064_v25  ;;  %v14539_v30 = vunpack.c.h.bf16 %v10987_v31 }
 0x23b   : > { %v3752_v1 = vmul.f32 %v14538_v17, %v1586_v24  ;;  %v14540_v20 = vrot.slane %v11008_v3, 6  ;;  %v4125_v27 = vrot.slane %v4124_v34, 1  ;;  %v8662_v56 = vunpack.c.l.bf16 %v10987_v31 }
 0x23c   : > { %v3745_v47 = vmul.f32 %v14539_v30, %v1537_v63  ;;  %v4077_v24 = vadd.f32 %v4076_v38, %v4075_v26  ;;  %v4067_v10 = vrot.slane %v4066_v40, 2  ;;  %v6864_v25 = vrot.slane %v11047_v9, 3 }
 0x23d   : > { %v11101_v8 = vsel %vm6839_vm4, %v14540_v20, %v7950_v51  ;;  %v4141_v45 = vsel %vm3986_vm3, %v3752_v1, 0.0  ;;  %v7957_v63 = vrot.slane %v11078_v50, 3  ;;  %v3744_v41 = vmul.f32 %v8662_v56, %v1530_v35  ;;  %v1607_v1 = vpop.permute.xlu2 %1606 }
 0x23e   : > { %v4142_v15 = vrot.slane %v4141_v45, 4  ;;  %v4092_v22 = vsel %vm3986_vm3, %v3745_v47, 0.0  ;;  %v6857_v39 = vsel %vm6836_vm0, %v6856_v18, %v6331_v0  ;;  %v4068_v59 = vadd.f32 %v4067_v10, %v4066_v40 }
 0x23f   : > { %v4093_v3 = vrot.slane %v4092_v22, 4  ;;  %v8683_v48 = vunpack.c.h.bf16 %v11106_v16  ;;  %v4126_v31 = vadd.f32 %v4125_v27, %v4124_v34  ;;  %v5852_v36 = vrot.slane %v10880_v33, 3 }
 0x240   : > { %v4143_v42 = vadd.f32 %v4142_v15, %v4141_v45  ;;  %v4085_v17 = vsel %vm3986_vm3, %v3744_v41, 0.0  ;;  %v14541_v51 = vperm.slane %v10681_v14, 5  ;;  %v4105_v38 = vadd.f32 %v4104_v46, %v4103_v6 }
 0x241   : > { %v4094_v26 = vadd.f32 %v4093_v3, %v4092_v22  ;;  %v6335_v30 = vadd.f32 %v5853_v32, %v4077_v24  ;;  %v4069_v47 = vrot.slane %v4068_v59, 1  ;;  %v14542_v0 = vperm.slane %v10724_v23, 2  ;;  %v1558_v32 = vpop.permute.xlu0 %1557 }
 0x242   : > { %1858 = vperm.xlu2 %9285, %v14541_v51   ;;  %v4144_v35 = vrot.slane %v4143_v42, 2  ;;  %v14543_v18 = vperm.slane %v10681_v14, 6  ;;  %v14544_v34 = vrot.slane %v10991_v61, 6  ;;  %v5862_v20 = vrot.slane %v11068_v37, 6 }
 0x243   : > { %1893 = vperm.xlu0 %9284, %v14542_v0   ;;  %v4095_v27 = vrot.slane %v4094_v26, 2  ;;  %v4086_v45 = vrot.slane %v4085_v17, 4  ;;  %v4070_v56 = vadd.f32 %v4069_v47, %v4068_v59  ;;  %v5856_v6 = vrot.slane %v10880_v33, 7  ;;  %v1551_v47 = vpop.permute.xlu1 %1550 }
 0x244   : > { %1865 = vperm.xlu1 %9283, %v14543_v18   ;;  %v6859_v40 = vsel %vm6839_vm4, %v14544_v34, %v6857_v39  ;;  %v4145_v10 = vadd.f32 %v4144_v35, %v4143_v42  ;;  %v3755_v46 = vmul.f32 %v8683_v48, %v1607_v1  ;;  %v11126_v24 = vadd.f32 %v5859_v11, %v4126_v31 }
 0x245   : > { %v4096_v15 = vadd.f32 %v4095_v27, %v4094_v26  ;;  %v4087_v22 = vadd.f32 %v4086_v45, %v4085_v17  ;;  %v8670_v14 = vunpack.c.l.bf16 %v10940_v43  ;;  %v7435_v3 = vmul.f32 %v6335_v30, %v6335_v30  ;;  %v11136_v45 = vld [vmem:[%s10785_s10 + $0x18] sm:$0xff] }
 0x246   : > { %v6334_v61 = vadd.f32 %v5852_v36, %v4070_v56  ;;  %v4146_v41 = vrot.slane %v4145_v10, 1  ;;  %v4162_v39 = vsel %vm3986_vm3, %v3755_v46, 0.0  ;;  %v6862_v35 = vrot.slane %v6335_v30, 4 }
 0x247   : > { %v4097_v51 = vrot.slane %v4096_v15, 1  ;;  %v4088_v0 = vrot.slane %v4087_v22, 2  ;;  %v4163_v59 = vrot.slane %v4162_v39, 4  ;;  %v3748_v42 = vmul.f32 %v8670_v14, %v1558_v32 }
 0x248   : > { %v6860_v48 = vrot.slane %v6334_v61, 5  ;;  %v7434_v1 = vmul.f32 %v6334_v61, %v6334_v61  ;;  %v5855_v11 = vrot.slane %v10880_v33, 6  ;;  %v14545_v36 = vperm.slane %v10724_v23, 0 }
 0x249   : > { %v4098_v31 = vadd.f32 %v4097_v51, %v4096_v15  ;;  %v4089_v26 = vadd.f32 %v4088_v0, %v4087_v22  ;;  %v4164_v17 = vadd.f32 %v4163_v59, %v4162_v39  ;;  %v4113_v43 = vsel %vm3986_vm3, %v3748_v42, 0.0  ;;  %v11159_v0 = vld [vmem:[%s10704_s7 + $0x50] sm:$0xff]   ;;  %v1628_v42 = vpop.permute.xlu2 %1627 }
 0x24a   : > { %1879 = vperm.xlu2 %9285, %v14545_v36   ;;  %v6861_v18 = vsel %vm6842_vm5, %v6860_v48, %v6859_v40  ;;  %v7953_v34 = vrot.slane %v7434_v1, 5  ;;  %v4147_v27 = vadd.f32 %v4146_v41, %v4145_v10  ;;  %v4114_v30 = vrot.slane %v4113_v43, 4  ;;  %v11150_v41 = vld [vmem:[%s10704_s7 + $0x70] sm:$0xff]  }
 0x24b   : > { %v14546_v56 = vperm.slane %v10724_v23, 5  ;;  %v14547_v33 = vperm.slane %v10724_v23, 1  ;;  %v7955_v46 = vrot.slane %v7435_v3, 4  ;;  %v4090_v32 = vrot.slane %v4089_v26, 1 }
 0x24c   : > { %v4165_v15 = vrot.slane %v4164_v17, 2  ;;  %v8667_v22 = vunpack.c.h.bf16 %v10906_v53  ;;  %v11144_v14 = vadd.f32 %v11068_v37, %v4105_v38  ;;  %v6863_v40 = vsel %vm6845_vm6, %v6862_v35, %v6861_v18 }
 0x24d   : > { %1914 = vperm.xlu0 %9284, %v14546_v56   ;;  %1886 = vperm.xlu1 %9283, %v14547_v33   ;;  %v7954_v10 = vsel %vm6842_vm5, %v7953_v34, %v11101_v8  ;;  %v6338_v61 = vadd.f32 %v5856_v6, %v4098_v31  ;;  %v11154_v39 = vmul.f32 %v11126_v24, %v11126_v24  ;;  %v5864_v53 = vrot.slane %v11136_v45, 1  ;;  %v1579_v34 = vpop.permute.xlu0 %1578 }
 0x24e   : > { %v7956_v3 = vsel %vm6845_vm6, %v7955_v46, %v7954_v10  ;;  %v4091_v51 = vadd.f32 %v4090_v32, %v4089_v26  ;;  %v11161_v38 = vadd.f32 %v5862_v20, %v4147_v27  ;;  %v4166_v6 = vadd.f32 %v4165_v15, %v4164_v17 }
 0x24f   : > { %v7958_v8 = vsel %vm6848_vm7, %v7957_v63, %v7956_v3  ;;  %v4115_v59 = vadd.f32 %v4114_v30, %v4113_v43  ;;  %v6865_v48 = vsel %vm6848_vm7, %v6864_v25, %v6863_v40  ;;  %v3747_v1 = vmul.f32 %v8667_v22, %v1551_v47  ;;  %v1572_v43 = vpop.permute.xlu1 %1571 }
 0x250   : > { %v6337_v35 = vadd.f32 %v5855_v11, %v4091_v51  ;;  %v8690_v31 = vunpack.c.l.bf16 %v11150_v41  ;;  %v7438_v26 = vmul.f32 %v6338_v61, %v6338_v61  ;;  %v4167_v36 = vrot.slane %v4166_v6, 1 }
 0x251   : > { %v4116_v18 = vrot.slane %v4115_v59, 2  ;;  %v8675_v20 = vunpack.c.h.bf16 %v11159_v0  ;;  %v4106_v63 = vsel %vm3986_vm3, %v3747_v1, 0.0  ;;  %v14548_v11 = vperm.slane %v10724_v23, 3 }
 0x252   : > { %v6866_v50 = vrot.slane %v6337_v35, 2  ;;  %v7437_v27 = vmul.f32 %v6337_v35, %v6337_v35  ;;  %v3758_v17 = vmul.f32 %v8690_v31, %v1628_v42  ;;  %v6868_v9 = vrot.slane %v6338_v61, 1 }
 0x253   : > { %1900 = vperm.xlu2 %9285, %v14548_v11   ;;  %v4168_v25 = vadd.f32 %v4167_v36, %v4166_v6  ;;  %v4117_v47 = vadd.f32 %v4116_v18, %v4115_v59  ;;  %v4107_v30 = vrot.slane %v4106_v63, 4  ;;  %v14549_v56 = vperm.slane %v10724_v23, 4 }
 0x254   : > { %v14550_v33 = vperm.slane %v10734_v55, 0  ;;  %v6867_v46 = vsel %vm6851_vm8, %v6866_v50, %v6865_v48  ;;  %v7959_v32 = vrot.slane %v7437_v27, 2  ;;  %v4183_v15 = vsel %vm3986_vm3, %v3758_v17, 0.0  ;;  %v1649_v17 = vpop.permute.xlu2 %1648 }
 0x255   : > { %1907 = vperm.xlu1 %9283, %v14549_v56   ;;  %v3751_v22 = vmul.f32 %v8675_v20, %v1579_v34  ;;  %v7961_v40 = vrot.slane %v7438_v26, 1  ;;  %v6869_v10 = vsel %vm6854_vm9, %v6868_v9, %v6867_v46  ;;  %v4118_v61 = vrot.slane %v4117_v47, 1  ;;  %v11197_v26 = vld [vmem:[%s10704_s7 + $0x78] sm:$0xff]  }
 0x256   : > { %1935 = vperm.xlu0 %9284, %v14550_v33   ;;  %v4108_v3 = vadd.f32 %v4107_v30, %v4106_v63  ;;  %v11183_v51 = vmul.f32 %v11144_v14, %v11144_v14  ;;  %7323 = vst.msk [vmem:[%s11055_s13 + $0x8] sm:$0xff] %vm3986_vm3, %v6869_v10  ;;  %v7960_v6 = vsel %vm6851_vm8, %v7959_v32, %v7958_v8  ;;  %v4184_v59 = vrot.slane %v4183_v15, 4 }
 0x257   : > { %v4134_v42 = vsel %vm3986_vm3, %v3751_v22, 0.0  ;;  %v6874_v35 = vrot.slane %v11126_v24, 5  ;;  %v7967_v48 = vrot.slane %v11154_v39, 5  ;;  %v11193_v1 = vmul.f32 %v11161_v38, %v11161_v38 }
 0x258   : > { %v7962_v31 = vsel %vm6854_vm9, %v7961_v40, %v7960_v6  ;;  %v11199_v36 = vadd.f32 %v5864_v53, %v4168_v25  ;;  %v5858_v18 = vrot.slane %v11068_v37, 2  ;;  %v4109_v8 = vrot.slane %v4108_v3, 2  ;;  %v1593_v6 = vpop.permute.xlu1 %1592 }
 0x259   : > { %v4135_v20 = vrot.slane %v4134_v42, 4  ;;  %v4119_v50 = vadd.f32 %v4118_v61, %v4117_v47  ;;  %v5857_v27 = vrot.slane %v11068_v37, 1  ;;  %v8674_v63 = vunpack.c.l.bf16 %v11159_v0 }
 0x25a   : > { %v4110_v11 = vadd.f32 %v4109_v8, %v4108_v3  ;;  %v4185_v9 = vadd.f32 %v4184_v59, %v4183_v15  ;;  %v8695_v56 = vunpack.c.h.bf16 %v11197_v26  ;;  %v14551_v53 = vperm.slane %v10724_v23, 6  ;;  %v1600_v3 = vpop.permute.xlu0 %1599 }
 0x25b   : > { %v4136_v30 = vadd.f32 %v4135_v20, %v4134_v42  ;;  %v5867_v33 = vrot.slane %v11136_v45, 4  ;;  %v5861_v46 = vrot.slane %v11068_v37, 5  ;;  %v3750_v47 = vmul.f32 %v8674_v63, %v1572_v43 }
 0x25c   : > { %1921 = vperm.xlu2 %9285, %v14551_v53   ;;  %v14552_v32 = vperm.slane %v10724_v23, 7  ;;  %v14553_v0 = vperm.slane %v10734_v55, 3  ;;  %v11217_v15 = vmul.f32 %v11199_v36, %v11199_v36  ;;  %v4111_v22 = vrot.slane %v4110_v11, 1 }
 0x25d   : > { %v4137_v40 = vrot.slane %v4136_v30, 2  ;;  %v3761_v61 = vmul.f32 %v8695_v56, %v1649_v17  ;;  %v11219_v59 = vadd.f32 %v5858_v18, %v4119_v50  ;;  %v4127_v42 = vsel %vm3986_vm3, %v3750_v47, 0.0 }
 0x25e   : > { %1928 = vperm.xlu1 %9283, %v14552_v32   ;;  %1956 = vperm.xlu0 %9284, %v14553_v0   ;;  %v8682_v43 = vunpack.c.l.bf16 %v11106_v16  ;;  %v8679_v23 = vunpack.c.h.bf16 %v10977_v28  ;;  %v4112_v8 = vadd.f32 %v4111_v22, %v4110_v11  ;;  %v4186_v20 = vrot.slane %v4185_v9, 2 }
 0x25f   : > { %v4138_v63 = vadd.f32 %v4137_v40, %v4136_v30  ;;  %v4128_v53 = vrot.slane %v4127_v42, 4  ;;  %v7355_v32 = vsel %vm3986_vm3, %v6869_v10, 0.0  ;;  %v4204_v0 = vsel %vm3986_vm3, %v3761_v61, 0.0 }
 0x260   : > { %v3754_v34 = vmul.f32 %v8682_v43, %v1600_v3  ;;  %v3753_v17 = vmul.f32 %v8679_v23, %v1593_v6  ;;  %v6884_v56 = vrot.slane %v11199_v36, 7  ;;  %v6340_v18 = vadd.f32 %v5857_v27, %v4112_v8 }
 0x261   : > { %v4139_v50 = vrot.slane %v4138_v63, 1  ;;  %v4129_v25 = vadd.f32 %v4128_v53, %v4127_v42  ;;  %v7441_v16 = vmul.f32 %v11219_v59, %v11219_v59  ;;  %v4205_v47 = vrot.slane %v4204_v0, 4 }
 0x262   : > { %v4155_v28 = vsel %vm3986_vm3, %v3754_v34, 0.0  ;;  %v4148_v11 = vsel %vm3986_vm3, %v3753_v17, 0.0  ;;  %v8416_v30 = vsel %vm3986_vm3, %v7962_v31, 0.0  ;;  %v7977_v10 = vrot.slane %v11217_v15, 7 }
 0x263   : > { %v7440_v22 = vmul.f32 %v6340_v18, %v6340_v18  ;;  %v4187_v40 = vadd.f32 %v4186_v20, %v4185_v9  ;;  %v14554_v61 = vperm.slane %v10734_v55, 1  ;;  %v6870_v27 = vrot.slane %v6340_v18, 7 }
 0x264   : > { %v4140_v3 = vadd.f32 %v4139_v50, %v4138_v63  ;;  %v4130_v6 = vrot.slane %v4129_v25, 2  ;;  %v4156_v42 = vrot.slane %v4155_v28, 4  ;;  %v14555_v43 = vperm.slane %v10734_v55, 2 }
 0x265   : > { %1942 = vperm.xlu2 %9285, %v14554_v61   ;;  %v14556_v34 = vperm.slane %v10734_v55, 6  ;;  %v7963_v23 = vrot.slane %v7440_v22, 7  ;;  %v5860_v31 = vrot.slane %v11068_v37, 4  ;;  %v4206_v8 = vadd.f32 %v4205_v47, %v4204_v0 }
 0x266   : > { %1949 = vperm.xlu1 %9283, %v14555_v43   ;;  %v4149_v53 = vrot.slane %v4148_v11, 4  ;;  %v6872_v9 = vrot.slane %v11219_v59, 6  ;;  %v7965_v20 = vrot.slane %v7441_v16, 6  ;;  %v4131_v17 = vadd.f32 %v4130_v6, %v4129_v25 }
 0x267   : > { %1977 = vperm.xlu0 %9284, %v14556_v34   ;;  %v5870_v63 = vrot.slane %v11136_v45, 7  ;;  %v7964_v18 = vsel %vm6836_vm0, %v7963_v23, %v11183_v51  ;;  %v4188_v50 = vrot.slane %v4187_v40, 1  ;;  %v4157_v61 = vadd.f32 %v4156_v42, %v4155_v28  ;;  %v11253_v51 = vld [vmem:[%s10704_s7 + $0x88] sm:$0xff]  }
 0x268   : > { %v7354_v22 = vsel %vm3986_vm3, %v11064_v29, 0.0  ;;  %v6871_v0 = vsel %vm6836_vm0, %v6870_v27, %v11144_v14  ;;  %v7966_v47 = vsel %vm6839_vm4, %v7965_v20, %v7964_v18  ;;  %v6344_v59 = vadd.f32 %v5861_v46, %v4140_v3  ;;  %v9156_v28 = vld [vmem:[%s10704_s7 + $0x68] sm:$0xff]   ;;  %v1670_v46 = vpop.permute.xlu2 %1669 }
 0x269   : > { %v4132_v43 = vrot.slane %v4131_v17, 1  ;;  %v7968_v25 = vsel %vm6842_vm5, %v7967_v48, %v7966_v47  ;;  %v4207_v16 = vrot.slane %v4206_v8, 2  ;;  %v4158_v6 = vrot.slane %v4157_v61, 2  ;;  %v1621_v48 = vpop.permute.xlu0 %1620 }
 0x26a   : > { %v4150_v34 = vadd.f32 %v4149_v53, %v4148_v11  ;;  %v5863_v29 = vrot.slane %v11068_v37, 7  ;;  %v11257_v23 = vadd.f32 %v7355_v32, %v7354_v22  ;;  %v8415_v14 = vsel %vm3986_vm3, %v11083_v19, 0.0 }
 0x26b   : > { %v4133_v42 = vadd.f32 %v4132_v43, %v4131_v17  ;;  %v4189_v27 = vadd.f32 %v4188_v50, %v4187_v40  ;;  %v4159_v3 = vadd.f32 %v4158_v6, %v4157_v61  ;;  %v11261_v20 = vadd.f32 %v8416_v30, %v8415_v14 }
 0x26c   : > { %v4151_v39 = vrot.slane %v4150_v34, 2  ;;  %v14557_v11 = vperm.slane %v10734_v55, 4  ;;  %v6873_v53 = vsel %vm6839_vm4, %v6872_v9, %v6871_v0  ;;  %v8702_v37 = vunpack.c.l.bf16 %v11253_v51 }
 0x26d   : > { %v6343_v17 = vadd.f32 %v5860_v31, %v4133_v42  ;;  %v8687_v32 = vunpack.c.h.bf16 %v9156_v28  ;;  %v14558_v18 = vperm.slane %v10734_v55, 5  ;;  %v14559_v19 = vperm.slane %v10717_v7, 1 }
 0x26e   : > { %1963 = vperm.xlu2 %9285, %v14557_v11   ;;  %v7444_v40 = vmul.f32 %v6344_v59, %v6344_v59  ;;  %v4208_v50 = vadd.f32 %v4207_v16, %v4206_v8  ;;  %v4160_v30 = vrot.slane %v4159_v3, 1  ;;  %v4152_v61 = vadd.f32 %v4151_v39, %v4150_v34 }
 0x26f   : > { %1970 = vperm.xlu1 %9283, %v14558_v18   ;;  %1998 = vperm.xlu0 %9284, %v14559_v19   ;;  %v6876_v22 = vrot.slane %v6343_v17, 4  ;;  %v7443_v47 = vmul.f32 %v6343_v17, %v6343_v17  ;;  %v3764_v43 = vmul.f32 %v8702_v37, %v1670_v46  ;;  %v3757_v6 = vmul.f32 %v8687_v32, %v1621_v48  ;;  %v1614_v48 = vpop.permute.xlu1 %1613 }
 0x270   : > { %v11273_v31 = vadd.f32 %v5867_v33, %v4189_v27  ;;  %v6875_v9 = vsel %vm6842_vm5, %v6874_v35, %v6873_v53  ;;  %v4161_v0 = vadd.f32 %v4160_v30, %v4159_v3  ;;  %v4153_v42 = vrot.slane %v4152_v61, 1  ;;  %v11286_v53 = vld [vmem:[%s10704_s7 + $0x90] sm:$0xff]  }
 0x271   : > { %v6878_v14 = vrot.slane %v6344_v59, 3  ;;  %v6877_v8 = vsel %vm6845_vm6, %v6876_v22, %v6875_v9  ;;  %v7969_v16 = vrot.slane %v7443_v47, 4  ;;  %v4225_v34 = vsel %vm3986_vm3, %v3764_v43, 0.0 }
 0x272   : > { %v7971_v39 = vrot.slane %v7444_v40, 3  ;;  %v11281_v46 = vadd.f32 %v11136_v45, %v4161_v0  ;;  %v4176_v33 = vsel %vm3986_vm3, %v3757_v6, 0.0  ;;  %v8686_v27 = vunpack.c.l.bf16 %v9156_v28 }
 0x273   : > { %v7970_v24 = vsel %vm6845_vm6, %v7969_v16, %v7968_v25  ;;  %v4209_v35 = vrot.slane %v4208_v50, 1  ;;  %v4154_v11 = vadd.f32 %v4153_v42, %v4152_v61  ;;  %v4226_v3 = vrot.slane %v4225_v34, 4  ;;  %v1691_v61 = vpop.permute.xlu2 %1690 }
 0x274   : > { %v6890_v59 = vrot.slane %v11273_v31, 4  ;;  %v6879_v17 = vsel %vm6848_vm7, %v6878_v14, %v6877_v8  ;;  %v7972_v37 = vsel %vm6848_vm7, %v7971_v39, %v7970_v24  ;;  %v7447_v32 = vmul.f32 %v11281_v46, %v11281_v46  ;;  %v1642_v24 = vpop.permute.xlu0 %1641 }
 0x275   : > { %v14560_v18 = vperm.slane %v10734_v55, 7  ;;  %v6346_v28 = vadd.f32 %v5863_v29, %v4154_v11  ;;  %v14561_v25 = vrot.slane %v11193_v1, 2  ;;  %v4227_v40 = vadd.f32 %v4226_v3, %v4225_v34 }
 0x276   : > { %v4177_v30 = vrot.slane %v4176_v33, 4  ;;  %v14562_v22 = vperm.slane %v10717_v7, 0  ;;  %v14563_v47 = vperm.slane %v10717_v7, 4  ;;  %v11304_v43 = vmul.f32 %v11273_v31, %v11273_v31 }
 0x277   : > { %1984 = vperm.xlu2 %9285, %v14560_v18   ;;  %v7974_v19 = vsel %vm6851_vm8, %v14561_v25, %v7972_v37  ;;  %v11309_v55 = vsel %vm6836_vm0, %v7977_v10, %v7447_v32  ;;  %v3756_v1 = vmul.f32 %v8686_v27, %v1614_v48  ;;  %v8707_v29 = vunpack.c.h.bf16 %v11286_v53  ;;  %v1635_v25 = vpop.permute.xlu1 %1634 }
 0x278   : > { %1991 = vperm.xlu1 %9283, %v14562_v22   ;;  %2019 = vperm.xlu0 %9284, %v14563_v47   ;;  %v4210_v6 = vadd.f32 %v4209_v35, %v4208_v50  ;;  %v6882_v9 = vrot.slane %v6346_v28, 1  ;;  %v7446_v0 = vmul.f32 %v6346_v28, %v6346_v28  ;;  %v4178_v42 = vadd.f32 %v4177_v30, %v4176_v33  ;;  %v11342_v47 = vld [vmem:[%s10704_s7 + $0xa0] sm:$0xff]  }
 0x279   : > { %v14564_v14 = vrot.slane %v11161_v38, 2  ;;  %v4169_v16 = vsel %vm3986_vm3, %v3756_v1, 0.0  ;;  %v3767_v34 = vmul.f32 %v8707_v29, %v1691_v61  ;;  %v8694_v15 = vunpack.c.l.bf16 %v11197_v26 }
 0x27a   : > { %v7975_v39 = vrot.slane %v7446_v0, 1  ;;  %v4228_v27 = vrot.slane %v4227_v40, 2  ;;  %v4179_v48 = vrot.slane %v4178_v42, 2  ;;  %v7983_v50 = vrot.slane %v11304_v43, 4 }
 0x27b   : > { %v6881_v8 = vsel %vm6851_vm8, %v14564_v14, %v6879_v17  ;;  %v4170_v33 = vrot.slane %v4169_v16, 4  ;;  %v4246_v35 = vsel %vm3986_vm3, %v3767_v34, 0.0  ;;  %v11325_v26 = vadd.f32 %v5870_v63, %v4210_v6  ;;  %v11338_v63 = vld [vmem:[%s10785_s10 + $0x20] sm:$0xff] }
 0x27c   : > { %v6883_v10 = vsel %vm6854_vm9, %v6882_v9, %v6881_v8  ;;  %v7976_v3 = vsel %vm6854_vm9, %v7975_v39, %v7974_v19  ;;  %v4180_v17 = vadd.f32 %v4179_v48, %v4178_v42  ;;  %v4247_v18 = vrot.slane %v4246_v35, 4  ;;  %v9159_v42 = vld [vmem:[%s10704_s7 + $0x80] sm:$0xff]  }
 0x27d   : > { %7324 = vst.msk [vmem:[%s11055_s13 + $0x10] sm:$0xff] %vm3986_vm3, %v6883_v10  ;;  %v7357_v38 = vsel %vm3986_vm3, %v6883_v10, 0.0  ;;  %v8418_v37 = vsel %vm3986_vm3, %v7976_v3, 0.0  ;;  %v4171_v32 = vadd.f32 %v4170_v33, %v4169_v16  ;;  %v3760_v28 = vmul.f32 %v8694_v15, %v1642_v24  ;;  %v1712_v16 = vpop.permute.xlu2 %1711 }
 0x27e   : > { %v11328_v11 = vadd.f32 %v7357_v38, %v11257_v23  ;;  %v14565_v30 = vperm.slane %v10717_v7, 2  ;;  %v11335_v61 = vadd.f32 %v8418_v37, %v11261_v20  ;;  %v4229_v23 = vadd.f32 %v4228_v27, %v4227_v40 }
 0x27f   : > { %v4181_v22 = vrot.slane %v4180_v17, 1  ;;  %v8691_v19 = vunpack.c.h.bf16 %v11150_v41  ;;  %v14566_v1 = vperm.slane %v10717_v7, 3  ;;  %v14567_v29 = vperm.slane %v10717_v7, 7 }
 0x280   : > { %2005 = vperm.xlu2 %9285, %v14565_v30   ;;  %v5866_v6 = vrot.slane %v11136_v45, 3  ;;  %v4172_v9 = vrot.slane %v4171_v32, 2  ;;  %v4248_v0 = vadd.f32 %v4247_v18, %v4246_v35  ;;  %v4197_v20 = vsel %vm3986_vm3, %v3760_v28, 0.0 }
 0x281   : > { %2012 = vperm.xlu1 %9283, %v14566_v1   ;;  %2040 = vperm.xlu0 %9284, %v14567_v29   ;;  %v11353_v40 = vmul.f32 %v11325_v26, %v11325_v26  ;;  %v4182_v41 = vadd.f32 %v4181_v22, %v4180_v17  ;;  %v4198_v14 = vrot.slane %v4197_v20, 4  ;;  %v3759_v8 = vmul.f32 %v8691_v19, %v1635_v25 }
 0x282   : > { %v5872_v34 = vrot.slane %v11338_v63, 2  ;;  %v4173_v15 = vadd.f32 %v4172_v9, %v4171_v32  ;;  %v4249_v10 = vrot.slane %v4248_v0, 2  ;;  %v8714_v39 = vunpack.c.l.bf16 %v11342_v47  ;;  %v1663_v32 = vpop.permute.xlu0 %1662 }
 0x283   : > { %v4230_v27 = vrot.slane %v4229_v23, 1  ;;  %v5865_v48 = vrot.slane %v11136_v45, 2  ;;  %v4199_v24 = vadd.f32 %v4198_v14, %v4197_v20  ;;  %v8699_v38 = vunpack.c.h.bf16 %v9159_v42 }
 0x284   : > { %v6350_v33 = vadd.f32 %v5866_v6, %v4182_v41  ;;  %v4174_v35 = vrot.slane %v4173_v15, 1  ;;  %v4190_v3 = vsel %vm3986_vm3, %v3759_v8, 0.0  ;;  %v3770_v37 = vmul.f32 %v8714_v39, %v1712_v16 }
 0x285   : > { %v6896_v17 = vrot.slane %v11325_v26, 1  ;;  %v7989_v18 = vrot.slane %v11353_v40, 1  ;;  %v4250_v28 = vadd.f32 %v4249_v10, %v4248_v0  ;;  %v4200_v25 = vrot.slane %v4199_v24, 2 }
 0x286   : > { %v6885_v30 = vsel %vm6836_vm0, %v6884_v56, %v11281_v46  ;;  %v4175_v22 = vadd.f32 %v4174_v35, %v4173_v15  ;;  %v4191_v19 = vrot.slane %v4190_v3, 4  ;;  %v4267_v1 = vsel %vm3986_vm3, %v3770_v37, 0.0 }
 0x287   : > { %v14568_v29 = vperm.slane %v10717_v7, 5  ;;  %v4231_v6 = vadd.f32 %v4230_v27, %v4229_v23  ;;  %v5875_v9 = vrot.slane %v11338_v63, 5  ;;  %v4201_v20 = vadd.f32 %v4200_v25, %v4199_v24  ;;  %v1656_v23 = vpop.permute.xlu1 %1655 }
 0x288   : > { %v4268_v41 = vrot.slane %v4267_v1, 4  ;;  %v14569_v0 = vperm.slane %v10717_v7, 6  ;;  %v14570_v14 = vperm.slane %v10779_v13, 2  ;;  %v7450_v36 = vmul.f32 %v6350_v33, %v6350_v33 }
 0x289   : > { %2026 = vperm.xlu2 %9285, %v14568_v29   ;;  %v6349_v56 = vadd.f32 %v5865_v48, %v4175_v22  ;;  %v4192_v46 = vadd.f32 %v4191_v19, %v4190_v3  ;;  %v3763_v8 = vmul.f32 %v8699_v38, %v1663_v32  ;;  %v4251_v16 = vrot.slane %v4250_v28, 1  ;;  %v11379_v22 = vld [vmem:[%s10704_s7 + $0xa8] sm:$0xff]  }
 0x28a   : > { %2033 = vperm.xlu1 %9283, %v14569_v0   ;;  %2061 = vperm.xlu0 %9284, %v14570_v14   ;;  %v4202_v15 = vrot.slane %v4201_v20, 1  ;;  %v4269_v10 = vadd.f32 %v4268_v41, %v4267_v1  ;;  %v8698_v39 = vunpack.c.l.bf16 %v9159_v42  ;;  %v5869_v24 = vrot.slane %v11136_v45, 6 }
 0x28b   : > { %v6886_v27 = vrot.slane %v6349_v56, 6  ;;  %v7449_v35 = vmul.f32 %v6349_v56, %v6349_v56  ;;  %v4193_v37 = vrot.slane %v4192_v46, 2  ;;  %v11374_v7 = vadd.f32 %v5872_v34, %v4231_v6  ;;  %v1733_v56 = vpop.permute.xlu2 %1732 }
 0x28c   : > { %v4203_v25 = vadd.f32 %v4202_v15, %v4201_v20  ;;  %v5868_v29 = vrot.slane %v11136_v45, 5  ;;  %v4218_v48 = vsel %vm3986_vm3, %v3763_v8, 0.0  ;;  %v6888_v38 = vrot.slane %v6350_v33, 5 }
 0x28d   : > { %v7981_v3 = vrot.slane %v7450_v36, 5  ;;  %v7979_v32 = vrot.slane %v7449_v35, 6  ;;  %v3762_v19 = vmul.f32 %v8698_v39, %v1656_v23  ;;  %v6887_v42 = vsel %vm6839_vm4, %v6886_v27, %v6885_v30 }
 0x28e   : > { %v4252_v1 = vadd.f32 %v4251_v16, %v4250_v28  ;;  %v4194_v41 = vadd.f32 %v4193_v37, %v4192_v46  ;;  %v4270_v0 = vrot.slane %v4269_v10, 2  ;;  %v6353_v6 = vadd.f32 %v5869_v24, %v4203_v25  ;;  %v1684_v37 = vpop.permute.xlu0 %1683 }
 0x28f   : > { %v7980_v34 = vsel %vm6839_vm4, %v7979_v32, %v11309_v55  ;;  %v4219_v20 = vrot.slane %v4218_v48, 4  ;;  %v8719_v45 = vunpack.c.h.bf16 %v11379_v22  ;;  %v14571_v14 = vperm.slane %v10779_v13, 0 }
 0x290   : > { %v11389_v33 = vmul.f32 %v11374_v7, %v11374_v7  ;;  %v7982_v36 = vsel %vm6842_vm5, %v7981_v3, %v7980_v34  ;;  %v4195_v30 = vrot.slane %v4194_v41, 1  ;;  %v5871_v28 = vrot.slane %v11338_v63, 1 }
 0x291   : > { %2047 = vperm.xlu2 %9285, %v14571_v14   ;;  %v14572_v46 = vperm.slane %v10779_v13, 1  ;;  %v14573_v55 = vperm.slane %v10779_v13, 5  ;;  %v6889_v8 = vsel %vm6842_vm5, %v6888_v38, %v6887_v42  ;;  %v7984_v16 = vsel %vm6845_vm6, %v7983_v50, %v7982_v36 }
 0x292   : > { %v4220_v15 = vadd.f32 %v4219_v20, %v4218_v48  ;;  %v4211_v39 = vsel %vm3986_vm3, %v3762_v19, 0.0  ;;  %v11402_v23 = vadd.f32 %v5875_v9, %v4252_v1  ;;  %v4196_v27 = vadd.f32 %v4195_v30, %v4194_v41  ;;  %v1677_v20 = vpop.permute.xlu1 %1676 }
 0x293   : > { %2054 = vperm.xlu1 %9283, %v14572_v46   ;;  %2082 = vperm.xlu0 %9284, %v14573_v55   ;;  %v4271_v35 = vadd.f32 %v4270_v0, %v4269_v10  ;;  %v4212_v24 = vrot.slane %v4211_v39, 4  ;;  %v7453_v25 = vmul.f32 %v6353_v6, %v6353_v6  ;;  %v3773_v32 = vmul.f32 %v8719_v45, %v1733_v56 }
 0x294   : > { %v4221_v3 = vrot.slane %v4220_v15, 2  ;;  %v8706_v34 = vunpack.c.l.bf16 %v11286_v53  ;;  %v6894_v14 = vrot.slane %v6353_v6, 2  ;;  %v6352_v38 = vadd.f32 %v5868_v29, %v4196_v27 }
 0x295   : > { %v6891_v43 = vsel %vm6845_vm6, %v6890_v59, %v6889_v8  ;;  %v4213_v50 = vadd.f32 %v4212_v24, %v4211_v39  ;;  %v4288_v9 = vsel %vm3986_vm3, %v3773_v32, 0.0  ;;  %v8703_v10 = vunpack.c.h.bf16 %v11253_v51 }
 0x296   : > { %v4222_v48 = vadd.f32 %v4221_v3, %v4220_v15  ;;  %v3766_v19 = vmul.f32 %v8706_v34, %v1684_v37  ;;  %v6892_v42 = vrot.slane %v6352_v38, 3  ;;  %v7452_v1 = vmul.f32 %v6352_v38, %v6352_v38 }
 0x297   : > { %v4214_v41 = vrot.slane %v4213_v50, 2  ;;  %v4289_v0 = vrot.slane %v4288_v9, 4  ;;  %v7987_v45 = vrot.slane %v7453_v25, 2  ;;  %v4272_v53 = vrot.slane %v4271_v35, 1 }
 0x298   : > { %v4223_v6 = vrot.slane %v4222_v48, 1  ;;  %v4239_v29 = vsel %vm3986_vm3, %v3766_v19, 0.0  ;;  %v14574_v31 = vperm.slane %v10779_v13, 3  ;;  %v6893_v59 = vsel %vm6848_vm7, %v6892_v42, %v6891_v43 }
 0x299   : > { %v7985_v36 = vrot.slane %v7452_v1, 3  ;;  %v4215_v30 = vadd.f32 %v4214_v41, %v4213_v50  ;;  %v4290_v56 = vadd.f32 %v4289_v0, %v4288_v9  ;;  %v14575_v51 = vperm.slane %v10779_v13, 4  ;;  %v1754_v50 = vpop.permute.xlu2 %1753 }
 0x29a   : > { %2068 = vperm.xlu2 %9285, %v14574_v31   ;;  %v14576_v46 = vperm.slane %v10749_v52, 0  ;;  %v6895_v55 = vsel %vm6851_vm8, %v6894_v14, %v6893_v59  ;;  %v4224_v8 = vadd.f32 %v4223_v6, %v4222_v48  ;;  %v4240_v15 = vrot.slane %v4239_v29, 4  ;;  %v11434_v14 = vld [vmem:[%s10704_s7 + $0xb8] sm:$0xff]  }
 0x29b   : > { %2075 = vperm.xlu1 %9283, %v14575_v51   ;;  %v3765_v39 = vmul.f32 %v8703_v10, %v1677_v20  ;;  %v11422_v27 = vsel %vm6854_vm9, %v6896_v17, %v6895_v55  ;;  %v7986_v24 = vsel %vm6848_vm7, %v7985_v36, %v7984_v16  ;;  %v4216_v37 = vrot.slane %v4215_v30, 1  ;;  %v9162_v48 = vld [vmem:[%s10704_s7 + $0x98] sm:$0xff]   ;;  %v11446_v10 = vld [vmem:[%s10785_s10 + $0x28] sm:$0xff] }
 0x29c   : > { %2103 = vperm.xlu0 %9284, %v14576_v46   ;;  %v4291_v25 = vrot.slane %v4290_v56, 2  ;;  %v11427_v3 = vmul.f32 %v11402_v23, %v11402_v23  ;;  %7325 = vst.msk [vmem:[%s11055_s13 + $0x18] sm:$0xff] %vm3986_vm3, %v11422_v27  ;;  %v7988_v32 = vsel %vm6851_vm8, %v7987_v45, %v7986_v24  ;;  %v6356_v34 = vadd.f32 %v5871_v28, %v4224_v8  ;;  %v1698_v24 = vpop.permute.xlu1 %1697 }
 0x29d   : > { %v4241_v26 = vadd.f32 %v4240_v15, %v4239_v29  ;;  %v11439_v17 = vsel %vm6854_vm9, %v7989_v18, %v7988_v32  ;;  %v4273_v16 = vadd.f32 %v4272_v53, %v4271_v35  ;;  %v4217_v38 = vadd.f32 %v4216_v37, %v4215_v30  ;;  %v1705_v35 = vpop.permute.xlu0 %1704 }
 0x29e   : > { %v4232_v43 = vsel %vm3986_vm3, %v3765_v39, 0.0  ;;  %v6900_v9 = vrot.slane %v11374_v7, 6  ;;  %v7993_v19 = vrot.slane %v11389_v33, 6  ;;  %v7456_v28 = vmul.f32 %v6356_v34, %v6356_v34 }
 0x29f   : > { %v4242_v42 = vrot.slane %v4241_v26, 2  ;;  %v6355_v1 = vadd.f32 %v11338_v63, %v4217_v38  ;;  %v4292_v40 = vadd.f32 %v4291_v25, %v4290_v56  ;;  %v4233_v41 = vrot.slane %v4232_v43, 4 }
 0x2a0   : > { %v8726_v18 = vunpack.c.l.bf16 %v11434_v14  ;;  %v6906_v0 = vrot.slane %v11402_v23, 3  ;;  %v7999_v20 = vrot.slane %v11427_v3, 3  ;;  %v8711_v53 = vunpack.c.h.bf16 %v9162_v48 }
 0x2a1   : > { %v4243_v45 = vadd.f32 %v4242_v42, %v4241_v26  ;;  %v14577_v7 = vperm.slane %v10779_v13, 6  ;;  %v11455_v33 = vadd.f32 %v11446_v10, %v4273_v16  ;;  %v7991_v6 = vrot.slane %v7456_v28, 7 }
 0x2a2   : > { %v7455_v29 = vmul.f32 %v6355_v1, %v6355_v1  ;;  %v4234_v31 = vadd.f32 %v4233_v41, %v4232_v43  ;;  %v14578_v59 = vperm.slane %v10779_v13, 7  ;;  %v5880_v36 = vrot.slane %v11446_v10, 3 }
 0x2a3   : > { %2089 = vperm.xlu2 %9285, %v14577_v7   ;;  %v5874_v30 = vrot.slane %v11338_v63, 4  ;;  %v4244_v56 = vrot.slane %v4243_v45, 1  ;;  %v3776_v51 = vmul.f32 %v8726_v18, %v1754_v50  ;;  %v14579_v46 = vperm.slane %v10749_v52, 3  ;;  %v11471_v50 = vld [vmem:[%s10704_s7 + $0xc0] sm:$0xff]  }
 0x2a4   : > { %2096 = vperm.xlu1 %9283, %v14578_v59   ;;  %v7992_v55 = vsel %vm6836_vm0, %v7991_v6, %v7455_v29  ;;  %v4293_v8 = vrot.slane %v4292_v40, 1  ;;  %v4235_v15 = vrot.slane %v4234_v31, 2  ;;  %v3769_v39 = vmul.f32 %v8711_v53, %v1705_v35  ;;  %v1775_v53 = vpop.permute.xlu2 %1774 }
 0x2a5   : > { %2124 = vperm.xlu0 %9284, %v14579_v46   ;;  %v7994_v37 = vsel %vm6839_vm4, %v7993_v19, %v7992_v55  ;;  %v4245_v13 = vadd.f32 %v4244_v56, %v4243_v45  ;;  %v4309_v25 = vsel %vm3986_vm3, %v3776_v51, 0.0  ;;  %v8710_v32 = vunpack.c.l.bf16 %v9162_v48  ;;  %v1726_v46 = vpop.permute.xlu0 %1725 }
 0x2a6   : > { %v11468_v26 = vmul.f32 %v11455_v33, %v11455_v33  ;;  %v6898_v16 = vrot.slane %v6356_v34, 7  ;;  %v4236_v38 = vadd.f32 %v4235_v15, %v4234_v31  ;;  %v4310_v43 = vrot.slane %v4309_v25, 4 }
 0x2a7   : > { %v11473_v28 = vadd.f32 %v5874_v30, %v4245_v13  ;;  %v5873_v42 = vrot.slane %v11338_v63, 3  ;;  %v4260_v41 = vsel %vm3986_vm3, %v3769_v39, 0.0  ;;  %v3768_v19 = vmul.f32 %v8710_v32, %v1698_v24 }
 0x2a8   : > { %v6899_v18 = vsel %vm6836_vm0, %v6898_v16, %v6355_v1  ;;  %v4237_v35 = vrot.slane %v4236_v38, 1  ;;  %v4311_v48 = vadd.f32 %v4310_v43, %v4309_v25  ;;  %v4261_v45 = vrot.slane %v4260_v41, 4 }
 0x2a9   : > { %v4294_v7 = vadd.f32 %v4293_v8, %v4292_v40  ;;  %v5883_v34 = vrot.slane %v11446_v10, 6  ;;  %v4253_v6 = vsel %vm3986_vm3, %v3768_v19, 0.0  ;;  %v8731_v29 = vunpack.c.h.bf16 %v11471_v50 }
 0x2aa   : > { %v14580_v31 = vperm.slane %v10749_v52, 1  ;;  %v4238_v59 = vadd.f32 %v4237_v35, %v4236_v38  ;;  %v4312_v30 = vrot.slane %v4311_v48, 2  ;;  %v4262_v56 = vadd.f32 %v4261_v45, %v4260_v41 }
 0x2ab   : > { %v4254_v51 = vrot.slane %v4253_v6, 4  ;;  %v14581_v1 = vperm.slane %v10749_v52, 2  ;;  %v6901_v55 = vsel %vm6839_vm4, %v6900_v9, %v6899_v18  ;;  %v7459_v40 = vmul.f32 %v11473_v28, %v11473_v28 }
 0x2ac   : > { %2110 = vperm.xlu2 %9285, %v14580_v31   ;;  %v3779_v8 = vmul.f32 %v8731_v29, %v1775_v53  ;;  %v8718_v15 = vunpack.c.l.bf16 %v11379_v22  ;;  %v14582_v39 = vperm.slane %v10749_v52, 6  ;;  %v6358_v24 = vadd.f32 %v5873_v42, %v4238_v59 }
 0x2ad   : > { %2117 = vperm.xlu1 %9283, %v14581_v1   ;;  %v4313_v13 = vadd.f32 %v4312_v30, %v4311_v48  ;;  %v4263_v25 = vrot.slane %v4262_v56, 2  ;;  %v4255_v32 = vadd.f32 %v4254_v51, %v4253_v6  ;;  %v11491_v16 = vadd.f32 %v5880_v36, %v4294_v7 }
 0x2ae   : > { %2145 = vperm.xlu0 %9284, %v14582_v39   ;;  %v5877_v38 = vrot.slane %v11338_v63, 7  ;;  %v4330_v43 = vsel %vm3986_vm3, %v3779_v8, 0.0  ;;  %v3772_v9 = vmul.f32 %v8718_v15, %v1726_v46  ;;  %v6902_v41 = vrot.slane %v6358_v24, 5 }
 0x2af   : > { %v7458_v19 = vmul.f32 %v6358_v24, %v6358_v24  ;;  %v4314_v18 = vrot.slane %v4313_v13, 1  ;;  %v4264_v35 = vadd.f32 %v4263_v25, %v4262_v56  ;;  %v5876_v22 = vrot.slane %v11338_v63, 6 }
 0x2b0   : > { %v4256_v45 = vrot.slane %v4255_v32, 2  ;;  %v4331_v53 = vrot.slane %v4330_v43, 4  ;;  %v4281_v42 = vsel %vm3986_vm3, %v3772_v9, 0.0  ;;  %v7997_v48 = vrot.slane %v7459_v40, 4  ;;  %v1719_v40 = vpop.permute.xlu1 %1718 }
 0x2b1   : > { %v7995_v29 = vrot.slane %v7458_v19, 5  ;;  %v4315_v6 = vadd.f32 %v4314_v18, %v4313_v13  ;;  %v4265_v36 = vrot.slane %v4264_v35, 1  ;;  %v4282_v59 = vrot.slane %v4281_v42, 4  ;;  %v1796_v18 = vpop.permute.xlu2 %1795 }
 0x2b2   : > { %v4257_v7 = vadd.f32 %v4256_v45, %v4255_v32  ;;  %v4332_v31 = vadd.f32 %v4331_v53, %v4330_v43  ;;  %v8715_v30 = vunpack.c.h.bf16 %v11342_v47  ;;  %v14583_v51 = vperm.slane %v10749_v52, 4  ;;  %v11507_v47 = vld [vmem:[%s10704_s7 + $0xd0] sm:$0xff]  }
 0x2b3   : > { %v6904_v56 = vrot.slane %v11473_v28, 4  ;;  %v6903_v63 = vsel %vm6842_vm5, %v6902_v41, %v6901_v55  ;;  %v7996_v46 = vsel %vm6842_vm5, %v7995_v29, %v7994_v37  ;;  %v4266_v1 = vadd.f32 %v4265_v36, %v4264_v35 }
 0x2b4   : > { %2131 = vperm.xlu2 %9285, %v14583_v51   ;;  %v14584_v8 = vperm.slane %v10749_v52, 5  ;;  %v7998_v15 = vsel %vm6845_vm6, %v7997_v48, %v7996_v46  ;;  %v4258_v39 = vrot.slane %v4257_v7, 1  ;;  %v4333_v24 = vrot.slane %v4332_v31, 2 }
 0x2b5   : > { %v4283_v13 = vadd.f32 %v4282_v59, %v4281_v42  ;;  %v14585_v25 = vperm.slane %v10745_v44, 1  ;;  %v11513_v28 = vsel %vm3986_vm3, %v11422_v27, 0.0  ;;  %v11515_v37 = vadd.f32 %v5883_v34, %v4315_v6  ;;  %v9165_v42 = vld [vmem:[%s10704_s7 + $0xb0] sm:$0xff]  }
 0x2b6   : > { %2138 = vperm.xlu1 %9283, %v14584_v8   ;;  %v6362_v55 = vadd.f32 %v5877_v38, %v4266_v1  ;;  %v8000_v32 = vsel %vm6848_vm7, %v7999_v20, %v7998_v15  ;;  %v6905_v43 = vsel %vm6845_vm6, %v6904_v56, %v6903_v63  ;;  %v4259_v9 = vadd.f32 %v4258_v39, %v4257_v7  ;;  %v1747_v7 = vpop.permute.xlu0 %1746  ;;  %v11539_v56 = vld [vmem:[%s10785_s10 + $0x30] sm:$0xff] }
 0x2b7   : > { %2166 = vperm.xlu0 %9284, %v14585_v25   ;;  %v4284_v41 = vrot.slane %v4283_v13, 2  ;;  %v3771_v19 = vmul.f32 %v8715_v30, %v1719_v40  ;;  %v11523_v35 = vmul.f32 %v11491_v16, %v11491_v16  ;;  %v4334_v27 = vadd.f32 %v4333_v24, %v4332_v31 }
 0x2b8   : > { %v5879_v34 = vrot.slane %v11446_v10, 2  ;;  %v8738_v45 = vunpack.c.l.bf16 %v11507_v47  ;;  %v7462_v38 = vmul.f32 %v6362_v55, %v6362_v55  ;;  %v6361_v3 = vadd.f32 %v5876_v22, %v4259_v9 }
 0x2b9   : > { %v4285_v53 = vadd.f32 %v4284_v41, %v4283_v13  ;;  %v4274_v20 = vsel %vm3986_vm3, %v3771_v19, 0.0  ;;  %v11531_v48 = vmul.f32 %v11515_v37, %v11515_v37  ;;  %v6907_v29 = vsel %vm6848_vm7, %v6906_v0, %v6905_v43  ;;  %v1740_v43 = vpop.permute.xlu1 %1739 }
 0x2ba   : > { %v4275_v6 = vrot.slane %v4274_v20, 4  ;;  %v3782_v36 = vmul.f32 %v8738_v45, %v1796_v18  ;;  %v6910_v31 = vrot.slane %v6362_v55, 1  ;;  %v6908_v59 = vrot.slane %v6361_v3, 2 }
 0x2bb   : > { %v7461_v30 = vmul.f32 %v6361_v3, %v6361_v3  ;;  %v4286_v51 = vrot.slane %v4285_v53, 1  ;;  %v14586_v22 = vperm.slane %v10749_v52, 7  ;;  %v4335_v63 = vrot.slane %v4334_v27, 1 }
 0x2bc   : > { %v4276_v46 = vadd.f32 %v4275_v6, %v4274_v20  ;;  %v4351_v1 = vsel %vm3986_vm3, %v3782_v36, 0.0  ;;  %v8723_v23 = vunpack.c.h.bf16 %v9165_v42  ;;  %v14587_v0 = vperm.slane %v10745_v44, 0  ;;  %v11559_v20 = vld [vmem:[%s10704_s7 + $0xd8] sm:$0xff]  }
 0x2bd   : > { %2152 = vperm.xlu2 %9285, %v14586_v22   ;;  %v8003_v40 = vrot.slane %v7462_v38, 1  ;;  %v6909_v8 = vsel %vm6851_vm8, %v6908_v59, %v6907_v29  ;;  %v8001_v15 = vrot.slane %v7461_v30, 2  ;;  %v4287_v39 = vadd.f32 %v4286_v51, %v4285_v53  ;;  %v1817_v30 = vpop.permute.xlu2 %1816 }
 0x2be   : > { %2159 = vperm.xlu1 %9283, %v14587_v0   ;;  %v14588_v24 = vperm.slane %v10745_v44, 4  ;;  %v6911_v52 = vsel %vm6854_vm9, %v6910_v31, %v6909_v8  ;;  %v4277_v13 = vrot.slane %v4276_v46, 2  ;;  %v4352_v25 = vrot.slane %v4351_v1, 4 }
 0x2bf   : > { %v3775_v55 = vmul.f32 %v8723_v23, %v1747_v7  ;;  %v11550_v9 = vsel %vm3986_vm3, %v11439_v17, 0.0  ;;  %v6916_v41 = vrot.slane %v11491_v16, 5  ;;  %7326 = vst.msk [vmem:[%s11055_s13 + $0x20] sm:$0xff] %vm3986_vm3, %v6911_v52  ;;  %v8002_v19 = vsel %vm6851_vm8, %v8001_v15, %v8000_v32 }
 0x2c0   : > { %2187 = vperm.xlu0 %9284, %v14588_v24   ;;  %v5885_v18 = vrot.slane %v11539_v56, 1  ;;  %v8004_v45 = vsel %vm6854_vm9, %v8003_v40, %v8002_v19  ;;  %v4336_v38 = vadd.f32 %v4335_v63, %v4334_v27  ;;  %v4278_v3 = vadd.f32 %v4277_v13, %v4276_v46  ;;  %v1768_v40 = vpop.permute.xlu0 %1767 }
 0x2c1   : > { %v4353_v53 = vadd.f32 %v4352_v25, %v4351_v1  ;;  %v8009_v29 = vrot.slane %v11523_v35, 5  ;;  %v5878_v17 = vrot.slane %v11446_v10, 1  ;;  %v4302_v6 = vsel %vm3986_vm3, %v3775_v55, 0.0  ;;  %v11615_v35 = vld [vmem:[%s10704_s7 + $0xe8] sm:$0xff]  }
 0x2c2   : > { %v8722_v36 = vunpack.c.l.bf16 %v9165_v42  ;;  %v8015_v32 = vrot.slane %v11531_v48, 2  ;;  %v11566_v31 = vadd.f32 %v5879_v34, %v4287_v39  ;;  %v4279_v59 = vrot.slane %v4278_v3, 1 }
 0x2c3   : > { %v5888_v27 = vrot.slane %v11539_v56, 4  ;;  %v4303_v51 = vrot.slane %v4302_v6, 4  ;;  %v8743_v63 = vunpack.c.h.bf16 %v11559_v20  ;;  %v14589_v46 = vperm.slane %v10745_v44, 2 }
 0x2c4   : > { %v3774_v22 = vmul.f32 %v8722_v36, %v1740_v43  ;;  %v11572_v1 = vadd.f32 %v5885_v18, %v4336_v38  ;;  %v4280_v42 = vadd.f32 %v4279_v59, %v4278_v3  ;;  %v4354_v23 = vrot.slane %v4353_v53, 2 }
 0x2c5   : > { %2173 = vperm.xlu2 %9285, %v14589_v46   ;;  %v5882_v0 = vrot.slane %v11446_v10, 5  ;;  %v14590_v34 = vperm.slane %v10745_v44, 3  ;;  %v4304_v8 = vadd.f32 %v4303_v51, %v4302_v6  ;;  %v3785_v39 = vmul.f32 %v8743_v63, %v1817_v30 }
 0x2c6   : > { %v4295_v15 = vsel %vm3986_vm3, %v3774_v22, 0.0  ;;  %v8730_v24 = vunpack.c.l.bf16 %v11471_v50  ;;  %v14591_v13 = vperm.slane %v10745_v44, 7  ;;  %v7361_v25 = vsel %vm3986_vm3, %v6911_v52, 0.0  ;;  %v1761_v52 = vpop.permute.xlu1 %1760 }
 0x2c7   : > { %2180 = vperm.xlu1 %9283, %v14590_v34   ;;  %v7465_v55 = vmul.f32 %v11566_v31, %v11566_v31  ;;  %v6364_v43 = vadd.f32 %v5878_v17, %v4280_v42  ;;  %v4296_v19 = vrot.slane %v4295_v15, 4  ;;  %v4305_v18 = vrot.slane %v4304_v8, 2 }
 0x2c8   : > { %2208 = vperm.xlu0 %9284, %v14591_v13   ;;  %v4372_v38 = vsel %vm3986_vm3, %v3785_v39, 0.0  ;;  %v3778_v3 = vmul.f32 %v8730_v24, %v1768_v40  ;;  %v8727_v6 = vunpack.c.h.bf16 %v11434_v14  ;;  %v11589_v50 = vmul.f32 %v11572_v1, %v11572_v1 }
 0x2c9   : > { %v7464_v59 = vmul.f32 %v6364_v43, %v6364_v43  ;;  %v4297_v30 = vadd.f32 %v4296_v19, %v4295_v15  ;;  %v4355_v51 = vadd.f32 %v4354_v23, %v4353_v53  ;;  %v4306_v22 = vadd.f32 %v4305_v18, %v4304_v8 }
 0x2ca   : > { %v4373_v63 = vrot.slane %v4372_v38, 4  ;;  %v4323_v17 = vsel %vm3986_vm3, %v3778_v3, 0.0  ;;  %v8007_v46 = vrot.slane %v7465_v55, 6  ;;  %v6912_v42 = vrot.slane %v6364_v43, 7 }
 0x2cb   : > { %v8005_v34 = vrot.slane %v7464_v59, 7  ;;  %v4298_v40 = vrot.slane %v4297_v30, 2  ;;  %v4307_v39 = vrot.slane %v4306_v22, 1  ;;  %v4324_v24 = vrot.slane %v4323_v17, 4 }
 0x2cc   : > { %v4374_v14 = vadd.f32 %v4373_v63, %v4372_v38  ;;  %v3777_v13 = vmul.f32 %v8727_v6, %v1761_v52  ;;  %v14592_v36 = vperm.slane %v10745_v44, 5  ;;  %v8422_v7 = vsel %vm3986_vm3, %v8004_v45, 0.0 }
 0x2cd   : > { %v8019_v15 = vrot.slane %v11589_v50, 7  ;;  %v8006_v53 = vsel %vm6836_vm0, %v8005_v34, %v11468_v26  ;;  %v4299_v23 = vadd.f32 %v4298_v40, %v4297_v30  ;;  %v14593_v8 = vperm.slane %v10745_v44, 6 }
 0x2ce   : > { %2194 = vperm.xlu2 %9285, %v14592_v36   ;;  %v8008_v55 = vsel %vm6839_vm4, %v8007_v46, %v8006_v53  ;;  %v4356_v43 = vrot.slane %v4355_v51, 1  ;;  %v4308_v19 = vadd.f32 %v4307_v39, %v4306_v22  ;;  %v4375_v18 = vrot.slane %v4374_v14, 2 }
 0x2cf   : > { %2201 = vperm.xlu1 %9283, %v14593_v8   ;;  %v14594_v38 = vperm.slane %v10806_v5, 2  ;;  %v5881_v45 = vrot.slane %v11446_v10, 4  ;;  %v4300_v3 = vrot.slane %v4299_v23, 1  ;;  %v8010_v26 = vsel %vm6842_vm5, %v8009_v29, %v8008_v55 }
 0x2d0   : > { %v4325_v6 = vadd.f32 %v4324_v24, %v4323_v17  ;;  %v6913_v44 = vsel %vm6836_vm0, %v6912_v42, %v11455_v33  ;;  %v6368_v36 = vadd.f32 %v5882_v0, %v4308_v19  ;;  %v4316_v59 = vsel %vm3986_vm3, %v3777_v13, 0.0  ;;  %v1838_v0 = vpop.permute.xlu2 %1837 }
 0x2d1   : > { %2229 = vperm.xlu0 %9284, %v14594_v38   ;;  %v7360_v30 = vadd.f32 %v11513_v28, %v11328_v11  ;;  %v4301_v52 = vadd.f32 %v4300_v3, %v4299_v23  ;;  %v4317_v63 = vrot.slane %v4316_v59, 4  ;;  %v8421_v46 = vadd.f32 %v11550_v9, %v11335_v61  ;;  %v9168_v11 = vld [vmem:[%s10704_s7 + $0xc8] sm:$0xff]   ;;  %v1789_v28 = vpop.permute.xlu0 %1788 }
 0x2d2   : > { %v4326_v22 = vrot.slane %v4325_v6, 2  ;;  %v6914_v29 = vrot.slane %v11566_v31, 6  ;;  %v4357_v17 = vadd.f32 %v4356_v43, %v4355_v51  ;;  %v4376_v34 = vadd.f32 %v4375_v18, %v4374_v14 }
 0x2d3   : > { %v11618_v33 = vadd.f32 %v7361_v25, %v7360_v30  ;;  %v6367_v42 = vadd.f32 %v5881_v45, %v4301_v52  ;;  %v4318_v39 = vadd.f32 %v4317_v63, %v4316_v59  ;;  %v11620_v24 = vadd.f32 %v8422_v7, %v8421_v46 }
 0x2d4   : > { %v4327_v40 = vadd.f32 %v4326_v22, %v4325_v6  ;;  %v6915_v13 = vsel %vm6839_vm4, %v6914_v29, %v6913_v44  ;;  %v7468_v53 = vmul.f32 %v6368_v36, %v6368_v36  ;;  %v5891_v61 = vrot.slane %v11539_v56, 7 }
 0x2d5   : > { %v8750_v9 = vunpack.c.l.bf16 %v11615_v35  ;;  %v14595_v31 = vperm.slane %v10806_v5, 0  ;;  %v6918_v25 = vrot.slane %v6367_v42, 4  ;;  %v7467_v51 = vmul.f32 %v6367_v42, %v6367_v42  ;;  %v11648_v42 = vld [vmem:[%s10704_s7 + $0xf0] sm:$0xff]  }
 0x2d6   : > { %v4328_v14 = vrot.slane %v4327_v40, 1  ;;  %v4319_v23 = vrot.slane %v4318_v39, 2  ;;  %v14596_v8 = vperm.slane %v10806_v5, 1  ;;  %v4377_v7 = vrot.slane %v4376_v34, 1 }
 0x2d7   : > { %2215 = vperm.xlu2 %9285, %v14595_v31   ;;  %v5884_v55 = vrot.slane %v11446_v10, 7  ;;  %v3788_v43 = vmul.f32 %v8750_v9, %v1838_v0  ;;  %v8735_v19 = vunpack.c.h.bf16 %v9168_v11  ;;  %v14597_v18 = vperm.slane %v10806_v5, 5  ;;  %v1782_v0 = vpop.permute.xlu1 %1781 }
 0x2d8   : > { %2222 = vperm.xlu1 %9283, %v14596_v8   ;;  %v11635_v38 = vadd.f32 %v5888_v27, %v4357_v17  ;;  %v8011_v45 = vrot.slane %v7467_v51, 4  ;;  %v4329_v3 = vadd.f32 %v4328_v14, %v4327_v40  ;;  %v4320_v6 = vadd.f32 %v4319_v23, %v4318_v39 }
 0x2d9   : > { %2250 = vperm.xlu0 %9284, %v14597_v18   ;;  %v6920_v44 = vrot.slane %v6368_v36, 3  ;;  %v8013_v59 = vrot.slane %v7468_v53, 3  ;;  %v6917_v30 = vsel %vm6842_vm5, %v6916_v41, %v6915_v13  ;;  %v4393_v10 = vsel %vm3986_vm3, %v3788_v43, 0.0 }
 0x2da   : > { %v6919_v52 = vsel %vm6845_vm6, %v6918_v25, %v6917_v30  ;;  %v8012_v22 = vsel %vm6845_vm6, %v8011_v45, %v8010_v26  ;;  %v11644_v63 = vadd.f32 %v11539_v56, %v4329_v3  ;;  %v4321_v27 = vrot.slane %v4320_v6, 1 }
 0x2db   : > { %v8014_v46 = vsel %vm6848_vm7, %v8013_v59, %v8012_v22  ;;  %v4378_v29 = vadd.f32 %v4377_v7, %v4376_v34  ;;  %v4394_v17 = vrot.slane %v4393_v10, 4  ;;  %v3781_v36 = vmul.f32 %v8735_v19, %v1789_v28  ;;  %v1859_v28 = vpop.permute.xlu2 %1858 }
 0x2dc   : > { %v6932_v16 = vrot.slane %v11635_v38, 4  ;;  %v7471_v41 = vmul.f32 %v11644_v63, %v11644_v63  ;;  %v4322_v40 = vadd.f32 %v4321_v27, %v4320_v6  ;;  %v8016_v26 = vsel %vm6851_vm8, %v8015_v32, %v8014_v46  ;;  %v1810_v32 = vpop.permute.xlu0 %1809 }
 0x2dd   : > { %v6921_v39 = vsel %vm6848_vm7, %v6920_v44, %v6919_v52  ;;  %v4395_v13 = vadd.f32 %v4394_v17, %v4393_v10  ;;  %v4344_v34 = vsel %vm3986_vm3, %v3781_v36, 0.0  ;;  %v8734_v53 = vunpack.c.l.bf16 %v9168_v11 }
 0x2de   : > { %v14598_v9 = vperm.slane %v10806_v5, 3  ;;  %v11663_v31 = vsel %vm6836_vm0, %v8019_v15, %v7471_v41  ;;  %v6370_v25 = vadd.f32 %v5884_v55, %v4322_v40  ;;  %v4345_v51 = vrot.slane %v4344_v34, 4  ;;  %v11690_v40 = vld [vmem:[%s10704_s7 + $0x100] sm:$0xff]  }
 0x2df   : > { %v8755_v48 = vunpack.c.h.bf16 %v11648_v42  ;;  %v11668_v14 = vmul.f32 %v11635_v38, %v11635_v38  ;;  %v11670_v11 = vadd.f32 %v5891_v61, %v4378_v29  ;;  %v3780_v23 = vmul.f32 %v8734_v53, %v1782_v0  ;;  %v1803_v41 = vpop.permute.xlu1 %1802 }
 0x2e0   : > { %2236 = vperm.xlu2 %9285, %v14598_v9   ;;  %v8742_v8 = vunpack.c.l.bf16 %v11559_v20  ;;  %v6924_v7 = vrot.slane %v6370_v25, 1  ;;  %v7470_v50 = vmul.f32 %v6370_v25, %v6370_v25  ;;  %v4346_v43 = vadd.f32 %v4345_v51, %v4344_v34  ;;  %v11702_v51 = vld [vmem:[%s10785_s10 + $0x38] sm:$0xff] }
 0x2e1   : > { %v3791_v15 = vmul.f32 %v8755_v48, %v1859_v28  ;;  %v14599_v55 = vrot.slane %v11515_v37, 2  ;;  %v4396_v18 = vrot.slane %v4395_v13, 2  ;;  %v4337_v45 = vsel %vm3986_vm3, %v3780_v23, 0.0 }
 0x2e2   : > { %v3784_v3 = vmul.f32 %v8742_v8, %v1810_v32  ;;  %v8017_v44 = vrot.slane %v7470_v50, 1  ;;  %v4347_v61 = vrot.slane %v4346_v43, 2  ;;  %v4338_v59 = vrot.slane %v4337_v45, 4 }
 0x2e3   : > { %v6923_v19 = vsel %vm6851_vm8, %v14599_v55, %v6921_v39  ;;  %v5887_v30 = vrot.slane %v11539_v56, 3  ;;  %v4414_v37 = vsel %vm3986_vm3, %v3791_v15, 0.0  ;;  %v4397_v17 = vadd.f32 %v4396_v18, %v4395_v13  ;;  %v1880_v25 = vpop.permute.xlu2 %1879 }
 0x2e4   : > { %v6925_v6 = vsel %vm6854_vm9, %v6924_v7, %v6923_v19  ;;  %v4365_v10 = vsel %vm3986_vm3, %v3784_v3, 0.0  ;;  %v8018_v22 = vsel %vm6854_vm9, %v8017_v44, %v8016_v26  ;;  %v4348_v27 = vadd.f32 %v4347_v61, %v4346_v43  ;;  %v9171_v44 = vld [vmem:[%s10704_s7 + $0xe0] sm:$0xff]  }
 0x2e5   : > { %7327 = vst.msk [vmem:[%s11055_s13 + $0x28] sm:$0xff] %vm3986_vm3, %v6925_v6  ;;  %v7363_v20 = vsel %vm3986_vm3, %v6925_v6, 0.0  ;;  %v4339_v46 = vadd.f32 %v4338_v59, %v4337_v45  ;;  %v8424_v29 = vsel %vm3986_vm3, %v8018_v22, 0.0  ;;  %v4415_v36 = vrot.slane %v4414_v37, 4 }
 0x2e6   : > { %v11685_v52 = vadd.f32 %v7363_v20, %v11618_v33  ;;  %v4366_v0 = vrot.slane %v4365_v10, 4  ;;  %v11693_v39 = vadd.f32 %v8424_v29, %v11620_v24  ;;  %v4349_v34 = vrot.slane %v4348_v27, 1 }
 0x2e7   : > { %v4340_v53 = vrot.slane %v4339_v46, 2  ;;  %v8739_v33 = vunpack.c.h.bf16 %v11507_v47  ;;  %v8025_v26 = vrot.slane %v11668_v14, 4  ;;  %v11699_v28 = vmul.f32 %v11670_v11, %v11670_v11 }
 0x2e8   : > { %v4416_v9 = vadd.f32 %v4415_v36, %v4414_v37  ;;  %v4367_v13 = vadd.f32 %v4366_v0, %v4365_v10  ;;  %v4350_v48 = vadd.f32 %v4349_v34, %v4348_v27  ;;  %v8762_v23 = vunpack.c.l.bf16 %v11690_v40 }
 0x2e9   : > { %v4341_v32 = vadd.f32 %v4340_v53, %v4339_v46  ;;  %v3783_v24 = vmul.f32 %v8739_v33, %v1803_v41  ;;  %v4398_v8 = vrot.slane %v4397_v17, 1  ;;  %v5886_v47 = vrot.slane %v11539_v56, 2  ;;  %v1831_v46 = vpop.permute.xlu0 %1830 }
 0x2ea   : > { %v4417_v7 = vrot.slane %v4416_v9, 2  ;;  %v4368_v50 = vrot.slane %v4367_v13, 2  ;;  %v6374_v43 = vadd.f32 %v5887_v30, %v4350_v48  ;;  %v3794_v19 = vmul.f32 %v8762_v23, %v1880_v25 }
 0x2eb   : > { %v4342_v15 = vrot.slane %v4341_v32, 1  ;;  %v4358_v55 = vsel %vm3986_vm3, %v3783_v24, 0.0  ;;  %v5893_v18 = vrot.slane %v11702_v51, 2  ;;  %v6938_v61 = vrot.slane %v11670_v11, 1  ;;  %v11760_v11 = vld [vmem:[%s10704_s7 + $0x118] sm:$0xff]  }
 0x2ec   : > { %v4418_v45 = vadd.f32 %v4417_v7, %v4416_v9  ;;  %v4369_v3 = vadd.f32 %v4368_v50, %v4367_v13  ;;  %v4359_v6 = vrot.slane %v4358_v55, 4  ;;  %v8031_v59 = vrot.slane %v11699_v28, 1  ;;  %v1824_v13 = vpop.permute.xlu1 %1823 }
 0x2ed   : > { %v4343_v20 = vadd.f32 %v4342_v15, %v4341_v32  ;;  %v4435_v37 = vsel %vm3986_vm3, %v3794_v19, 0.0  ;;  %v5890_v10 = vrot.slane %v11539_v56, 6  ;;  %v4399_v29 = vadd.f32 %v4398_v8, %v4397_v17 }
 0x2ee   : > { %v4370_v30 = vrot.slane %v4369_v3, 1  ;;  %v4360_v22 = vadd.f32 %v4359_v6, %v4358_v55  ;;  %v4436_v27 = vrot.slane %v4435_v37, 4  ;;  %v7474_v36 = vmul.f32 %v6374_v43, %v6374_v43 }
 0x2ef   : > { %v6373_v0 = vadd.f32 %v5886_v47, %v4343_v20  ;;  %v8747_v41 = vunpack.c.h.bf16 %v9171_v44  ;;  %v4419_v34 = vrot.slane %v4418_v45, 1  ;;  %v8746_v24 = vunpack.c.l.bf16 %v9171_v44 }
 0x2f0   : > { %v4371_v53 = vadd.f32 %v4370_v30, %v4369_v3  ;;  %v4361_v33 = vrot.slane %v4360_v22, 2  ;;  %v4437_v9 = vadd.f32 %v4436_v27, %v4435_v37  ;;  %v14600_v23 = vrot.slane %v11572_v1, 7 }
 0x2f1   : > { %v6928_v25 = vrot.slane %v6373_v0, 6  ;;  %v7473_v48 = vmul.f32 %v6373_v0, %v6373_v0  ;;  %v3787_v32 = vmul.f32 %v8747_v41, %v1831_v46  ;;  %v5896_v17 = vrot.slane %v11702_v51, 5 }
 0x2f2   : > { %v6927_v7 = vsel %vm6836_vm0, %v14600_v23, %v11644_v63  ;;  %v6377_v8 = vadd.f32 %v5890_v10, %v4371_v53  ;;  %v4362_v47 = vadd.f32 %v4361_v33, %v4360_v22  ;;  %v3786_v19 = vmul.f32 %v8746_v24, %v1824_v13  ;;  %v11726_v10 = vld [vmem:[%s10704_s7 + $0x108] sm:$0xff]   ;;  %v1852_v53 = vpop.permute.xlu0 %1851 }
 0x2f3   : > { %v6929_v50 = vsel %vm6839_vm4, %v6928_v25, %v6927_v7  ;;  %v8021_v15 = vrot.slane %v7473_v48, 6  ;;  %v4386_v55 = vsel %vm3986_vm3, %v3787_v32, 0.0  ;;  %v11720_v3 = vadd.f32 %v5893_v18, %v4399_v29 }
 0x2f4   : > { %v6930_v6 = vrot.slane %v6374_v43, 5  ;;  %v8023_v44 = vrot.slane %v7474_v36, 5  ;;  %v4438_v20 = vrot.slane %v4437_v9, 2  ;;  %v4420_v63 = vadd.f32 %v4419_v34, %v4418_v45  ;;  %v1901_v45 = vpop.permute.xlu2 %1900 }
 0x2f5   : > { %v8022_v1 = vsel %vm6839_vm4, %v8021_v15, %v11663_v31  ;;  %v5889_v37 = vrot.slane %v11539_v56, 5  ;;  %v4363_v30 = vrot.slane %v4362_v47, 1  ;;  %v5892_v46 = vrot.slane %v11702_v51, 1 }
 0x2f6   : > { %v6931_v22 = vsel %vm6842_vm5, %v6930_v6, %v6929_v50  ;;  %v8024_v27 = vsel %vm6842_vm5, %v8023_v44, %v8022_v1  ;;  %v4387_v18 = vrot.slane %v4386_v55, 4  ;;  %v7477_v29 = vmul.f32 %v6377_v8, %v6377_v8 }
 0x2f7   : > { %v4364_v43 = vadd.f32 %v4363_v30, %v4362_v47  ;;  %v8026_v36 = vsel %vm6845_vm6, %v8025_v26, %v8024_v27  ;;  %v4379_v31 = vsel %vm3986_vm3, %v3786_v19, 0.0  ;;  %v4439_v56 = vadd.f32 %v4438_v20, %v4437_v9 }
 0x2f8   : > { %v4388_v0 = vadd.f32 %v4387_v18, %v4386_v55  ;;  %v4380_v41 = vrot.slane %v4379_v31, 4  ;;  %v8767_v34 = vunpack.c.h.bf16 %v11726_v10  ;;  %v11736_v33 = vadd.f32 %v5896_v17, %v4420_v63 }
 0x2f9   : > { %v6936_v13 = vrot.slane %v6377_v8, 2  ;;  %v6376_v25 = vadd.f32 %v5889_v37, %v4364_v43  ;;  %v8754_v48 = vunpack.c.l.bf16 %v11648_v42  ;;  %v6933_v14 = vsel %vm6845_vm6, %v6932_v16, %v6931_v22  ;;  %v1845_v22 = vpop.permute.xlu1 %1844 }
 0x2fa   : > { %v4389_v26 = vrot.slane %v4388_v0, 2  ;;  %v4381_v32 = vadd.f32 %v4380_v41, %v4379_v31  ;;  %v3797_v24 = vmul.f32 %v8767_v34, %v1901_v45  ;;  %v8029_v23 = vrot.slane %v7477_v29, 2 }
 0x2fb   : > { %v6934_v9 = vrot.slane %v6376_v25, 3  ;;  %v7476_v7 = vmul.f32 %v6376_v25, %v6376_v25  ;;  %v3790_v47 = vmul.f32 %v8754_v48, %v1852_v53  ;;  %v4440_v50 = vrot.slane %v4439_v56, 1 }
 0x2fc   : > { %v4390_v15 = vadd.f32 %v4389_v26, %v4388_v0  ;;  %v4382_v55 = vrot.slane %v4381_v32, 2  ;;  %v4456_v17 = vsel %vm3986_vm3, %v3797_v24, 0.0  ;;  %v8751_v20 = vunpack.c.h.bf16 %v11615_v35  ;;  %v1922_v53 = vpop.permute.xlu2 %1921  ;;  %v11775_v26 = vld [vmem:[%s10785_s10 + $0x40] sm:$0xff] }
 0x2fd   : > { %v6935_v8 = vsel %vm6848_vm7, %v6934_v9, %v6933_v14  ;;  %v8027_v42 = vrot.slane %v7476_v7, 3  ;;  %v4457_v19 = vrot.slane %v4456_v17, 4  ;;  %v4407_v38 = vsel %vm3986_vm3, %v3790_v47, 0.0  ;;  %v9174_v14 = vld [vmem:[%s10704_s7 + $0xf8] sm:$0xff]   ;;  %v1873_v47 = vpop.permute.xlu0 %1872 }
 0x2fe   : > { %v6937_v16 = vsel %vm6851_vm8, %v6936_v13, %v6935_v8  ;;  %v4391_v6 = vrot.slane %v4390_v15, 1  ;;  %v4383_v44 = vadd.f32 %v4382_v55, %v4381_v32  ;;  %v4408_v30 = vrot.slane %v4407_v38, 4 }
 0x2ff   : > { %v11750_v1 = vsel %vm6854_vm9, %v6938_v61, %v6937_v16  ;;  %v8028_v63 = vsel %vm6848_vm7, %v8027_v42, %v8026_v36  ;;  %v4458_v37 = vadd.f32 %v4457_v19, %v4456_v17  ;;  %v7481_v27 = vmul.f32 %v11720_v3, %v11720_v3 }
 0x300   : > { %7328 = vst.msk [vmem:[%s11055_s13 + $0x30] sm:$0xff] %vm3986_vm3, %v11750_v1  ;;  %v8030_v18 = vsel %vm6851_vm8, %v8029_v23, %v8028_v63  ;;  %v4392_v29 = vadd.f32 %v4391_v6, %v4390_v15  ;;  %v4384_v35 = vrot.slane %v4383_v44, 1  ;;  %v6942_v61 = vrot.slane %v11720_v3, 6 }
 0x301   : > { %v11766_v43 = vsel %vm6854_vm9, %v8031_v59, %v8030_v18  ;;  %v4459_v36 = vrot.slane %v4458_v37, 2  ;;  %v4409_v31 = vadd.f32 %v4408_v30, %v4407_v38  ;;  %v11770_v45 = vmul.f32 %v11736_v33, %v11736_v33 }
 0x302   : > { %v6380_v0 = vadd.f32 %v5892_v46, %v4392_v29  ;;  %v4385_v41 = vadd.f32 %v4384_v35, %v4383_v44  ;;  %v3789_v34 = vmul.f32 %v8751_v20, %v1845_v22  ;;  %v4441_v13 = vadd.f32 %v4440_v50, %v4439_v56  ;;  %v1866_v22 = vpop.permute.xlu1 %1865 }
 0x303   : > { %v4460_v25 = vadd.f32 %v4459_v36, %v4458_v37  ;;  %v4410_v48 = vrot.slane %v4409_v31, 2  ;;  %v8774_v3 = vunpack.c.l.bf16 %v11760_v11  ;;  %v8035_v28 = vrot.slane %v7481_v27, 6  ;;  %v11789_v27 = vld [vmem:[%s10704_s7 + $0x120] sm:$0xff]  }
 0x304   : > { %v7480_v59 = vmul.f32 %v6380_v0, %v6380_v0  ;;  %v6379_v32 = vadd.f32 %v11702_v51, %v4385_v41  ;;  %v4400_v24 = vsel %vm3986_vm3, %v3789_v34, 0.0  ;;  %v6948_v23 = vrot.slane %v11736_v33, 3 }
 0x305   : > { %v4411_v46 = vadd.f32 %v4410_v48, %v4409_v31  ;;  %v4401_v9 = vrot.slane %v4400_v24, 4  ;;  %v3800_v7 = vmul.f32 %v8774_v3, %v1922_v53  ;;  %v8041_v56 = vrot.slane %v11770_v45, 3 }
 0x306   : > { %v8033_v50 = vrot.slane %v7480_v59, 7  ;;  %v7479_v15 = vmul.f32 %v6379_v32, %v6379_v32  ;;  %v8759_v55 = vunpack.c.h.bf16 %v9174_v14  ;;  %v11782_v17 = vadd.f32 %v11775_v26, %v4441_v13 }
 0x307   : > { %v4461_v8 = vrot.slane %v4460_v25, 1  ;;  %v4412_v42 = vrot.slane %v4411_v46, 1  ;;  %v4402_v19 = vadd.f32 %v4401_v9, %v4400_v24  ;;  %v5895_v16 = vrot.slane %v11702_v51, 4 }
 0x308   : > { %v8034_v38 = vsel %vm6836_vm0, %v8033_v50, %v7479_v15  ;;  %v4477_v6 = vsel %vm3986_vm3, %v3800_v7, 0.0  ;;  %v3793_v44 = vmul.f32 %v8759_v55, %v1873_v47  ;;  %v6940_v20 = vrot.slane %v6380_v0, 7 }
 0x309   : > { %v8036_v63 = vsel %vm6839_vm4, %v8035_v28, %v8034_v38  ;;  %v4413_v37 = vadd.f32 %v4412_v42, %v4411_v46  ;;  %v4403_v30 = vrot.slane %v4402_v19, 2  ;;  %v5901_v18 = vrot.slane %v11775_v26, 3  ;;  %v1943_v28 = vpop.permute.xlu2 %1942 }
 0x30a   : > { %v4478_v29 = vrot.slane %v4477_v6, 4  ;;  %v4428_v35 = vsel %vm3986_vm3, %v3793_v44, 0.0  ;;  %v8758_v36 = vunpack.c.l.bf16 %v9174_v14  ;;  %v11795_v31 = vmul.f32 %v11782_v17, %v11782_v17 }
 0x30b   : > { %v6941_v41 = vsel %vm6836_vm0, %v6940_v20, %v6379_v32  ;;  %v4462_v0 = vadd.f32 %v4461_v8, %v4460_v25  ;;  %v4404_v34 = vadd.f32 %v4403_v30, %v4402_v19  ;;  %v4429_v13 = vrot.slane %v4428_v35, 4  ;;  %v1894_v8 = vpop.permute.xlu0 %1893 }
 0x30c   : > { %v4479_v53 = vadd.f32 %v4478_v29, %v4477_v6  ;;  %v3792_v48 = vmul.f32 %v8758_v36, %v1866_v22  ;;  %v8779_v3 = vunpack.c.h.bf16 %v11789_v27  ;;  %v6383_v59 = vadd.f32 %v5895_v16, %v4413_v37 }
 0x30d   : > { %v5894_v24 = vrot.slane %v11702_v51, 3  ;;  %v4405_v46 = vrot.slane %v4404_v34, 1  ;;  %v5904_v14 = vrot.slane %v11775_v26, 6  ;;  %v6943_v9 = vsel %vm6839_vm4, %v6942_v61, %v6941_v41 }
 0x30e   : > { %v4480_v7 = vrot.slane %v4479_v53, 2  ;;  %v4430_v47 = vadd.f32 %v4429_v13, %v4428_v35  ;;  %v4421_v32 = vsel %vm3986_vm3, %v3792_v48, 0.0  ;;  %v5898_v50 = vrot.slane %v11702_v51, 7 }
 0x30f   : > { %v4406_v25 = vadd.f32 %v4405_v46, %v4404_v34  ;;  %v4422_v15 = vrot.slane %v4421_v32, 4  ;;  %v3803_v55 = vmul.f32 %v8779_v3, %v1943_v28  ;;  %v11804_v42 = vadd.f32 %v5901_v18, %v4462_v0 }
 0x310   : > { %v4481_v19 = vadd.f32 %v4480_v7, %v4479_v53  ;;  %v4431_v38 = vrot.slane %v4430_v47, 2  ;;  %v8766_v16 = vunpack.c.l.bf16 %v11726_v10  ;;  %v7483_v6 = vmul.f32 %v6383_v59, %v6383_v59 }
 0x311   : > { %v6382_v44 = vadd.f32 %v5894_v24, %v4406_v25  ;;  %v4423_v20 = vadd.f32 %v4422_v15, %v4421_v32  ;;  %v4498_v61 = vsel %vm3986_vm3, %v3803_v55, 0.0  ;;  %v6946_v35 = vrot.slane %v6383_v59, 4  ;;  %v1887_v24 = vpop.permute.xlu1 %1886 }
 0x312   : > { %v4482_v37 = vrot.slane %v4481_v19, 1  ;;  %v4432_v30 = vadd.f32 %v4431_v38, %v4430_v47  ;;  %v4499_v22 = vrot.slane %v4498_v61, 4  ;;  %v3796_v29 = vmul.f32 %v8766_v16, %v1894_v8  ;;  %v11820_v16 = vld [vmem:[%s10704_s7 + $0x130] sm:$0xff]  }
 0x313   : > { %v6944_v36 = vrot.slane %v6382_v44, 5  ;;  %v7482_v41 = vmul.f32 %v6382_v44, %v6382_v44  ;;  %v4424_v34 = vrot.slane %v4423_v20, 2  ;;  %v8039_v46 = vrot.slane %v7483_v6, 4  ;;  %v9177_v44 = vld [vmem:[%s10704_s7 + $0x110] sm:$0xff]   ;;  %v1915_v45 = vpop.permute.xlu0 %1914 }
 0x314   : > { %v4483_v13 = vadd.f32 %v4482_v37, %v4481_v19  ;;  %v4433_v18 = vrot.slane %v4432_v30, 1  ;;  %v4500_v0 = vadd.f32 %v4499_v22, %v4498_v61  ;;  %v4449_v53 = vsel %vm3986_vm3, %v3796_v29, 0.0  ;;  %v1964_v37 = vpop.permute.xlu2 %1963 }
 0x315   : > { %v6945_v10 = vsel %vm6842_vm5, %v6944_v36, %v6943_v9  ;;  %v8037_v48 = vrot.slane %v7482_v41, 5  ;;  %v4425_v3 = vadd.f32 %v4424_v34, %v4423_v20  ;;  %v4450_v28 = vrot.slane %v4449_v53, 4 }
 0x316   : > { %v4434_v7 = vadd.f32 %v4433_v18, %v4432_v30  ;;  %v4501_v47 = vrot.slane %v4500_v0, 2  ;;  %v8763_v59 = vunpack.c.h.bf16 %v11690_v40  ;;  %v5897_v25 = vrot.slane %v11702_v51, 6 }
 0x317   : > { %v8038_v32 = vsel %vm6842_vm5, %v8037_v48, %v8036_v63  ;;  %v4426_v15 = vrot.slane %v4425_v3, 1  ;;  %v4451_v55 = vadd.f32 %v4450_v28, %v4449_v53  ;;  %v11815_v9 = vsel %vm3986_vm3, %v11750_v1, 0.0 }
 0x318   : > { %v6947_v8 = vsel %vm6845_vm6, %v6946_v35, %v6945_v10  ;;  %v8040_v19 = vsel %vm6845_vm6, %v8039_v46, %v8038_v32  ;;  %v6386_v38 = vadd.f32 %v5898_v50, %v4434_v7  ;;  %v11822_v6 = vadd.f32 %v5904_v14, %v4483_v13 }
 0x319   : > { %v4427_v40 = vadd.f32 %v4426_v15, %v4425_v3  ;;  %v8042_v51 = vsel %vm6848_vm7, %v8041_v56, %v8040_v19  ;;  %v4452_v63 = vrot.slane %v4451_v55, 2  ;;  %v11830_v1 = vsel %vm3986_vm3, %v11766_v43, 0.0  ;;  %v1908_v46 = vpop.permute.xlu1 %1907 }
 0x31a   : > { %v6958_v20 = vrot.slane %v11804_v42, 5  ;;  %v4502_v61 = vadd.f32 %v4501_v47, %v4500_v0  ;;  %v3795_v50 = vmul.f32 %v8763_v59, %v1887_v24  ;;  %v7486_v30 = vmul.f32 %v6386_v38, %v6386_v38  ;;  %v11847_v0 = vld [vmem:[%s10785_s10 + $0x48] sm:$0xff] }
 0x31b   : > { %v6385_v14 = vadd.f32 %v5897_v25, %v4427_v40  ;;  %v4453_v22 = vadd.f32 %v4452_v63, %v4451_v55  ;;  %v8786_v29 = vunpack.c.l.bf16 %v11820_v16  ;;  %v11836_v56 = vmul.f32 %v11804_v42, %v11804_v42 }
 0x31c   : > { %v6949_v43 = vsel %vm6848_vm7, %v6948_v23, %v6947_v8  ;;  %v4442_v35 = vsel %vm3986_vm3, %v3795_v50, 0.0  ;;  %v8771_v36 = vunpack.c.h.bf16 %v9177_v44  ;;  %v11844_v41 = vmul.f32 %v11822_v6, %v11822_v6  ;;  %v11861_v50 = vld [vmem:[%s10704_s7 + $0x138] sm:$0xff]  }
 0x31d   : > { %v6952_v34 = vrot.slane %v6386_v38, 1  ;;  %v6950_v13 = vrot.slane %v6385_v14, 2  ;;  %v7485_v18 = vmul.f32 %v6385_v14, %v6385_v14  ;;  %v4454_v53 = vrot.slane %v4453_v22, 1 }
 0x31e   : > { %v4443_v10 = vrot.slane %v4442_v35, 4  ;;  %v3806_v48 = vmul.f32 %v8786_v29, %v1964_v37  ;;  %v3799_v3 = vmul.f32 %v8771_v36, %v1915_v45  ;;  %v8045_v33 = vrot.slane %v7486_v30, 1  ;;  %v1985_v36 = vpop.permute.xlu2 %1984 }
 0x31f   : > { %v6951_v23 = vsel %vm6851_vm8, %v6950_v13, %v6949_v43  ;;  %v8043_v28 = vrot.slane %v7485_v18, 2  ;;  %v4503_v24 = vrot.slane %v4502_v61, 1  ;;  %v8051_v25 = vrot.slane %v11836_v56, 5 }
 0x320   : > { %v6953_v7 = vsel %vm6854_vm9, %v6952_v34, %v6951_v23  ;;  %v4444_v47 = vadd.f32 %v4443_v10, %v4442_v35  ;;  %v4519_v59 = vsel %vm3986_vm3, %v3806_v48, 0.0  ;;  %v4470_v32 = vsel %vm3986_vm3, %v3799_v3, 0.0 }
 0x321   : > { %7329 = vst.msk [vmem:[%s11055_s13 + $0x38] sm:$0xff] %vm3986_vm3, %v6953_v7  ;;  %v8044_v15 = vsel %vm6851_vm8, %v8043_v28, %v8042_v51  ;;  %v5906_v55 = vrot.slane %v11847_v0, 1  ;;  %v5900_v8 = vrot.slane %v11775_v26, 2  ;;  %v4455_v38 = vadd.f32 %v4454_v53, %v4453_v22 }
 0x322   : > { %v8046_v19 = vsel %vm6854_vm9, %v8045_v33, %v8044_v15  ;;  %v4445_v40 = vrot.slane %v4444_v47, 2  ;;  %v4520_v63 = vrot.slane %v4519_v59, 4  ;;  %v6964_v37 = vrot.slane %v11822_v6, 2  ;;  %v1936_v33 = vpop.permute.xlu0 %1935 }
 0x323   : > { %v5899_v30 = vrot.slane %v11775_v26, 1  ;;  %v4471_v14 = vrot.slane %v4470_v32, 4  ;;  %v8770_v29 = vunpack.c.l.bf16 %v9177_v44  ;;  %v8057_v45 = vrot.slane %v11844_v41, 2 }
 0x324   : > { %v4504_v51 = vadd.f32 %v4503_v24, %v4502_v61  ;;  %v4446_v43 = vadd.f32 %v4445_v40, %v4444_v47  ;;  %v4521_v35 = vadd.f32 %v4520_v63, %v4519_v59  ;;  %v5909_v34 = vrot.slane %v11847_v0, 4  ;;  %v1929_v40 = vpop.permute.xlu1 %1928 }
 0x325   : > { %v4472_v13 = vadd.f32 %v4471_v14, %v4470_v32  ;;  %v3798_v22 = vmul.f32 %v8770_v29, %v1908_v46  ;;  %v8791_v18 = vunpack.c.h.bf16 %v11861_v50  ;;  %v11868_v53 = vadd.f32 %v5900_v8, %v4455_v38 }
 0x326   : > { %v4447_v10 = vrot.slane %v4446_v43, 1  ;;  %v4522_v48 = vrot.slane %v4521_v35, 2  ;;  %v5903_v3 = vrot.slane %v11775_v26, 5  ;;  %v8778_v28 = vunpack.c.l.bf16 %v11789_v27 }
 0x327   : > { %v4473_v44 = vrot.slane %v4472_v13, 2  ;;  %v4463_v23 = vsel %vm3986_vm3, %v3798_v22, 0.0  ;;  %v3809_v61 = vmul.f32 %v8791_v18, %v1985_v36  ;;  %v11873_v24 = vadd.f32 %v5906_v55, %v4504_v51 }
 0x328   : > { %v4448_v47 = vadd.f32 %v4447_v10, %v4446_v43  ;;  %v4464_v59 = vrot.slane %v4463_v23, 4  ;;  %v8775_v46 = vunpack.c.h.bf16 %v11760_v11  ;;  %v7367_v32 = vsel %vm3986_vm3, %v6953_v7, 0.0 }
 0x329   : > { %v4474_v15 = vadd.f32 %v4473_v44, %v4472_v13  ;;  %v4540_v8 = vsel %vm3986_vm3, %v3809_v61, 0.0  ;;  %v3802_v38 = vmul.f32 %v8778_v28, %v1936_v33  ;;  %v4523_v14 = vadd.f32 %v4522_v48, %v4521_v35 }
 0x32a   : > { %v6388_v63 = vadd.f32 %v5899_v30, %v4448_v47  ;;  %v4465_v29 = vadd.f32 %v4464_v59, %v4463_v23  ;;  %v4541_v22 = vrot.slane %v4540_v8, 4  ;;  %v7489_v27 = vmul.f32 %v11868_v53, %v11868_v53 }
 0x32b   : > { %v4475_v55 = vrot.slane %v4474_v15, 1  ;;  %v4491_v51 = vsel %vm3986_vm3, %v3802_v38, 0.0  ;;  %v7366_v11 = vadd.f32 %v11815_v9, %v11685_v52  ;;  %v6968_v7 = vrot.slane %v11873_v24, 7 }
 0x32c   : > { %v7488_v43 = vmul.f32 %v6388_v63, %v6388_v63  ;;  %v4466_v36 = vrot.slane %v4465_v29, 2  ;;  %v3801_v13 = vmul.f32 %v8775_v46, %v1929_v40  ;;  %v11886_v30 = vmul.f32 %v11873_v24, %v11873_v24 }
 0x32d   : > { %v4476_v35 = vadd.f32 %v4475_v55, %v4474_v15  ;;  %v4542_v18 = vadd.f32 %v4541_v22, %v4540_v8  ;;  %v4492_v10 = vrot.slane %v4491_v51, 4  ;;  %v8428_v48 = vsel %vm3986_vm3, %v8046_v19, 0.0 }
 0x32e   : > { %v8047_v33 = vrot.slane %v7488_v43, 7  ;;  %v4524_v44 = vrot.slane %v4523_v14, 1  ;;  %v4467_v23 = vadd.f32 %v4466_v36, %v4465_v29  ;;  %v8049_v61 = vrot.slane %v7489_v27, 6  ;;  %v11906_v27 = vld [vmem:[%s10704_s7 + $0x128] sm:$0xff]  }
 0x32f   : > { %v6954_v52 = vrot.slane %v6388_v63, 7  ;;  %v5902_v9 = vrot.slane %v11775_v26, 4  ;;  %v4493_v28 = vadd.f32 %v4492_v10, %v4491_v51  ;;  %v11892_v59 = vadd.f32 %v5903_v3, %v4476_v35  ;;  %v11899_v63 = vld [vmem:[%s10704_s7 + $0x148] sm:$0xff]  }
 0x330   : > { %v8048_v47 = vsel %vm6836_vm0, %v8047_v33, %v11795_v31  ;;  %v4468_v46 = vrot.slane %v4467_v23, 1  ;;  %v4484_v15 = vsel %vm3986_vm3, %v3801_v13, 0.0  ;;  %v8061_v19 = vrot.slane %v11886_v30, 7  ;;  %v2006_v13 = vpop.permute.xlu2 %2005 }
 0x331   : > { %v6956_v8 = vrot.slane %v11868_v53, 6  ;;  %v8050_v38 = vsel %vm6839_vm4, %v8049_v61, %v8048_v47  ;;  %v4543_v40 = vrot.slane %v4542_v18, 2  ;;  %v4525_v29 = vadd.f32 %v4524_v44, %v4523_v14 }
 0x332   : > { %v4469_v22 = vadd.f32 %v4468_v46, %v4467_v23  ;;  %v8052_v31 = vsel %vm6842_vm5, %v8051_v25, %v8050_v38  ;;  %v5912_v3 = vrot.slane %v11847_v0, 7  ;;  %v6955_v55 = vsel %vm6836_vm0, %v6954_v52, %v11782_v17  ;;  %v1957_v17 = vpop.permute.xlu0 %1956 }
 0x333   : > { %v4494_v51 = vrot.slane %v4493_v28, 2  ;;  %v4485_v53 = vrot.slane %v4484_v15, 4  ;;  %v11910_v43 = vadd.f32 %v7367_v32, %v7366_v11  ;;  %v7492_v36 = vmul.f32 %v11892_v59, %v11892_v59 }
 0x334   : > { %v6391_v14 = vadd.f32 %v5902_v9, %v4469_v22  ;;  %v8427_v56 = vadd.f32 %v11830_v1, %v11693_v39  ;;  %v8798_v25 = vunpack.c.l.bf16 %v11899_v63  ;;  %v4544_v35 = vadd.f32 %v4543_v40, %v4542_v18 }
 0x335   : > { %v4495_v10 = vadd.f32 %v4494_v51, %v4493_v28  ;;  %v4486_v33 = vadd.f32 %v4485_v53, %v4484_v15  ;;  %v8783_v44 = vunpack.c.h.bf16 %v11906_v27  ;;  %v11920_v32 = vadd.f32 %v5909_v34, %v4525_v29 }
 0x336   : > { %v7491_v11 = vmul.f32 %v6391_v14, %v6391_v14  ;;  %v5905_v23 = vrot.slane %v11775_v26, 7  ;;  %v11923_v61 = vadd.f32 %v8428_v48, %v8427_v56  ;;  %v6957_v39 = vsel %vm6839_vm4, %v6956_v8, %v6955_v55 }
 0x337   : > { %v4496_v1 = vrot.slane %v4495_v10, 1  ;;  %v4487_v52 = vrot.slane %v4486_v33, 2  ;;  %v3812_v9 = vmul.f32 %v8798_v25, %v2006_v13  ;;  %v8055_v18 = vrot.slane %v7492_v36, 3  ;;  %v1950_v13 = vpop.permute.xlu1 %1949 }
 0x338   : > { %v6960_v28 = vrot.slane %v6391_v14, 4  ;;  %v8053_v47 = vrot.slane %v7491_v11, 4  ;;  %v3805_v46 = vmul.f32 %v8783_v44, %v1957_v17  ;;  %v4545_v15 = vrot.slane %v4544_v35, 1 }
 0x339   : > { %v4497_v38 = vadd.f32 %v4496_v1, %v4495_v10  ;;  %v4488_v40 = vadd.f32 %v4487_v52, %v4486_v33  ;;  %v4561_v34 = vsel %vm3986_vm3, %v3812_v9, 0.0  ;;  %v11929_v29 = vmul.f32 %v11920_v32, %v11920_v32  ;;  %v11949_v10 = vld [vmem:[%s10704_s7 + $0x150] sm:$0xff]   ;;  %v2027_v1 = vpop.permute.xlu2 %2026 }
 0x33a   : > { %v6962_v26 = vrot.slane %v11892_v59, 3  ;;  %v6959_v48 = vsel %vm6842_vm5, %v6958_v20, %v6957_v39  ;;  %v8054_v8 = vsel %vm6845_vm6, %v8053_v47, %v8052_v31  ;;  %v4562_v53 = vrot.slane %v4561_v34, 4 }
 0x33b   : > { %v8056_v22 = vsel %vm6848_vm7, %v8055_v18, %v8054_v8  ;;  %v11938_v55 = vadd.f32 %v11847_v0, %v4497_v38  ;;  %v4489_v51 = vrot.slane %v4488_v40, 1  ;;  %v6961_v36 = vsel %vm6845_vm6, %v6960_v28, %v6959_v48 }
 0x33c   : > { %v8058_v59 = vsel %vm6851_vm8, %v8057_v45, %v8056_v22  ;;  %v4512_v42 = vsel %vm3986_vm3, %v3805_v46, 0.0  ;;  %v2238_v14 = vperm.slane %v10806_v5, 4  ;;  %v4546_v20 = vadd.f32 %v4545_v15, %v4544_v35  ;;  %v1978_v15 = vpop.permute.xlu0 %1977 }
 0x33d   : > { %v7495_v31 = vmul.f32 %v11938_v55, %v11938_v55  ;;  %v4490_v56 = vadd.f32 %v4489_v51, %v4488_v40  ;;  %v4563_v25 = vadd.f32 %v4562_v53, %v4561_v34  ;;  %v4513_v33 = vrot.slane %v4512_v42, 4 }
 0x33e   : > { %2243 = vperm.xlu1 %9283, %v2238_v14   ;;  %v2252_v44 = vperm.slane %v10806_v5, 6  ;;  %v2266_v41 = vperm.slane %v10774_v12, 0  ;;  %v8782_v45 = vunpack.c.l.bf16 %v11906_v27  ;;  %v6963_v17 = vsel %vm6848_vm7, %v6962_v26, %v6961_v36  ;;  %v11982_v14 = vld [vmem:[%s10785_s10 + $0x50] sm:$0xff] }
 0x33f   : > { %v11958_v35 = vsel %vm6836_vm0, %v8061_v19, %v7495_v31  ;;  %v6394_v11 = vadd.f32 %v5905_v23, %v4490_v56  ;;  %v4564_v39 = vrot.slane %v4563_v25, 2  ;;  %v5908_v52 = vrot.slane %v11847_v0, 3 }
 0x340   : > { %v4514_v9 = vadd.f32 %v4513_v33, %v4512_v42  ;;  %2257 = vperm.xlu2 %9285, %v2252_v44   ;;  %2271 = vperm.xlu0 %9284, %v2266_v41   ;;  %v3804_v18 = vmul.f32 %v8782_v45, %v1950_v13  ;;  %v8803_v28 = vunpack.c.h.bf16 %v11949_v10  ;;  %v8790_v30 = vunpack.c.l.bf16 %v11861_v50 }
 0x341   : > { %v6966_v27 = vrot.slane %v6394_v11, 1  ;;  %v7494_v47 = vmul.f32 %v6394_v11, %v6394_v11  ;;  %v4565_v46 = vadd.f32 %v4564_v39, %v4563_v25  ;;  %v6965_v19 = vsel %vm6851_vm8, %v6964_v37, %v6963_v17 }
 0x342   : > { %v4515_v23 = vrot.slane %v4514_v9, 2  ;;  %v4505_v38 = vsel %vm3986_vm3, %v3804_v18, 0.0  ;;  %v3815_v40 = vmul.f32 %v8803_v28, %v2027_v1  ;;  %v11969_v34 = vadd.f32 %v5912_v3, %v4546_v20 }
 0x343   : > { %v6967_v26 = vsel %vm6854_vm9, %v6966_v27, %v6965_v19  ;;  %v8059_v48 = vrot.slane %v7494_v47, 1  ;;  %v4506_v8 = vrot.slane %v4505_v38, 4  ;;  %v3808_v22 = vmul.f32 %v8790_v30, %v1978_v15  ;;  %v11999_v47 = vld [vmem:[%s10704_s7 + $0x160] sm:$0xff]  }
 0x344   : > { %7330 = vst.msk [vmem:[%s11055_s13 + $0x40] sm:$0xff] %vm3986_vm3, %v6967_v26  ;;  %v7369_v50 = vsel %vm3986_vm3, %v6967_v26, 0.0  ;;  %v4516_v6 = vadd.f32 %v4515_v23, %v4514_v9  ;;  %v4582_v37 = vsel %vm3986_vm3, %v3815_v40, 0.0  ;;  %v4566_v36 = vrot.slane %v4565_v46, 1  ;;  %v1971_v9 = vpop.permute.xlu1 %1970 }
 0x345   : > { %v11977_v51 = vadd.f32 %v7369_v50, %v11910_v43  ;;  %v8060_v53 = vsel %vm6854_vm9, %v8059_v48, %v8058_v59  ;;  %v4507_v3 = vadd.f32 %v4506_v8, %v4505_v38  ;;  %v4583_v31 = vrot.slane %v4582_v37, 4  ;;  %v2048_v48 = vpop.permute.xlu2 %2047 }
 0x346   : > { %v8430_v42 = vsel %vm3986_vm3, %v8060_v53, 0.0  ;;  %v4517_v20 = vrot.slane %v4516_v6, 1  ;;  %v4533_v56 = vsel %vm3986_vm3, %v3808_v22, 0.0  ;;  %v11987_v25 = vmul.f32 %v11969_v34, %v11969_v34 }
 0x347   : > { %v11990_v13 = vadd.f32 %v8430_v42, %v11923_v61  ;;  %v4508_v43 = vrot.slane %v4507_v3, 2  ;;  %v4534_v33 = vrot.slane %v4533_v56, 4  ;;  %v4584_v44 = vadd.f32 %v4583_v31, %v4582_v37  ;;  %v1999_v37 = vpop.permute.xlu0 %1998 }
 0x348   : > { %v4518_v59 = vadd.f32 %v4517_v20, %v4516_v6  ;;  %v2259_v41 = vperm.slane %v10806_v5, 7  ;;  %v2273_v45 = vperm.slane %v10774_v12, 1  ;;  %v6974_v17 = vrot.slane %v11920_v32, 4  ;;  %v12002_v5 = vld [vmem:[%s10704_s7 + $0x140] sm:$0xff]  }
 0x349   : > { %v5914_v11 = vrot.slane %v11982_v14, 2  ;;  %v4509_v39 = vadd.f32 %v4508_v43, %v4507_v3  ;;  %v4535_v1 = vadd.f32 %v4534_v33, %v4533_v56  ;;  %v4567_v18 = vadd.f32 %v4566_v36, %v4565_v46 }
 0x34a   : > { %v4585_v61 = vrot.slane %v4584_v44, 2  ;;  %2264 = vperm.xlu1 %9283, %v2259_v41   ;;  %2278 = vperm.xlu2 %9285, %v2273_v45   ;;  %v2287_v28 = vperm.slane %v10774_v12, 3  ;;  %v8787_v27 = vunpack.c.h.bf16 %v11820_v16  ;;  %v8067_v30 = vrot.slane %v11929_v29, 4 }
 0x34b   : > { %v5907_v15 = vrot.slane %v11847_v0, 2  ;;  %v4510_v19 = vrot.slane %v4509_v39, 1  ;;  %v4536_v23 = vrot.slane %v4535_v1, 2  ;;  %v6980_v38 = vrot.slane %v11969_v34, 1 }
 0x34c   : > { %v8073_v46 = vrot.slane %v11987_v25, 1  ;;  %v6398_v40 = vadd.f32 %v5908_v52, %v4518_v59  ;;  %2292 = vperm.xlu0 %9284, %v2287_v28   ;;  %v3807_v26 = vmul.f32 %v8787_v27, %v1971_v9  ;;  %v8810_v50 = vunpack.c.l.bf16 %v11999_v47 }
 0x34d   : > { %v4511_v8 = vadd.f32 %v4510_v19, %v4509_v39  ;;  %v4537_v16 = vadd.f32 %v4536_v23, %v4535_v1  ;;  %v8795_v6 = vunpack.c.h.bf16 %v12002_v5  ;;  %v12010_v29 = vadd.f32 %v5914_v11, %v4567_v18 }
 0x34e   : > { %v4586_v22 = vadd.f32 %v4585_v61, %v4584_v44  ;;  %v5911_v53 = vrot.slane %v11847_v0, 6  ;;  %v4526_v36 = vsel %vm3986_vm3, %v3807_v26, 0.0  ;;  %v3818_v20 = vmul.f32 %v8810_v50, %v2048_v48 }
 0x34f   : > { %v6397_v3 = vadd.f32 %v5907_v15, %v4511_v8  ;;  %v4538_v42 = vrot.slane %v4537_v16, 1  ;;  %v4527_v52 = vrot.slane %v4526_v36, 4  ;;  %v7498_v31 = vmul.f32 %v6398_v40, %v6398_v40  ;;  %v12033_v8 = vld [vmem:[%s10704_s7 + $0x168] sm:$0xff]  }
 0x350   : > { %v3811_v56 = vmul.f32 %v8795_v6, %v1999_v37  ;;  %v2280_v43 = vperm.slane %v10774_v12, 2  ;;  %v2294_v33 = vperm.slane %v10774_v12, 4  ;;  %v6969_v44 = vsel %vm6836_vm0, %v6968_v7, %v11938_v55 }
 0x351   : > { %v6970_v59 = vrot.slane %v6397_v3, 6  ;;  %v7497_v41 = vmul.f32 %v6397_v3, %v6397_v3  ;;  %v4539_v45 = vadd.f32 %v4538_v42, %v4537_v16  ;;  %v4528_v11 = vadd.f32 %v4527_v52, %v4526_v36  ;;  %v1992_v52 = vpop.permute.xlu1 %1991 }
 0x352   : > { %v5917_v39 = vrot.slane %v11982_v14, 5  ;;  %v4603_v1 = vsel %vm3986_vm3, %v3818_v20, 0.0  ;;  %2285 = vperm.xlu1 %9283, %v2280_v43   ;;  %2299 = vperm.xlu2 %9285, %v2294_v33   ;;  %v2308_v9 = vperm.slane %v10774_v12, 6  ;;  %v12025_v18 = vmul.f32 %v12010_v29, %v12010_v29  ;;  %v2069_v20 = vpop.permute.xlu2 %2068 }
 0x353   : > { %v8063_v61 = vrot.slane %v7497_v41, 6  ;;  %v4587_v28 = vrot.slane %v4586_v22, 1  ;;  %v4529_v27 = vrot.slane %v4528_v11, 2  ;;  %v8065_v15 = vrot.slane %v7498_v31, 5 }
 0x354   : > { %v6401_v24 = vadd.f32 %v5911_v53, %v4539_v45  ;;  %v4604_v19 = vrot.slane %v4603_v1, 4  ;;  %v4554_v7 = vsel %vm3986_vm3, %v3811_v56, 0.0  ;;  %2313 = vperm.xlu0 %9284, %v2308_v9   ;;  %v6971_v55 = vsel %vm6839_vm4, %v6970_v59, %v6969_v44 }
 0x355   : > { %v8064_v23 = vsel %vm6839_vm4, %v8063_v61, %v11958_v35  ;;  %v5910_v26 = vrot.slane %v11847_v0, 5  ;;  %v4530_v48 = vadd.f32 %v4529_v27, %v4528_v11  ;;  %v6972_v16 = vrot.slane %v6398_v40, 5  ;;  %v2020_v40 = vpop.permute.xlu0 %2019 }
 0x356   : > { %v8066_v50 = vsel %vm6842_vm5, %v8065_v15, %v8064_v23  ;;  %v4605_v6 = vadd.f32 %v4604_v19, %v4603_v1  ;;  %v5913_v37 = vrot.slane %v11982_v14, 1  ;;  %v4588_v53 = vadd.f32 %v4587_v28, %v4586_v22 }
 0x357   : > { %v4531_v36 = vrot.slane %v4530_v48, 1  ;;  %v8068_v3 = vsel %vm6845_vm6, %v8067_v30, %v8066_v50  ;;  %v4555_v42 = vrot.slane %v4554_v7, 4  ;;  %v6973_v35 = vsel %vm6842_vm5, %v6972_v16, %v6971_v55 }
 0x358   : > { %v6978_v31 = vrot.slane %v6401_v24, 2  ;;  %v8794_v0 = vunpack.c.l.bf16 %v12002_v5  ;;  %v8815_v56 = vunpack.c.h.bf16 %v12033_v8  ;;  %v7501_v43 = vmul.f32 %v6401_v24, %v6401_v24 }
 0x359   : > { %v4532_v33 = vadd.f32 %v4531_v36, %v4530_v48  ;;  %v4556_v59 = vadd.f32 %v4555_v42, %v4554_v7  ;;  %v8802_v41 = vunpack.c.l.bf16 %v11949_v10  ;;  %v4606_v22 = vrot.slane %v4605_v6, 2 }
 0x35a   : > { %v3810_v45 = vmul.f32 %v8794_v0, %v1992_v52  ;;  %v3821_v11 = vmul.f32 %v8815_v56, %v2069_v20  ;;  %v2301_v30 = vperm.slane %v10774_v12, 5  ;;  %v2315_v61 = vperm.slane %v10774_v12, 7  ;;  %v2013_v56 = vpop.permute.xlu1 %2012 }
 0x35b   : > { %v6400_v44 = vadd.f32 %v5910_v26, %v4532_v33  ;;  %v4557_v1 = vrot.slane %v4556_v59, 2  ;;  %v3814_v9 = vmul.f32 %v8802_v41, %v2020_v40  ;;  %v6975_v5 = vsel %vm6845_vm6, %v6974_v17, %v6973_v35  ;;  %v9186_v41 = vld [vmem:[%s10704_s7 + $0x158] sm:$0xff]  }
 0x35c   : > { %v4547_v28 = vsel %vm3986_vm3, %v3810_v45, 0.0  ;;  %v4624_v27 = vsel %vm3986_vm3, %v3821_v11, 0.0  ;;  %2306 = vperm.xlu1 %9283, %v2301_v30   ;;  %v2329_v10 = vperm.slane %v10770_v49, 1  ;;  %2320 = vperm.xlu2 %9285, %v2315_v61   ;;  %v8071_v55 = vrot.slane %v7501_v43, 2 }
 0x35d   : > { %v6976_v15 = vrot.slane %v6400_v44, 3  ;;  %v7500_v24 = vmul.f32 %v6400_v44, %v6400_v44  ;;  %v4558_v19 = vadd.f32 %v4557_v1, %v4556_v59  ;;  %v4548_v7 = vrot.slane %v4547_v28, 4  ;;  %v2041_v1 = vpop.permute.xlu0 %2040 }
 0x35e   : > { %v4607_v23 = vadd.f32 %v4606_v22, %v4605_v6  ;;  %v4625_v26 = vrot.slane %v4624_v27, 4  ;;  %v4575_v12 = vsel %vm3986_vm3, %v3814_v9, 0.0  ;;  %2334 = vperm.xlu0 %9284, %v2329_v10   ;;  %v8799_v52 = vunpack.c.h.bf16 %v11899_v63 }
 0x35f   : > { %v6977_v32 = vsel %vm6848_vm7, %v6976_v15, %v6975_v5  ;;  %v8069_v17 = vrot.slane %v7500_v24, 3  ;;  %v4559_v48 = vrot.slane %v4558_v19, 1  ;;  %v4549_v16 = vadd.f32 %v4548_v7, %v4547_v28 }
 0x360   : > { %v6979_v50 = vsel %vm6851_vm8, %v6978_v31, %v6977_v32  ;;  %v4626_v36 = vadd.f32 %v4625_v26, %v4624_v27  ;;  %v4576_v42 = vrot.slane %v4575_v12, 4  ;;  %v12060_v40 = vmul.f32 %v9764_v4, %v10661_v60  ;;  %v12100_v27 = vld [vmem:[%s10785_s10 + $0x58] sm:$0xff] }
 0x361   : > { %v6981_v6 = vsel %vm6854_vm9, %v6980_v38, %v6979_v50  ;;  %v8070_v20 = vsel %vm6848_vm7, %v8069_v17, %v8068_v3  ;;  %v4560_v35 = vadd.f32 %v4559_v48, %v4558_v19  ;;  %v4550_v0 = vrot.slane %v4549_v16, 2 }
 0x362   : > { %v12064_v31 = vmul.f32 %v9732_v58, %v10670_v57  ;;  %v12068_v63 = vadd.f32 %v5917_v39, %v4588_v53  ;;  %7331 = vst.msk [vmem:[%s11055_s13 + $0x48] sm:$0xff] %vm3986_vm3, %v6981_v6  ;;  %v8072_v34 = vsel %vm6851_vm8, %v8071_v55, %v8070_v20  ;;  %v4577_v3 = vadd.f32 %v4576_v42, %v4575_v12  ;;  %v12081_v58 = vld [vmem:[%s10704_s7 + $0x178] sm:$0xff]  }
 0x363   : > { %v12076_v38 = vsel %vm6854_vm9, %v8073_v46, %v8072_v34  ;;  %v12078_v4 = vadd.f32 %v5913_v37, %v4560_v35  ;;  %v4551_v60 = vadd.f32 %v4550_v0, %v4549_v16  ;;  %v12085_v57 = vmul.f32 %v9778_v21, %v10673_v2  ;;  %v2090_v37 = vpop.permute.xlu2 %2089 }
 0x364   : > { %v4608_v39 = vrot.slane %v4607_v23, 1  ;;  %v4627_v53 = vrot.slane %v4626_v36, 2  ;;  %v3813_v43 = vmul.f32 %v8799_v52, %v2013_v56  ;;  %v6984_v33 = vrot.slane %v12010_v29, 6 }
 0x365   : > { %v8077_v25 = vrot.slane %v12025_v18, 6  ;;  %v4552_v59 = vrot.slane %v4551_v60, 1  ;;  %v4578_v46 = vrot.slane %v4577_v3, 2  ;;  %v6990_v22 = vrot.slane %v12068_v63, 3 }
 0x366   : > { %v12093_v45 = vmul.f32 %v12068_v63, %v12068_v63  ;;  %v4568_v21 = vsel %vm3986_vm3, %v3813_v43, 0.0  ;;  %v8822_v2 = vunpack.c.l.bf16 %v12081_v58  ;;  %v7504_v11 = vmul.f32 %v12078_v4, %v12078_v4 }
 0x367   : > { %v4553_v30 = vadd.f32 %v4552_v59, %v4551_v60  ;;  %v4579_v18 = vadd.f32 %v4578_v46, %v4577_v3  ;;  %v4569_v44 = vrot.slane %v4568_v21, 4  ;;  %v4609_v9 = vadd.f32 %v4608_v39, %v4607_v23  ;;  %v12119_v39 = vld [vmem:[%s10704_s7 + $0x180] sm:$0xff]  }
 0x368   : > { %v4628_v61 = vadd.f32 %v4627_v53, %v4626_v36  ;;  %v3824_v5 = vmul.f32 %v8822_v2, %v2090_v37  ;;  %v8807_v28 = vunpack.c.h.bf16 %v9186_v41  ;;  %v2322_v19 = vperm.slane %v10770_v49, 0  ;;  %v2034_v37 = vpop.permute.xlu1 %2033 }
 0x369   : > { %v6403_v10 = vadd.f32 %v11982_v14, %v4553_v30  ;;  %v4580_v15 = vrot.slane %v4579_v18, 1  ;;  %v4570_v24 = vadd.f32 %v4569_v44, %v4568_v21  ;;  %v8083_v7 = vrot.slane %v12093_v45, 3 }
 0x36a   : > { %v4645_v55 = vsel %vm3986_vm3, %v3824_v5, 0.0  ;;  %v3817_v26 = vmul.f32 %v8807_v28, %v2041_v1  ;;  %v2336_v12 = vperm.slane %v10770_v49, 2  ;;  %v8075_v32 = vrot.slane %v7504_v11, 7  ;;  %2327 = vperm.xlu1 %9283, %v2322_v19  }
 0x36b   : > { %v7503_v23 = vmul.f32 %v6403_v10, %v6403_v10  ;;  %v5922_v17 = vrot.slane %v12100_v27, 3  ;;  %v4571_v48 = vrot.slane %v4570_v24, 2  ;;  %v12109_v16 = vadd.f32 %v12100_v27, %v4609_v9  ;;  %v2062_v9 = vpop.permute.xlu0 %2061 }
 0x36c   : > { %v5916_v50 = vrot.slane %v11982_v14, 4  ;;  %v4581_v36 = vadd.f32 %v4580_v15, %v4579_v18  ;;  %v4646_v42 = vrot.slane %v4645_v55, 4  ;;  %2341 = vperm.xlu2 %9285, %v2336_v12   ;;  %v4629_v20 = vrot.slane %v4628_v61, 1 }
 0x36d   : > { %v8076_v52 = vsel %vm6836_vm0, %v8075_v32, %v7503_v23  ;;  %v4572_v35 = vadd.f32 %v4571_v48, %v4570_v24  ;;  %v4596_v0 = vsel %vm3986_vm3, %v3817_v26, 0.0  ;;  %v12115_v56 = vsel %vm3986_vm3, %v6981_v6, 0.0  ;;  %v2111_v6 = vpop.permute.xlu2 %2110 }
 0x36e   : > { %v8078_v34 = vsel %vm6839_vm4, %v8077_v25, %v8076_v52  ;;  %v4647_v60 = vadd.f32 %v4646_v42, %v4645_v55  ;;  %v4597_v3 = vrot.slane %v4596_v0, 4  ;;  %v6982_v53 = vrot.slane %v12078_v4, 7 }
 0x36f   : > { %v5915_v43 = vrot.slane %v11982_v14, 3  ;;  %v4573_v59 = vrot.slane %v4572_v35, 1  ;;  %v2350_v46 = vperm.slane %v10770_v49, 4  ;;  %v6407_v21 = vadd.f32 %v5916_v50, %v4581_v36 }
 0x370   : > { %v4648_v2 = vrot.slane %v4647_v60, 2  ;;  %v4598_v11 = vadd.f32 %v4597_v3, %v4596_v0  ;;  %v8806_v30 = vunpack.c.l.bf16 %v9186_v41  ;;  %v4630_v18 = vadd.f32 %v4629_v20, %v4628_v61 }
 0x371   : > { %v4574_v44 = vadd.f32 %v4573_v59, %v4572_v35  ;;  %v5925_v25 = vrot.slane %v12100_v27, 6  ;;  %2355 = vperm.xlu0 %9284, %v2350_v46   ;;  %v8827_v1 = vunpack.c.h.bf16 %v12119_v39  ;;  %v8814_v15 = vunpack.c.l.bf16 %v12033_v8 }
 0x372   : > { %v4649_v4 = vadd.f32 %v4648_v2, %v4647_v60  ;;  %v4599_v5 = vrot.slane %v4598_v11, 2  ;;  %v3816_v28 = vmul.f32 %v8806_v30, %v2034_v37  ;;  %v6983_v24 = vsel %vm6836_vm0, %v6982_v53, %v6403_v10 }
 0x373   : > { %v6406_v19 = vadd.f32 %v5915_v43, %v4574_v44  ;;  %v3827_v55 = vmul.f32 %v8827_v1, %v2111_v6  ;;  %v2343_v41 = vperm.slane %v10770_v49, 3  ;;  %v7507_v26 = vmul.f32 %v6407_v21, %v6407_v21 }
 0x374   : > { %v4600_v61 = vadd.f32 %v4599_v5, %v4598_v11  ;;  %v4589_v12 = vsel %vm3986_vm3, %v3816_v28, 0.0  ;;  %v3820_v32 = vmul.f32 %v8814_v15, %v2062_v9  ;;  %v4650_v48 = vrot.slane %v4649_v4, 1  ;;  %v12157_v5 = vld [vmem:[%s10785_s10 + $0x60] sm:$0xff] }
 0x375   : > { %v7506_v23 = vmul.f32 %v6406_v19, %v6406_v19  ;;  %v4590_v50 = vrot.slane %v4589_v12, 4  ;;  %v4666_v36 = vsel %vm3986_vm3, %v3827_v55, 0.0  ;;  %2348 = vperm.xlu1 %9283, %v2343_v41   ;;  %v6986_v42 = vrot.slane %v6406_v19, 5  ;;  %v2055_v19 = vpop.permute.xlu1 %2054  ;;  %v2132_v55 = vpop.permute.xlu2 %2131 }
 0x376   : > { %v4601_v52 = vrot.slane %v4600_v61, 1  ;;  %v4667_v8 = vrot.slane %v4666_v36, 4  ;;  %v4617_v10 = vsel %vm3986_vm3, %v3820_v32, 0.0  ;;  %v5919_v35 = vrot.slane %v11982_v14, 7 }
 0x377   : > { %v8079_v20 = vrot.slane %v7506_v23, 5  ;;  %v4591_v0 = vadd.f32 %v4590_v50, %v4589_v12  ;;  %v4618_v60 = vrot.slane %v4617_v10, 4  ;;  %v6985_v3 = vsel %vm6839_vm4, %v6984_v33, %v6983_v24  ;;  %v2083_v50 = vpop.permute.xlu0 %2082 }
 0x378   : > { %v12136_v53 = vadd.f32 %v5922_v17, %v4630_v18  ;;  %v8081_v43 = vrot.slane %v7507_v26, 4  ;;  %v4668_v59 = vadd.f32 %v4667_v8, %v4666_v36  ;;  %v6988_v46 = vrot.slane %v6407_v21, 4  ;;  %v12145_v21 = vld [vmem:[%s10704_s7 + $0x190] sm:$0xff]  }
 0x379   : > { %v8080_v37 = vsel %vm6842_vm5, %v8079_v20, %v8078_v34  ;;  %v4592_v2 = vrot.slane %v4591_v0, 2  ;;  %v4619_v11 = vadd.f32 %v4618_v60, %v4617_v10  ;;  %v6987_v30 = vsel %vm6842_vm5, %v6986_v42, %v6985_v3 }
 0x37a   : > { %v8082_v6 = vsel %vm6845_vm6, %v8081_v43, %v8080_v37  ;;  %v4651_v44 = vadd.f32 %v4650_v48, %v4649_v4  ;;  %v4602_v1 = vadd.f32 %v4601_v52, %v4600_v61  ;;  %v4669_v17 = vrot.slane %v4668_v59, 2 }
 0x37b   : > { %v4593_v29 = vadd.f32 %v4592_v2, %v4591_v0  ;;  %v8084_v33 = vsel %vm6848_vm7, %v8083_v7, %v8082_v6  ;;  %v4620_v18 = vrot.slane %v4619_v11, 2  ;;  %v12149_v34 = vsel %vm3986_vm3, %v12076_v38, 0.0  ;;  %v12163_v38 = vld [vmem:[%s10704_s7 + $0x170] sm:$0xff]  }
 0x37c   : > { %v12153_v9 = vmul.f32 %v12109_v16, %v12109_v16  ;;  %v5918_v4 = vrot.slane %v11982_v14, 6  ;;  %v2357_v45 = vperm.slane %v10770_v49, 5  ;;  %v6989_v7 = vsel %vm6845_vm6, %v6988_v46, %v6987_v30 }
 0x37d   : > { %v4594_v28 = vrot.slane %v4593_v29, 1  ;;  %v4670_v15 = vadd.f32 %v4669_v17, %v4668_v59  ;;  %v2371_v24 = vperm.slane %v10770_v49, 7  ;;  %v6410_v41 = vadd.f32 %v5919_v35, %v4602_v1 }
 0x37e   : > { %v4621_v26 = vadd.f32 %v4620_v18, %v4619_v11  ;;  %2362 = vperm.xlu2 %9285, %v2357_v45   ;;  %v8811_v61 = vunpack.c.h.bf16 %v11999_v47  ;;  %v8834_v14 = vunpack.c.l.bf16 %v12145_v21  ;;  %v12169_v12 = vmul.f32 %v12136_v53, %v12136_v53 }
 0x37f   : > { %v12173_v32 = vadd.f32 %v5925_v25, %v4651_v44  ;;  %v4595_v23 = vadd.f32 %v4594_v28, %v4593_v29  ;;  %v5927_v48 = vrot.slane %v12157_v5, 1  ;;  %2376 = vperm.xlu0 %9284, %v2371_v24   ;;  %v4671_v36 = vrot.slane %v4670_v15, 1  ;;  %v12199_v24 = vld [vmem:[%s10704_s7 + $0x198] sm:$0xff]  }
 0x380   : > { %v3819_v42 = vmul.f32 %v8811_v61, %v2055_v19  ;;  %v3830_v52 = vmul.f32 %v8834_v14, %v2132_v55  ;;  %v8819_v47 = vunpack.c.h.bf16 %v12163_v38  ;;  %v6991_v10 = vsel %vm6848_vm7, %v6990_v22, %v6989_v7 }
 0x381   : > { %v6409_v8 = vadd.f32 %v5918_v4, %v4595_v23  ;;  %v5921_v20 = vrot.slane %v12100_v27, 2  ;;  %v2364_v25 = vperm.slane %v10770_v49, 6  ;;  %v7510_v35 = vmul.f32 %v6410_v41, %v6410_v41 }
 0x382   : > { %v4622_v0 = vrot.slane %v4621_v26, 1  ;;  %v4610_v60 = vsel %vm3986_vm3, %v3819_v42, 0.0  ;;  %v3823_v3 = vmul.f32 %v8819_v47, %v2083_v50  ;;  %v12185_v43 = vmul.f32 %v12173_v32, %v12173_v32 }
 0x383   : > { %v6994_v59 = vrot.slane %v6410_v41, 1  ;;  %v6992_v46 = vrot.slane %v6409_v8, 2  ;;  %v7509_v37 = vmul.f32 %v6409_v8, %v6409_v8  ;;  %2369 = vperm.xlu1 %9283, %v2364_v25   ;;  %v4672_v63 = vadd.f32 %v4671_v36, %v4670_v15  ;;  %v2076_v15 = vpop.permute.xlu1 %2075  ;;  %v2104_v8 = vpop.permute.xlu0 %2103 }
 0x384   : > { %v4611_v22 = vrot.slane %v4610_v60, 4  ;;  %v4687_v2 = vsel %vm3986_vm3, %v3830_v52, 0.0  ;;  %v2378_v49 = vperm.slane %v10825_v54, 0  ;;  %v4638_v6 = vsel %vm3986_vm3, %v3823_v3, 0.0 }
 0x385   : > { %v6993_v11 = vsel %vm6851_vm8, %v6992_v46, %v6991_v10  ;;  %v8085_v30 = vrot.slane %v7509_v37, 2  ;;  %v2392_v44 = vperm.slane %v10825_v54, 2  ;;  %v8087_v1 = vrot.slane %v7510_v35, 1 }
 0x386   : > { %v6995_v29 = vsel %vm6854_vm9, %v6994_v59, %v6993_v11  ;;  %v4623_v17 = vadd.f32 %v4622_v0, %v4621_v26  ;;  %v4612_v18 = vadd.f32 %v4611_v22, %v4610_v60  ;;  %2383 = vperm.xlu2 %9285, %v2378_v49   ;;  %v7000_v4 = vrot.slane %v12136_v53, 5 }
 0x387   : > { %v8093_v45 = vrot.slane %v12169_v12, 5  ;;  %7332 = vst.msk [vmem:[%s11055_s13 + $0x50] sm:$0xff] %vm3986_vm3, %v6995_v29  ;;  %v8086_v7 = vsel %vm6851_vm8, %v8085_v30, %v8084_v33  ;;  %v4688_v28 = vrot.slane %v4687_v2, 4  ;;  %2397 = vperm.xlu0 %9284, %v2392_v44   ;;  %v7006_v19 = vrot.slane %v12173_v32, 2  ;;  %v2153_v33 = vpop.permute.xlu2 %2152 }
 0x388   : > { %v8088_v55 = vsel %vm6854_vm9, %v8087_v1, %v8086_v7  ;;  %v4613_v41 = vrot.slane %v4612_v18, 2  ;;  %v4639_v26 = vrot.slane %v4638_v6, 4  ;;  %v8099_v61 = vrot.slane %v12185_v43, 2 }
 0x389   : > { %v12204_v14 = vadd.f32 %v5927_v48, %v4672_v63  ;;  %v5920_v23 = vrot.slane %v12100_v27, 1  ;;  %v8818_v50 = vunpack.c.l.bf16 %v12163_v38  ;;  %v12208_v36 = vadd.f32 %v5921_v20, %v4623_v17 }
 0x38a   : > { %v4614_v42 = vadd.f32 %v4613_v41, %v4612_v18  ;;  %v4640_v52 = vadd.f32 %v4639_v26, %v4638_v6  ;;  %v8839_v47 = vunpack.c.h.bf16 %v12199_v24  ;;  %v4689_v10 = vadd.f32 %v4688_v28, %v4687_v2 }
 0x38b   : > { %v3822_v25 = vmul.f32 %v8818_v50, %v2076_v15  ;;  %v8826_v35 = vunpack.c.l.bf16 %v12119_v39  ;;  %v2385_v0 = vperm.slane %v10825_v54, 1  ;;  %v2399_v59 = vperm.slane %v10825_v54, 3  ;;  %v2097_v26 = vpop.permute.xlu1 %2096 }
 0x38c   : > { %v4615_v48 = vrot.slane %v4614_v42, 1  ;;  %v4641_v60 = vrot.slane %v4640_v52, 2  ;;  %v3833_v3 = vmul.f32 %v8839_v47, %v2153_v33  ;;  %v12216_v38 = vmul.f32 %v12204_v14, %v12204_v14 }
 0x38d   : > { %v4631_v20 = vsel %vm3986_vm3, %v3822_v25, 0.0  ;;  %v3826_v46 = vmul.f32 %v8826_v35, %v2104_v8  ;;  %2390 = vperm.xlu1 %9283, %v2385_v0   ;;  %v2413_v37 = vperm.slane %v10825_v54, 5  ;;  %v4690_v49 = vrot.slane %v4689_v10, 2 }
 0x38e   : > { %v4616_v63 = vadd.f32 %v4615_v48, %v4614_v42  ;;  %v4642_v22 = vadd.f32 %v4641_v60, %v4640_v52  ;;  %v4632_v39 = vrot.slane %v4631_v20, 4  ;;  %v4708_v2 = vsel %vm3986_vm3, %v3833_v3, 0.0  ;;  %2404 = vperm.xlu2 %9285, %v2399_v59  }
 0x38f   : > { %v4709_v11 = vrot.slane %v4708_v2, 4  ;;  %v4659_v30 = vsel %vm3986_vm3, %v3826_v46, 0.0  ;;  %2418 = vperm.xlu0 %9284, %v2413_v37   ;;  %v8823_v6 = vunpack.c.h.bf16 %v12081_v58  ;;  %v7513_v7 = vmul.f32 %v12208_v36, %v12208_v36 }
 0x390   : > { %v6412_v44 = vadd.f32 %v5920_v23, %v4616_v63  ;;  %v4643_v1 = vrot.slane %v4642_v22, 1  ;;  %v4633_v17 = vadd.f32 %v4632_v39, %v4631_v20  ;;  %v4660_v18 = vrot.slane %v4659_v30, 4 }
 0x391   : > { %v5930_v28 = vrot.slane %v12157_v5, 4  ;;  %v5924_v15 = vrot.slane %v12100_v27, 5  ;;  %v4710_v41 = vadd.f32 %v4709_v11, %v4708_v2  ;;  %v7373_v50 = vsel %vm3986_vm3, %v6995_v29, 0.0  ;;  %v12239_v2 = vld [vmem:[%s10704_s7 + $0x1a8] sm:$0xff]  }
 0x392   : > { %v6998_v33 = vrot.slane %v12208_v36, 6  ;;  %v7512_v42 = vmul.f32 %v6412_v44, %v6412_v44  ;;  %v4634_v52 = vrot.slane %v4633_v17, 2  ;;  %v8103_v58 = vrot.slane %v12216_v38, 7 }
 0x393   : > { %v6996_v23 = vrot.slane %v6412_v44, 7  ;;  %v4644_v47 = vadd.f32 %v4643_v1, %v4642_v22  ;;  %v4661_v8 = vadd.f32 %v4660_v18, %v4659_v30  ;;  %v4691_v35 = vadd.f32 %v4690_v49, %v4689_v10  ;;  %v2174_v1 = vpop.permute.xlu2 %2173 }
 0x394   : > { %v8089_v25 = vrot.slane %v7512_v42, 7  ;;  %v4635_v0 = vadd.f32 %v4634_v52, %v4633_v17  ;;  %v3825_v48 = vmul.f32 %v8823_v6, %v2097_v26  ;;  %v8434_v60 = vsel %vm3986_vm3, %v8088_v55, 0.0 }
 0x395   : > { %v8091_v3 = vrot.slane %v7513_v7, 6  ;;  %v4711_v59 = vrot.slane %v4710_v41, 2  ;;  %v4662_v20 = vrot.slane %v4661_v8, 2  ;;  %v5923_v36 = vrot.slane %v12100_v27, 4 }
 0x396   : > { %v8090_v29 = vsel %vm6836_vm0, %v8089_v25, %v12153_v9  ;;  %v4636_v46 = vrot.slane %v4635_v0, 1  ;;  %v5933_v37 = vrot.slane %v12157_v5, 7  ;;  %v6997_v63 = vsel %vm6836_vm0, %v6996_v23, %v12109_v16 }
 0x397   : > { %v8092_v10 = vsel %vm6839_vm4, %v8091_v3, %v8090_v29  ;;  %v6416_v22 = vadd.f32 %v5924_v15, %v4644_v47  ;;  %v4663_v39 = vadd.f32 %v4662_v20, %v4661_v8  ;;  %v4692_v55 = vrot.slane %v4691_v35, 1  ;;  %v2125_v15 = vpop.permute.xlu0 %2124 }
 0x398   : > { %v4637_v49 = vadd.f32 %v4636_v46, %v4635_v0  ;;  %v8094_v9 = vsel %vm6842_vm5, %v8093_v45, %v8092_v10  ;;  %v4652_v11 = vsel %vm3986_vm3, %v3825_v48, 0.0  ;;  %v4712_v30 = vadd.f32 %v4711_v59, %v4710_v41  ;;  %v9192_v41 = vld [vmem:[%s10704_s7 + $0x188] sm:$0xff]  }
 0x399   : > { %v4664_v6 = vrot.slane %v4663_v39, 1  ;;  %v4653_v44 = vrot.slane %v4652_v11, 4  ;;  %v7372_v16 = vadd.f32 %v12115_v56, %v11977_v51  ;;  %v6999_v17 = vsel %vm6839_vm4, %v6998_v33, %v6997_v63 }
 0x39a   : > { %v6415_v18 = vadd.f32 %v5923_v36, %v4637_v49  ;;  %v8433_v7 = vadd.f32 %v12149_v34, %v11990_v13  ;;  %v8846_v12 = vunpack.c.l.bf16 %v12239_v2  ;;  %v7516_v45 = vmul.f32 %v6416_v22, %v6416_v22  ;;  %v2118_v49 = vpop.permute.xlu1 %2117 }
 0x39b   : > { %v4665_v26 = vadd.f32 %v4664_v6, %v4663_v39  ;;  %v4654_v42 = vadd.f32 %v4653_v44, %v4652_v11  ;;  %v12251_v52 = vadd.f32 %v7373_v50, %v7372_v16  ;;  %v4693_v56 = vadd.f32 %v4692_v55, %v4691_v35  ;;  %v2195_v43 = vpop.permute.xlu2 %2194 }
 0x39c   : > { %v7002_v23 = vrot.slane %v6415_v18, 4  ;;  %v7515_v47 = vmul.f32 %v6415_v18, %v6415_v18  ;;  %v12254_v8 = vadd.f32 %v8434_v60, %v8433_v7  ;;  %v3836_v51 = vmul.f32 %v8846_v12, %v2174_v1 }
 0x39d   : > { %v4713_v33 = vrot.slane %v4712_v30, 1  ;;  %v12257_v25 = vadd.f32 %v12157_v5, %v4665_v26  ;;  %v4655_v13 = vrot.slane %v4654_v42, 2  ;;  %v7001_v34 = vsel %vm6842_vm5, %v7000_v4, %v6999_v17 }
 0x39e   : > { %v8095_v0 = vrot.slane %v7515_v47, 4  ;;  %v4729_v50 = vsel %vm3986_vm3, %v3836_v51, 0.0  ;;  %v8831_v48 = vunpack.c.h.bf16 %v9192_v41  ;;  %v8097_v3 = vrot.slane %v7516_v45, 3 }
 0x39f   : > { %v7003_v59 = vsel %vm6845_vm6, %v7002_v23, %v7001_v34  ;;  %v7519_v35 = vmul.f32 %v12257_v25, %v12257_v25  ;;  %v5926_v60 = vrot.slane %v12100_v27, 7  ;;  %v7004_v20 = vrot.slane %v6416_v22, 3 }
 0x3a0   : > { %v8096_v29 = vsel %vm6845_vm6, %v8095_v0, %v8094_v9  ;;  %v4656_v36 = vadd.f32 %v4655_v13, %v4654_v42  ;;  %v4730_v53 = vrot.slane %v4729_v50, 4  ;;  %v4714_v46 = vadd.f32 %v4713_v33, %v4712_v30  ;;  %v12280_v9 = vld [vmem:[%s10704_s7 + $0x1b0] sm:$0xff]  }
 0x3a1   : > { %v8098_v4 = vsel %vm6848_vm7, %v8097_v3, %v8096_v29  ;;  %v12272_v63 = vsel %vm6836_vm0, %v8103_v58, %v7519_v35  ;;  %v3829_v10 = vmul.f32 %v8831_v48, %v2125_v15  ;;  %v7005_v39 = vsel %vm6848_vm7, %v7004_v20, %v7003_v59 }
 0x3a2   : > { %v4657_v55 = vrot.slane %v4656_v36, 1  ;;  %v8100_v27 = vsel %vm6851_vm8, %v8099_v61, %v8098_v4  ;;  %v2406_v22 = vperm.slane %v10825_v54, 4  ;;  %v2420_v38 = vperm.slane %v10825_v54, 6  ;;  %v2146_v61 = vpop.permute.xlu0 %2145 }
 0x3a3   : > { %v4680_v11 = vsel %vm3986_vm3, %v3829_v10, 0.0  ;;  %v2434_v58 = vperm.slane %v10810_v62, 0  ;;  %v8830_v30 = vunpack.c.l.bf16 %v9192_v41  ;;  %v7010_v6 = vrot.slane %v12204_v14, 7 }
 0x3a4   : > { %v4658_v44 = vadd.f32 %v4657_v55, %v4656_v36  ;;  %v4731_v16 = vadd.f32 %v4730_v53, %v4729_v50  ;;  %v4681_v1 = vrot.slane %v4680_v11, 4  ;;  %2411 = vperm.xlu1 %9283, %v2406_v22   ;;  %v12288_v17 = vadd.f32 %v5930_v28, %v4693_v56  ;;  %2425 = vperm.xlu2 %9285, %v2420_v38   ;;  %v12323_v22 = vld [vmem:[%s10704_s7 + $0x1c0] sm:$0xff]  }
 0x3a5   : > { %2439 = vperm.xlu0 %9284, %v2434_v58   ;;  %v3828_v18 = vmul.f32 %v8830_v30, %v2118_v49  ;;  %v8851_v7 = vunpack.c.h.bf16 %v12280_v9  ;;  %v8838_v12 = vunpack.c.l.bf16 %v12199_v24  ;;  %v12294_v15 = vadd.f32 %v5933_v37, %v4714_v46  ;;  %v12326_v49 = vld [vmem:[%s10785_s10 + $0x68] sm:$0xff] }
 0x3a6   : > { %v6418_v45 = vadd.f32 %v5926_v60, %v4658_v44  ;;  %v7007_v26 = vsel %vm6851_vm8, %v7006_v19, %v7005_v39  ;;  %v4682_v42 = vadd.f32 %v4681_v1, %v4680_v11  ;;  %v5929_v28 = vrot.slane %v12157_v5, 3  ;;  %v2139_v44 = vpop.permute.xlu1 %2138 }
 0x3a7   : > { %v4673_v41 = vsel %vm3986_vm3, %v3828_v18, 0.0  ;;  %v3839_v23 = vmul.f32 %v8851_v7, %v2195_v43  ;;  %v3832_v47 = vmul.f32 %v8838_v12, %v2146_v61  ;;  %v4732_v24 = vrot.slane %v4731_v16, 2  ;;  %v2216_v18 = vpop.permute.xlu2 %2215 }
 0x3a8   : > { %v7008_v51 = vrot.slane %v6418_v45, 1  ;;  %v7518_v56 = vmul.f32 %v6418_v45, %v6418_v45  ;;  %v4683_v33 = vrot.slane %v4682_v42, 2  ;;  %v4674_v13 = vrot.slane %v4673_v41, 4 }
 0x3a9   : > { %v4750_v37 = vsel %vm3986_vm3, %v3839_v23, 0.0  ;;  %v4701_v34 = vsel %vm3986_vm3, %v3832_v47, 0.0  ;;  %v2427_v32 = vperm.slane %v10825_v54, 7  ;;  %v2441_v48 = vperm.slane %v10810_v62, 1 }
 0x3aa   : > { %v7009_v19 = vsel %vm6854_vm9, %v7008_v51, %v7007_v26  ;;  %v8101_v0 = vrot.slane %v7518_v56, 1  ;;  %v4684_v50 = vadd.f32 %v4683_v33, %v4682_v42  ;;  %v4675_v59 = vadd.f32 %v4674_v13, %v4673_v41  ;;  %v2167_v42 = vpop.permute.xlu0 %2166 }
 0x3ab   : > { %7333 = vst.msk [vmem:[%s11055_s13 + $0x58] sm:$0xff] %vm3986_vm3, %v7009_v19  ;;  %v7375_v3 = vsel %vm3986_vm3, %v7009_v19, 0.0  ;;  %v4751_v35 = vrot.slane %v4750_v37, 4  ;;  %v4702_v60 = vrot.slane %v4701_v34, 4  ;;  %v4733_v29 = vadd.f32 %v4732_v24, %v4731_v16  ;;  %v12330_v16 = vld [vmem:[%s10704_s7 + $0x1a0] sm:$0xff]  }
 0x3ac   : > { %v12310_v20 = vadd.f32 %v7375_v3, %v12251_v52  ;;  %v8102_v54 = vsel %vm6854_vm9, %v8101_v0, %v8100_v27  ;;  %v4685_v36 = vrot.slane %v4684_v50, 1  ;;  %2432 = vperm.xlu1 %9283, %v2427_v32   ;;  %v4676_v4 = vrot.slane %v4675_v59, 2  ;;  %2446 = vperm.xlu2 %9285, %v2441_v48  }
 0x3ad   : > { %v8436_v53 = vsel %vm3986_vm3, %v8102_v54, 0.0  ;;  %v4752_v46 = vadd.f32 %v4751_v35, %v4750_v37  ;;  %v4703_v10 = vadd.f32 %v4702_v60, %v4701_v34  ;;  %v7016_v39 = vrot.slane %v12288_v17, 4 }
 0x3ae   : > { %v12317_v55 = vmul.f32 %v12288_v17, %v12288_v17  ;;  %v12320_v52 = vadd.f32 %v8436_v53, %v12254_v8  ;;  %v4686_v27 = vadd.f32 %v4685_v36, %v4684_v50  ;;  %v4677_v11 = vadd.f32 %v4676_v4, %v4675_v59 }
 0x3af   : > { %v4753_v38 = vrot.slane %v4752_v46, 2  ;;  %v4704_v58 = vrot.slane %v4703_v10, 2  ;;  %v2455_v30 = vperm.slane %v10810_v62, 3  ;;  %v12334_v1 = vmul.f32 %v12294_v15, %v12294_v15 }
 0x3b0   : > { %v4734_v43 = vrot.slane %v4733_v29, 1  ;;  %v5928_v8 = vrot.slane %v12157_v5, 2  ;;  %v8835_v61 = vunpack.c.h.bf16 %v12145_v21  ;;  %v12338_v7 = vadd.f32 %v5929_v28, %v4686_v27 }
 0x3b1   : > { %v4678_v12 = vrot.slane %v4677_v11, 1  ;;  %v4754_v45 = vadd.f32 %v4753_v38, %v4752_v46  ;;  %2460 = vperm.xlu0 %9284, %v2455_v30   ;;  %v8858_v26 = vunpack.c.l.bf16 %v12323_v22  ;;  %v8109_v41 = vrot.slane %v12317_v55, 4  ;;  %v12364_v30 = vld [vmem:[%s10704_s7 + $0x1c8] sm:$0xff]  }
 0x3b2   : > { %v5935_v23 = vrot.slane %v12326_v49, 2  ;;  %v3831_v47 = vmul.f32 %v8835_v61, %v2139_v44  ;;  %v8843_v51 = vunpack.c.h.bf16 %v12330_v16  ;;  %v7022_v56 = vrot.slane %v12294_v15, 1  ;;  %v12413_v15 = vld [vmem:[%s10704_s7 + $0x1b8] sm:$0xff]  }
 0x3b3   : > { %v4679_v24 = vadd.f32 %v4678_v12, %v4677_v11  ;;  %v4705_v21 = vadd.f32 %v4704_v58, %v4703_v10  ;;  %v3842_v33 = vmul.f32 %v8858_v26, %v2216_v18  ;;  %v8115_v28 = vrot.slane %v12334_v1, 1 }
 0x3b4   : > { %v4735_v13 = vadd.f32 %v4734_v43, %v4733_v29  ;;  %v4694_v37 = vsel %vm3986_vm3, %v3831_v47, 0.0  ;;  %v3835_v34 = vmul.f32 %v8843_v51, %v2167_v42  ;;  %v7522_v32 = vmul.f32 %v12338_v7, %v12338_v7  ;;  %v2160_v42 = vpop.permute.xlu1 %2159 }
 0x3b5   : > { %v6421_v19 = vadd.f32 %v5928_v8, %v4679_v24  ;;  %v4755_v0 = vrot.slane %v4754_v45, 1  ;;  %v4695_v50 = vrot.slane %v4694_v37, 4  ;;  %v4771_v48 = vsel %vm3986_vm3, %v3842_v33, 0.0  ;;  %v2188_v24 = vpop.permute.xlu0 %2187 }
 0x3b6   : > { %v4722_v3 = vsel %vm3986_vm3, %v3835_v34, 0.0  ;;  %v2448_v59 = vperm.slane %v10810_v62, 2  ;;  %v2462_v35 = vperm.slane %v10810_v62, 4  ;;  %v7011_v60 = vsel %vm6836_vm0, %v7010_v6, %v12257_v25 }
 0x3b7   : > { %v7521_v54 = vmul.f32 %v6421_v19, %v6421_v19  ;;  %v5938_v29 = vrot.slane %v12326_v49, 5  ;;  %v4706_v36 = vrot.slane %v4705_v21, 1  ;;  %v4696_v53 = vadd.f32 %v4695_v50, %v4694_v37 }
 0x3b8   : > { %v4772_v4 = vrot.slane %v4771_v48, 4  ;;  %v4723_v46 = vrot.slane %v4722_v3, 4  ;;  %2453 = vperm.xlu1 %9283, %v2448_v59   ;;  %2467 = vperm.xlu2 %9285, %v2462_v35   ;;  %v2476_v10 = vperm.slane %v10810_v62, 6  ;;  %v12359_v55 = vadd.f32 %v5935_v23, %v4735_v13  ;;  %v2237_v23 = vpop.permute.xlu2 %2236 }
 0x3b9   : > { %v8105_v27 = vrot.slane %v7521_v54, 6  ;;  %v4756_v11 = vadd.f32 %v4755_v0, %v4754_v45  ;;  %v5932_v14 = vrot.slane %v12157_v5, 6  ;;  %v8107_v38 = vrot.slane %v7522_v32, 5 }
 0x3ba   : > { %v7012_v25 = vrot.slane %v6421_v19, 6  ;;  %v5931_v6 = vrot.slane %v12157_v5, 5  ;;  %v4697_v58 = vrot.slane %v4696_v53, 2  ;;  %2481 = vperm.xlu0 %9284, %v2476_v10   ;;  %v7014_v44 = vrot.slane %v12338_v7, 5 }
 0x3bb   : > { %v8106_v43 = vsel %vm6839_vm4, %v8105_v27, %v12272_v63  ;;  %v4707_v8 = vadd.f32 %v4706_v36, %v4705_v21  ;;  %v4773_v61 = vadd.f32 %v4772_v4, %v4771_v48  ;;  %v5934_v45 = vrot.slane %v12326_v49, 1 }
 0x3bc   : > { %v8108_v18 = vsel %vm6842_vm5, %v8107_v38, %v8106_v43  ;;  %v4698_v12 = vadd.f32 %v4697_v58, %v4696_v53  ;;  %v4724_v26 = vadd.f32 %v4723_v46, %v4722_v3  ;;  %v12371_v5 = vadd.f32 %v5938_v29, %v4756_v11  ;;  %v14601_v46 = vld [vmem:[#allocation12_spill] sm:$0xff] }
 0x3bd   : > { %v8110_v47 = vsel %vm6845_vm6, %v8109_v41, %v8108_v18  ;;  %v8842_v51 = vunpack.c.l.bf16 %v12330_v16  ;;  %v8863_v7 = vunpack.c.h.bf16 %v12364_v30  ;;  %v7013_v63 = vsel %vm6839_vm4, %v7012_v25, %v7011_v60 }
 0x3be   : > { %v4699_v21 = vrot.slane %v4698_v12, 1  ;;  %v4725_v33 = vrot.slane %v4724_v26, 2  ;;  %v8850_v13 = vunpack.c.l.bf16 %v12280_v9  ;;  %v6425_v37 = vadd.f32 %v5932_v14, %v4707_v8 }
 0x3bf   : > { %v4774_v34 = vrot.slane %v4773_v61, 2  ;;  %v3834_v32 = vmul.f32 %v8842_v51, %v2160_v42  ;;  %v3845_v19 = vmul.f32 %v8863_v7, %v2237_v23  ;;  %v2469_v41 = vperm.slane %v10810_v62, 5  ;;  %v12401_v7 = vld [vmem:[%s10704_s7 + $0x1d8] sm:$0xff]  }
 0x3c0   : > { %v4700_v0 = vadd.f32 %v4699_v21, %v4698_v12  ;;  %v4726_v50 = vadd.f32 %v4725_v33, %v4724_v26  ;;  %v3838_v48 = vmul.f32 %v8850_v13, %v2188_v24  ;;  %v7015_v16 = vsel %vm6842_vm5, %v7014_v44, %v7013_v63  ;;  %v2181_v26 = vpop.permute.xlu1 %2180 }
 0x3c1   : > { %v4715_v3 = vsel %vm3986_vm3, %v3834_v32, 0.0  ;;  %v4792_v59 = vsel %vm3986_vm3, %v3845_v19, 0.0  ;;  %v2483_v35 = vperm.slane %v10810_v62, 7  ;;  %2474 = vperm.xlu1 %9283, %v2469_v41   ;;  %v7020_v36 = vrot.slane %v6425_v37, 2 }
 0x3c2   : > { %v6424_v60 = vadd.f32 %v5931_v6, %v4700_v0  ;;  %v4727_v54 = vrot.slane %v4726_v50, 1  ;;  %v4716_v9 = vrot.slane %v4715_v3, 4  ;;  %v4793_v29 = vrot.slane %v4792_v59, 4 }
 0x3c3   : > { %v7525_v53 = vmul.f32 %v6425_v37, %v6425_v37  ;;  %v4743_v4 = vsel %vm3986_vm3, %v3838_v48, 0.0  ;;  %2488 = vperm.xlu2 %9285, %v2483_v35   ;;  %v2497_v10 = vperm.slane %v14601_v46, 1  ;;  %v4775_v14 = vadd.f32 %v4774_v34, %v4773_v61  ;;  %v2258_v34 = vpop.permute.xlu2 %2257 }
 0x3c4   : > { %v7018_v27 = vrot.slane %v6424_v60, 3  ;;  %v7524_v11 = vmul.f32 %v6424_v60, %v6424_v60  ;;  %v4717_v38 = vadd.f32 %v4716_v9, %v4715_v3  ;;  %v7017_v62 = vsel %vm6845_vm6, %v7016_v39, %v7015_v16  ;;  %v12424_v3 = vld [vmem:[%s10785_s10 + $0x70] sm:$0xff] }
 0x3c5   : > { %v4728_v25 = vadd.f32 %v4727_v54, %v4726_v50  ;;  %v4744_v6 = vrot.slane %v4743_v4, 4  ;;  %2502 = vperm.xlu0 %9284, %v2497_v10   ;;  %v8847_v58 = vunpack.c.h.bf16 %v12239_v2  ;;  %v4794_v18 = vadd.f32 %v4793_v29, %v4792_v59  ;;  %v2209_v50 = vpop.permute.xlu0 %2208 }
 0x3c6   : > { %v7019_v44 = vsel %vm6848_vm7, %v7018_v27, %v7017_v62  ;;  %v8111_v43 = vrot.slane %v7524_v11, 3  ;;  %v4718_v8 = vrot.slane %v4717_v38, 2  ;;  %v12392_v61 = vmul.f32 %v12359_v55, %v12359_v55 }
 0x3c7   : > { %v8113_v17 = vrot.slane %v7525_v53, 2  ;;  %v7021_v39 = vsel %vm6851_vm8, %v7020_v36, %v7019_v44  ;;  %v4745_v12 = vadd.f32 %v4744_v6, %v4743_v4  ;;  %v7026_v42 = vrot.slane %v12359_v55, 6 }
 0x3c8   : > { %v7023_v2 = vsel %vm6854_vm9, %v7022_v56, %v7021_v39  ;;  %v8112_v23 = vsel %vm6848_vm7, %v8111_v43, %v8110_v47  ;;  %v4776_v51 = vrot.slane %v4775_v14, 1  ;;  %v12405_v24 = vmul.f32 %v12371_v5, %v12371_v5 }
 0x3c9   : > { %7334 = vst.msk [vmem:[%s11055_s13 + $0x60] sm:$0xff] %vm3986_vm3, %v7023_v2  ;;  %v8114_v63 = vsel %vm6851_vm8, %v8113_v17, %v8112_v23  ;;  %v12410_v21 = vadd.f32 %v5934_v45, %v4728_v25  ;;  %v4719_v33 = vadd.f32 %v4718_v8, %v4717_v38  ;;  %v4795_v47 = vrot.slane %v4794_v18, 2  ;;  %v12443_v23 = vld [vmem:[%s10704_s7 + $0x1e0] sm:$0xff]  }
 0x3ca   : > { %v8116_v56 = vsel %vm6854_vm9, %v8115_v28, %v8114_v63  ;;  %v4746_v13 = vrot.slane %v4745_v12, 2  ;;  %v3837_v37 = vmul.f32 %v8847_v58, %v2181_v26  ;;  %v8119_v32 = vrot.slane %v12392_v61, 6 }
 0x3cb   : > { %v7032_v19 = vrot.slane %v12371_v5, 3  ;;  %v4720_v0 = vrot.slane %v4719_v33, 1  ;;  %v8870_v45 = vunpack.c.l.bf16 %v12401_v7  ;;  %v4777_v48 = vadd.f32 %v4776_v51, %v4775_v14 }
 0x3cc   : > { %v4747_v41 = vadd.f32 %v4746_v13, %v4745_v12  ;;  %v4736_v16 = vsel %vm3986_vm3, %v3837_v37, 0.0  ;;  %v8855_v1 = vunpack.c.h.bf16 %v12413_v15  ;;  %v7528_v28 = vmul.f32 %v12410_v21, %v12410_v21  ;;  %v2202_v13 = vpop.permute.xlu1 %2201 }
 0x3cd   : > { %v4721_v59 = vadd.f32 %v4720_v0, %v4719_v33  ;;  %v4737_v35 = vrot.slane %v4736_v16, 4  ;;  %v3848_v60 = vmul.f32 %v8870_v45, %v2258_v34  ;;  %v8125_v54 = vrot.slane %v12405_v24, 3 }
 0x3ce   : > { %v4796_v9 = vadd.f32 %v4795_v47, %v4794_v18  ;;  %v3841_v29 = vmul.f32 %v8855_v1, %v2209_v50  ;;  %v2490_v36 = vperm.slane %v14601_v46, 0  ;;  %v4748_v4 = vrot.slane %v4747_v41, 1  ;;  %v2279_v50 = vpop.permute.xlu2 %2278  ;;  %v2230_v1 = vpop.permute.xlu0 %2229 }
 0x3cf   : > { %v6427_v53 = vadd.f32 %v12326_v49, %v4721_v59  ;;  %v4738_v10 = vadd.f32 %v4737_v35, %v4736_v16  ;;  %v4813_v27 = vsel %vm3986_vm3, %v3848_v60, 0.0  ;;  %v12433_v11 = vadd.f32 %v12424_v3, %v4777_v48 }
 0x3d0   : > { %v4814_v14 = vrot.slane %v4813_v27, 4  ;;  %v4764_v38 = vsel %vm3986_vm3, %v3841_v29, 0.0  ;;  %2495 = vperm.xlu1 %9283, %v2490_v36   ;;  %v2504_v62 = vperm.slane %v14601_v46, 2  ;;  %v8117_v25 = vrot.slane %v7528_v28, 7 }
 0x3d1   : > { %v7527_v6 = vmul.f32 %v6427_v53, %v6427_v53  ;;  %v5943_v58 = vrot.slane %v12424_v3, 3  ;;  %v5937_v44 = vrot.slane %v12326_v49, 4  ;;  %v4797_v43 = vrot.slane %v4796_v9, 1 }
 0x3d2   : > { %v5936_v8 = vrot.slane %v12326_v49, 3  ;;  %v4739_v18 = vrot.slane %v4738_v10, 2  ;;  %v4815_v61 = vadd.f32 %v4814_v14, %v4813_v27  ;;  %2509 = vperm.xlu2 %9285, %v2504_v62   ;;  %v4749_v39 = vadd.f32 %v4748_v4, %v4747_v41 }
 0x3d3   : > { %v8118_v17 = vsel %vm6836_vm0, %v8117_v25, %v7527_v6  ;;  %v4765_v12 = vrot.slane %v4764_v38, 4  ;;  %v2518_v26 = vperm.slane %v14601_v46, 4  ;;  %v12447_v51 = vmul.f32 %v12433_v11, %v12433_v11 }
 0x3d4   : > { %v7024_v63 = vrot.slane %v12410_v21, 7  ;;  %v8120_v33 = vsel %vm6839_vm4, %v8119_v32, %v8118_v17  ;;  %v4740_v47 = vadd.f32 %v4739_v18, %v4738_v10  ;;  %v12452_v37 = vsel %vm3986_vm3, %v7023_v2, 0.0 }
 0x3d5   : > { %v4816_v34 = vrot.slane %v4815_v61, 2  ;;  %v4766_v0 = vadd.f32 %v4765_v12, %v4764_v38  ;;  %2523 = vperm.xlu0 %9284, %v2518_v26   ;;  %v8854_v45 = vunpack.c.l.bf16 %v12413_v15  ;;  %v12456_v48 = vsel %vm3986_vm3, %v8116_v56, 0.0 }
 0x3d6   : > { %v4798_v41 = vadd.f32 %v4797_v43, %v4796_v9  ;;  %v4741_v16 = vrot.slane %v4740_v47, 1  ;;  %v8875_v21 = vunpack.c.h.bf16 %v12443_v23  ;;  %v6431_v32 = vadd.f32 %v5937_v44, %v4749_v39 }
 0x3d7   : > { %v4767_v28 = vrot.slane %v4766_v0, 2  ;;  %v3840_v59 = vmul.f32 %v8854_v45, %v2202_v13  ;;  %v8862_v2 = vunpack.c.l.bf16 %v12364_v30  ;;  %v7025_v35 = vsel %vm6836_vm0, %v7024_v63, %v6427_v53 }
 0x3d8   : > { %v4742_v60 = vadd.f32 %v4741_v16, %v4740_v47  ;;  %v3851_v29 = vmul.f32 %v8875_v21, %v2279_v50  ;;  %v2511_v15 = vperm.slane %v14601_v46, 3  ;;  %v4817_v36 = vadd.f32 %v4816_v34, %v4815_v61 }
 0x3d9   : > { %v4768_v4 = vadd.f32 %v4767_v28, %v4766_v0  ;;  %v4757_v56 = vsel %vm3986_vm3, %v3840_v59, 0.0  ;;  %v3844_v9 = vmul.f32 %v8862_v2, %v2230_v1  ;;  %v2525_v38 = vperm.slane %v14601_v46, 5  ;;  %v12479_v28 = vld [vmem:[%s10704_s7 + $0x1f0] sm:$0xff]  }
 0x3da   : > { %v6430_v10 = vadd.f32 %v5936_v8, %v4742_v60  ;;  %v4758_v27 = vrot.slane %v4757_v56, 4  ;;  %v4834_v14 = vsel %vm3986_vm3, %v3851_v29, 0.0  ;;  %2516 = vperm.xlu1 %9283, %v2511_v15   ;;  %v7531_v62 = vmul.f32 %v6431_v32, %v6431_v32  ;;  %v2300_v15 = vpop.permute.xlu2 %2299 }
 0x3db   : > { %v4769_v30 = vrot.slane %v4768_v4, 1  ;;  %v4835_v25 = vrot.slane %v4834_v14, 4  ;;  %v4785_v53 = vsel %vm3986_vm3, %v3844_v9, 0.0  ;;  %2530 = vperm.xlu2 %9285, %v2525_v38   ;;  %v4818_v61 = vrot.slane %v4817_v36, 1 }
 0x3dc   : > { %v7028_v6 = vrot.slane %v6430_v10, 5  ;;  %v7530_v44 = vmul.f32 %v6430_v10, %v6430_v10  ;;  %v4759_v43 = vadd.f32 %v4758_v27, %v4757_v56  ;;  %v4786_v18 = vrot.slane %v4785_v53, 4  ;;  %v2251_v27 = vpop.permute.xlu0 %2250 }
 0x3dd   : > { %v5940_v17 = vrot.slane %v12326_v49, 7  ;;  %v4836_v8 = vadd.f32 %v4835_v25, %v4834_v14  ;;  %v2539_v39 = vperm.slane %v14601_v46, 7  ;;  %v4770_v26 = vadd.f32 %v4769_v30, %v4768_v4  ;;  %v12490_v4 = vld [vmem:[%s10704_s7 + $0x1d0] sm:$0xff]  }
 0x3de   : > { %v8121_v12 = vrot.slane %v7530_v44, 5  ;;  %v4760_v63 = vrot.slane %v4759_v43, 2  ;;  %v4787_v47 = vadd.f32 %v4786_v18, %v4785_v53  ;;  %v7027_v13 = vsel %vm6839_vm4, %v7026_v42, %v7025_v35 }
 0x3df   : > { %v12473_v34 = vadd.f32 %v5943_v58, %v4798_v41  ;;  %v8123_v0 = vrot.slane %v7531_v62, 4  ;;  %v5946_v45 = vrot.slane %v12424_v3, 6  ;;  %2544 = vperm.xlu0 %9284, %v2539_v39   ;;  %v7029_v50 = vsel %vm6842_vm5, %v7028_v6, %v7027_v13  ;;  %v12484_v41 = vld [vmem:[%s10785_s10 + $0x78] sm:$0xff] }
 0x3e0   : > { %v8122_v16 = vsel %vm6842_vm5, %v8121_v12, %v8120_v33  ;;  %v4761_v21 = vadd.f32 %v4760_v63, %v4759_v43  ;;  %v4837_v1 = vrot.slane %v4836_v8, 2  ;;  %v7030_v55 = vrot.slane %v6431_v32, 4  ;;  %v2223_v33 = vpop.permute.xlu1 %2222 }
 0x3e1   : > { %v8124_v42 = vsel %vm6845_vm6, %v8123_v0, %v8122_v16  ;;  %v4819_v59 = vadd.f32 %v4818_v61, %v4817_v36  ;;  %v5939_v58 = vrot.slane %v12326_v49, 6  ;;  %v6434_v2 = vadd.f32 %v5940_v17, %v4770_v26 }
 0x3e2   : > { %v4762_v35 = vrot.slane %v4761_v21, 1  ;;  %v8126_v60 = vsel %vm6848_vm7, %v8125_v54, %v8124_v42  ;;  %v4788_v29 = vrot.slane %v4787_v47, 2  ;;  %v12494_v32 = vmul.f32 %v12473_v34, %v12473_v34 }
 0x3e3   : > { %v7031_v36 = vsel %vm6845_vm6, %v7030_v55, %v7029_v50  ;;  %v8859_v49 = vunpack.c.h.bf16 %v12323_v22  ;;  %v8882_v56 = vunpack.c.l.bf16 %v12479_v28  ;;  %v5948_v24 = vrot.slane %v12484_v41, 1 }
 0x3e4   : > { %v4763_v9 = vadd.f32 %v4762_v35, %v4761_v21  ;;  %v4838_v10 = vadd.f32 %v4837_v1, %v4836_v8  ;;  %v4789_v54 = vadd.f32 %v4788_v29, %v4787_v47  ;;  %v12500_v14 = vadd.f32 %v5946_v45, %v4819_v59 }
 0x3e5   : > { %v3843_v38 = vmul.f32 %v8859_v49, %v2223_v33  ;;  %v3854_v62 = vmul.f32 %v8882_v56, %v2300_v15  ;;  %v8867_v30 = vunpack.c.h.bf16 %v12490_v4  ;;  %v7534_v25 = vmul.f32 %v6434_v2, %v6434_v2 }
 0x3e6   : > { %v6433_v53 = vadd.f32 %v5939_v58, %v4763_v9  ;;  %v7033_v22 = vsel %vm6848_vm7, %v7032_v19, %v7031_v36  ;;  %v2532_v6 = vperm.slane %v14601_v46, 6  ;;  %v2546_v61 = vperm.slane %v12064_v31, 0  ;;  %v12523_v58 = vld [vmem:[%s10704_s7 + $0x1f8] sm:$0xff]  }
 0x3e7   : > { %v4778_v44 = vsel %vm3986_vm3, %v3843_v38, 0.0  ;;  %v4855_v43 = vsel %vm3986_vm3, %v3854_v62, 0.0  ;;  %v3847_v18 = vmul.f32 %v8867_v30, %v2251_v27  ;;  %v4839_v39 = vrot.slane %v4838_v10, 1 }
 0x3e8   : > { %v7034_v17 = vrot.slane %v6433_v53, 2  ;;  %v7533_v8 = vmul.f32 %v6433_v53, %v6433_v53  ;;  %v4790_v12 = vrot.slane %v4789_v54, 1  ;;  %2537 = vperm.xlu1 %9283, %v2532_v6   ;;  %v7036_v26 = vrot.slane %v6434_v2, 1  ;;  %2551 = vperm.xlu2 %9285, %v2546_v61   ;;  %v2244_v15 = vpop.permute.xlu1 %2243 }
 0x3e9   : > { %v4779_v63 = vrot.slane %v4778_v44, 4  ;;  %v4806_v5 = vsel %vm3986_vm3, %v3847_v18, 0.0  ;;  %v2560_v46 = vperm.slane %v12064_v31, 2  ;;  %v5942_v13 = vrot.slane %v12424_v3, 2 }
 0x3ea   : > { %v7035_v19 = vsel %vm6851_vm8, %v7034_v17, %v7033_v22  ;;  %v8127_v47 = vrot.slane %v7533_v8, 2  ;;  %v4856_v0 = vrot.slane %v4855_v43, 4  ;;  %v12516_v45 = vmul.f32 %v12500_v14, %v12500_v14  ;;  %v2272_v22 = vpop.permute.xlu0 %2271 }
 0x3eb   : > { %v8129_v50 = vrot.slane %v7534_v25, 1  ;;  %v7037_v16 = vsel %vm6854_vm9, %v7036_v26, %v7035_v19  ;;  %v4780_v21 = vadd.f32 %v4779_v63, %v4778_v44  ;;  %2565 = vperm.xlu0 %9284, %v2560_v46   ;;  %v4840_v55 = vadd.f32 %v4839_v39, %v4838_v10 }
 0x3ec   : > { %7335 = vst.msk [vmem:[%s11055_s13 + $0x68] sm:$0xff] %vm3986_vm3, %v7037_v16  ;;  %v8128_v1 = vsel %vm6851_vm8, %v8127_v47, %v8126_v60  ;;  %v4791_v42 = vadd.f32 %v4790_v12, %v4789_v54  ;;  %v4807_v59 = vrot.slane %v4806_v5, 4  ;;  %v7042_v2 = vrot.slane %v12473_v34, 5  ;;  %v2321_v60 = vpop.permute.xlu2 %2320 }
 0x3ed   : > { %v8135_v35 = vrot.slane %v12494_v32, 5  ;;  %v8130_v29 = vsel %vm6854_vm9, %v8129_v50, %v8128_v1  ;;  %v4781_v33 = vrot.slane %v4780_v21, 2  ;;  %v7048_v36 = vrot.slane %v12500_v14, 2  ;;  %v9204_v32 = vld [vmem:[%s10704_s7 + $0x1e8] sm:$0xff]  }
 0x3ee   : > { %v4857_v49 = vadd.f32 %v4856_v0, %v4855_v43  ;;  %v4808_v56 = vadd.f32 %v4807_v59, %v4806_v5  ;;  %v8866_v9 = vunpack.c.l.bf16 %v12490_v4  ;;  %v8141_v10 = vrot.slane %v12516_v45, 2 }
 0x3ef   : > { %v5941_v54 = vrot.slane %v12424_v3, 1  ;;  %v4782_v27 = vadd.f32 %v4781_v33, %v4780_v21  ;;  %v8887_v38 = vunpack.c.h.bf16 %v12523_v58  ;;  %v12533_v62 = vadd.f32 %v5948_v24, %v4840_v55 }
 0x3f0   : > { %v12535_v30 = vadd.f32 %v5942_v13, %v4791_v42  ;;  %v4809_v25 = vrot.slane %v4808_v56, 2  ;;  %v3846_v53 = vmul.f32 %v8866_v9, %v2244_v15  ;;  %v8874_v43 = vunpack.c.l.bf16 %v12443_v23 }
 0x3f1   : > { %v4783_v6 = vrot.slane %v4782_v27, 1  ;;  %v3857_v44 = vmul.f32 %v8887_v38, %v2321_v60  ;;  %v2553_v4 = vperm.slane %v12064_v31, 1  ;;  %v4858_v18 = vrot.slane %v4857_v49, 2 }
 0x3f2   : > { %v4810_v61 = vadd.f32 %v4809_v25, %v4808_v56  ;;  %v4799_v17 = vsel %vm3986_vm3, %v3846_v53, 0.0  ;;  %v2567_v8 = vperm.slane %v12064_v31, 3  ;;  %v3850_v26 = vmul.f32 %v8874_v43, %v2272_v22  ;;  %v2265_v22 = vpop.permute.xlu1 %2264 }
 0x3f3   : > { %v4784_v39 = vadd.f32 %v4783_v6, %v4782_v27  ;;  %v4800_v24 = vrot.slane %v4799_v17, 4  ;;  %v4876_v12 = vsel %vm3986_vm3, %v3857_v44, 0.0  ;;  %2558 = vperm.xlu1 %9283, %v2553_v4   ;;  %v12544_v63 = vmul.f32 %v12533_v62, %v12533_v62 }
 0x3f4   : > { %v4811_v5 = vrot.slane %v4810_v61, 1  ;;  %v4877_v23 = vrot.slane %v4876_v12, 4  ;;  %2572 = vperm.xlu2 %9285, %v2567_v8   ;;  %v2581_v46 = vperm.slane %v12064_v31, 5  ;;  %v5951_v47 = vrot.slane %v12484_v41, 4 }
 0x3f5   : > { %v6436_v19 = vadd.f32 %v5941_v54, %v4784_v39  ;;  %v4801_v13 = vadd.f32 %v4800_v24, %v4799_v17  ;;  %v4827_v0 = vsel %vm3986_vm3, %v3850_v26, 0.0  ;;  %v7052_v50 = vrot.slane %v12533_v62, 7  ;;  %v2342_v26 = vpop.permute.xlu2 %2341 }
 0x3f6   : > { %v7537_v21 = vmul.f32 %v12535_v30, %v12535_v30  ;;  %v5945_v1 = vrot.slane %v12424_v3, 5  ;;  %v4828_v55 = vrot.slane %v4827_v0, 4  ;;  %2586 = vperm.xlu0 %9284, %v2581_v46   ;;  %v4859_v59 = vadd.f32 %v4858_v18, %v4857_v49 }
 0x3f7   : > { %v7536_v42 = vmul.f32 %v6436_v19, %v6436_v19  ;;  %v4812_v33 = vadd.f32 %v4811_v5, %v4810_v61  ;;  %v4802_v15 = vrot.slane %v4801_v13, 2  ;;  %v7379_v56 = vsel %vm3986_vm3, %v7037_v16, 0.0 }
 0x3f8   : > { %v8145_v9 = vrot.slane %v12544_v63, 7  ;;  %v4878_v60 = vadd.f32 %v4877_v23, %v4876_v12  ;;  %v8871_v54 = vunpack.c.h.bf16 %v12401_v7  ;;  %v7038_v27 = vrot.slane %v6436_v19, 7  ;;  %v12564_v7 = vld [vmem:[%s10704_s7 + $0x208] sm:$0xff]  }
 0x3f9   : > { %v8131_v38 = vrot.slane %v7536_v42, 7  ;;  %v4803_v25 = vadd.f32 %v4802_v15, %v4801_v13  ;;  %v4829_v53 = vadd.f32 %v4828_v55, %v4827_v0  ;;  %v8440_v6 = vsel %vm3986_vm3, %v8130_v29, 0.0  ;;  %v2293_v55 = vpop.permute.xlu0 %2292 }
 0x3fa   : > { %v7040_v44 = vrot.slane %v12535_v30, 6  ;;  %v8133_v49 = vrot.slane %v7537_v21, 6  ;;  %v5944_v43 = vrot.slane %v12424_v3, 4  ;;  %v4860_v4 = vrot.slane %v4859_v59, 1 }
 0x3fb   : > { %v8132_v16 = vsel %vm6836_vm0, %v8131_v38, %v12447_v51  ;;  %v12561_v18 = vadd.f32 %v5945_v1, %v4812_v33  ;;  %v4804_v61 = vrot.slane %v4803_v25, 1  ;;  %v4879_v8 = vrot.slane %v4878_v60, 2 }
 0x3fc   : > { %v8134_v17 = vsel %vm6839_vm4, %v8133_v49, %v8132_v16  ;;  %v4830_v39 = vrot.slane %v4829_v53, 2  ;;  %v3849_v29 = vmul.f32 %v8871_v54, %v2265_v22  ;;  %v7039_v30 = vsel %vm6836_vm0, %v7038_v27, %v12433_v11 }
 0x3fd   : > { %v4805_v24 = vadd.f32 %v4804_v61, %v4803_v25  ;;  %v8136_v51 = vsel %vm6842_vm5, %v8135_v35, %v8134_v17  ;;  %v7378_v12 = vadd.f32 %v12452_v37, %v12310_v20  ;;  %v8439_v46 = vadd.f32 %v12456_v48, %v12320_v52 }
 0x3fe   : > { %v4831_v5 = vadd.f32 %v4830_v39, %v4829_v53  ;;  %v4820_v23 = vsel %vm3986_vm3, %v3849_v29, 0.0  ;;  %v8894_v19 = vunpack.c.l.bf16 %v12564_v7  ;;  %v4861_v13 = vadd.f32 %v4860_v4, %v4859_v59  ;;  %v12608_v39 = vld [vmem:[%s10704_s7 + $0x210] sm:$0xff]  }
 0x3ff   : > { %v6439_v0 = vadd.f32 %v5944_v43, %v4805_v24  ;;  %v4821_v11 = vrot.slane %v4820_v23, 4  ;;  %v12578_v21 = vadd.f32 %v7379_v56, %v7378_v12  ;;  %v7540_v35 = vmul.f32 %v12561_v18, %v12561_v18  ;;  %v2286_v12 = vpop.permute.xlu1 %2285 }
 0x400   : > { %v4832_v1 = vrot.slane %v4831_v5, 1  ;;  %v12583_v20 = vadd.f32 %v8440_v6, %v8439_v46  ;;  %v3860_v37 = vmul.f32 %v8894_v19, %v2342_v26  ;;  %v7041_v42 = vsel %vm6839_vm4, %v7040_v44, %v7039_v30  ;;  %v14602_v26 = vld [vmem:[#allocation14_spill] sm:$0xff]  ;;  %v2363_v46 = vpop.permute.xlu2 %2362 }
 0x401   : > { %v7539_v33 = vmul.f32 %v6439_v0, %v6439_v0  ;;  %v4880_v52 = vadd.f32 %v4879_v8, %v4878_v60  ;;  %v4822_v48 = vadd.f32 %v4821_v11, %v4820_v23  ;;  %v7044_v15 = vrot.slane %v6439_v0, 4  ;;  %v2314_v0 = vpop.permute.xlu0 %2313 }
 0x402   : > { %v4833_v59 = vadd.f32 %v4832_v1, %v4831_v5  ;;  %v4897_v54 = vsel %vm3986_vm3, %v3860_v37, 0.0  ;;  %v8879_v56 = vunpack.c.h.bf16 %v9204_v32  ;;  %v12587_v27 = vadd.f32 %v5951_v47, %v4861_v13 }
 0x403   : > { %v7046_v38 = vrot.slane %v12561_v18, 3  ;;  %v8137_v25 = vrot.slane %v7539_v33, 4  ;;  %v5947_v53 = vrot.slane %v12424_v3, 7  ;;  %v8139_v22 = vrot.slane %v7540_v35, 3 }
 0x404   : > { %v12592_v6 = vadd.f32 %v12484_v41, %v4833_v59  ;;  %v4823_v44 = vrot.slane %v4822_v48, 2  ;;  %v4898_v60 = vrot.slane %v4897_v54, 4  ;;  %v7043_v49 = vsel %vm6842_vm5, %v7042_v2, %v7041_v42 }
 0x405   : > { %v8138_v43 = vsel %vm6845_vm6, %v8137_v25, %v8136_v51  ;;  %v4881_v47 = vrot.slane %v4880_v52, 1  ;;  %v3853_v16 = vmul.f32 %v8879_v56, %v2293_v55  ;;  %v7045_v4 = vsel %vm6845_vm6, %v7044_v15, %v7043_v49 }
 0x406   : > { %v8140_v18 = vsel %vm6848_vm7, %v8139_v22, %v8138_v43  ;;  %v7543_v3 = vmul.f32 %v12592_v6, %v12592_v6  ;;  %v4824_v61 = vadd.f32 %v4823_v44, %v4822_v48  ;;  %v4899_v8 = vadd.f32 %v4898_v60, %v4897_v54 }
 0x407   : > { %v8142_v17 = vsel %vm6851_vm8, %v8141_v10, %v8140_v18  ;;  %v4848_v34 = vsel %vm3986_vm3, %v3853_v16, 0.0  ;;  %v2574_v2 = vperm.slane %v12064_v31, 4  ;;  %v2588_v51 = vperm.slane %v12064_v31, 6 }
 0x408   : > { %v12613_v29 = vsel %vm6836_vm0, %v8145_v9, %v7543_v3  ;;  %v4825_v30 = vrot.slane %v4824_v61, 1  ;;  %v4849_v24 = vrot.slane %v4848_v34, 4  ;;  %v5954_v45 = vrot.slane %v12484_v41, 7  ;;  %v12644_v3 = vld [vmem:[%s10785_s10 + $0x80] sm:$0xff] }
 0x409   : > { %v4900_v10 = vrot.slane %v4899_v8, 2  ;;  %2579 = vperm.xlu1 %9283, %v2574_v2   ;;  %v2602_v5 = vperm.slane %v14602_v26, 0  ;;  %v8878_v23 = vunpack.c.l.bf16 %v9204_v32  ;;  %v7047_v19 = vsel %vm6848_vm7, %v7046_v38, %v7045_v4  ;;  %2593 = vperm.xlu2 %9285, %v2588_v51  }
 0x40a   : > { %v4826_v13 = vadd.f32 %v4825_v30, %v4824_v61  ;;  %v4850_v63 = vadd.f32 %v4849_v24, %v4848_v34  ;;  %v8899_v9 = vunpack.c.h.bf16 %v12608_v39  ;;  %v12622_v11 = vmul.f32 %v12587_v27, %v12587_v27 }
 0x40b   : > { %v4882_v35 = vadd.f32 %v4881_v47, %v4880_v52  ;;  %2607 = vperm.xlu0 %9284, %v2602_v5   ;;  %v3852_v1 = vmul.f32 %v8878_v23, %v2286_v12  ;;  %v8886_v37 = vunpack.c.l.bf16 %v12523_v58  ;;  %v5950_v32 = vrot.slane %v12484_v41, 3  ;;  %v12654_v5 = vld [vmem:[%s10704_s7 + $0x220] sm:$0xff]  }
 0x40c   : > { %v6442_v55 = vadd.f32 %v5947_v53, %v4826_v13  ;;  %v4851_v42 = vrot.slane %v4850_v63, 2  ;;  %v3863_v33 = vmul.f32 %v8899_v9, %v2363_v46  ;;  %v7049_v48 = vsel %vm6851_vm8, %v7048_v36, %v7047_v19  ;;  %v12657_v23 = vld [vmem:[%s10704_s7 + $0x200] sm:$0xff]  }
 0x40d   : > { %v4901_v15 = vadd.f32 %v4900_v10, %v4899_v8  ;;  %v4841_v59 = vsel %vm3986_vm3, %v3852_v1, 0.0  ;;  %v3856_v54 = vmul.f32 %v8886_v37, %v2314_v0  ;;  %v2595_v22 = vperm.slane %v12064_v31, 7  ;;  %v2307_v10 = vpop.permute.xlu1 %2306  ;;  %v2335_v1 = vpop.permute.xlu0 %2334 }
 0x40e   : > { %v7050_v56 = vrot.slane %v6442_v55, 1  ;;  %v7542_v52 = vmul.f32 %v6442_v55, %v6442_v55  ;;  %v4852_v38 = vadd.f32 %v4851_v42, %v4850_v63  ;;  %v4842_v25 = vrot.slane %v4841_v59, 4 }
 0x40f   : > { %v4918_v58 = vsel %vm3986_vm3, %v3863_v33, 0.0  ;;  %v4869_v53 = vsel %vm3986_vm3, %v3856_v54, 0.0  ;;  %v2609_v14 = vperm.slane %v14602_v26, 1  ;;  %v2623_v4 = vperm.slane %v14602_v26, 3 }
 0x410   : > { %v7051_v36 = vsel %vm6854_vm9, %v7050_v56, %v7049_v48  ;;  %v8143_v44 = vrot.slane %v7542_v52, 1  ;;  %v4853_v60 = vrot.slane %v4852_v38, 1  ;;  %v4843_v49 = vadd.f32 %v4842_v25, %v4841_v59 }
 0x411   : > { %7336 = vst.msk [vmem:[%s11055_s13 + $0x70] sm:$0xff] %vm3986_vm3, %v7051_v36  ;;  %v7381_v43 = vsel %vm3986_vm3, %v7051_v36, 0.0  ;;  %v4919_v47 = vrot.slane %v4918_v58, 4  ;;  %v4870_v16 = vrot.slane %v4869_v53, 4  ;;  %2600 = vperm.xlu1 %9283, %v2595_v22   ;;  %2614 = vperm.xlu2 %9285, %v2609_v14   ;;  %v7058_v34 = vrot.slane %v12587_v27, 4 }
 0x412   : > { %v12640_v18 = vadd.f32 %v7381_v43, %v12578_v21  ;;  %v8144_v31 = vsel %vm6854_vm9, %v8143_v44, %v8142_v17  ;;  %v4854_v61 = vadd.f32 %v4853_v60, %v4852_v38  ;;  %v4844_v8 = vrot.slane %v4843_v49, 2 }
 0x413   : > { %v12647_v2 = vadd.f32 %v5954_v45, %v4882_v35  ;;  %v8442_v30 = vsel %vm3986_vm3, %v8144_v31, 0.0  ;;  %v4920_v24 = vadd.f32 %v4919_v47, %v4918_v58  ;;  %2628 = vperm.xlu0 %9284, %v2623_v4   ;;  %v4902_v51 = vrot.slane %v4901_v15, 1  ;;  %v2384_v35 = vpop.permute.xlu2 %2383 }
 0x414   : > { %v12651_v21 = vadd.f32 %v8442_v30, %v12583_v20  ;;  %v4845_v12 = vadd.f32 %v4844_v8, %v4843_v49  ;;  %v4871_v17 = vadd.f32 %v4870_v16, %v4869_v53  ;;  %v8151_v46 = vrot.slane %v12622_v11, 4 }
 0x415   : > { %v5956_v45 = vrot.slane %v12644_v3, 2  ;;  %v12661_v19 = vadd.f32 %v5950_v32, %v4854_v61  ;;  %v8883_v13 = vunpack.c.h.bf16 %v12479_v28  ;;  %v5949_v63 = vrot.slane %v12484_v41, 2 }
 0x416   : > { %v4846_v20 = vrot.slane %v4845_v12, 1  ;;  %v4921_v9 = vrot.slane %v4920_v24, 2  ;;  %v4872_v0 = vrot.slane %v4871_v17, 2  ;;  %v7064_v37 = vrot.slane %v12647_v2, 1 }
 0x417   : > { %v3855_v55 = vmul.f32 %v8883_v13, %v2307_v10  ;;  %v8906_v42 = vunpack.c.l.bf16 %v12654_v5  ;;  %v8891_v11 = vunpack.c.h.bf16 %v12657_v23  ;;  %v12670_v32 = vmul.f32 %v12647_v2, %v12647_v2  ;;  %v12697_v13 = vld [vmem:[%s10704_s7 + $0x228] sm:$0xff]  }
 0x418   : > { %v4903_v33 = vadd.f32 %v4902_v51, %v4901_v15  ;;  %v4847_v28 = vadd.f32 %v4846_v20, %v4845_v12  ;;  %v4873_v48 = vadd.f32 %v4872_v0, %v4871_v17  ;;  %v7546_v59 = vmul.f32 %v12661_v19, %v12661_v19 }
 0x419   : > { %v4862_v54 = vsel %vm3986_vm3, %v3855_v55, 0.0  ;;  %v3866_v56 = vmul.f32 %v8906_v42, %v2384_v35  ;;  %v3859_v52 = vmul.f32 %v8891_v11, %v2335_v1  ;;  %v4922_v25 = vadd.f32 %v4921_v9, %v4920_v24  ;;  %v2328_v11 = vpop.permute.xlu1 %2327 }
 0x41a   : > { %v6445_v38 = vadd.f32 %v5949_v63, %v4847_v28  ;;  %v4863_v58 = vrot.slane %v4862_v54, 4  ;;  %v2616_v53 = vperm.slane %v14602_v26, 2  ;;  %v4874_v22 = vrot.slane %v4873_v48, 1 }
 0x41b   : > { %v4939_v14 = vsel %vm3986_vm3, %v3866_v56, 0.0  ;;  %v4890_v36 = vsel %vm3986_vm3, %v3859_v52, 0.0  ;;  %v2630_v15 = vperm.slane %v14602_v26, 4  ;;  %v8157_v44 = vrot.slane %v12670_v32, 1 }
 0x41c   : > { %v12680_v60 = vadd.f32 %v5956_v45, %v4903_v33  ;;  %v7545_v49 = vmul.f32 %v6445_v38, %v6445_v38  ;;  %v4864_v43 = vadd.f32 %v4863_v58, %v4862_v54  ;;  %2621 = vperm.xlu1 %9283, %v2616_v53   ;;  %v7053_v47 = vsel %vm6836_vm0, %v7052_v50, %v12592_v6 }
 0x41d   : > { %v7054_v16 = vrot.slane %v6445_v38, 6  ;;  %v4940_v4 = vrot.slane %v4939_v14, 4  ;;  %2635 = vperm.xlu2 %9285, %v2630_v15   ;;  %v2644_v31 = vperm.slane %v14602_v26, 6  ;;  %v5959_v8 = vrot.slane %v12644_v3, 5 }
 0x41e   : > { %v8147_v61 = vrot.slane %v7545_v49, 6  ;;  %v4865_v30 = vrot.slane %v4864_v43, 2  ;;  %v4891_v24 = vrot.slane %v4890_v36, 4  ;;  %v8149_v51 = vrot.slane %v7546_v59, 5 }
 0x41f   : > { %v4923_v12 = vrot.slane %v4922_v25, 1  ;;  %v5953_v17 = vrot.slane %v12484_v41, 6  ;;  %v4875_v10 = vadd.f32 %v4874_v22, %v4873_v48  ;;  %2649 = vperm.xlu0 %9284, %v2644_v31   ;;  %v12691_v62 = vmul.f32 %v12680_v60, %v12680_v60 }
 0x420   : > { %v8148_v50 = vsel %vm6839_vm4, %v8147_v61, %v12613_v29  ;;  %v5952_v6 = vrot.slane %v12484_v41, 5  ;;  %v4866_v45 = vadd.f32 %v4865_v30, %v4864_v43  ;;  %v7056_v63 = vrot.slane %v12661_v19, 5  ;;  %v2405_v29 = vpop.permute.xlu2 %2404  ;;  %v2356_v19 = vpop.permute.xlu0 %2355  ;;  %v14603_v43 = vld [vmem:[#allocation13_spill] sm:$0xff] }
 0x421   : > { %v7055_v20 = vsel %vm6839_vm4, %v7054_v16, %v7053_v47  ;;  %v8150_v9 = vsel %vm6842_vm5, %v8149_v51, %v8148_v50  ;;  %v4941_v0 = vadd.f32 %v4940_v4, %v4939_v14  ;;  %v5955_v55 = vrot.slane %v12644_v3, 1 }
 0x422   : > { %v4867_v35 = vrot.slane %v4866_v45, 1  ;;  %v8152_v1 = vsel %vm6845_vm6, %v8151_v46, %v8150_v9  ;;  %v4892_v42 = vadd.f32 %v4891_v24, %v4890_v36  ;;  %v4924_v33 = vadd.f32 %v4923_v12, %v4922_v25 }
 0x423   : > { %v6449_v41 = vadd.f32 %v5953_v17, %v4875_v10  ;;  %v8890_v28 = vunpack.c.l.bf16 %v12657_v23  ;;  %v8911_v48 = vunpack.c.h.bf16 %v12697_v13  ;;  %v7057_v59 = vsel %vm6842_vm5, %v7056_v63, %v7055_v20 }
 0x424   : > { %v4868_v54 = vadd.f32 %v4867_v35, %v4866_v45  ;;  %v4893_v56 = vrot.slane %v4892_v42, 2  ;;  %v8898_v52 = vunpack.c.l.bf16 %v12608_v39  ;;  %v4942_v38 = vrot.slane %v4941_v0, 2 }
 0x425   : > { %v3858_v46 = vmul.f32 %v8890_v28, %v2328_v11  ;;  %v3869_v58 = vmul.f32 %v8911_v48, %v2405_v29  ;;  %v2637_v53 = vperm.slane %v14602_v26, 5  ;;  %v2651_v36 = vperm.slane %v14602_v26, 7  ;;  %v2349_v11 = vpop.permute.xlu1 %2348  ;;  %v12735_v29 = vld [vmem:[%s10704_s7 + $0x238] sm:$0xff]   ;;  %v14606_v48 = vld [vmem:[#allocation8_spill] sm:$0xff] }
 0x426   : > { %v6448_v22 = vadd.f32 %v5952_v6, %v4868_v54  ;;  %v4894_v14 = vadd.f32 %v4893_v56, %v4892_v42  ;;  %v3862_v25 = vmul.f32 %v8898_v52, %v2356_v19  ;;  %v7549_v23 = vmul.f32 %v6449_v41, %v6449_v41  ;;  %v12749_v28 = vld [vmem:[%s10704_s7 + $0x218] sm:$0xff]   ;;  %v14607_v19 = vld [vmem:[#allocation2_spill] sm:$0xff] }
 0x427   : > { %v4883_v15 = vsel %vm3986_vm3, %v3858_v46, 0.0  ;;  %v4960_v49 = vsel %vm3986_vm3, %v3869_v58, 0.0  ;;  %2642 = vperm.xlu1 %9283, %v2637_v53   ;;  %v2665_v47 = vperm.slane %v14603_v43, 1  ;;  %2656 = vperm.xlu2 %9285, %v2651_v36   ;;  %v7062_v61 = vrot.slane %v6449_v41, 2  ;;  %v14605_v41 = vld [vmem:[#allocation4_spill] sm:$0xff]  ;;  %v12764_v36 = vld [vmem:[%s10785_s10 + $0x88] sm:$0xff] }
 0x428   : > { %v7060_v16 = vrot.slane %v6448_v22, 3  ;;  %v7548_v39 = vmul.f32 %v6448_v22, %v6448_v22  ;;  %v4895_v4 = vrot.slane %v4894_v14, 1  ;;  %v4884_v31 = vrot.slane %v4883_v15, 4  ;;  %v2377_v58 = vpop.permute.xlu0 %2376 }
 0x429   : > { %v7059_v30 = vsel %vm6845_vm6, %v7058_v34, %v7057_v59  ;;  %v4943_v24 = vadd.f32 %v4942_v38, %v4941_v0  ;;  %v4911_v26 = vsel %vm3986_vm3, %v3862_v25, 0.0  ;;  %2670 = vperm.xlu0 %9284, %v2665_v47   ;;  %v8155_v50 = vrot.slane %v7549_v23, 2  ;;  %v2426_v38 = vpop.permute.xlu2 %2425 }
 0x42a   : > { %v7061_v51 = vsel %vm6848_vm7, %v7060_v16, %v7059_v30  ;;  %v8153_v12 = vrot.slane %v7548_v39, 3  ;;  %v4896_v17 = vadd.f32 %v4895_v4, %v4894_v14  ;;  %v4885_v10 = vadd.f32 %v4884_v31, %v4883_v15 }
 0x42b   : > { %v7063_v6 = vsel %vm6851_vm8, %v7062_v61, %v7061_v51  ;;  %v4961_v45 = vrot.slane %v4960_v49, 4  ;;  %v4912_v63 = vrot.slane %v4911_v26, 4  ;;  %v8895_v9 = vunpack.c.h.bf16 %v12564_v7 }
 0x42c   : > { %v12722_v27 = vsel %vm6854_vm9, %v7064_v37, %v7063_v6  ;;  %v8154_v34 = vsel %vm6848_vm7, %v8153_v12, %v8152_v1  ;;  %v4886_v20 = vrot.slane %v4885_v10, 2  ;;  %v12728_v0 = vadd.f32 %v5959_v8, %v4924_v33  ;;  %v14604_v37 = vld [vmem:[#allocation10_spill] sm:$0xff] }
 0x42d   : > { %7337 = vst.msk [vmem:[%s11055_s13 + $0x78] sm:$0xff] %vm3986_vm3, %v12722_v27  ;;  %v8156_v35 = vsel %vm6851_vm8, %v8155_v50, %v8154_v34  ;;  %v4944_v42 = vrot.slane %v4943_v24, 1  ;;  %v4913_v2 = vadd.f32 %v4912_v63, %v4911_v26  ;;  %v12739_v1 = vmul.f32 %v14605_v41, %v14604_v37  ;;  %v12784_v37 = vld [vmem:[%s10704_s7 + $0x240] sm:$0xff]  }
 0x42e   : > { %v12744_v7 = vsel %vm6854_vm9, %v8157_v44, %v8156_v35  ;;  %v12746_v8 = vadd.f32 %v5955_v55, %v4896_v17  ;;  %v4887_v33 = vadd.f32 %v4886_v20, %v4885_v10  ;;  %v12753_v59 = vmul.f32 %v14607_v19, %v14606_v48 }
 0x42f   : > { %v7068_v54 = vrot.slane %v12680_v60, 6  ;;  %v4962_v56 = vadd.f32 %v4961_v45, %v4960_v49  ;;  %v4914_v52 = vrot.slane %v4913_v2, 2  ;;  %v8161_v32 = vrot.slane %v12691_v62, 6 }
 0x430   : > { %v4888_v46 = vrot.slane %v4887_v33, 1  ;;  %v3861_v44 = vmul.f32 %v8895_v9, %v2349_v11  ;;  %v8918_v55 = vunpack.c.l.bf16 %v12735_v29  ;;  %v12760_v53 = vmul.f32 %v12728_v0, %v12728_v0 }
 0x431   : > { %v4945_v22 = vadd.f32 %v4944_v42, %v4943_v24  ;;  %v4915_v14 = vadd.f32 %v4914_v52, %v4913_v2  ;;  %v8903_v25 = vunpack.c.h.bf16 %v12749_v28  ;;  %v7552_v23 = vmul.f32 %v12746_v8, %v12746_v8 }
 0x432   : > { %v4889_v15 = vadd.f32 %v4888_v46, %v4887_v33  ;;  %v4904_v62 = vsel %vm3986_vm3, %v3861_v44, 0.0  ;;  %v3872_v49 = vmul.f32 %v8918_v55, %v2426_v38  ;;  %v4963_v47 = vrot.slane %v4962_v56, 2  ;;  %v2447_v55 = vpop.permute.xlu2 %2446 }
 0x433   : > { %v4916_v16 = vrot.slane %v4915_v14, 1  ;;  %v4905_v39 = vrot.slane %v4904_v62, 4  ;;  %v3865_v4 = vmul.f32 %v8903_v25, %v2377_v58  ;;  %v2658_v30 = vperm.slane %v14603_v43, 0 }
 0x434   : > { %v6451_v31 = vadd.f32 %v12644_v3, %v4889_v15  ;;  %v4981_v61 = vsel %vm3986_vm3, %v3872_v49, 0.0  ;;  %v2672_v24 = vperm.slane %v14603_v43, 2  ;;  %v7074_v26 = vrot.slane %v12728_v0, 3 }
 0x435   : > { %v12775_v51 = vadd.f32 %v12764_v36, %v4945_v22  ;;  %v4906_v12 = vadd.f32 %v4905_v39, %v4904_v62  ;;  %v4982_v17 = vrot.slane %v4981_v61, 4  ;;  %v8159_v10 = vrot.slane %v7552_v23, 7  ;;  %2663 = vperm.xlu1 %9283, %v2658_v30   ;;  %v2398_v62 = vpop.permute.xlu0 %2397 }
 0x436   : > { %v7551_v50 = vmul.f32 %v6451_v31, %v6451_v31  ;;  %v4932_v6 = vsel %vm3986_vm3, %v3865_v4, 0.0  ;;  %2677 = vperm.xlu2 %9285, %v2672_v24   ;;  %v2686_v45 = vperm.slane %v14603_v43, 4  ;;  %v8167_v63 = vrot.slane %v12760_v53, 3 }
 0x437   : > { %v5964_v34 = vrot.slane %v12764_v36, 3  ;;  %v4964_v20 = vadd.f32 %v4963_v47, %v4962_v56  ;;  %v5958_v9 = vrot.slane %v12644_v3, 4  ;;  %v4917_v42 = vadd.f32 %v4916_v16, %v4915_v14  ;;  %v2370_v56 = vpop.permute.xlu1 %2369 }
 0x438   : > { %v8160_v35 = vsel %vm6836_vm0, %v8159_v10, %v7551_v50  ;;  %v4907_v2 = vrot.slane %v4906_v12, 2  ;;  %v4933_v11 = vrot.slane %v4932_v6, 4  ;;  %2691 = vperm.xlu0 %9284, %v2686_v45   ;;  %v12788_v41 = vsel %vm3986_vm3, %v12722_v27, 0.0 }
 0x439   : > { %v12792_v33 = vmul.f32 %v12775_v51, %v12775_v51  ;;  %v8162_v48 = vsel %vm6839_vm4, %v8161_v32, %v8160_v35  ;;  %v4983_v19 = vadd.f32 %v4982_v17, %v4981_v61  ;;  %v7066_v52 = vrot.slane %v12746_v8, 7 }
 0x43a   : > { %v4908_v38 = vadd.f32 %v4907_v2, %v4906_v12  ;;  %v4934_v46 = vadd.f32 %v4933_v11, %v4932_v6  ;;  %v8902_v44 = vunpack.c.l.bf16 %v12749_v28  ;;  %v4965_v58 = vrot.slane %v4964_v20, 1 }
 0x43b   : > { %v5957_v22 = vrot.slane %v12644_v3, 3  ;;  %v5967_v27 = vrot.slane %v12764_v36, 6  ;;  %v8923_v14 = vunpack.c.h.bf16 %v12784_v37  ;;  %v6455_v25 = vadd.f32 %v5958_v9, %v4917_v42 }
 0x43c   : > { %v4909_v23 = vrot.slane %v4908_v38, 1  ;;  %v4935_v15 = vrot.slane %v4934_v46, 2  ;;  %v3864_v32 = vmul.f32 %v8902_v44, %v2370_v56  ;;  %v4984_v49 = vrot.slane %v4983_v19, 2 }
 0x43d   : > { %v3875_v47 = vmul.f32 %v8923_v14, %v2447_v55  ;;  %v8910_v8 = vunpack.c.l.bf16 %v12697_v13  ;;  %v2679_v16 = vperm.slane %v14603_v43, 3  ;;  %v7067_v28 = vsel %vm6836_vm0, %v7066_v52, %v6451_v31 }
 0x43e   : > { %v4910_v39 = vadd.f32 %v4909_v23, %v4908_v38  ;;  %v4936_v4 = vadd.f32 %v4935_v15, %v4934_v46  ;;  %v4925_v61 = vsel %vm3986_vm3, %v3864_v32, 0.0  ;;  %v2693_v17 = vperm.slane %v14603_v43, 5 }
 0x43f   : > { %v4926_v30 = vrot.slane %v4925_v61, 4  ;;  %v5002_v24 = vsel %vm3986_vm3, %v3875_v47, 0.0  ;;  %v3868_v12 = vmul.f32 %v8910_v8, %v2398_v62  ;;  %2684 = vperm.xlu1 %9283, %v2679_v16   ;;  %v7555_v10 = vmul.f32 %v6455_v25, %v6455_v25  ;;  %v2391_v32 = vpop.permute.xlu1 %2390  ;;  %v12820_v47 = vld [vmem:[%s10704_s7 + $0x250] sm:$0xff]  }
 0x440   : > { %v6454_v50 = vadd.f32 %v5957_v22, %v4910_v39  ;;  %v4937_v6 = vrot.slane %v4936_v4, 1  ;;  %v5003_v45 = vrot.slane %v5002_v24, 4  ;;  %v4985_v13 = vadd.f32 %v4984_v49, %v4983_v19  ;;  %2698 = vperm.xlu2 %9285, %v2693_v17  }
 0x441   : > { %v4927_v9 = vadd.f32 %v4926_v30, %v4925_v61  ;;  %v4953_v35 = vsel %vm3986_vm3, %v3868_v12, 0.0  ;;  %v2707_v31 = vperm.slane %v14603_v43, 7  ;;  %v4966_v42 = vadd.f32 %v4965_v58, %v4964_v20  ;;  %v2468_v61 = vpop.permute.xlu2 %2467 }
 0x442   : > { %v7070_v2 = vrot.slane %v6454_v50, 5  ;;  %v7554_v11 = vmul.f32 %v6454_v50, %v6454_v50  ;;  %v5961_v56 = vrot.slane %v12644_v3, 7  ;;  %v7069_v52 = vsel %vm6839_vm4, %v7068_v54, %v7067_v28  ;;  %v12826_v28 = vld [vmem:[%s10704_s7 + $0x230] sm:$0xff]  }
 0x443   : > { %v4928_v38 = vrot.slane %v4927_v9, 2  ;;  %v5004_v46 = vadd.f32 %v5003_v45, %v5002_v24  ;;  %v4954_v44 = vrot.slane %v4953_v35, 4  ;;  %2712 = vperm.xlu0 %9284, %v2707_v31   ;;  %v4938_v22 = vadd.f32 %v4937_v6, %v4936_v4 }
 0x444   : > { %v7071_v19 = vsel %vm6842_vm5, %v7070_v2, %v7069_v52  ;;  %v8163_v55 = vrot.slane %v7554_v11, 5  ;;  %v8907_v20 = vunpack.c.h.bf16 %v12654_v5  ;;  %v7072_v58 = vrot.slane %v6455_v25, 4 }
 0x445   : > { %v8165_v14 = vrot.slane %v7555_v10, 4  ;;  %v4986_v23 = vrot.slane %v4985_v13, 1  ;;  %v4929_v15 = vadd.f32 %v4928_v38, %v4927_v9  ;;  %v12816_v60 = vadd.f32 %v5964_v34, %v4966_v42  ;;  %v2419_v10 = vpop.permute.xlu0 %2418 }
 0x446   : > { %v8164_v54 = vsel %vm6842_vm5, %v8163_v55, %v8162_v48  ;;  %v5005_v62 = vrot.slane %v5004_v46, 2  ;;  %v4955_v49 = vadd.f32 %v4954_v44, %v4953_v35  ;;  %v7073_v8 = vsel %vm6845_vm6, %v7072_v58, %v7071_v19 }
 0x447   : > { %v8166_v16 = vsel %vm6845_vm6, %v8165_v14, %v8164_v54  ;;  %v5960_v5 = vrot.slane %v12644_v3, 6  ;;  %v4930_v25 = vrot.slane %v4929_v15, 1  ;;  %v6458_v39 = vadd.f32 %v5961_v56, %v4938_v22  ;;  %v12843_v22 = vld [vmem:[%s10785_s10 + $0x90] sm:$0xff] }
 0x448   : > { %v8168_v34 = vsel %vm6848_vm7, %v8167_v63, %v8166_v16  ;;  %v4956_v4 = vrot.slane %v4955_v49, 2  ;;  %v3867_v48 = vmul.f32 %v8907_v20, %v2391_v32  ;;  %v4987_v30 = vadd.f32 %v4986_v23, %v4985_v13 }
 0x449   : > { %v4931_v24 = vadd.f32 %v4930_v25, %v4929_v15  ;;  %v5963_v12 = vrot.slane %v12764_v36, 2  ;;  %v8930_v17 = vunpack.c.l.bf16 %v12820_v47  ;;  %v5006_v50 = vadd.f32 %v5005_v62, %v5004_v46 }
 0x44a   : > { %v4957_v3 = vadd.f32 %v4956_v4, %v4955_v49  ;;  %v4946_v6 = vsel %vm3986_vm3, %v3867_v48, 0.0  ;;  %v8915_v45 = vunpack.c.h.bf16 %v12826_v28  ;;  %v7075_v53 = vsel %vm6848_vm7, %v7074_v26, %v7073_v8  ;;  %v2412_v48 = vpop.permute.xlu1 %2411 }
 0x44b   : > { %v6457_v9 = vadd.f32 %v5960_v5, %v4931_v24  ;;  %v4947_v63 = vrot.slane %v4946_v6, 4  ;;  %v3878_v35 = vmul.f32 %v8930_v17, %v2468_v61  ;;  %v7558_v13 = vmul.f32 %v6458_v39, %v6458_v39  ;;  %v12868_v61 = vld [vmem:[%s10704_s7 + $0x258] sm:$0xff]  }
 0x44c   : > { %v4958_v31 = vrot.slane %v4957_v3, 1  ;;  %v3871_v42 = vmul.f32 %v8915_v45, %v2419_v10  ;;  %v2700_v2 = vperm.slane %v14603_v43, 6  ;;  %v7078_v11 = vrot.slane %v6458_v39, 1 }
 0x44d   : > { %v7076_v56 = vrot.slane %v6457_v9, 2  ;;  %v7557_v52 = vmul.f32 %v6457_v9, %v6457_v9  ;;  %v4948_v38 = vadd.f32 %v4947_v63, %v4946_v6  ;;  %v5007_v46 = vrot.slane %v5006_v50, 1  ;;  %v2489_v6 = vpop.permute.xlu2 %2488  ;;  %v2440_v45 = vpop.permute.xlu0 %2439 }
 0x44e   : > { %v4959_v44 = vadd.f32 %v4958_v31, %v4957_v3  ;;  %v5023_v19 = vsel %vm3986_vm3, %v3878_v35, 0.0  ;;  %v4974_v0 = vsel %vm3986_vm3, %v3871_v42, 0.0  ;;  %2705 = vperm.xlu1 %9283, %v2700_v2   ;;  %v12847_v43 = vsel %vm3986_vm3, %v12744_v7, 0.0 }
 0x44f   : > { %v7077_v26 = vsel %vm6851_vm8, %v7076_v56, %v7075_v53  ;;  %v8169_v55 = vrot.slane %v7557_v52, 2  ;;  %v4949_v20 = vrot.slane %v4948_v38, 2  ;;  %v4975_v58 = vrot.slane %v4974_v0, 4 }
 0x450   : > { %v12851_v14 = vmul.f32 %v12816_v60, %v12816_v60  ;;  %v8171_v23 = vrot.slane %v7558_v13, 1  ;;  %v7079_v15 = vsel %vm6854_vm9, %v7078_v11, %v7077_v26  ;;  %v12856_v32 = vadd.f32 %v5967_v27, %v4987_v30 }
 0x451   : > { %7338 = vst.msk [vmem:[%s11055_s13 + $0x80] sm:$0xff] %vm3986_vm3, %v7079_v15  ;;  %v8170_v54 = vsel %vm6851_vm8, %v8169_v55, %v8168_v34  ;;  %v4950_v62 = vadd.f32 %v4949_v20, %v4948_v38  ;;  %v5024_v49 = vrot.slane %v5023_v19, 4  ;;  %v7084_v7 = vrot.slane %v12816_v60, 5 }
 0x452   : > { %v8172_v8 = vsel %vm6854_vm9, %v8171_v23, %v8170_v54  ;;  %v5969_v16 = vrot.slane %v12843_v22, 1  ;;  %v5008_v5 = vadd.f32 %v5007_v46, %v5006_v50  ;;  %v12864_v25 = vadd.f32 %v5963_v12, %v4959_v44 }
 0x453   : > { %v5962_v39 = vrot.slane %v12764_v36, 1  ;;  %v4951_v4 = vrot.slane %v4950_v62, 1  ;;  %v4976_v27 = vadd.f32 %v4975_v58, %v4974_v0  ;;  %v8177_v34 = vrot.slane %v12851_v14, 5 }
 0x454   : > { %v2714_v30 = vperm.slane %v12753_v59, 0  ;;  %v2728_v24 = vperm.slane %v12753_v59, 2  ;;  %v8914_v17 = vunpack.c.l.bf16 %v12826_v28  ;;  %v12876_v10 = vmul.f32 %v12856_v32, %v12856_v32 }
 0x455   : > { %v4952_v12 = vadd.f32 %v4951_v4, %v4950_v62  ;;  %v5025_v50 = vadd.f32 %v5024_v49, %v5023_v19  ;;  %v4977_v3 = vrot.slane %v4976_v27, 2  ;;  %v12878_v9 = vadd.f32 %v5969_v16, %v5008_v5 }
 0x456   : > { %2719 = vperm.xlu2 %9285, %v2714_v30   ;;  %2733 = vperm.xlu0 %9284, %v2728_v24   ;;  %v3870_v53 = vmul.f32 %v8914_v17, %v2412_v48  ;;  %v8935_v63 = vunpack.c.h.bf16 %v12868_v61  ;;  %v8922_v35 = vunpack.c.l.bf16 %v12784_v37  ;;  %v7561_v28 = vmul.f32 %v12864_v25, %v12864_v25 }
 0x457   : > { %v12884_v13 = vadd.f32 %v5962_v39, %v4952_v12  ;;  %v4978_v31 = vadd.f32 %v4977_v3, %v4976_v27  ;;  %v2721_v42 = vperm.slane %v12753_v59, 1  ;;  %v7090_v2 = vrot.slane %v12856_v32, 2 }
 0x458   : > { %v4967_v11 = vsel %vm3986_vm3, %v3870_v53, 0.0  ;;  %v3881_v56 = vmul.f32 %v8935_v63, %v2489_v6  ;;  %v3874_v52 = vmul.f32 %v8922_v35, %v2440_v45  ;;  %v8183_v38 = vrot.slane %v12876_v10, 2  ;;  %v12913_v35 = vld [vmem:[%s10704_s7 + $0x268] sm:$0xff]  }
 0x459   : > { %v7560_v46 = vmul.f32 %v12884_v13, %v12884_v13  ;;  %v5972_v37 = vrot.slane %v12843_v22, 4  ;;  %v5026_v44 = vrot.slane %v5025_v50, 2  ;;  %2726 = vperm.xlu1 %9283, %v2721_v42   ;;  %v12895_v19 = vmul.f32 %v12878_v9, %v12878_v9 }
 0x45a   : > { %v4968_v0 = vrot.slane %v4967_v11, 4  ;;  %v5044_v26 = vsel %vm3986_vm3, %v3881_v56, 0.0  ;;  %v4995_v55 = vsel %vm3986_vm3, %v3874_v52, 0.0  ;;  %v8175_v20 = vrot.slane %v7561_v28, 6  ;;  %v12922_v52 = vld [vmem:[%s10704_s7 + $0x248] sm:$0xff]  }
 0x45b   : > { %v8173_v58 = vrot.slane %v7560_v46, 7  ;;  %v4979_v14 = vrot.slane %v4978_v31, 1  ;;  %v2735_v23 = vperm.slane %v12753_v59, 3  ;;  %v5045_v62 = vrot.slane %v5044_v26, 4 }
 0x45c   : > { %v4969_v54 = vadd.f32 %v4968_v0, %v4967_v11  ;;  %v4996_v49 = vrot.slane %v4995_v55, 4  ;;  %v2749_v16 = vperm.slane %v12753_v59, 5  ;;  %v7094_v5 = vrot.slane %v12878_v9, 7  ;;  %v2510_v0 = vpop.permute.xlu2 %2509 }
 0x45d   : > { %v8174_v39 = vsel %vm6836_vm0, %v8173_v58, %v12792_v33  ;;  %v5027_v4 = vadd.f32 %v5026_v44, %v5025_v50  ;;  %v5966_v27 = vrot.slane %v12764_v36, 5  ;;  %v7385_v48 = vsel %vm3986_vm3, %v7079_v15, 0.0  ;;  %v2433_v50 = vpop.permute.xlu1 %2432 }
 0x45e   : > { %v8187_v30 = vrot.slane %v12895_v19, 7  ;;  %v8176_v24 = vsel %vm6839_vm4, %v8175_v20, %v8174_v39  ;;  %v4970_v17 = vrot.slane %v4969_v54, 2  ;;  %2740 = vperm.xlu2 %9285, %v2735_v23   ;;  %2754 = vperm.xlu0 %9284, %v2749_v16   ;;  %v8446_v12 = vsel %vm3986_vm3, %v8172_v8, 0.0 }
 0x45f   : > { %v7082_v3 = vrot.slane %v12864_v25, 6  ;;  %v4980_v6 = vadd.f32 %v4979_v14, %v4978_v31  ;;  %v8178_v33 = vsel %vm6842_vm5, %v8177_v34, %v8176_v24  ;;  %v5046_v53 = vadd.f32 %v5045_v62, %v5044_v26 }
 0x460   : > { %v4971_v45 = vadd.f32 %v4970_v17, %v4969_v54  ;;  %v4997_v63 = vadd.f32 %v4996_v49, %v4995_v55  ;;  %v8919_v15 = vunpack.c.h.bf16 %v12735_v29  ;;  %v7080_v28 = vrot.slane %v12884_v13, 7 }
 0x461   : > { %v5028_v42 = vrot.slane %v5027_v4, 1  ;;  %v7384_v8 = vadd.f32 %v12788_v41, %v12640_v18  ;;  %v8445_v25 = vadd.f32 %v12847_v43, %v12651_v21  ;;  %v5965_v31 = vrot.slane %v12764_v36, 4  ;;  %v2461_v43 = vpop.permute.xlu0 %2460 }
 0x462   : > { %v4972_v34 = vrot.slane %v4971_v45, 1  ;;  %v4998_v11 = vrot.slane %v4997_v63, 2  ;;  %v3873_v56 = vmul.f32 %v8919_v15, %v2433_v50  ;;  %v12924_v46 = vadd.f32 %v5966_v27, %v4980_v6 }
 0x463   : > { %v12926_v29 = vadd.f32 %v7385_v48, %v7384_v8  ;;  %v12928_v44 = vadd.f32 %v8446_v12, %v8445_v25  ;;  %v8942_v13 = vunpack.c.l.bf16 %v12913_v35  ;;  %v5047_v41 = vrot.slane %v5046_v53, 2 }
 0x464   : > { %v4973_v18 = vadd.f32 %v4972_v34, %v4971_v45  ;;  %v4999_v26 = vadd.f32 %v4998_v11, %v4997_v63  ;;  %v4988_v21 = vsel %vm3986_vm3, %v3873_v56, 0.0  ;;  %v7081_v55 = vsel %vm6836_vm0, %v7080_v28, %v12775_v51  ;;  %v14608_v45 = vld [vmem:[#allocation15_spill] sm:$0xff] }
 0x465   : > { %v5029_v20 = vadd.f32 %v5028_v42, %v5027_v4  ;;  %v4989_v58 = vrot.slane %v4988_v21, 4  ;;  %v8927_v14 = vunpack.c.h.bf16 %v12922_v52  ;;  %v3884_v62 = vmul.f32 %v8942_v13, %v2510_v0  ;;  %v12957_v13 = vld [vmem:[%s10704_s7 + $0x270] sm:$0xff]  }
 0x466   : > { %v6463_v23 = vadd.f32 %v5965_v31, %v4973_v18  ;;  %v5000_v54 = vrot.slane %v4999_v26, 1  ;;  %v2742_v49 = vperm.slane %v12753_v59, 4  ;;  %v7564_v16 = vmul.f32 %v12924_v46, %v12924_v46 }
 0x467   : > { %v4990_v39 = vadd.f32 %v4989_v58, %v4988_v21  ;;  %v3877_v27 = vmul.f32 %v8927_v14, %v2461_v43  ;;  %v2756_v48 = vperm.slane %v12753_v59, 6  ;;  %v7083_v24 = vsel %vm6839_vm4, %v7082_v3, %v7081_v55  ;;  %v2531_v43 = vpop.permute.xlu2 %2530 }
 0x468   : > { %v7563_v17 = vmul.f32 %v6463_v23, %v6463_v23  ;;  %v5048_v51 = vadd.f32 %v5047_v41, %v5046_v53  ;;  %v5001_v4 = vadd.f32 %v5000_v54, %v4999_v26  ;;  %2747 = vperm.xlu1 %9283, %v2742_v49   ;;  %v5975_v12 = vrot.slane %v12843_v22, 7  ;;  %v2454_v41 = vpop.permute.xlu1 %2453 }
 0x469   : > { %v4991_v6 = vrot.slane %v4990_v39, 2  ;;  %v5016_v50 = vsel %vm3986_vm3, %v3877_v27, 0.0  ;;  %2761 = vperm.xlu2 %9285, %v2756_v48   ;;  %v2770_v63 = vperm.slane %v14608_v45, 0  ;;  %v12945_v15 = vadd.f32 %v5972_v37, %v5029_v20  ;;  %v2482_v19 = vpop.permute.xlu0 %2481 }
 0x46a   : > { %v7086_v28 = vrot.slane %v6463_v23, 4  ;;  %v8179_v42 = vrot.slane %v7563_v17, 4  ;;  %v5065_v3 = vsel %vm3986_vm3, %v3884_v62, 0.0  ;;  %v8181_v53 = vrot.slane %v7564_v16, 3 }
 0x46b   : > { %v7085_v8 = vsel %vm6842_vm5, %v7084_v7, %v7083_v24  ;;  %v12952_v25 = vadd.f32 %v12843_v22, %v5001_v4  ;;  %v4992_v31 = vadd.f32 %v4991_v6, %v4990_v39  ;;  %2775 = vperm.xlu0 %9284, %v2770_v63   ;;  %v5049_v11 = vrot.slane %v5048_v51, 1 }
 0x46c   : > { %v8180_v34 = vsel %vm6845_vm6, %v8179_v42, %v8178_v33  ;;  %v5968_v37 = vrot.slane %v12764_v36, 7  ;;  %v5017_v56 = vrot.slane %v5016_v50, 4  ;;  %v5066_v7 = vrot.slane %v5065_v3, 4 }
 0x46d   : > { %v8182_v0 = vsel %vm6848_vm7, %v8181_v53, %v8180_v34  ;;  %v7567_v60 = vmul.f32 %v12952_v25, %v12952_v25  ;;  %v4993_v18 = vrot.slane %v4992_v31, 1  ;;  %v7087_v26 = vsel %vm6845_vm6, %v7086_v28, %v7085_v8  ;;  %v12997_v34 = vld [vmem:[%s10785_s10 + $0x98] sm:$0xff] }
 0x46e   : > { %v8184_v33 = vsel %vm6851_vm8, %v8183_v38, %v8182_v0  ;;  %v5018_v21 = vadd.f32 %v5017_v56, %v5016_v50  ;;  %v8926_v36 = vunpack.c.l.bf16 %v12922_v52  ;;  %v7088_v55 = vrot.slane %v12924_v46, 3 }
 0x46f   : > { %v12971_v20 = vsel %vm6836_vm0, %v8187_v30, %v7567_v60  ;;  %v4994_v58 = vadd.f32 %v4993_v18, %v4992_v31  ;;  %v8947_v14 = vunpack.c.h.bf16 %v12957_v13  ;;  %v12976_v23 = vmul.f32 %v12945_v15, %v12945_v15 }
 0x470   : > { %v5050_v10 = vadd.f32 %v5049_v11, %v5048_v51  ;;  %v5019_v38 = vrot.slane %v5018_v21, 2  ;;  %v3876_v54 = vmul.f32 %v8926_v36, %v2454_v41  ;;  %v7089_v52 = vsel %vm6848_vm7, %v7088_v55, %v7087_v26 }
 0x471   : > { %v6466_v62 = vadd.f32 %v5968_v37, %v4994_v58  ;;  %v3887_v49 = vmul.f32 %v8947_v14, %v2531_v43  ;;  %v8934_v46 = vunpack.c.l.bf16 %v12868_v61  ;;  %v5067_v16 = vadd.f32 %v5066_v7, %v5065_v3  ;;  %v2475_v58 = vpop.permute.xlu1 %2474 }
 0x472   : > { %v5020_v30 = vadd.f32 %v5019_v38, %v5018_v21  ;;  %v5009_v39 = vsel %vm3986_vm3, %v3876_v54, 0.0  ;;  %v2763_v27 = vperm.slane %v12753_v59, 7  ;;  %v7091_v4 = vsel %vm6851_vm8, %v7090_v2, %v7089_v52  ;;  %v13014_v21 = vld [vmem:[%s10704_s7 + $0x260] sm:$0xff]   ;;  %v2552_v54 = vpop.permute.xlu2 %2551  ;;  %v2503_v52 = vpop.permute.xlu0 %2502 }
 0x473   : > { %v7092_v48 = vrot.slane %v6466_v62, 1  ;;  %v7566_v24 = vmul.f32 %v6466_v62, %v6466_v62  ;;  %v5010_v17 = vrot.slane %v5009_v39, 4  ;;  %v5086_v51 = vsel %vm3986_vm3, %v3887_v49, 0.0 }
 0x474   : > { %v5021_v6 = vrot.slane %v5020_v30, 1  ;;  %v5087_v61 = vrot.slane %v5086_v51, 4  ;;  %v3880_v50 = vmul.f32 %v8934_v46, %v2482_v19  ;;  %2768 = vperm.xlu1 %9283, %v2763_v27   ;;  %v2777_v59 = vperm.slane %v14608_v45, 1 }
 0x475   : > { %v7093_v63 = vsel %vm6854_vm9, %v7092_v48, %v7091_v4  ;;  %v8185_v28 = vrot.slane %v7566_v24, 1  ;;  %v5011_v42 = vadd.f32 %v5010_v17, %v5009_v39  ;;  %v5068_v53 = vrot.slane %v5067_v16, 2 }
 0x476   : > { %7339 = vst.msk [vmem:[%s11055_s13 + $0x88] sm:$0xff] %vm3986_vm3, %v7093_v63  ;;  %v7387_v3 = vsel %vm3986_vm3, %v7093_v63, 0.0  ;;  %v5971_v32 = vrot.slane %v12843_v22, 3  ;;  %v5022_v2 = vadd.f32 %v5021_v6, %v5020_v30  ;;  %v5037_v37 = vsel %vm3986_vm3, %v3880_v50, 0.0  ;;  %2782 = vperm.xlu2 %9285, %v2777_v59  }
 0x477   : > { %v12993_v8 = vadd.f32 %v7387_v3, %v12926_v29  ;;  %v8186_v31 = vsel %vm6854_vm9, %v8185_v28, %v8184_v33  ;;  %v5012_v11 = vrot.slane %v5011_v42, 2  ;;  %v7100_v56 = vrot.slane %v12945_v15, 4  ;;  %v13011_v33 = vld [vmem:[%s10704_s7 + $0x280] sm:$0xff]  }
 0x478   : > { %v8193_v0 = vrot.slane %v12976_v23, 4  ;;  %v13004_v60 = vadd.f32 %v5975_v12, %v5050_v10  ;;  %v8448_v18 = vsel %vm3986_vm3, %v8186_v31, 0.0  ;;  %v5088_v41 = vadd.f32 %v5087_v61, %v5086_v51 }
 0x479   : > { %v13008_v29 = vadd.f32 %v8448_v18, %v12928_v44  ;;  %v5013_v7 = vadd.f32 %v5012_v11, %v5011_v42  ;;  %v5038_v26 = vrot.slane %v5037_v37, 4  ;;  %v5977_v36 = vrot.slane %v12997_v34, 2 }
 0x47a   : > { %v5069_v43 = vadd.f32 %v5068_v53, %v5067_v16  ;;  %v5970_v55 = vrot.slane %v12843_v22, 2  ;;  %v2791_v12 = vperm.slane %v14608_v45, 3  ;;  %v13019_v14 = vadd.f32 %v5971_v32, %v5022_v2 }
 0x47b   : > { %v5014_v10 = vrot.slane %v5013_v7, 1  ;;  %v5039_v44 = vadd.f32 %v5038_v26, %v5037_v37  ;;  %v8931_v38 = vunpack.c.h.bf16 %v12820_v47  ;;  %v7106_v62 = vrot.slane %v13004_v60, 1 }
 0x47c   : > { %v13025_v49 = vmul.f32 %v13004_v60, %v13004_v60  ;;  %2796 = vperm.xlu0 %9284, %v2791_v12   ;;  %v8954_v46 = vunpack.c.l.bf16 %v13011_v33  ;;  %v8939_v19 = vunpack.c.h.bf16 %v13014_v21  ;;  %v5089_v30 = vrot.slane %v5088_v41, 2 }
 0x47d   : > { %v5015_v16 = vadd.f32 %v5014_v10, %v5013_v7  ;;  %v5040_v39 = vrot.slane %v5039_v44, 2  ;;  %v3879_v27 = vmul.f32 %v8931_v38, %v2475_v58  ;;  %v5070_v48 = vrot.slane %v5069_v43, 1 }
 0x47e   : > { %v3890_v24 = vmul.f32 %v8954_v46, %v2552_v54  ;;  %v3883_v47 = vmul.f32 %v8939_v19, %v2503_v52  ;;  %v2784_v17 = vperm.slane %v14608_v45, 2  ;;  %v7570_v51 = vmul.f32 %v13019_v14, %v13019_v14 }
 0x47f   : > { %v6469_v4 = vadd.f32 %v5970_v55, %v5015_v16  ;;  %v5041_v6 = vadd.f32 %v5040_v39, %v5039_v44  ;;  %v5030_v61 = vsel %vm3986_vm3, %v3879_v27, 0.0  ;;  %v2798_v42 = vperm.slane %v14608_v45, 4  ;;  %v13045_v44 = vld [vmem:[%s10704_s7 + $0x288] sm:$0xff]   ;;  %v2496_v16 = vpop.permute.xlu1 %2495 }
 0x480   : > { %v5031_v50 = vrot.slane %v5030_v61, 4  ;;  %v5107_v63 = vsel %vm3986_vm3, %v3890_v24, 0.0  ;;  %v5058_v28 = vsel %vm3986_vm3, %v3883_v47, 0.0  ;;  %2789 = vperm.xlu1 %9283, %v2784_v17   ;;  %v5090_v53 = vadd.f32 %v5089_v30, %v5088_v41  ;;  %v2573_v30 = vpop.permute.xlu2 %2572 }
 0x481   : > { %v7096_v59 = vrot.slane %v6469_v4, 6  ;;  %v7569_v3 = vmul.f32 %v6469_v4, %v6469_v4  ;;  %v5042_v32 = vrot.slane %v5041_v6, 1  ;;  %v5108_v31 = vrot.slane %v5107_v63, 4  ;;  %2803 = vperm.xlu2 %9285, %v2798_v42  }
 0x482   : > { %v5032_v2 = vadd.f32 %v5031_v50, %v5030_v61  ;;  %v5059_v11 = vrot.slane %v5058_v28, 4  ;;  %v2812_v37 = vperm.slane %v14608_v45, 6  ;;  %v8199_v18 = vrot.slane %v13025_v49, 1 }
 0x483   : > { %v7095_v7 = vsel %vm6836_vm0, %v7094_v5, %v12952_v25  ;;  %v8189_v26 = vrot.slane %v7569_v3, 6  ;;  %v5980_v55 = vrot.slane %v12997_v34, 5  ;;  %v8191_v12 = vrot.slane %v7570_v51, 5 }
 0x484   : > { %v5974_v41 = vrot.slane %v12843_v22, 6  ;;  %v5043_v58 = vadd.f32 %v5042_v32, %v5041_v6  ;;  %v5033_v10 = vrot.slane %v5032_v2, 2  ;;  %2817 = vperm.xlu0 %9284, %v2812_v37   ;;  %v5071_v38 = vadd.f32 %v5070_v48, %v5069_v43 }
 0x485   : > { %v8190_v54 = vsel %vm6839_vm4, %v8189_v26, %v12971_v20  ;;  %v5091_v52 = vrot.slane %v5090_v53, 1  ;;  %v5060_v46 = vadd.f32 %v5059_v11, %v5058_v28  ;;  %v7097_v9 = vsel %vm6839_vm4, %v7096_v59, %v7095_v7 }
 0x486   : > { %v8192_v5 = vsel %vm6842_vm5, %v8191_v12, %v8190_v54  ;;  %v5034_v25 = vadd.f32 %v5033_v10, %v5032_v2  ;;  %v5109_v19 = vadd.f32 %v5108_v31, %v5107_v63  ;;  %v8938_v43 = vunpack.c.l.bf16 %v13014_v21  ;;  %v2524_v21 = vpop.permute.xlu0 %2523 }
 0x487   : > { %v8194_v39 = vsel %vm6845_vm6, %v8193_v0, %v8192_v5  ;;  %v5061_v27 = vrot.slane %v5060_v46, 2  ;;  %v8959_v48 = vunpack.c.h.bf16 %v13045_v44  ;;  %v7098_v20 = vrot.slane %v13019_v14, 5 }
 0x488   : > { %v6473_v24 = vadd.f32 %v5974_v41, %v5043_v58  ;;  %v5973_v47 = vrot.slane %v12843_v22, 5  ;;  %v5035_v17 = vrot.slane %v5034_v25, 1  ;;  %v5976_v51 = vrot.slane %v12997_v34, 1 }
 0x489   : > { %v5062_v4 = vadd.f32 %v5061_v27, %v5060_v46  ;;  %v3882_v6 = vmul.f32 %v8938_v43, %v2496_v16  ;;  %v3893_v61 = vmul.f32 %v8959_v48, %v2573_v30  ;;  %v7099_v23 = vsel %vm6842_vm5, %v7098_v20, %v7097_v9  ;;  %v13085_v30 = vld [vmem:[%s10704_s7 + $0x298] sm:$0xff]   ;;  %v14609_v27 = vld [vmem:[#allocation11_spill] sm:$0xff] }
 0x48a   : > { %v5092_v50 = vadd.f32 %v5091_v52, %v5090_v53  ;;  %v5036_v0 = vadd.f32 %v5035_v17, %v5034_v25  ;;  %v8946_v63 = vunpack.c.l.bf16 %v12957_v13  ;;  %v5110_v28 = vrot.slane %v5109_v19, 2  ;;  %v14610_v43 = vld [vmem:[#allocation3_spill] sm:$0xff] }
 0x48b   : > { %v5063_v42 = vrot.slane %v5062_v4, 1  ;;  %v5051_v14 = vsel %vm3986_vm3, %v3882_v6, 0.0  ;;  %v5128_v59 = vsel %vm3986_vm3, %v3893_v61, 0.0  ;;  %v7573_v22 = vmul.f32 %v6473_v24, %v6473_v24  ;;  %v9222_v6 = vld [vmem:[%s10704_s7 + $0x278] sm:$0xff]  }
 0x48c   : > { %v6472_v3 = vadd.f32 %v5973_v47, %v5036_v0  ;;  %v5052_v32 = vrot.slane %v5051_v14, 4  ;;  %v5129_v2 = vrot.slane %v5128_v59, 4  ;;  %v3886_v11 = vmul.f32 %v8946_v63, %v2524_v21 }
 0x48d   : > { %v5064_v31 = vadd.f32 %v5063_v42, %v5062_v4  ;;  %v2805_v37 = vperm.slane %v14608_v45, 5  ;;  %v2819_v53 = vperm.slane %v14608_v45, 7  ;;  %v7101_v13 = vsel %vm6845_vm6, %v7100_v56, %v7099_v23  ;;  %v2594_v4 = vpop.permute.xlu2 %2593 }
 0x48e   : > { %v7102_v7 = vrot.slane %v6472_v3, 3  ;;  %v7572_v26 = vmul.f32 %v6472_v3, %v6472_v3  ;;  %v5053_v12 = vadd.f32 %v5052_v32, %v5051_v14  ;;  %v7104_v41 = vrot.slane %v6473_v24, 2  ;;  %v2517_v24 = vpop.permute.xlu1 %2516  ;;  %v2545_v21 = vpop.permute.xlu0 %2544 }
 0x48f   : > { %v5111_v58 = vadd.f32 %v5110_v28, %v5109_v19  ;;  %v5079_v10 = vsel %vm3986_vm3, %v3886_v11, 0.0  ;;  %2810 = vperm.xlu1 %9283, %v2805_v37   ;;  %2824 = vperm.xlu2 %9285, %v2819_v53   ;;  %v2833_v54 = vperm.slane %v12060_v40, 1  ;;  %v13072_v52 = vadd.f32 %v5977_v36, %v5071_v38 }
 0x490   : > { %v7103_v45 = vsel %vm6848_vm7, %v7102_v7, %v7101_v13  ;;  %v8195_v15 = vrot.slane %v7572_v26, 3  ;;  %v5054_v56 = vrot.slane %v5053_v12, 2  ;;  %v8197_v46 = vrot.slane %v7573_v22, 2 }
 0x491   : > { %v7105_v9 = vsel %vm6851_vm8, %v7104_v41, %v7103_v45  ;;  %v13076_v5 = vadd.f32 %v5976_v51, %v5064_v31  ;;  %v5130_v25 = vadd.f32 %v5129_v2, %v5128_v59  ;;  %2838 = vperm.xlu0 %9284, %v2833_v54   ;;  %v5080_v16 = vrot.slane %v5079_v10, 4  ;;  %v13120_v31 = vld [vmem:[%s10785_s10 + $0xa0] sm:$0xff] }
 0x492   : > { %v13081_v19 = vsel %vm6854_vm9, %v7106_v62, %v7105_v9  ;;  %v8196_v36 = vsel %vm6848_vm7, %v8195_v15, %v8194_v39  ;;  %v5055_v38 = vadd.f32 %v5054_v56, %v5053_v12  ;;  %v13089_v48 = vmul.f32 %v14610_v43, %v14609_v27 }
 0x493   : > { %v13093_v20 = vadd.f32 %v5980_v55, %v5092_v50  ;;  %7340 = vst.msk [vmem:[%s11055_s13 + $0x90] sm:$0xff] %vm3986_vm3, %v13081_v19  ;;  %v8198_v60 = vsel %vm6851_vm8, %v8197_v46, %v8196_v36  ;;  %v5112_v62 = vrot.slane %v5111_v58, 1  ;;  %v5081_v17 = vadd.f32 %v5080_v16, %v5079_v10  ;;  %v13135_v16 = vld [vmem:[%s10704_s7 + $0x2a0] sm:$0xff]  }
 0x494   : > { %v13102_v39 = vsel %vm6854_vm9, %v8199_v18, %v8198_v60  ;;  %v5056_v47 = vrot.slane %v5055_v38, 1  ;;  %v8943_v51 = vunpack.c.h.bf16 %v12913_v35  ;;  %v7110_v55 = vrot.slane %v13072_v52, 6 }
 0x495   : > { %v7577_v61 = vmul.f32 %v13072_v52, %v13072_v52  ;;  %v7576_v23 = vmul.f32 %v13076_v5, %v13076_v5  ;;  %v8966_v49 = vunpack.c.l.bf16 %v13085_v30  ;;  %v5131_v18 = vrot.slane %v5130_v25, 2 }
 0x496   : > { %v5057_v50 = vadd.f32 %v5056_v47, %v5055_v38  ;;  %v5082_v0 = vrot.slane %v5081_v17, 2  ;;  %v3885_v63 = vmul.f32 %v8943_v51, %v2517_v24  ;;  %v13114_v35 = vmul.f32 %v13093_v20, %v13093_v20  ;;  %v2538_v24 = vpop.permute.xlu1 %2537 }
 0x497   : > { %v5113_v28 = vadd.f32 %v5112_v62, %v5111_v58  ;;  %v3896_v42 = vmul.f32 %v8966_v49, %v2594_v4  ;;  %v8951_v14 = vunpack.c.h.bf16 %v9222_v6  ;;  %v2826_v32 = vperm.slane %v12060_v40, 0 }
 0x498   : > { %v6475_v59 = vadd.f32 %v12997_v34, %v5057_v50  ;;  %v5083_v22 = vadd.f32 %v5082_v0, %v5081_v17  ;;  %v5072_v3 = vsel %vm3986_vm3, %v3885_v63, 0.0  ;;  %v8203_v2 = vrot.slane %v7577_v61, 6  ;;  %v2615_v61 = vpop.permute.xlu2 %2614 }
 0x499   : > { %v5073_v11 = vrot.slane %v5072_v3, 4  ;;  %v5149_v37 = vsel %vm3986_vm3, %v3896_v42, 0.0  ;;  %v3889_v53 = vmul.f32 %v8951_v14, %v2545_v21  ;;  %v8201_v13 = vrot.slane %v7576_v23, 7  ;;  %2831 = vperm.xlu1 %9283, %v2826_v32   ;;  %v2566_v42 = vpop.permute.xlu0 %2565 }
 0x49a   : > { %v7575_v7 = vmul.f32 %v6475_v59, %v6475_v59  ;;  %v5132_v26 = vadd.f32 %v5131_v18, %v5130_v25  ;;  %v5084_v12 = vrot.slane %v5083_v22, 1  ;;  %v7116_v41 = vrot.slane %v13093_v20, 3 }
 0x49b   : > { %v8209_v58 = vrot.slane %v13114_v35, 3  ;;  %v5074_v10 = vadd.f32 %v5073_v11, %v5072_v3  ;;  %v5150_v54 = vrot.slane %v5149_v37, 4  ;;  %v13126_v45 = vadd.f32 %v13120_v31, %v5113_v28 }
 0x49c   : > { %v8202_v15 = vsel %vm6836_vm0, %v8201_v13, %v7575_v7  ;;  %v5979_v56 = vrot.slane %v12997_v34, 4  ;;  %v5100_v46 = vsel %vm3986_vm3, %v3889_v53, 0.0  ;;  %v5085_v25 = vadd.f32 %v5084_v12, %v5083_v22 }
 0x49d   : > { %v13132_v9 = vsel %vm6839_vm4, %v8203_v2, %v8202_v15  ;;  %v5075_v36 = vrot.slane %v5074_v10, 2  ;;  %v5101_v38 = vrot.slane %v5100_v46, 4  ;;  %v5985_v27 = vrot.slane %v13120_v31, 3 }
 0x49e   : > { %v5133_v43 = vrot.slane %v5132_v26, 1  ;;  %v2840_v60 = vperm.slane %v12060_v40, 2  ;;  %v2854_v62 = vperm.slane %v12060_v40, 4  ;;  %v5151_v17 = vadd.f32 %v5150_v54, %v5149_v37 }
 0x49f   : > { %v5076_v47 = vadd.f32 %v5075_v36, %v5074_v10  ;;  %v5102_v51 = vadd.f32 %v5101_v38, %v5100_v46  ;;  %v8950_v4 = vunpack.c.l.bf16 %v9222_v6  ;;  %v13142_v23 = vmul.f32 %v13126_v45, %v13126_v45 }
 0x4a0   : > { %v7108_v49 = vrot.slane %v13076_v5, 7  ;;  %v5978_v50 = vrot.slane %v12997_v34, 3  ;;  %2845 = vperm.xlu2 %9285, %v2840_v60   ;;  %2859 = vperm.xlu0 %9284, %v2854_v62   ;;  %v8971_v18 = vunpack.c.h.bf16 %v13135_v16  ;;  %v13147_v0 = vadd.f32 %v5979_v56, %v5085_v25 }
 0x4a1   : > { %v5077_v63 = vrot.slane %v5076_v47, 1  ;;  %v5103_v21 = vrot.slane %v5102_v51, 2  ;;  %v3888_v28 = vmul.f32 %v8950_v4, %v2538_v24  ;;  %v13151_v6 = vsel %vm3986_vm3, %v13081_v19, 0.0 }
 0x4a2   : > { %v5134_v14 = vadd.f32 %v5133_v43, %v5132_v26  ;;  %v3899_v22 = vmul.f32 %v8971_v18, %v2615_v61  ;;  %v8958_v5 = vunpack.c.l.bf16 %v13045_v44  ;;  %v5152_v32 = vrot.slane %v5151_v17, 2 }
 0x4a3   : > { %v5078_v3 = vadd.f32 %v5077_v63, %v5076_v47  ;;  %v5104_v2 = vadd.f32 %v5103_v21, %v5102_v51  ;;  %v5093_v11 = vsel %vm3986_vm3, %v3888_v28, 0.0  ;;  %v7109_v37 = vsel %vm6836_vm0, %v7108_v49, %v6475_v59 }
 0x4a4   : > { %v5094_v53 = vrot.slane %v5093_v11, 4  ;;  %v5170_v13 = vsel %vm3986_vm3, %v3899_v22, 0.0  ;;  %v3892_v7 = vmul.f32 %v8958_v5, %v2566_v42  ;;  %v7579_v12 = vmul.f32 %v13147_v0, %v13147_v0  ;;  %v2559_v42 = vpop.permute.xlu1 %2558  ;;  %v13182_v22 = vld [vmem:[%s10704_s7 + $0x290] sm:$0xff]  }
 0x4a5   : > { %v6478_v19 = vadd.f32 %v5978_v50, %v5078_v3  ;;  %v5105_v10 = vrot.slane %v5104_v2, 1  ;;  %v2847_v26 = vperm.slane %v12060_v40, 3  ;;  %v5171_v44 = vrot.slane %v5170_v13, 4 }
 0x4a6   : > { %v5095_v54 = vadd.f32 %v5094_v53, %v5093_v11  ;;  %v5121_v15 = vsel %vm3986_vm3, %v3892_v7, 0.0  ;;  %v2861_v56 = vperm.slane %v12060_v40, 5  ;;  %v13164_v59 = vsel %vm3986_vm3, %v13102_v39, 0.0  ;;  %v2587_v53 = vpop.permute.xlu0 %2586 }
 0x4a7   : > { %v7112_v46 = vrot.slane %v6478_v19, 5  ;;  %v7578_v25 = vmul.f32 %v6478_v19, %v6478_v19  ;;  %v5153_v36 = vadd.f32 %v5152_v32, %v5151_v17  ;;  %2852 = vperm.xlu1 %9283, %v2847_v26   ;;  %v5982_v38 = vrot.slane %v12997_v34, 7 }
 0x4a8   : > { %v5106_v43 = vadd.f32 %v5105_v10, %v5104_v2  ;;  %v5096_v60 = vrot.slane %v5095_v54, 2  ;;  %v5122_v62 = vrot.slane %v5121_v15, 4  ;;  %2866 = vperm.xlu2 %9285, %v2861_v56   ;;  %v7111_v24 = vsel %vm6839_vm4, %v7110_v55, %v7109_v37 }
 0x4a9   : > { %v13170_v47 = vadd.f32 %v5985_v27, %v5134_v14  ;;  %v8205_v51 = vrot.slane %v7578_v25, 5  ;;  %v5988_v39 = vrot.slane %v13120_v31, 6  ;;  %v8207_v4 = vrot.slane %v7579_v12, 4  ;;  %v13179_v14 = vld [vmem:[%s10704_s7 + $0x2b0] sm:$0xff]  }
 0x4aa   : > { %v5097_v17 = vadd.f32 %v5096_v60, %v5095_v54  ;;  %v5172_v61 = vadd.f32 %v5171_v44, %v5170_v13  ;;  %v5123_v49 = vadd.f32 %v5122_v62, %v5121_v15  ;;  %v7113_v50 = vsel %vm6842_vm5, %v7112_v46, %v7111_v24 }
 0x4ab   : > { %v8206_v18 = vsel %vm6842_vm5, %v8205_v51, %v13132_v9  ;;  %v5154_v63 = vrot.slane %v5153_v36, 1  ;;  %v5981_v52 = vrot.slane %v12997_v34, 6  ;;  %v6482_v27 = vadd.f32 %v5982_v38, %v5106_v43  ;;  %v13204_v43 = vld [vmem:[%s10785_s10 + $0xa8] sm:$0xff] }
 0x4ac   : > { %v8208_v55 = vsel %vm6845_vm6, %v8207_v4, %v8206_v18  ;;  %v5098_v21 = vrot.slane %v5097_v17, 1  ;;  %v5124_v28 = vrot.slane %v5123_v49, 2  ;;  %v7114_v5 = vrot.slane %v13147_v0, 4 }
 0x4ad   : > { %v8210_v3 = vsel %vm6848_vm7, %v8209_v58, %v8208_v55  ;;  %v2875_v9 = vperm.slane %v12060_v40, 7  ;;  %v8955_v34 = vunpack.c.h.bf16 %v13011_v33  ;;  %v7126_v32 = vrot.slane %v13170_v47, 5  ;;  %v2636_v58 = vpop.permute.xlu2 %2635 }
 0x4ae   : > { %v13193_v2 = vmul.f32 %v13170_v47, %v13170_v47  ;;  %v5099_v11 = vadd.f32 %v5098_v21, %v5097_v17  ;;  %v5173_v37 = vrot.slane %v5172_v61, 2  ;;  %v7115_v13 = vsel %vm6845_vm6, %v7114_v5, %v7113_v50 }
 0x4af   : > { %2880 = vperm.xlu0 %9284, %v2875_v9   ;;  %v3891_v0 = vmul.f32 %v8955_v34, %v2559_v42  ;;  %v8978_v35 = vunpack.c.l.bf16 %v13179_v14  ;;  %v8963_v7 = vunpack.c.h.bf16 %v13182_v22  ;;  %v5155_v33 = vadd.f32 %v5154_v63, %v5153_v36  ;;  %v13226_v42 = vld [vmem:[%s10704_s7 + $0x2b8] sm:$0xff]  }
 0x4b0   : > { %v7120_v12 = vrot.slane %v6482_v27, 1  ;;  %v6481_v19 = vadd.f32 %v5981_v52, %v5099_v11  ;;  %v5125_v10 = vadd.f32 %v5124_v28, %v5123_v49  ;;  %v7582_v26 = vmul.f32 %v6482_v27, %v6482_v27  ;;  %v2580_v52 = vpop.permute.xlu1 %2579 }
 0x4b1   : > { %v5114_v54 = vsel %vm3986_vm3, %v3891_v0, 0.0  ;;  %v3895_v44 = vmul.f32 %v8963_v7, %v2587_v53  ;;  %v2868_v15 = vperm.slane %v12060_v40, 6  ;;  %v7117_v56 = vsel %vm6848_vm7, %v7116_v41, %v7115_v13 }
 0x4b2   : > { %v7118_v46 = vrot.slane %v6481_v19, 2  ;;  %v7581_v25 = vmul.f32 %v6481_v19, %v6481_v19  ;;  %v5174_v38 = vadd.f32 %v5173_v37, %v5172_v61  ;;  %v5115_v36 = vrot.slane %v5114_v54, 4 }
 0x4b3   : > { %v3902_v60 = vmul.f32 %v8978_v35, %v2636_v58  ;;  %v5142_v62 = vsel %vm3986_vm3, %v3895_v44, 0.0  ;;  %2873 = vperm.xlu1 %9283, %v2868_v15   ;;  %v2882_v24 = vperm.slane %v13089_v48, 0  ;;  %v13208_v51 = vadd.f32 %v5988_v39, %v5155_v33 }
 0x4b4   : > { %v7119_v40 = vsel %vm6851_vm8, %v7118_v46, %v7117_v56  ;;  %v8211_v20 = vrot.slane %v7581_v25, 2  ;;  %v5126_v4 = vrot.slane %v5125_v10, 1  ;;  %v8219_v41 = vrot.slane %v13193_v2, 5 }
 0x4b5   : > { %v8213_v17 = vrot.slane %v7582_v26, 1  ;;  %v13213_v61 = vsel %vm6854_vm9, %v7120_v12, %v7119_v40  ;;  %v5116_v49 = vadd.f32 %v5115_v36, %v5114_v54  ;;  %2887 = vperm.xlu2 %9285, %v2882_v24   ;;  %v5990_v39 = vrot.slane %v13204_v43, 1  ;;  %v2657_v0 = vpop.permute.xlu2 %2656  ;;  %v2608_v12 = vpop.permute.xlu0 %2607 }
 0x4b6   : > { %7341 = vst.msk [vmem:[%s11055_s13 + $0x98] sm:$0xff] %vm3986_vm3, %v13213_v61  ;;  %v8212_v50 = vsel %vm6851_vm8, %v8211_v20, %v8210_v3  ;;  %v5175_v18 = vrot.slane %v5174_v38, 1  ;;  %v5143_v63 = vrot.slane %v5142_v62, 4  ;;  %v5984_v27 = vrot.slane %v13120_v31, 2 }
 0x4b7   : > { %v13221_v55 = vsel %vm6854_vm9, %v8213_v17, %v8212_v50  ;;  %v5117_v21 = vrot.slane %v5116_v49, 2  ;;  %v5191_v28 = vsel %vm3986_vm3, %v3902_v60, 0.0  ;;  %v7132_v5 = vrot.slane %v13208_v51, 2 }
 0x4b8   : > { %v5127_v9 = vadd.f32 %v5126_v4, %v5125_v10  ;;  %v5144_v34 = vadd.f32 %v5143_v63, %v5142_v62  ;;  %v2896_v3 = vperm.slane %v13089_v48, 2  ;;  %v13232_v11 = vmul.f32 %v13208_v51, %v13208_v51 }
 0x4b9   : > { %v5983_v37 = vrot.slane %v13120_v31, 1  ;;  %v5118_v53 = vadd.f32 %v5117_v21, %v5116_v49  ;;  %v8962_v13 = vunpack.c.l.bf16 %v13182_v22  ;;  %v5176_v35 = vadd.f32 %v5175_v18, %v5174_v38 }
 0x4ba   : > { %v5192_v58 = vrot.slane %v5191_v28, 4  ;;  %v5145_v7 = vrot.slane %v5144_v34, 2  ;;  %2901 = vperm.xlu0 %9284, %v2896_v3   ;;  %v8983_v33 = vunpack.c.h.bf16 %v13226_v42  ;;  %v8970_v26 = vunpack.c.l.bf16 %v13135_v16 }
 0x4bb   : > { %v5119_v19 = vrot.slane %v5118_v53, 1  ;;  %v3894_v10 = vmul.f32 %v8962_v13, %v2580_v52  ;;  %v2889_v54 = vperm.slane %v13089_v48, 1  ;;  %v13239_v44 = vadd.f32 %v5984_v27, %v5127_v9 }
 0x4bc   : > { %v5146_v15 = vadd.f32 %v5145_v7, %v5144_v34  ;;  %v3905_v56 = vmul.f32 %v8983_v33, %v2657_v0  ;;  %v2903_v22 = vperm.slane %v13089_v48, 3  ;;  %v8225_v46 = vrot.slane %v13232_v11, 2 }
 0x4bd   : > { %v5120_v25 = vadd.f32 %v5119_v19, %v5118_v53  ;;  %v5135_v38 = vsel %vm3986_vm3, %v3894_v10, 0.0  ;;  %v3898_v36 = vmul.f32 %v8970_v26, %v2608_v12  ;;  %2894 = vperm.xlu1 %9283, %v2889_v54   ;;  %v13244_v60 = vadd.f32 %v5990_v39, %v5176_v35  ;;  %v2601_v39 = vpop.permute.xlu1 %2600 }
 0x4be   : > { %v5193_v62 = vadd.f32 %v5192_v58, %v5191_v28  ;;  %v5136_v24 = vrot.slane %v5135_v38, 4  ;;  %v5212_v16 = vsel %vm3986_vm3, %v3905_v56, 0.0  ;;  %2908 = vperm.xlu2 %9285, %v2903_v22   ;;  %v5147_v20 = vrot.slane %v5146_v15, 1 }
 0x4bf   : > { %v6484_v40 = vadd.f32 %v5983_v37, %v5120_v25  ;;  %v5163_v4 = vsel %vm3986_vm3, %v3898_v36, 0.0  ;;  %v8967_v17 = vunpack.c.h.bf16 %v13085_v30  ;;  %v7585_v49 = vmul.f32 %v13239_v44, %v13239_v44 }
 0x4c0   : > { %v5137_v50 = vadd.f32 %v5136_v24, %v5135_v38  ;;  %v5164_v18 = vrot.slane %v5163_v4, 4  ;;  %v2917_v63 = vperm.slane %v13089_v48, 5  ;;  %v5993_v27 = vrot.slane %v13204_v43, 4 }
 0x4c1   : > { %v7584_v52 = vmul.f32 %v6484_v40, %v6484_v40  ;;  %v5987_v21 = vrot.slane %v13120_v31, 5  ;;  %v5213_v28 = vrot.slane %v5212_v16, 4  ;;  %v7136_v9 = vrot.slane %v13244_v60, 7 }
 0x4c2   : > { %v5194_v34 = vrot.slane %v5193_v62, 2  ;;  %v5138_v3 = vrot.slane %v5137_v50, 2  ;;  %v5165_v37 = vadd.f32 %v5164_v18, %v5163_v4  ;;  %2922 = vperm.xlu0 %9284, %v2917_v63   ;;  %v13257_v30 = vmul.f32 %v13244_v60, %v13244_v60 }
 0x4c3   : > { %v8215_v53 = vrot.slane %v7584_v52, 7  ;;  %v5148_v13 = vadd.f32 %v5147_v20, %v5146_v15  ;;  %v3897_v0 = vmul.f32 %v8967_v17, %v2601_v39  ;;  %v7391_v35 = vsel %vm3986_vm3, %v13213_v61, 0.0  ;;  %v13269_v61 = vld [vmem:[%s10704_s7 + $0x2c8] sm:$0xff]  }
 0x4c4   : > { %v7124_v58 = vrot.slane %v13239_v44, 6  ;;  %v8217_v7 = vrot.slane %v7585_v49, 6  ;;  %v7122_v33 = vrot.slane %v6484_v40, 7  ;;  %v8452_v12 = vsel %vm3986_vm3, %v13221_v55, 0.0 }
 0x4c5   : > { %v8216_v19 = vsel %vm6836_vm0, %v8215_v53, %v13142_v23  ;;  %v5139_v10 = vadd.f32 %v5138_v3, %v5137_v50  ;;  %v5214_v26 = vadd.f32 %v5213_v28, %v5212_v16  ;;  %v5195_v15 = vadd.f32 %v5194_v34, %v5193_v62  ;;  %v13280_v16 = vld [vmem:[%s10704_s7 + $0x2a8] sm:$0xff]  }
 0x4c6   : > { %v8218_v54 = vsel %vm6839_vm4, %v8217_v7, %v8216_v19  ;;  %v5986_v56 = vrot.slane %v13120_v31, 4  ;;  %v5166_v22 = vrot.slane %v5165_v37, 2  ;;  %v6488_v44 = vadd.f32 %v5987_v21, %v5148_v13 }
 0x4c7   : > { %v5140_v25 = vrot.slane %v5139_v10, 1  ;;  %v8220_v55 = vsel %vm6842_vm5, %v8219_v41, %v8218_v54  ;;  %v5156_v38 = vsel %vm3986_vm3, %v3897_v0, 0.0  ;;  %v7123_v23 = vsel %vm6836_vm0, %v7122_v33, %v13126_v45  ;;  %v2678_v41 = vpop.permute.xlu2 %2677  ;;  %v2629_v45 = vpop.permute.xlu0 %2628 }
 0x4c8   : > { %v5167_v36 = vadd.f32 %v5166_v22, %v5165_v37  ;;  %v5157_v24 = vrot.slane %v5156_v38, 4  ;;  %v7390_v62 = vadd.f32 %v13151_v6, %v12993_v8  ;;  %v5215_v20 = vrot.slane %v5214_v26, 2 }
 0x4c9   : > { %v5141_v40 = vadd.f32 %v5140_v25, %v5139_v10  ;;  %v8451_v4 = vadd.f32 %v13164_v59, %v13008_v29  ;;  %v8990_v2 = vunpack.c.l.bf16 %v13269_v61  ;;  %v5196_v17 = vrot.slane %v5195_v15, 1 }
 0x4ca   : > { %v5168_v49 = vrot.slane %v5167_v36, 1  ;;  %v5158_v50 = vadd.f32 %v5157_v24, %v5156_v38  ;;  %v13285_v18 = vadd.f32 %v7391_v35, %v7390_v62  ;;  %v7125_v63 = vsel %vm6839_vm4, %v7124_v58, %v7123_v23  ;;  %v2622_v24 = vpop.permute.xlu1 %2621 }
 0x4cb   : > { %v6487_v39 = vadd.f32 %v5986_v56, %v5141_v40  ;;  %v13288_v8 = vadd.f32 %v8452_v12, %v8451_v4  ;;  %v8975_v6 = vunpack.c.h.bf16 %v13280_v16  ;;  %v7588_v52 = vmul.f32 %v6488_v44, %v6488_v44 }
 0x4cc   : > { %v5169_v21 = vadd.f32 %v5168_v49, %v5167_v36  ;;  %v5159_v28 = vrot.slane %v5158_v50, 2  ;;  %v3908_v29 = vmul.f32 %v8990_v2, %v2678_v41  ;;  %v5216_v3 = vadd.f32 %v5215_v20, %v5214_v26 }
 0x4cd   : > { %v7128_v59 = vrot.slane %v6487_v39, 4  ;;  %v7587_v34 = vmul.f32 %v6487_v39, %v6487_v39  ;;  %v3901_v37 = vmul.f32 %v8975_v6, %v2629_v45  ;;  %v8229_v53 = vrot.slane %v13257_v30, 7 }
 0x4ce   : > { %v5197_v13 = vadd.f32 %v5196_v17, %v5195_v15  ;;  %v13293_v0 = vadd.f32 %v13204_v43, %v5169_v21  ;;  %v5160_v35 = vadd.f32 %v5159_v28, %v5158_v50  ;;  %v7130_v58 = vrot.slane %v6488_v44, 3 }
 0x4cf   : > { %v8221_v7 = vrot.slane %v7587_v34, 4  ;;  %v5989_v33 = vrot.slane %v13120_v31, 7  ;;  %v5184_v12 = vsel %vm3986_vm3, %v3901_v37, 0.0  ;;  %v8223_v19 = vrot.slane %v7588_v52, 3  ;;  %v2699_v2 = vpop.permute.xlu2 %2698  ;;  %v2650_v49 = vpop.permute.xlu0 %2649 }
 0x4d0   : > { %v7127_v10 = vsel %vm6842_vm5, %v7126_v32, %v7125_v63  ;;  %v7591_v30 = vmul.f32 %v13293_v0, %v13293_v0  ;;  %v5233_v26 = vsel %vm3986_vm3, %v3908_v29, 0.0  ;;  %v5217_v56 = vrot.slane %v5216_v3, 1  ;;  %v13311_v32 = vld [vmem:[%s10704_s7 + $0x2d0] sm:$0xff]  }
 0x4d1   : > { %v7129_v54 = vsel %vm6845_vm6, %v7128_v59, %v7127_v10  ;;  %v8222_v15 = vsel %vm6845_vm6, %v8221_v7, %v8220_v55  ;;  %v5161_v22 = vrot.slane %v5160_v35, 1  ;;  %v5185_v25 = vrot.slane %v5184_v12, 4 }
 0x4d2   : > { %v8224_v31 = vsel %vm6848_vm7, %v8223_v19, %v8222_v15  ;;  %v13307_v44 = vsel %vm6836_vm0, %v8229_v53, %v7591_v30  ;;  %v2910_v47 = vperm.slane %v13089_v48, 4  ;;  %v5234_v36 = vrot.slane %v5233_v26, 4 }
 0x4d3   : > { %v5162_v38 = vadd.f32 %v5161_v22, %v5160_v35  ;;  %v8226_v23 = vsel %vm6851_vm8, %v8225_v46, %v8224_v31  ;;  %v2924_v55 = vperm.slane %v13089_v48, 6  ;;  %v7131_v62 = vsel %vm6848_vm7, %v7130_v58, %v7129_v54 }
 0x4d4   : > { %v5186_v40 = vadd.f32 %v5185_v25, %v5184_v12  ;;  %2915 = vperm.xlu1 %9283, %v2910_v47   ;;  %v2938_v20 = vperm.slane %v12739_v1, 0  ;;  %v8974_v4 = vunpack.c.l.bf16 %v13280_v16  ;;  %v13322_v41 = vadd.f32 %v5993_v27, %v5197_v13  ;;  %v2643_v25 = vpop.permute.xlu1 %2642  ;;  %v13355_v47 = vld [vmem:[%s10704_s7 + $0x2e0] sm:$0xff]  }
 0x4d5   : > { %v5996_v11 = vrot.slane %v13204_v43, 7  ;;  %v6490_v46 = vadd.f32 %v5989_v33, %v5162_v38  ;;  %2929 = vperm.xlu2 %9285, %v2924_v55   ;;  %v8995_v17 = vunpack.c.h.bf16 %v13311_v32  ;;  %v5218_v50 = vadd.f32 %v5217_v56, %v5216_v3  ;;  %v13361_v55 = vld [vmem:[%s10704_s7 + $0x2c0] sm:$0xff]  }
 0x4d6   : > { %v5187_v45 = vrot.slane %v5186_v40, 2  ;;  %2943 = vperm.xlu0 %9284, %v2938_v20   ;;  %v3900_v63 = vmul.f32 %v8974_v4, %v2622_v24  ;;  %v8982_v39 = vunpack.c.l.bf16 %v13226_v42  ;;  %v7133_v16 = vsel %vm6851_vm8, %v7132_v5, %v7131_v62 }
 0x4d7   : > { %v7134_v27 = vrot.slane %v6490_v46, 1  ;;  %v7590_v6 = vmul.f32 %v6490_v46, %v6490_v46  ;;  %v3911_v52 = vmul.f32 %v8995_v17, %v2699_v2  ;;  %v5235_v21 = vadd.f32 %v5234_v36, %v5233_v26  ;;  %v2720_v17 = vpop.permute.xlu2 %2719 }
 0x4d8   : > { %v5188_v28 = vadd.f32 %v5187_v45, %v5186_v40  ;;  %v5177_v29 = vsel %vm3986_vm3, %v3900_v63, 0.0  ;;  %v3904_v59 = vmul.f32 %v8982_v39, %v2650_v49  ;;  %v2931_v53 = vperm.slane %v13089_v48, 7  ;;  %v13369_v40 = vld [vmem:[%s10785_s10 + $0xb0] sm:$0xff]  ;;  %v2671_v49 = vpop.permute.xlu0 %2670 }
 0x4d9   : > { %v7135_v34 = vsel %vm6854_vm9, %v7134_v27, %v7133_v16  ;;  %v8227_v3 = vrot.slane %v7590_v6, 1  ;;  %v5178_v37 = vrot.slane %v5177_v29, 4  ;;  %v5254_v5 = vsel %vm3986_vm3, %v3911_v52, 0.0 }
 0x4da   : > { %7342 = vst.msk [vmem:[%s11055_s13 + $0xa0] sm:$0xff] %vm3986_vm3, %v7135_v34  ;;  %v7393_v51 = vsel %vm3986_vm3, %v7135_v34, 0.0  ;;  %v5189_v42 = vrot.slane %v5188_v28, 1  ;;  %v5205_v13 = vsel %vm3986_vm3, %v3904_v59, 0.0  ;;  %v13340_v35 = vmul.f32 %v13322_v41, %v13322_v41 }
 0x4db   : > { %v13343_v58 = vadd.f32 %v7393_v51, %v13285_v18  ;;  %v8228_v7 = vsel %vm6854_vm9, %v8227_v3, %v8226_v23  ;;  %v5179_v48 = vadd.f32 %v5178_v37, %v5177_v29  ;;  %v13346_v33 = vadd.f32 %v5996_v11, %v5218_v50 }
 0x4dc   : > { %v8454_v12 = vsel %vm3986_vm3, %v8228_v7, 0.0  ;;  %v5255_v19 = vrot.slane %v5254_v5, 4  ;;  %v5206_v10 = vrot.slane %v5205_v13, 4  ;;  %2936 = vperm.xlu1 %9283, %v2931_v53   ;;  %v5236_v26 = vrot.slane %v5235_v21, 2 }
 0x4dd   : > { %v13350_v30 = vadd.f32 %v8454_v12, %v13288_v8  ;;  %v5992_v18 = vrot.slane %v13204_v43, 3  ;;  %v5180_v54 = vrot.slane %v5179_v48, 2  ;;  %v5190_v15 = vadd.f32 %v5189_v42, %v5188_v28 }
 0x4de   : > { %v5256_v56 = vadd.f32 %v5255_v19, %v5254_v5  ;;  %v5207_v22 = vadd.f32 %v5206_v10, %v5205_v13  ;;  %v2945_v31 = vperm.slane %v12739_v1, 1  ;;  %v7142_v38 = vrot.slane %v13322_v41, 4 }
 0x4df   : > { %v5181_v23 = vadd.f32 %v5180_v54, %v5179_v48  ;;  %v2959_v36 = vperm.slane %v12739_v1, 3  ;;  %v8979_v8 = vunpack.c.h.bf16 %v13179_v14  ;;  %v8235_v24 = vrot.slane %v13340_v35, 4 }
 0x4e0   : > { %v13366_v62 = vmul.f32 %v13346_v33, %v13346_v33  ;;  %v5991_v20 = vrot.slane %v13204_v43, 2  ;;  %v5208_v4 = vrot.slane %v5207_v22, 2  ;;  %2950 = vperm.xlu2 %9285, %v2945_v31   ;;  %v5237_v2 = vadd.f32 %v5236_v26, %v5235_v21 }
 0x4e1   : > { %v5182_v11 = vrot.slane %v5181_v23, 1  ;;  %2964 = vperm.xlu0 %9284, %v2959_v36   ;;  %v3903_v46 = vmul.f32 %v8979_v8, %v2643_v25  ;;  %v9002_v14 = vunpack.c.l.bf16 %v13355_v47  ;;  %v13373_v50 = vadd.f32 %v5992_v18, %v5190_v15 }
 0x4e2   : > { %v5257_v45 = vrot.slane %v5256_v56, 2  ;;  %v5209_v63 = vadd.f32 %v5208_v4, %v5207_v22  ;;  %v8987_v39 = vunpack.c.h.bf16 %v13361_v55  ;;  %v7148_v16 = vrot.slane %v13346_v33, 1 }
 0x4e3   : > { %v5998_v27 = vrot.slane %v13369_v40, 2  ;;  %v5183_v6 = vadd.f32 %v5182_v11, %v5181_v23  ;;  %v5198_v52 = vsel %vm3986_vm3, %v3903_v46, 0.0  ;;  %v3914_v29 = vmul.f32 %v9002_v14, %v2720_v17  ;;  %v2664_v23 = vpop.permute.xlu1 %2663  ;;  %v13398_v11 = vld [vmem:[%s10704_s7 + $0x2e8] sm:$0xff]  }
 0x4e4   : > { %v5210_v21 = vrot.slane %v5209_v63, 1  ;;  %v5199_v28 = vrot.slane %v5198_v52, 4  ;;  %v3907_v59 = vmul.f32 %v8987_v39, %v2671_v49  ;;  %v8241_v34 = vrot.slane %v13366_v62, 1 }
 0x4e5   : > { %v5238_v3 = vrot.slane %v5237_v2, 1  ;;  %v6493_v37 = vadd.f32 %v5991_v20, %v5183_v6  ;;  %v2952_v53 = vperm.slane %v12739_v1, 2  ;;  %v7594_v51 = vmul.f32 %v13373_v50, %v13373_v50 }
 0x4e6   : > { %v5258_v42 = vadd.f32 %v5257_v45, %v5256_v56  ;;  %v5200_v5 = vadd.f32 %v5199_v28, %v5198_v52  ;;  %v2966_v13 = vperm.slane %v12739_v1, 4  ;;  %v7137_v7 = vsel %vm6836_vm0, %v7136_v9, %v13293_v0  ;;  %v2692_v52 = vpop.permute.xlu0 %2691 }
 0x4e7   : > { %v7593_v48 = vmul.f32 %v6493_v37, %v6493_v37  ;;  %v5226_v12 = vsel %vm3986_vm3, %v3907_v59, 0.0  ;;  %2957 = vperm.xlu1 %9283, %v2952_v53   ;;  %v2980_v19 = vperm.slane %v12739_v1, 6  ;;  %v5995_v10 = vrot.slane %v13204_v43, 6 }
 0x4e8   : > { %v5211_v26 = vadd.f32 %v5210_v21, %v5209_v63  ;;  %v5201_v18 = vrot.slane %v5200_v5, 2  ;;  %v5275_v54 = vsel %vm3986_vm3, %v3914_v29, 0.0  ;;  %2971 = vperm.xlu2 %9285, %v2966_v13   ;;  %v7138_v15 = vrot.slane %v6493_v37, 6  ;;  %v2741_v29 = vpop.permute.xlu2 %2740 }
 0x4e9   : > { %v8231_v56 = vrot.slane %v7593_v48, 6  ;;  %v5227_v22 = vrot.slane %v5226_v12, 4  ;;  %2985 = vperm.xlu0 %9284, %v2980_v19   ;;  %v8986_v60 = vunpack.c.l.bf16 %v13361_v55  ;;  %v5239_v9 = vadd.f32 %v5238_v3, %v5237_v2 }
 0x4ea   : > { %v8233_v0 = vrot.slane %v7594_v51, 5  ;;  %v6001_v31 = vrot.slane %v13369_v40, 5  ;;  %v5259_v25 = vrot.slane %v5258_v42, 1  ;;  %v7140_v36 = vrot.slane %v13373_v50, 5 }
 0x4eb   : > { %v8232_v8 = vsel %vm6839_vm4, %v8231_v56, %v13307_v44  ;;  %v5202_v20 = vadd.f32 %v5201_v18, %v5200_v5  ;;  %v5276_v4 = vrot.slane %v5275_v54, 4  ;;  %v6497_v14 = vadd.f32 %v5995_v10, %v5211_v26 }
 0x4ec   : > { %v8234_v46 = vsel %vm6842_vm5, %v8233_v0, %v8232_v8  ;;  %v5994_v55 = vrot.slane %v13204_v43, 5  ;;  %v5228_v2 = vadd.f32 %v5227_v22, %v5226_v12  ;;  %v7139_v17 = vsel %vm6839_vm4, %v7138_v15, %v7137_v7 }
 0x4ed   : > { %v5203_v49 = vrot.slane %v5202_v20, 1  ;;  %v8236_v50 = vsel %vm6845_vm6, %v8235_v24, %v8234_v46  ;;  %v3906_v45 = vmul.f32 %v8986_v60, %v2664_v23  ;;  %v5260_v63 = vadd.f32 %v5259_v25, %v5258_v42  ;;  %v14612_v46 = vld [vmem:[#allocation7_spill] sm:$0xff] }
 0x4ee   : > { %v5997_v44 = vrot.slane %v13369_v40, 1  ;;  %v5229_v39 = vrot.slane %v5228_v2, 2  ;;  %v9007_v6 = vunpack.c.h.bf16 %v13398_v11  ;;  %v5277_v28 = vadd.f32 %v5276_v4, %v5275_v54  ;;  %v14611_v4 = vld [vmem:[#allocation9_spill] sm:$0xff] }
 0x4ef   : > { %v5204_v21 = vadd.f32 %v5203_v49, %v5202_v20  ;;  %v5219_v43 = vsel %vm3986_vm3, %v3906_v45, 0.0  ;;  %v8994_v59 = vunpack.c.l.bf16 %v13311_v32  ;;  %v7141_v3 = vsel %vm6842_vm5, %v7140_v36, %v7139_v17  ;;  %v2685_v36 = vpop.permute.xlu1 %2684 }
 0x4f0   : > { %v7146_v35 = vrot.slane %v6497_v14, 2  ;;  %v5230_v37 = vadd.f32 %v5229_v39, %v5228_v2  ;;  %v5220_v24 = vrot.slane %v5219_v43, 4  ;;  %v2973_v42 = vperm.slane %v12739_v1, 5  ;;  %v13446_v2 = vld [vmem:[%s10704_s7 + $0x2f8] sm:$0xff]   ;;  %v14613_v39 = vld [vmem:[#allocation16_spill] sm:$0xff] }
 0x4f1   : > { %v6496_v53 = vadd.f32 %v5994_v55, %v5204_v21  ;;  %v3910_v51 = vmul.f32 %v8994_v59, %v2692_v52  ;;  %v2987_v5 = vperm.slane %v12739_v1, 7  ;;  %v7597_v13 = vmul.f32 %v6497_v14, %v6497_v14  ;;  %v14616_v52 = vld [vmem:[#allocation5_spill] sm:$0xff] }
 0x4f2   : > { %v5231_v7 = vrot.slane %v5230_v37, 1  ;;  %v5221_v48 = vadd.f32 %v5220_v24, %v5219_v43  ;;  %v3917_v12 = vmul.f32 %v9007_v6, %v2741_v29  ;;  %v7143_v19 = vsel %vm6845_vm6, %v7142_v38, %v7141_v3  ;;  %2978 = vperm.xlu1 %9283, %v2973_v42   ;;  %v14615_v6 = vld [vmem:[#allocation17_spill] sm:$0xff]  ;;  %v2762_v43 = vpop.permute.xlu2 %2761 }
 0x4f3   : > { %v7144_v32 = vrot.slane %v6496_v53, 3  ;;  %v7596_v10 = vmul.f32 %v6496_v53, %v6496_v53  ;;  %v5247_v26 = vsel %vm3986_vm3, %v3910_v51, 0.0  ;;  %2992 = vperm.xlu2 %9285, %v2987_v5   ;;  %v5278_v18 = vrot.slane %v5277_v28, 2 }
 0x4f4   : > { %v5232_v54 = vadd.f32 %v5231_v7, %v5230_v37  ;;  %v5222_v15 = vrot.slane %v5221_v48, 2  ;;  %v5248_v56 = vrot.slane %v5247_v26, 4  ;;  %v13419_v1 = vadd.f32 %v5998_v27, %v5239_v9 }
 0x4f5   : > { %v7145_v22 = vsel %vm6848_vm7, %v7144_v32, %v7143_v19  ;;  %v8237_v41 = vrot.slane %v7596_v10, 3  ;;  %v3001_v38 = vperm.slane %v12085_v57, 1  ;;  %v8239_v60 = vrot.slane %v7597_v13, 2 }
 0x4f6   : > { %v7147_v0 = vsel %vm6851_vm8, %v7146_v35, %v7145_v22  ;;  %v5223_v25 = vadd.f32 %v5222_v15, %v5221_v48  ;;  %v5296_v23 = vsel %vm3986_vm3, %v3917_v12, 0.0  ;;  %v13431_v8 = vadd.f32 %v5997_v44, %v5232_v54  ;;  %v9234_v44 = vld [vmem:[%s10704_s7 + $0x2d8] sm:$0xff]   ;;  %v2713_v35 = vpop.permute.xlu0 %2712 }
 0x4f7   : > { %v13428_v27 = vsel %vm6854_vm9, %v7148_v16, %v7147_v0  ;;  %v8238_v9 = vsel %vm6848_vm7, %v8237_v41, %v8236_v50  ;;  %v5249_v20 = vadd.f32 %v5248_v56, %v5247_v26  ;;  %3006 = vperm.xlu0 %9284, %v3001_v38   ;;  %v13435_v14 = vmul.f32 %v14612_v46, %v14611_v4  ;;  %v2706_v41 = vpop.permute.xlu1 %2705  ;;  %v13493_v46 = vld [vmem:[%s10704_s7 + $0x300] sm:$0xff]  }
 0x4f8   : > { %v13439_v55 = vadd.f32 %v6001_v31, %v5260_v63  ;;  %7343 = vst.msk [vmem:[%s11055_s13 + $0xa8] sm:$0xff] %vm3986_vm3, %v13428_v27  ;;  %v8240_v33 = vsel %vm6851_vm8, %v8239_v60, %v8238_v9  ;;  %v5279_v16 = vadd.f32 %v5278_v18, %v5277_v28  ;;  %v5224_v49 = vrot.slane %v5223_v25, 1  ;;  %v14614_v31 = vld [vmem:[#allocation6_spill] sm:$0xff] }
 0x4f9   : > { %v13451_v17 = vsel %vm6854_vm9, %v8241_v34, %v8240_v33  ;;  %v5297_v50 = vrot.slane %v5296_v23, 4  ;;  %v5250_v45 = vrot.slane %v5249_v20, 2  ;;  %v13456_v63 = vmul.f32 %v14614_v31, %v14613_v39 }
 0x4fa   : > { %v13460_v21 = vmul.f32 %v14616_v52, %v14615_v6  ;;  %v7601_v28 = vmul.f32 %v13419_v1, %v13419_v1  ;;  %v8991_v62 = vunpack.c.h.bf16 %v13269_v61  ;;  %v7600_v34 = vmul.f32 %v13431_v8, %v13431_v8  ;;  %v2783_v52 = vpop.permute.xlu2 %2782 }
 0x4fb   : > { %v5225_v29 = vadd.f32 %v5224_v49, %v5223_v25  ;;  %v5251_v59 = vadd.f32 %v5250_v45, %v5249_v20  ;;  %v9014_v3 = vunpack.c.l.bf16 %v13446_v2  ;;  %v7152_v37 = vrot.slane %v13419_v1, 6 }
 0x4fc   : > { %v13471_v24 = vmul.f32 %v13439_v55, %v13439_v55  ;;  %v3909_v53 = vmul.f32 %v8991_v62, %v2685_v36  ;;  %v8999_v51 = vunpack.c.h.bf16 %v9234_v44  ;;  %v5280_v42 = vrot.slane %v5279_v16, 1 }
 0x4fd   : > { %v13474_v61 = vadd.f32 %v13369_v40, %v5225_v29  ;;  %v5298_v5 = vadd.f32 %v5297_v50, %v5296_v23  ;;  %v3920_v13 = vmul.f32 %v9014_v3, %v2762_v43  ;;  %v2994_v12 = vperm.slane %v12085_v57, 0  ;;  %v13487_v23 = vld [vmem:[%s10785_s10 + $0xb8] sm:$0xff] }
 0x4fe   : > { %v5240_v7 = vsel %vm3986_vm3, %v3909_v53, 0.0  ;;  %v3913_v48 = vmul.f32 %v8999_v51, %v2713_v35  ;;  %v3008_v19 = vperm.slane %v12085_v57, 2  ;;  %v8245_v32 = vrot.slane %v7601_v28, 6  ;;  %v2734_v53 = vpop.permute.xlu0 %2733 }
 0x4ff   : > { %v8243_v10 = vrot.slane %v7600_v34, 7  ;;  %v7599_v26 = vmul.f32 %v13474_v61, %v13474_v61  ;;  %v5252_v18 = vrot.slane %v5251_v59, 1  ;;  %v7158_v54 = vrot.slane %v13439_v55, 3  ;;  %2999 = vperm.xlu1 %9283, %v2994_v12  }
 0x500   : > { %v5241_v15 = vrot.slane %v5240_v7, 4  ;;  %v5317_v56 = vsel %vm3986_vm3, %v3920_v13, 0.0  ;;  %v5268_v22 = vsel %vm3986_vm3, %v3913_v48, 0.0  ;;  %3013 = vperm.xlu2 %9285, %v3008_v19   ;;  %v8251_v38 = vrot.slane %v13471_v24, 3 }
 0x501   : > { %v5281_v60 = vadd.f32 %v5280_v42, %v5279_v16  ;;  %v8244_v0 = vsel %vm6836_vm0, %v8243_v10, %v7599_v26  ;;  %v5299_v25 = vrot.slane %v5298_v5, 2  ;;  %v5318_v20 = vrot.slane %v5317_v56, 4 }
 0x502   : > { %v13490_v36 = vsel %vm6839_vm4, %v8245_v32, %v8244_v0  ;;  %v5242_v9 = vadd.f32 %v5241_v15, %v5240_v7  ;;  %v5269_v4 = vrot.slane %v5268_v22, 4  ;;  %v6006_v33 = vrot.slane %v13487_v23, 3 }
 0x503   : > { %v6000_v49 = vrot.slane %v13369_v40, 4  ;;  %v5253_v50 = vadd.f32 %v5252_v18, %v5251_v59  ;;  %v3022_v16 = vperm.slane %v12085_v57, 4  ;;  %v5319_v39 = vadd.f32 %v5318_v20, %v5317_v56 }
 0x504   : > { %v5243_v45 = vrot.slane %v5242_v9, 2  ;;  %v5270_v31 = vadd.f32 %v5269_v4, %v5268_v22  ;;  %v8998_v6 = vunpack.c.l.bf16 %v9234_v44  ;;  %v13499_v28 = vadd.f32 %v13487_v23, %v5281_v60  ;;  %v2727_v22 = vpop.permute.xlu1 %2726 }
 0x505   : > { %v7150_v62 = vrot.slane %v13431_v8, 7  ;;  %v5300_v43 = vadd.f32 %v5299_v25, %v5298_v5  ;;  %3027 = vperm.xlu0 %9284, %v3022_v16   ;;  %v9019_v34 = vunpack.c.h.bf16 %v13493_v46  ;;  %v5999_v29 = vrot.slane %v13369_v40, 3 }
 0x506   : > { %v5244_v3 = vadd.f32 %v5243_v45, %v5242_v9  ;;  %v5271_v59 = vrot.slane %v5270_v31, 2  ;;  %v3912_v35 = vmul.f32 %v8998_v6, %v2706_v41  ;;  %v6503_v51 = vadd.f32 %v6000_v49, %v5253_v50 }
 0x507   : > { %v3923_v42 = vmul.f32 %v9019_v34, %v2783_v52  ;;  %v9006_v44 = vunpack.c.l.bf16 %v13398_v11  ;;  %v3015_v13 = vperm.slane %v12085_v57, 3  ;;  %v5320_v48 = vrot.slane %v5319_v39, 2 }
 0x508   : > { %v5245_v7 = vrot.slane %v5244_v3, 1  ;;  %v5272_v12 = vadd.f32 %v5271_v59, %v5270_v31  ;;  %v5261_v8 = vsel %vm3986_vm3, %v3912_v35, 0.0  ;;  %v3029_v10 = vperm.slane %v12085_v57, 5 }
 0x509   : > { %v5262_v5 = vrot.slane %v5261_v8, 4  ;;  %v5338_v19 = vsel %vm3986_vm3, %v3923_v42, 0.0  ;;  %v3916_v32 = vmul.f32 %v9006_v44, %v2734_v53  ;;  %3020 = vperm.xlu1 %9283, %v3015_v13   ;;  %v5301_v26 = vrot.slane %v5300_v43, 1 }
 0x50a   : > { %v5246_v18 = vadd.f32 %v5245_v7, %v5244_v3  ;;  %v5273_v15 = vrot.slane %v5272_v12, 1  ;;  %v5339_v56 = vrot.slane %v5338_v19, 4  ;;  %3034 = vperm.xlu2 %9285, %v3029_v10   ;;  %v3043_v60 = vperm.slane %v12085_v57, 7  ;;  %v13522_v7 = vld [vmem:[%s10704_s7 + $0x310] sm:$0xff]  }
 0x50b   : > { %v5263_v11 = vadd.f32 %v5262_v5, %v5261_v8  ;;  %v5289_v41 = vsel %vm3986_vm3, %v3916_v32, 0.0  ;;  %v9003_v0 = vunpack.c.h.bf16 %v13355_v47  ;;  %v7151_v25 = vsel %vm6836_vm0, %v7150_v62, %v13474_v61 }
 0x50c   : > { %v7603_v9 = vmul.f32 %v6503_v51, %v6503_v51  ;;  %v6502_v20 = vadd.f32 %v5999_v29, %v5246_v18  ;;  %v6003_v4 = vrot.slane %v13369_v40, 7  ;;  %v5321_v49 = vadd.f32 %v5320_v48, %v5319_v39 }
 0x50d   : > { %v5264_v50 = vrot.slane %v5263_v11, 2  ;;  %v5290_v16 = vrot.slane %v5289_v41, 4  ;;  %3048 = vperm.xlu0 %9284, %v3043_v60   ;;  %v3915_v45 = vmul.f32 %v9003_v0, %v2727_v22  ;;  %v5274_v52 = vadd.f32 %v5273_v15, %v5272_v12 }
 0x50e   : > { %v7154_v31 = vrot.slane %v6502_v20, 5  ;;  %v7602_v6 = vmul.f32 %v6502_v20, %v6502_v20  ;;  %v5340_v34 = vadd.f32 %v5339_v56, %v5338_v19  ;;  %v7153_v47 = vsel %vm6839_vm4, %v7152_v37, %v7151_v25  ;;  %v2804_v56 = vpop.permute.xlu2 %2803 }
 0x50f   : > { %v5302_v3 = vadd.f32 %v5301_v26, %v5300_v43  ;;  %v5265_v61 = vadd.f32 %v5264_v50, %v5263_v11  ;;  %v5291_v62 = vadd.f32 %v5290_v16, %v5289_v41  ;;  %v7156_v29 = vrot.slane %v6503_v51, 4  ;;  %v13528_v51 = vld [vmem:[%s10704_s7 + $0x2f0] sm:$0xff]   ;;  %v2755_v11 = vpop.permute.xlu0 %2754 }
 0x510   : > { %v8249_v59 = vrot.slane %v7603_v9, 4  ;;  %v7155_v39 = vsel %vm6842_vm5, %v7154_v31, %v7153_v47  ;;  %v8247_v35 = vrot.slane %v7602_v6, 5  ;;  %v5322_v53 = vrot.slane %v5321_v49, 1 }
 0x511   : > { %v6002_v42 = vrot.slane %v13369_v40, 6  ;;  %v5266_v44 = vrot.slane %v5265_v61, 1  ;;  %v5282_v13 = vsel %vm3986_vm3, %v3915_v45, 0.0  ;;  %v6009_v37 = vrot.slane %v13487_v23, 6 }
 0x512   : > { %v8248_v1 = vsel %vm6842_vm5, %v8247_v35, %v13490_v36  ;;  %v6506_v43 = vadd.f32 %v6003_v4, %v5274_v52  ;;  %v5341_v48 = vrot.slane %v5340_v34, 2  ;;  %v7157_v12 = vsel %vm6845_vm6, %v7156_v29, %v7155_v39  ;;  %v13563_v29 = vld [vmem:[%s10785_s10 + $0xc0] sm:$0xff] }
 0x513   : > { %v8250_v8 = vsel %vm6845_vm6, %v8249_v59, %v8248_v1  ;;  %v5267_v5 = vadd.f32 %v5266_v44, %v5265_v61  ;;  %v5292_v40 = vrot.slane %v5291_v62, 2  ;;  %v13534_v19 = vadd.f32 %v6006_v33, %v5302_v3  ;;  %v13580_v1 = vld [vmem:[%s10704_s7 + $0x318] sm:$0xff]  }
 0x514   : > { %v8252_v36 = vsel %vm6848_vm7, %v8251_v38, %v8250_v8  ;;  %v5283_v32 = vrot.slane %v5282_v13, 4  ;;  %v9026_v10 = vunpack.c.l.bf16 %v13522_v7  ;;  %v5323_v26 = vadd.f32 %v5322_v53, %v5321_v49  ;;  %v2748_v8 = vpop.permute.xlu1 %2747 }
 0x515   : > { %v6505_v18 = vadd.f32 %v6002_v42, %v5267_v5  ;;  %v5293_v15 = vadd.f32 %v5292_v40, %v5291_v62  ;;  %v9011_v22 = vunpack.c.h.bf16 %v13528_v51  ;;  %v7162_v41 = vrot.slane %v6506_v43, 1 }
 0x516   : > { %v7606_v60 = vmul.f32 %v6506_v43, %v6506_v43  ;;  %v7159_v33 = vsel %vm6848_vm7, %v7158_v54, %v7157_v12  ;;  %v5284_v0 = vadd.f32 %v5283_v32, %v5282_v13  ;;  %v5342_v38 = vadd.f32 %v5341_v48, %v5340_v34 }
 0x517   : > { %v7160_v24 = vrot.slane %v6505_v18, 2  ;;  %v7605_v25 = vmul.f32 %v6505_v18, %v6505_v18  ;;  %v5294_v9 = vrot.slane %v5293_v15, 1  ;;  %v3926_v4 = vmul.f32 %v9026_v10, %v2804_v56  ;;  %v2776_v18 = vpop.permute.xlu0 %2775 }
 0x518   : > { %v5285_v20 = vrot.slane %v5284_v0, 2  ;;  %v3919_v49 = vmul.f32 %v9011_v22, %v2755_v11  ;;  %v3036_v50 = vperm.slane %v12085_v57, 6  ;;  %v6005_v31 = vrot.slane %v13487_v23, 2  ;;  %v2825_v22 = vpop.permute.xlu2 %2824 }
 0x519   : > { %v7161_v16 = vsel %vm6851_vm8, %v7160_v24, %v7159_v33  ;;  %v8253_v45 = vrot.slane %v7605_v25, 2  ;;  %v5295_v55 = vadd.f32 %v5294_v9, %v5293_v15  ;;  %v7607_v54 = vmul.f32 %v13499_v28, %v13499_v28 }
 0x51a   : > { %v8255_v6 = vrot.slane %v7606_v60, 1  ;;  %v13550_v52 = vsel %vm6854_vm9, %v7162_v41, %v7161_v16  ;;  %v5286_v34 = vadd.f32 %v5285_v20, %v5284_v0  ;;  %3041 = vperm.xlu1 %9283, %v3036_v50   ;;  %v13552_v47 = vadd.f32 %v6009_v37, %v5323_v26 }
 0x51b   : > { %7344 = vst.msk [vmem:[%s11055_s13 + $0xb0] sm:$0xff] %vm3986_vm3, %v13550_v52  ;;  %v8254_v57 = vsel %vm6851_vm8, %v8253_v45, %v8252_v36  ;;  %v5343_v3 = vrot.slane %v5342_v38, 1  ;;  %v6004_v61 = vrot.slane %v13487_v23, 1  ;;  %v5359_v39 = vsel %vm3986_vm3, %v3926_v4, 0.0 }
 0x51c   : > { %v13560_v62 = vsel %vm6854_vm9, %v8255_v6, %v8254_v57  ;;  %v5287_v59 = vrot.slane %v5286_v34, 1  ;;  %v5310_v35 = vsel %vm3986_vm3, %v3919_v49, 0.0  ;;  %v13569_v53 = vsel %vm3986_vm3, %v13428_v27, 0.0 }
 0x51d   : > { %v13573_v42 = vsel %vm3986_vm3, %v13451_v17, 0.0  ;;  %v7610_v44 = vmul.f32 %v13534_v19, %v13534_v19  ;;  %v13577_v13 = vadd.f32 %v6005_v31, %v5295_v55  ;;  %v5311_v43 = vrot.slane %v5310_v35, 4 }
 0x51e   : > { %v5288_v37 = vadd.f32 %v5287_v59, %v5286_v34  ;;  %v3050_v48 = vperm.slane %v13460_v21, 0  ;;  %v3064_v12 = vperm.slane %v13460_v21, 2  ;;  %v6011_v27 = vrot.slane %v13563_v29, 1 }
 0x51f   : > { %v5344_v5 = vadd.f32 %v5343_v3, %v5342_v38  ;;  %v5360_v40 = vrot.slane %v5359_v39, 4  ;;  %v9010_v17 = vunpack.c.l.bf16 %v13528_v51  ;;  %v13588_v36 = vmul.f32 %v13552_v47, %v13552_v47 }
 0x520   : > { %v13590_v32 = vadd.f32 %v6004_v61, %v5288_v37  ;;  %v5312_v10 = vadd.f32 %v5311_v43, %v5310_v35  ;;  %3055 = vperm.xlu2 %9285, %v3050_v48   ;;  %3069 = vperm.xlu0 %9284, %v3064_v12   ;;  %v9031_v26 = vunpack.c.h.bf16 %v13580_v1  ;;  %v7609_v15 = vmul.f32 %v13577_v13, %v13577_v13  ;;  %v2769_v43 = vpop.permute.xlu1 %2768 }
 0x521   : > { %v3918_v56 = vmul.f32 %v9010_v17, %v2748_v8  ;;  %v9018_v11 = vunpack.c.l.bf16 %v13493_v46  ;;  %v3057_v51 = vperm.slane %v13460_v21, 1  ;;  %v7168_v41 = vrot.slane %v13534_v19, 5 }
 0x522   : > { %v8261_v60 = vrot.slane %v7610_v44, 5  ;;  %v7608_v33 = vmul.f32 %v13590_v32, %v13590_v32  ;;  %v5313_v0 = vrot.slane %v5312_v10, 2  ;;  %v13600_v24 = vadd.f32 %v6011_v27, %v5344_v5 }
 0x523   : > { %v5361_v25 = vadd.f32 %v5360_v40, %v5359_v39  ;;  %v5303_v38 = vsel %vm3986_vm3, %v3918_v56, 0.0  ;;  %v3922_v9 = vmul.f32 %v9018_v11, %v2776_v18  ;;  %3062 = vperm.xlu1 %9283, %v3057_v51   ;;  %v3929_v46 = vmul.f32 %v9031_v26, %v2825_v22  ;;  %v13631_v51 = vld [vmem:[%s10704_s7 + $0x328] sm:$0xff]  }
 0x524   : > { %v8257_v20 = vrot.slane %v7608_v33, 7  ;;  %v5314_v4 = vadd.f32 %v5313_v0, %v5312_v10  ;;  %v5304_v49 = vrot.slane %v5303_v38, 4  ;;  %v8267_v50 = vrot.slane %v13588_v36, 2 }
 0x525   : > { %v8259_v16 = vrot.slane %v7609_v15, 6  ;;  %v6014_v45 = vrot.slane %v13563_v29, 4  ;;  %v5331_v31 = vsel %vm3986_vm3, %v3922_v9, 0.0  ;;  %v3071_v57 = vperm.slane %v13460_v21, 3 }
 0x526   : > { %v8258_v55 = vsel %vm6836_vm0, %v8257_v20, %v7607_v54  ;;  %v5315_v6 = vrot.slane %v5314_v4, 1  ;;  %v5305_v34 = vadd.f32 %v5304_v49, %v5303_v38  ;;  %v13610_v3 = vmul.f32 %v13600_v24, %v13600_v24 }
 0x527   : > { %v8260_v61 = vsel %vm6839_vm4, %v8259_v16, %v8258_v55  ;;  %v5362_v59 = vrot.slane %v5361_v25, 2  ;;  %v6008_v39 = vrot.slane %v13487_v23, 5  ;;  %v5380_v37 = vsel %vm3986_vm3, %v3929_v46, 0.0  ;;  %v2846_v55 = vpop.permute.xlu2 %2845 }
 0x528   : > { %v5306_v35 = vrot.slane %v5305_v34, 2  ;;  %v13615_v44 = vsel %vm6842_vm5, %v8261_v60, %v8260_v61  ;;  %v5332_v54 = vrot.slane %v5331_v31, 4  ;;  %3076 = vperm.xlu2 %9285, %v3071_v57   ;;  %v7397_v48 = vsel %vm3986_vm3, %v13550_v52, 0.0 }
 0x529   : > { %v5316_v12 = vadd.f32 %v5315_v6, %v5314_v4  ;;  %v3085_v8 = vperm.slane %v13460_v21, 5  ;;  %v9015_v27 = vunpack.c.h.bf16 %v13446_v2  ;;  %v8458_v5 = vsel %vm3986_vm3, %v13560_v62, 0.0  ;;  %v13634_v62 = vld [vmem:[%s10704_s7 + $0x308] sm:$0xff]  }
 0x52a   : > { %v7164_v40 = vrot.slane %v13590_v32, 7  ;;  %v5307_v17 = vadd.f32 %v5306_v35, %v5305_v34  ;;  %v5333_v10 = vadd.f32 %v5332_v54, %v5331_v31  ;;  %v5381_v26 = vrot.slane %v5380_v37, 4 }
 0x52b   : > { %3090 = vperm.xlu0 %9284, %v3085_v8   ;;  %v3921_v18 = vmul.f32 %v9015_v27, %v2769_v43  ;;  %v7396_v52 = vadd.f32 %v13569_v53, %v13343_v58  ;;  %v8457_v15 = vadd.f32 %v13573_v42, %v13350_v30  ;;  %v5363_v56 = vadd.f32 %v5362_v59, %v5361_v25  ;;  %v2797_v25 = vpop.permute.xlu0 %2796 }
 0x52c   : > { %v6007_v22 = vrot.slane %v13487_v23, 4  ;;  %v5308_v2 = vrot.slane %v5307_v17, 1  ;;  %v5334_v11 = vrot.slane %v5333_v10, 2  ;;  %v6512_v32 = vadd.f32 %v6008_v39, %v5316_v12 }
 0x52d   : > { %v5324_v60 = vsel %vm3986_vm3, %v3921_v18, 0.0  ;;  %v13637_v33 = vadd.f32 %v7397_v48, %v7396_v52  ;;  %v13639_v0 = vadd.f32 %v8458_v5, %v8457_v15  ;;  %v7165_v58 = vsel %vm6836_vm0, %v7164_v40, %v13499_v28 }
 0x52e   : > { %v5309_v30 = vadd.f32 %v5308_v2, %v5307_v17  ;;  %v5335_v53 = vadd.f32 %v5334_v11, %v5333_v10  ;;  %v5325_v42 = vrot.slane %v5324_v60, 4  ;;  %v7166_v38 = vrot.slane %v13577_v13, 6 }
 0x52f   : > { %v5382_v9 = vadd.f32 %v5381_v26, %v5380_v37  ;;  %v9038_v20 = vunpack.c.l.bf16 %v13631_v51  ;;  %v9023_v4 = vunpack.c.h.bf16 %v13634_v62  ;;  %v5364_v49 = vrot.slane %v5363_v56, 1 }
 0x530   : > { %v6511_v46 = vadd.f32 %v6007_v22, %v5309_v30  ;;  %v5336_v16 = vrot.slane %v5335_v53, 1  ;;  %v5326_v31 = vadd.f32 %v5325_v42, %v5324_v60  ;;  %v7167_v6 = vsel %vm6839_vm4, %v7166_v38, %v7165_v58  ;;  %v13666_v22 = vld [vmem:[%s10704_s7 + $0x330] sm:$0xff]   ;;  %v2790_v60 = vpop.permute.xlu1 %2789 }
 0x531   : > { %v7612_v34 = vmul.f32 %v6512_v32, %v6512_v32  ;;  %v3925_v28 = vmul.f32 %v9023_v4, %v2797_v25  ;;  %v3078_v57 = vperm.slane %v13460_v21, 4  ;;  %v8271_v35 = vrot.slane %v13610_v3, 7 }
 0x532   : > { %v7170_v61 = vrot.slane %v6511_v46, 4  ;;  %v7611_v59 = vmul.f32 %v6511_v46, %v6511_v46  ;;  %v5337_v39 = vadd.f32 %v5336_v16, %v5335_v53  ;;  %v5327_v13 = vrot.slane %v5326_v31, 2 }
 0x533   : > { %v5383_v37 = vrot.slane %v5382_v9, 2  ;;  %v3932_v54 = vmul.f32 %v9038_v20, %v2846_v55  ;;  %3083 = vperm.xlu1 %9283, %v3078_v57   ;;  %v3092_v43 = vperm.slane %v13460_v21, 6  ;;  %v5365_v48 = vadd.f32 %v5364_v49, %v5363_v56 }
 0x534   : > { %v8263_v12 = vrot.slane %v7611_v59, 4  ;;  %v13651_v8 = vadd.f32 %v13563_v29, %v5337_v39  ;;  %v5328_v27 = vadd.f32 %v5327_v13, %v5326_v31  ;;  %v8265_v5 = vrot.slane %v7612_v34, 3 }
 0x535   : > { %v7169_v40 = vsel %vm6842_vm5, %v7168_v41, %v7167_v6  ;;  %v6010_v17 = vrot.slane %v13487_v23, 7  ;;  %v5352_v3 = vsel %vm3986_vm3, %v3925_v28, 0.0  ;;  %3097 = vperm.xlu2 %9285, %v3092_v43   ;;  %v7172_v15 = vrot.slane %v6512_v32, 3 }
 0x536   : > { %v7171_v10 = vsel %vm6845_vm6, %v7170_v61, %v7169_v40  ;;  %v8264_v26 = vsel %vm6845_vm6, %v8263_v12, %v13615_v44  ;;  %v7615_v18 = vmul.f32 %v13651_v8, %v13651_v8  ;;  %v5329_v52 = vrot.slane %v5328_v27, 1 }
 0x537   : > { %v8266_v56 = vsel %vm6848_vm7, %v8265_v5, %v8264_v26  ;;  %v5384_v19 = vadd.f32 %v5383_v37, %v5382_v9  ;;  %v5401_v41 = vsel %vm3986_vm3, %v3932_v54, 0.0  ;;  %v5353_v11 = vrot.slane %v5352_v3, 4  ;;  %v2867_v9 = vpop.permute.xlu2 %2866 }
 0x538   : > { %v13669_v23 = vsel %vm6836_vm0, %v8271_v35, %v7615_v18  ;;  %v5330_v2 = vadd.f32 %v5329_v52, %v5328_v27  ;;  %v8268_v44 = vsel %vm6851_vm8, %v8267_v50, %v8266_v56  ;;  %v7174_v58 = vrot.slane %v13552_v47, 2  ;;  %v2818_v50 = vpop.permute.xlu0 %2817 }
 0x539   : > { %v7173_v32 = vsel %vm6848_vm7, %v7172_v15, %v7171_v10  ;;  %v3106_v30 = vperm.slane %v13456_v63, 0  ;;  %v9022_v53 = vunpack.c.l.bf16 %v13634_v62  ;;  %v13680_v42 = vadd.f32 %v6014_v45, %v5365_v48  ;;  %v2811_v15 = vpop.permute.xlu1 %2810 }
 0x53a   : > { %v6514_v25 = vadd.f32 %v6010_v17, %v5330_v2  ;;  %v5354_v38 = vadd.f32 %v5353_v11, %v5352_v3  ;;  %v9043_v36 = vunpack.c.h.bf16 %v13666_v22  ;;  %v5385_v20 = vrot.slane %v5384_v19, 1 }
 0x53b   : > { %v5402_v4 = vrot.slane %v5401_v41, 4  ;;  %3111 = vperm.xlu0 %9284, %v3106_v30   ;;  %v3924_v47 = vmul.f32 %v9022_v53, %v2790_v60  ;;  %v9030_v49 = vunpack.c.l.bf16 %v13580_v1  ;;  %v7175_v46 = vsel %vm6851_vm8, %v7174_v58, %v7173_v32  ;;  %v13718_v32 = vld [vmem:[%s10704_s7 + $0x340] sm:$0xff]   ;;  %v13722_v53 = vld [vmem:[%s10785_s10 + $0xc8] sm:$0xff] }
 0x53c   : > { %v7176_v62 = vrot.slane %v6514_v25, 1  ;;  %v7614_v16 = vmul.f32 %v6514_v25, %v6514_v25  ;;  %v5355_v31 = vrot.slane %v5354_v38, 2  ;;  %v3935_v55 = vmul.f32 %v9043_v36, %v2867_v9 }
 0x53d   : > { %v5345_v45 = vsel %vm3986_vm3, %v3924_v47, 0.0  ;;  %v3928_v6 = vmul.f32 %v9030_v49, %v2818_v50  ;;  %v3099_v34 = vperm.slane %v13460_v21, 7  ;;  %v6017_v39 = vrot.slane %v13563_v29, 7 }
 0x53e   : > { %v7177_v28 = vsel %vm6854_vm9, %v7176_v62, %v7175_v46  ;;  %v8269_v57 = vrot.slane %v7614_v16, 1  ;;  %v5356_v61 = vadd.f32 %v5355_v31, %v5354_v38  ;;  %v5346_v59 = vrot.slane %v5345_v45, 4 }
 0x53f   : > { %7345 = vst.msk [vmem:[%s11055_s13 + $0xb8] sm:$0xff] %vm3986_vm3, %v7177_v28  ;;  %v7399_v1 = vsel %vm3986_vm3, %v7177_v28, 0.0  ;;  %v5403_v13 = vadd.f32 %v5402_v4, %v5401_v41  ;;  %v5373_v35 = vsel %vm3986_vm3, %v3928_v6, 0.0  ;;  %3104 = vperm.xlu1 %9283, %v3099_v34   ;;  %v5386_v48 = vadd.f32 %v5385_v20, %v5384_v19  ;;  %v2888_v62 = vpop.permute.xlu2 %2887 }
 0x540   : > { %v13694_v37 = vadd.f32 %v7399_v1, %v13637_v33  ;;  %v8270_v21 = vsel %vm6854_vm9, %v8269_v57, %v8268_v44  ;;  %v5357_v54 = vrot.slane %v5356_v61, 1  ;;  %v5347_v43 = vadd.f32 %v5346_v59, %v5345_v45  ;;  %v2839_v20 = vpop.permute.xlu0 %2838 }
 0x541   : > { %v8460_v12 = vsel %vm3986_vm3, %v8270_v21, 0.0  ;;  %v5422_v27 = vsel %vm3986_vm3, %v3935_v55, 0.0  ;;  %v5374_v5 = vrot.slane %v5373_v35, 4  ;;  %v13701_v40 = vmul.f32 %v13680_v42, %v13680_v42 }
 0x542   : > { %v13704_v17 = vadd.f32 %v8460_v12, %v13639_v0  ;;  %v5348_v33 = vrot.slane %v5347_v43, 2  ;;  %v3113_v3 = vperm.slane %v13456_v63, 1  ;;  %v5404_v10 = vrot.slane %v5403_v13, 2  ;;  %v13711_v0 = vld [vmem:[%s10704_s7 + $0x320] sm:$0xff]  }
 0x543   : > { %v6013_v26 = vrot.slane %v13563_v29, 3  ;;  %v5358_v18 = vadd.f32 %v5357_v54, %v5356_v61  ;;  %v5375_v52 = vadd.f32 %v5374_v5, %v5373_v35  ;;  %v5423_v19 = vrot.slane %v5422_v27, 4 }
 0x544   : > { %v5349_v56 = vadd.f32 %v5348_v33, %v5347_v43  ;;  %3118 = vperm.xlu2 %9285, %v3113_v3   ;;  %v3127_v41 = vperm.slane %v13456_v63, 3  ;;  %v9027_v2 = vunpack.c.h.bf16 %v13522_v7  ;;  %v7178_v44 = vrot.slane %v13600_v24, 7 }
 0x545   : > { %v7184_v11 = vrot.slane %v13680_v42, 4  ;;  %v13715_v60 = vadd.f32 %v6017_v39, %v5386_v48  ;;  %v5376_v58 = vrot.slane %v5375_v52, 2  ;;  %v8277_v30 = vrot.slane %v13701_v40, 4 }
 0x546   : > { %v6012_v25 = vrot.slane %v13563_v29, 2  ;;  %v5350_v38 = vrot.slane %v5349_v56, 1  ;;  %3132 = vperm.xlu0 %9284, %v3127_v41   ;;  %v3927_v7 = vmul.f32 %v9027_v2, %v2811_v15  ;;  %v5405_v36 = vadd.f32 %v5404_v10, %v5403_v13  ;;  %v13751_v41 = vld [vmem:[%s10704_s7 + $0x348] sm:$0xff]  }
 0x547   : > { %v13725_v9 = vadd.f32 %v6013_v26, %v5358_v18  ;;  %v5377_v24 = vadd.f32 %v5376_v58, %v5375_v52  ;;  %v9035_v50 = vunpack.c.h.bf16 %v13711_v0  ;;  %v5424_v47 = vadd.f32 %v5423_v19, %v5422_v27 }
 0x548   : > { %v5351_v4 = vadd.f32 %v5350_v38, %v5349_v56  ;;  %v5366_v49 = vsel %vm3986_vm3, %v3927_v7, 0.0  ;;  %v9050_v46 = vunpack.c.l.bf16 %v13718_v32  ;;  %v7190_v16 = vrot.slane %v13715_v60, 1  ;;  %v2832_v38 = vpop.permute.xlu1 %2831 }
 0x549   : > { %v13733_v31 = vmul.f32 %v13715_v60, %v13715_v60  ;;  %v6019_v45 = vrot.slane %v13722_v53, 2  ;;  %v5367_v55 = vrot.slane %v5366_v49, 4  ;;  %v3931_v34 = vmul.f32 %v9035_v50, %v2839_v20 }
 0x54a   : > { %v6517_v6 = vadd.f32 %v6012_v25, %v5351_v4  ;;  %v3120_v28 = vperm.slane %v13456_v63, 2  ;;  %v3169_v57 = vperm.slane %v13435_v14, 1  ;;  %v5406_v61 = vrot.slane %v5405_v36, 1 }
 0x54b   : > { %v7618_v59 = vmul.f32 %v13725_v9, %v13725_v9  ;;  %v5378_v39 = vrot.slane %v5377_v24, 1  ;;  %v5368_v1 = vadd.f32 %v5367_v55, %v5366_v49  ;;  %v5425_v35 = vrot.slane %v5424_v47, 2 }
 0x54c   : > { %v7617_v13 = vmul.f32 %v6517_v6, %v6517_v6  ;;  %v3938_v21 = vmul.f32 %v9050_v46, %v2888_v62  ;;  %v5394_v54 = vsel %vm3986_vm3, %v3931_v34, 0.0  ;;  %3125 = vperm.xlu1 %9283, %v3120_v28   ;;  %3174 = vperm.xlu2 %9285, %v3169_v57   ;;  %v8283_v43 = vrot.slane %v13733_v31, 1 }
 0x54d   : > { %v7179_v48 = vsel %vm6836_vm0, %v7178_v44, %v13651_v8  ;;  %v5369_v12 = vrot.slane %v5368_v1, 2  ;;  %v5395_v27 = vrot.slane %v5394_v54, 4  ;;  %v7180_v5 = vrot.slane %v6517_v6, 6 }
 0x54e   : > { %v8273_v40 = vrot.slane %v7617_v13, 6  ;;  %v6016_v33 = vrot.slane %v13563_v29, 6  ;;  %v3176_v3 = vperm.slane %v13435_v14, 2  ;;  %v5407_v10 = vadd.f32 %v5406_v61, %v5405_v36 }
 0x54f   : > { %v8275_v26 = vrot.slane %v7618_v59, 5  ;;  %v5379_v18 = vadd.f32 %v5378_v39, %v5377_v24  ;;  %v6015_v52 = vrot.slane %v13563_v29, 5  ;;  %v5426_v56 = vadd.f32 %v5425_v35, %v5424_v47  ;;  %v2909_v24 = vpop.permute.xlu2 %2908 }
 0x550   : > { %v8274_v15 = vsel %vm6839_vm4, %v8273_v40, %v13669_v23  ;;  %v5370_v19 = vadd.f32 %v5369_v12, %v5368_v1  ;;  %v5443_v8 = vsel %vm3986_vm3, %v3938_v21, 0.0  ;;  %3181 = vperm.xlu0 %9284, %v3176_v3   ;;  %v7182_v2 = vrot.slane %v13725_v9, 5  ;;  %v2860_v9 = vpop.permute.xlu0 %2859  ;;  %v2853_v60 = vpop.permute.xlu1 %2852 }
 0x551   : > { %v8276_v44 = vsel %vm6842_vm5, %v8275_v26, %v8274_v15  ;;  %v6018_v58 = vrot.slane %v13722_v53, 1  ;;  %v5396_v25 = vadd.f32 %v5395_v27, %v5394_v54  ;;  %v7181_v29 = vsel %vm6839_vm4, %v7180_v5, %v7179_v48 }
 0x552   : > { %v5371_v7 = vrot.slane %v5370_v19, 1  ;;  %v8278_v23 = vsel %vm6845_vm6, %v8277_v30, %v8276_v44  ;;  %v9034_v36 = vunpack.c.l.bf16 %v13711_v0  ;;  %v6521_v50 = vadd.f32 %v6016_v33, %v5379_v18 }
 0x553   : > { %v5444_v20 = vrot.slane %v5443_v8, 4  ;;  %v5397_v4 = vrot.slane %v5396_v25, 2  ;;  %v9055_v47 = vunpack.c.h.bf16 %v13751_v41  ;;  %v5427_v49 = vrot.slane %v5426_v56, 1 }
 0x554   : > { %v5372_v46 = vadd.f32 %v5371_v7, %v5370_v19  ;;  %v3930_v62 = vmul.f32 %v9034_v36, %v2832_v38  ;;  %v9042_v55 = vunpack.c.l.bf16 %v13666_v22  ;;  %v7183_v6 = vsel %vm6842_vm5, %v7182_v2, %v7181_v29  ;;  %v13796_v36 = vld [vmem:[%s10704_s7 + $0x358] sm:$0xff]  }
 0x555   : > { %v5398_v34 = vadd.f32 %v5397_v4, %v5396_v25  ;;  %v3941_v28 = vmul.f32 %v9055_v47, %v2909_v24  ;;  %v3134_v30 = vperm.slane %v13456_v63, 4  ;;  %v3141_v59 = vperm.slane %v13456_v63, 5  ;;  %v9246_v24 = vld [vmem:[%s10704_s7 + $0x338] sm:$0xff]  }
 0x556   : > { %v6520_v57 = vadd.f32 %v6015_v52, %v5372_v46  ;;  %v5387_v0 = vsel %vm3986_vm3, %v3930_v62, 0.0  ;;  %v3934_v61 = vmul.f32 %v9042_v55, %v2860_v9  ;;  %v7621_v39 = vmul.f32 %v6521_v50, %v6521_v50 }
 0x557   : > { %v5445_v1 = vadd.f32 %v5444_v20, %v5443_v8  ;;  %v5399_v13 = vrot.slane %v5398_v34, 1  ;;  %v5388_v35 = vrot.slane %v5387_v0, 4  ;;  %3139 = vperm.xlu1 %9283, %v3134_v30   ;;  %v7188_v21 = vrot.slane %v6521_v50, 2  ;;  %3146 = vperm.xlu2 %9285, %v3141_v59   ;;  %v2930_v50 = vpop.permute.xlu2 %2929 }
 0x558   : > { %v7186_v54 = vrot.slane %v6520_v57, 3  ;;  %v7620_v22 = vmul.f32 %v6520_v57, %v6520_v57  ;;  %v5415_v48 = vsel %vm3986_vm3, %v3934_v61, 0.0  ;;  %v7185_v12 = vsel %vm6845_vm6, %v7184_v11, %v7183_v6  ;;  %v2881_v9 = vpop.permute.xlu0 %2880 }
 0x559   : > { %v5389_v27 = vadd.f32 %v5388_v35, %v5387_v0  ;;  %v5464_v5 = vsel %vm3986_vm3, %v3941_v28, 0.0  ;;  %v5416_v40 = vrot.slane %v5415_v48, 4  ;;  %v5400_v26 = vadd.f32 %v5399_v13, %v5398_v34 }
 0x55a   : > { %v7187_v33 = vsel %vm6848_vm7, %v7186_v54, %v7185_v12  ;;  %v8279_v3 = vrot.slane %v7620_v22, 3  ;;  %v3183_v18 = vperm.slane %v13435_v14, 3  ;;  %v13774_v52 = vadd.f32 %v6019_v45, %v5407_v10 }
 0x55b   : > { %v8281_v15 = vrot.slane %v7621_v39, 2  ;;  %v7189_v42 = vsel %vm6851_vm8, %v7188_v21, %v7187_v33  ;;  %v5390_v19 = vrot.slane %v5389_v27, 2  ;;  %v5446_v2 = vrot.slane %v5445_v1, 2  ;;  %v13815_v21 = vld [vmem:[%s10785_s10 + $0xd0] sm:$0xff] }
 0x55c   : > { %v13780_v11 = vsel %vm6854_vm9, %v7190_v16, %v7189_v42  ;;  %v8280_v8 = vsel %vm6848_vm7, %v8279_v3, %v8278_v23  ;;  %v5417_v44 = vadd.f32 %v5416_v40, %v5415_v48  ;;  %3188 = vperm.xlu0 %9284, %v3183_v18   ;;  %v6022_v25 = vrot.slane %v13722_v53, 5  ;;  %v2874_v3 = vpop.permute.xlu1 %2873 }
 0x55d   : > { %v5428_v45 = vadd.f32 %v5427_v49, %v5426_v56  ;;  %7346 = vst.msk [vmem:[%s11055_s13 + $0xc0] sm:$0xff] %vm3986_vm3, %v13780_v11  ;;  %v8282_v10 = vsel %vm6851_vm8, %v8281_v15, %v8280_v8  ;;  %v5465_v38 = vrot.slane %v5464_v5, 4  ;;  %v13793_v29 = vadd.f32 %v6018_v58, %v5400_v26  ;;  %v13823_v26 = vld [vmem:[%s10704_s7 + $0x360] sm:$0xff]  }
 0x55e   : > { %v13791_v16 = vsel %vm6854_vm9, %v8283_v43, %v8282_v10  ;;  %v5391_v7 = vadd.f32 %v5390_v19, %v5389_v27  ;;  %v5418_v23 = vrot.slane %v5417_v44, 2  ;;  %v9039_v56 = vunpack.c.h.bf16 %v13631_v51 }
 0x55f   : > { %v7625_v20 = vmul.f32 %v13774_v52, %v13774_v52  ;;  %v5447_v4 = vadd.f32 %v5446_v2, %v5445_v1  ;;  %v9062_v43 = vunpack.c.l.bf16 %v13796_v36  ;;  %v9047_v58 = vunpack.c.h.bf16 %v9246_v24 }
 0x560   : > { %v5392_v47 = vrot.slane %v5391_v7, 1  ;;  %v5419_v31 = vadd.f32 %v5418_v23, %v5417_v44  ;;  %v3933_v49 = vmul.f32 %v9039_v56, %v2853_v60  ;;  %v13803_v46 = vadd.f32 %v6022_v25, %v5428_v45  ;;  %v2951_v25 = vpop.permute.xlu2 %2950 }
 0x561   : > { %v7624_v62 = vmul.f32 %v13793_v29, %v13793_v29  ;;  %v5466_v51 = vadd.f32 %v5465_v38, %v5464_v5  ;;  %v3937_v34 = vmul.f32 %v9047_v58, %v2881_v9  ;;  %v3162_v28 = vperm.slane %v13435_v14, 0 }
 0x562   : > { %v5393_v55 = vadd.f32 %v5392_v47, %v5391_v7  ;;  %v5408_v6 = vsel %vm3986_vm3, %v3933_v49, 0.0  ;;  %v3148_v30 = vperm.slane %v13456_v63, 6  ;;  %v7194_v57 = vrot.slane %v13774_v52, 6  ;;  %v2902_v7 = vpop.permute.xlu0 %2901 }
 0x563   : > { %v5448_v0 = vrot.slane %v5447_v4, 1  ;;  %v5409_v59 = vrot.slane %v5408_v6, 4  ;;  %v5420_v39 = vrot.slane %v5419_v31, 1  ;;  %v3944_v1 = vmul.f32 %v9062_v43, %v2930_v50  ;;  %3167 = vperm.xlu1 %9283, %v3162_v28  }
 0x564   : > { %v6523_v61 = vadd.f32 %v13722_v53, %v5393_v55  ;;  %v5436_v13 = vsel %vm3986_vm3, %v3937_v34, 0.0  ;;  %3153 = vperm.xlu2 %9285, %v3148_v30   ;;  %v3155_v35 = vperm.slane %v13456_v63, 7  ;;  %v8285_v54 = vrot.slane %v7624_v62, 7 }
 0x565   : > { %v5467_v48 = vrot.slane %v5466_v51, 2  ;;  %v9046_v12 = vunpack.c.l.bf16 %v9246_v24  ;;  %v8287_v27 = vrot.slane %v7625_v20, 6  ;;  %v13819_v5 = vmul.f32 %v13803_v46, %v13803_v46 }
 0x566   : > { %v7623_v22 = vmul.f32 %v6523_v61, %v6523_v61  ;;  %v6027_v40 = vrot.slane %v13815_v21, 3  ;;  %v5410_v33 = vadd.f32 %v5409_v59, %v5408_v6  ;;  %3160 = vperm.xlu0 %9284, %v3155_v35   ;;  %v5449_v18 = vadd.f32 %v5448_v0, %v5447_v4 }
 0x567   : > { %v6021_v15 = vrot.slane %v13722_v53, 4  ;;  %v5437_v42 = vrot.slane %v5436_v13, 4  ;;  %v5421_v8 = vadd.f32 %v5420_v39, %v5419_v31  ;;  %v5485_v44 = vsel %vm3986_vm3, %v3944_v1, 0.0 }
 0x568   : > { %v8286_v63 = vsel %vm6836_vm0, %v8285_v54, %v7623_v22  ;;  %v5411_v2 = vrot.slane %v5410_v33, 2  ;;  %v5468_v45 = vadd.f32 %v5467_v48, %v5466_v51  ;;  %v3936_v38 = vmul.f32 %v9046_v12, %v2874_v3  ;;  %v2895_v54 = vpop.permute.xlu1 %2894 }
 0x569   : > { %v13828_v19 = vsel %vm6839_vm4, %v8287_v27, %v8286_v63  ;;  %v5438_v10 = vadd.f32 %v5437_v42, %v5436_v13  ;;  %v9067_v60 = vunpack.c.h.bf16 %v13823_v26  ;;  %v7192_v23 = vrot.slane %v13793_v29, 7 }
 0x56a   : > { %v6020_v24 = vrot.slane %v13722_v53, 3  ;;  %v5412_v56 = vadd.f32 %v5411_v2, %v5410_v33  ;;  %v9054_v50 = vunpack.c.l.bf16 %v13751_v41  ;;  %v5486_v20 = vrot.slane %v5485_v44, 4 }
 0x56b   : > { %v5439_v4 = vrot.slane %v5438_v10, 2  ;;  %v5429_v47 = vsel %vm3986_vm3, %v3936_v38, 0.0  ;;  %v3947_v9 = vmul.f32 %v9067_v60, %v2951_v25  ;;  %v6527_v31 = vadd.f32 %v6021_v15, %v5421_v8 }
 0x56c   : > { %v5413_v49 = vrot.slane %v5412_v56, 1  ;;  %v5430_v43 = vrot.slane %v5429_v47, 4  ;;  %v3940_v58 = vmul.f32 %v9054_v50, %v2902_v7  ;;  %v7193_v62 = vsel %vm6836_vm0, %v7192_v23, %v6523_v61 }
 0x56d   : > { %v5469_v55 = vrot.slane %v5468_v45, 1  ;;  %v5440_v51 = vadd.f32 %v5439_v4, %v5438_v10  ;;  %v3190_v29 = vperm.slane %v13435_v14, 4  ;;  %v5506_v28 = vsel %vm3986_vm3, %v3947_v9, 0.0  ;;  %v9249_v4 = vld [vmem:[%s10704_s7 + $0x350] sm:$0xff]  }
 0x56e   : > { %v5414_v6 = vadd.f32 %v5413_v49, %v5412_v56  ;;  %v5431_v34 = vadd.f32 %v5430_v43, %v5429_v47  ;;  %v5457_v41 = vsel %vm3986_vm3, %v3940_v58, 0.0  ;;  %v5487_v30 = vadd.f32 %v5486_v20, %v5485_v44  ;;  %v13865_v49 = vld [vmem:[%s10704_s7 + $0x370] sm:$0xff]  }
 0x56f   : > { %v5441_v0 = vrot.slane %v5440_v51, 1  ;;  %v5458_v59 = vrot.slane %v5457_v41, 4  ;;  %3195 = vperm.xlu1 %9283, %v3190_v29   ;;  %v3197_v39 = vperm.slane %v13435_v14, 5  ;;  %v7627_v1 = vmul.f32 %v6527_v31, %v6527_v31 }
 0x570   : > { %v6526_v13 = vadd.f32 %v6020_v24, %v5414_v6  ;;  %v5432_v35 = vrot.slane %v5431_v34, 2  ;;  %v3211_v61 = vperm.slane %v13435_v14, 7  ;;  %v6024_v22 = vrot.slane %v13722_v53, 7 }
 0x571   : > { %v5442_v48 = vadd.f32 %v5441_v0, %v5440_v51  ;;  %v5507_v12 = vrot.slane %v5506_v28, 4  ;;  %v5459_v27 = vadd.f32 %v5458_v59, %v5457_v41  ;;  %3202 = vperm.xlu2 %9285, %v3197_v39   ;;  %v13844_v33 = vadd.f32 %v13815_v21, %v5449_v18 }
 0x572   : > { %v7196_v3 = vrot.slane %v6526_v13, 5  ;;  %v7626_v63 = vmul.f32 %v6526_v13, %v6526_v13  ;;  %v5433_v15 = vadd.f32 %v5432_v35, %v5431_v34  ;;  %3216 = vperm.xlu0 %9284, %v3211_v61   ;;  %v7195_v42 = vsel %vm6839_vm4, %v7194_v57, %v7193_v62  ;;  %v2916_v34 = vpop.permute.xlu1 %2915 }
 0x573   : > { %v5470_v8 = vadd.f32 %v5469_v55, %v5468_v45  ;;  %v5488_v2 = vrot.slane %v5487_v30, 2  ;;  %v6023_v44 = vrot.slane %v13722_v53, 6  ;;  %v8291_v25 = vrot.slane %v7627_v1, 4  ;;  %v2972_v1 = vpop.permute.xlu2 %2971 }
 0x574   : > { %v8289_v10 = vrot.slane %v7626_v63, 5  ;;  %v5434_v38 = vrot.slane %v5433_v15, 1  ;;  %v9051_v60 = vunpack.c.h.bf16 %v13718_v32  ;;  %v7197_v18 = vsel %vm6842_vm5, %v7196_v3, %v7195_v42 }
 0x575   : > { %v6530_v7 = vadd.f32 %v6024_v22, %v5442_v48  ;;  %v5508_v23 = vadd.f32 %v5507_v12, %v5506_v28  ;;  %v5460_v24 = vrot.slane %v5459_v27, 2  ;;  %v8293_v52 = vrot.slane %v13819_v5, 3 }
 0x576   : > { %v7198_v56 = vrot.slane %v6527_v31, 4  ;;  %v8290_v57 = vsel %vm6842_vm5, %v8289_v10, %v13828_v19  ;;  %v5435_v45 = vadd.f32 %v5434_v38, %v5433_v15  ;;  %v7200_v53 = vrot.slane %v13803_v46, 3  ;;  %v2923_v19 = vpop.permute.xlu0 %2922 }
 0x577   : > { %v13858_v50 = vmul.f32 %v13844_v33, %v13844_v33  ;;  %v8292_v32 = vsel %vm6845_vm6, %v8291_v25, %v8290_v57  ;;  %v5489_v20 = vadd.f32 %v5488_v2, %v5487_v30  ;;  %v3939_v31 = vmul.f32 %v9051_v60, %v2895_v54 }
 0x578   : > { %v7199_v47 = vsel %vm6845_vm6, %v7198_v56, %v7197_v18  ;;  %v6529_v9 = vadd.f32 %v6023_v44, %v5435_v45  ;;  %v8294_v5 = vsel %vm6848_vm7, %v8293_v52, %v8292_v32  ;;  %v13869_v46 = vadd.f32 %v6027_v40, %v5470_v8  ;;  %v13902_v56 = vld [vmem:[%s10785_s10 + $0xd8] sm:$0xff] }
 0x579   : > { %v7630_v43 = vmul.f32 %v6530_v7, %v6530_v7  ;;  %v5509_v58 = vrot.slane %v5508_v23, 2  ;;  %v5461_v62 = vadd.f32 %v5460_v24, %v5459_v27  ;;  %v5450_v29 = vsel %vm3986_vm3, %v3939_v31, 0.0 }
 0x57a   : > { %v7202_v55 = vrot.slane %v6529_v9, 2  ;;  %v7629_v51 = vmul.f32 %v6529_v9, %v6529_v9  ;;  %v9059_v6 = vunpack.c.h.bf16 %v9249_v4  ;;  %v7204_v28 = vrot.slane %v6530_v7, 1  ;;  %v2937_v9 = vpop.permute.xlu1 %2936 }
 0x57b   : > { %v7201_v41 = vsel %vm6848_vm7, %v7200_v53, %v7199_v47  ;;  %v5451_v30 = vrot.slane %v5450_v29, 4  ;;  %v9074_v0 = vunpack.c.l.bf16 %v13865_v49  ;;  %v5490_v59 = vrot.slane %v5489_v20, 1 }
 0x57c   : > { %v7203_v40 = vsel %vm6851_vm8, %v7202_v55, %v7201_v41  ;;  %v8295_v39 = vrot.slane %v7629_v51, 2  ;;  %v3943_v13 = vmul.f32 %v9059_v6, %v2923_v19  ;;  %v7401_v35 = vsel %vm3986_vm3, %v13780_v11, 0.0 }
 0x57d   : > { %v8297_v61 = vrot.slane %v7630_v43, 1  ;;  %v13878_v54 = vsel %vm6854_vm9, %v7204_v28, %v7203_v40  ;;  %v5462_v22 = vrot.slane %v5461_v62, 1  ;;  %v13882_v48 = vmul.f32 %v13869_v46, %v13869_v46  ;;  %v13914_v43 = vld [vmem:[%s10704_s7 + $0x378] sm:$0xff]  }
 0x57e   : > { %7347 = vst.msk [vmem:[%s11055_s13 + $0xc8] sm:$0xff] %vm3986_vm3, %v13878_v54  ;;  %v8296_v12 = vsel %vm6851_vm8, %v8295_v39, %v8294_v5  ;;  %v5510_v27 = vadd.f32 %v5509_v58, %v5508_v23  ;;  %v5452_v3 = vadd.f32 %v5451_v30, %v5450_v29  ;;  %v13890_v63 = vsel %vm3986_vm3, %v13791_v16, 0.0  ;;  %v2944_v52 = vpop.permute.xlu0 %2943 }
 0x57f   : > { %v6030_v11 = vrot.slane %v13815_v21, 6  ;;  %v13894_v15 = vsel %vm6854_vm9, %v8297_v61, %v8296_v12  ;;  %v3950_v42 = vmul.f32 %v9074_v0, %v2972_v1  ;;  %v5491_v8 = vadd.f32 %v5490_v59, %v5489_v20  ;;  %v2993_v1 = vpop.permute.xlu2 %2992 }
 0x580   : > { %v6026_v2 = vrot.slane %v13815_v21, 2  ;;  %v5453_v44 = vrot.slane %v5452_v3, 2  ;;  %v5478_v25 = vsel %vm3986_vm3, %v3943_v13, 0.0  ;;  %v5463_v10 = vadd.f32 %v5462_v22, %v5461_v62 }
 0x581   : > { %v5479_v38 = vrot.slane %v5478_v25, 4  ;;  %v3204_v60 = vperm.slane %v13435_v14, 6  ;;  %v9058_v18 = vunpack.c.l.bf16 %v9249_v4  ;;  %v7210_v16 = vrot.slane %v13869_v46, 5 }
 0x582   : > { %v8303_v7 = vrot.slane %v13882_v48, 5  ;;  %v5511_v23 = vrot.slane %v5510_v27, 1  ;;  %v5454_v24 = vadd.f32 %v5453_v44, %v5452_v3  ;;  %v5527_v57 = vsel %vm3986_vm3, %v3950_v42, 0.0  ;;  %v13953_v48 = vld [vmem:[%s10704_s7 + $0x388] sm:$0xff]  }
 0x583   : > { %v5480_v45 = vadd.f32 %v5479_v38, %v5478_v25  ;;  %3209 = vperm.xlu1 %9283, %v3204_v60   ;;  %v3942_v53 = vmul.f32 %v9058_v18, %v2916_v34  ;;  %v9066_v32 = vunpack.c.l.bf16 %v13823_v26  ;;  %v13906_v20 = vadd.f32 %v6030_v11, %v5491_v8 }
 0x584   : > { %v6025_v14 = vrot.slane %v13815_v21, 1  ;;  %v5455_v4 = vrot.slane %v5454_v24, 1  ;;  %v9063_v47 = vunpack.c.h.bf16 %v13796_v36  ;;  %v13910_v5 = vadd.f32 %v6026_v2, %v5463_v10 }
 0x585   : > { %v5481_v31 = vrot.slane %v5480_v45, 2  ;;  %v5471_v19 = vsel %vm3986_vm3, %v3942_v53, 0.0  ;;  %v3946_v58 = vmul.f32 %v9066_v32, %v2944_v52  ;;  %v6032_v62 = vrot.slane %v13902_v56, 1 }
 0x586   : > { %v5456_v55 = vadd.f32 %v5455_v4, %v5454_v24  ;;  %v5528_v26 = vrot.slane %v5527_v57, 4  ;;  %v5472_v51 = vrot.slane %v5471_v19, 4  ;;  %v5512_v29 = vadd.f32 %v5511_v23, %v5510_v27 }
 0x587   : > { %v5482_v6 = vadd.f32 %v5481_v31, %v5480_v45  ;;  %v5499_v34 = vsel %vm3986_vm3, %v3946_v58, 0.0  ;;  %v3945_v28 = vmul.f32 %v9063_v47, %v2937_v9  ;;  %v9079_v30 = vunpack.c.h.bf16 %v13914_v43 }
 0x588   : > { %v6532_v36 = vadd.f32 %v6025_v14, %v5456_v55  ;;  %v5473_v41 = vadd.f32 %v5472_v51, %v5471_v19  ;;  %v5500_v0 = vrot.slane %v5499_v34, 4  ;;  %v13921_v59 = vmul.f32 %v13906_v20, %v13906_v20 }
 0x589   : > { %v7633_v40 = vmul.f32 %v13910_v5, %v13910_v5  ;;  %v5483_v39 = vrot.slane %v5482_v6, 1  ;;  %v7402_v13 = vadd.f32 %v7401_v35, %v13694_v37  ;;  %v5529_v22 = vadd.f32 %v5528_v26, %v5527_v57 }
 0x58a   : > { %v7632_v61 = vmul.f32 %v6532_v36, %v6532_v36  ;;  %v5474_v12 = vrot.slane %v5473_v41, 2  ;;  %v5492_v27 = vsel %vm3986_vm3, %v3945_v28, 0.0  ;;  %v13927_v3 = vadd.f32 %v6032_v62, %v5512_v29 }
 0x58b   : > { %v6029_v11 = vrot.slane %v13815_v21, 5  ;;  %v5484_v42 = vadd.f32 %v5483_v39, %v5482_v6  ;;  %v5501_v8 = vadd.f32 %v5500_v0, %v5499_v34  ;;  %v7403_v2 = vsel %vm3986_vm3, %v13878_v54, 0.0  ;;  %v9252_v6 = vld [vmem:[%s10704_s7 + $0x368] sm:$0xff]   ;;  %v2965_v34 = vpop.permute.xlu0 %2964 }
 0x58c   : > { %v8299_v44 = vrot.slane %v7632_v61, 7  ;;  %v5475_v25 = vadd.f32 %v5474_v12, %v5473_v41  ;;  %v3953_v10 = vmul.f32 %v9079_v30, %v2993_v1  ;;  %v8301_v38 = vrot.slane %v7633_v40, 6 }
 0x58d   : > { %v7206_v60 = vrot.slane %v6532_v36, 7  ;;  %v5502_v37 = vrot.slane %v5501_v8, 2  ;;  %v5493_v35 = vrot.slane %v5492_v27, 4  ;;  %v5530_v23 = vrot.slane %v5529_v22, 2 }
 0x58e   : > { %v8300_v18 = vsel %vm6836_vm0, %v8299_v44, %v13858_v50  ;;  %v6028_v24 = vrot.slane %v13815_v21, 4  ;;  %v5476_v52 = vrot.slane %v5475_v25, 1  ;;  %v8309_v57 = vrot.slane %v13921_v59, 2 }
 0x58f   : > { %v7640_v54 = vmul.f32 %v13927_v3, %v13927_v3  ;;  %v8302_v45 = vsel %vm6839_vm4, %v8301_v38, %v8300_v18  ;;  %v6536_v53 = vadd.f32 %v6029_v11, %v5484_v42  ;;  %v8464_v32 = vsel %vm3986_vm3, %v13894_v15, 0.0 }
 0x590   : > { %v5477_v14 = vadd.f32 %v5476_v52, %v5475_v25  ;;  %v8304_v50 = vsel %vm6842_vm5, %v8303_v7, %v8302_v45  ;;  %v5548_v4 = vsel %vm3986_vm3, %v3953_v10, 0.0  ;;  %v7207_v47 = vsel %vm6836_vm0, %v7206_v60, %v13844_v33  ;;  %v2958_v25 = vpop.permute.xlu1 %2957 }
 0x591   : > { %v5503_v9 = vadd.f32 %v5502_v37, %v5501_v8  ;;  %v5494_v31 = vadd.f32 %v5493_v35, %v5492_v27  ;;  %v13947_v19 = vadd.f32 %v7403_v2, %v7402_v13  ;;  %v7208_v58 = vrot.slane %v13910_v5, 6 }
 0x592   : > { %v5531_v62 = vadd.f32 %v5530_v23, %v5529_v22  ;;  %v6535_v55 = vadd.f32 %v6028_v24, %v5477_v14  ;;  %v8463_v15 = vadd.f32 %v13890_v63, %v13704_v17  ;;  %v7636_v26 = vmul.f32 %v6536_v53, %v6536_v53  ;;  %v3014_v17 = vpop.permute.xlu2 %3013  ;;  %v13980_v24 = vld [vmem:[%s10704_s7 + $0x390] sm:$0xff]  }
 0x593   : > { %v5549_v7 = vrot.slane %v5548_v4, 4  ;;  %v5504_v51 = vrot.slane %v5503_v9, 1  ;;  %v5495_v29 = vrot.slane %v5494_v31, 2  ;;  %v7209_v33 = vsel %vm6839_vm4, %v7208_v58, %v7207_v47 }
 0x594   : > { %v7212_v28 = vrot.slane %v6535_v55, 4  ;;  %v7635_v36 = vmul.f32 %v6535_v55, %v6535_v55  ;;  %v13957_v41 = vadd.f32 %v8464_v32, %v8463_v15  ;;  %v8313_v5 = vrot.slane %v7640_v54, 7 }
 0x595   : > { %v5505_v30 = vadd.f32 %v5504_v51, %v5503_v9  ;;  %v5496_v0 = vadd.f32 %v5495_v29, %v5494_v31  ;;  %v9086_v59 = vunpack.c.l.bf16 %v13953_v48  ;;  %v5532_v63 = vrot.slane %v5531_v62, 1 }
 0x596   : > { %v8305_v40 = vrot.slane %v7635_v36, 4  ;;  %v6031_v39 = vrot.slane %v13815_v21, 7  ;;  %v9071_v1 = vunpack.c.h.bf16 %v9252_v6  ;;  %v8307_v13 = vrot.slane %v7636_v26, 3 }
 0x597   : > { %v7211_v61 = vsel %vm6842_vm5, %v7210_v16, %v7209_v33  ;;  %v13965_v22 = vadd.f32 %v13902_v56, %v5505_v30  ;;  %v5497_v12 = vrot.slane %v5496_v0, 1  ;;  %v7214_v27 = vrot.slane %v6536_v53, 3 }
 0x598   : > { %v7213_v11 = vsel %vm6845_vm6, %v7212_v28, %v7211_v61  ;;  %v8306_v42 = vsel %vm6845_vm6, %v8305_v40, %v8304_v50  ;;  %v5550_v8 = vadd.f32 %v5549_v7, %v5548_v4  ;;  %v3956_v46 = vmul.f32 %v9086_v59, %v3014_v17  ;;  %v2986_v50 = vpop.permute.xlu0 %2985 }
 0x599   : > { %v8308_v2 = vsel %vm6848_vm7, %v8307_v13, %v8306_v42  ;;  %v7639_v21 = vmul.f32 %v13965_v22, %v13965_v22  ;;  %v5498_v44 = vadd.f32 %v5497_v12, %v5496_v0  ;;  %v7216_v16 = vrot.slane %v13906_v20, 2  ;;  %v9255_v42 = vld [vmem:[%s10704_s7 + $0x380] sm:$0xff]  }
 0x59a   : > { %v8310_v10 = vsel %vm6851_vm8, %v8309_v57, %v8308_v2  ;;  %v3949_v38 = vmul.f32 %v9071_v1, %v2965_v34  ;;  %v9070_v60 = vunpack.c.l.bf16 %v9252_v6  ;;  %v6035_v37 = vrot.slane %v13902_v56, 4  ;;  %v3035_v26 = vpop.permute.xlu2 %3034 }
 0x59b   : > { %v7215_v35 = vsel %vm6848_vm7, %v7214_v27, %v7213_v11  ;;  %v13977_v18 = vsel %vm6836_vm0, %v8313_v5, %v7639_v21  ;;  %v6538_v23 = vadd.f32 %v6031_v39, %v5498_v44  ;;  %v5533_v52 = vadd.f32 %v5532_v63, %v5531_v62 }
 0x59c   : > { %v5551_v54 = vrot.slane %v5550_v8, 2  ;;  %v5520_v45 = vsel %vm3986_vm3, %v3949_v38, 0.0  ;;  %v3948_v53 = vmul.f32 %v9070_v60, %v2958_v25  ;;  %v5569_v32 = vsel %vm3986_vm3, %v3956_v46, 0.0 }
 0x59d   : > { %v7218_v20 = vrot.slane %v6538_v23, 1  ;;  %v7638_v57 = vmul.f32 %v6538_v23, %v6538_v23  ;;  %v5521_v14 = vrot.slane %v5520_v45, 4  ;;  %v7217_v4 = vsel %vm6851_vm8, %v7216_v16, %v7215_v35 }
 0x59e   : > { %v5513_v47 = vsel %vm3986_vm3, %v3948_v53, 0.0  ;;  %v9091_v9 = vunpack.c.h.bf16 %v13980_v24  ;;  %v9078_v31 = vunpack.c.l.bf16 %v13914_v43  ;;  %v5552_v7 = vadd.f32 %v5551_v54, %v5550_v8 }
 0x59f   : > { %v7219_v58 = vsel %vm6854_vm9, %v7218_v20, %v7217_v4  ;;  %v8311_v62 = vrot.slane %v7638_v57, 1  ;;  %v5522_v55 = vadd.f32 %v5521_v14, %v5520_v45  ;;  %v5514_v15 = vrot.slane %v5513_v47, 4 }
 0x5a0   : > { %7348 = vst.msk [vmem:[%s11055_s13 + $0xd0] sm:$0xff] %vm3986_vm3, %v7219_v58  ;;  %v7405_v51 = vsel %vm3986_vm3, %v7219_v58, 0.0  ;;  %v5570_v29 = vrot.slane %v5569_v32, 4  ;;  %v3952_v6 = vmul.f32 %v9078_v31, %v2986_v50  ;;  %v13996_v36 = vadd.f32 %v6035_v37, %v5533_v52 }
 0x5a1   : > { %v13993_v34 = vadd.f32 %v7405_v51, %v13947_v19  ;;  %v8312_v33 = vsel %vm6854_vm9, %v8311_v62, %v8310_v10  ;;  %v5523_v28 = vrot.slane %v5522_v55, 2  ;;  %v5515_v43 = vadd.f32 %v5514_v15, %v5513_v47  ;;  %v2979_v19 = vpop.permute.xlu1 %2978  ;;  %v14018_v62 = vld [vmem:[%s10785_s10 + $0xe0] sm:$0xff] }
 0x5a2   : > { %v8466_v5 = vsel %vm3986_vm3, %v8312_v33, 0.0  ;;  %v3959_v30 = vmul.f32 %v9091_v9, %v3035_v26  ;;  %v5541_v0 = vsel %vm3986_vm3, %v3952_v6, 0.0  ;;  %v5553_v39 = vrot.slane %v5552_v7, 1 }
 0x5a3   : > { %v14001_v59 = vadd.f32 %v8466_v5, %v13957_v41  ;;  %v5524_v17 = vadd.f32 %v5523_v28, %v5522_v55  ;;  %v5516_v63 = vrot.slane %v5515_v43, 2  ;;  %v5542_v40 = vrot.slane %v5541_v0, 4 }
 0x5a4   : > { %v5571_v1 = vadd.f32 %v5570_v29, %v5569_v32  ;;  %v9075_v13 = vunpack.c.h.bf16 %v13865_v49  ;;  %v6034_v61 = vrot.slane %v13902_v56, 3  ;;  %v7643_v8 = vmul.f32 %v13996_v36, %v13996_v36  ;;  %v3007_v49 = vpop.permute.xlu0 %3006 }
 0x5a5   : > { %v5525_v12 = vrot.slane %v5524_v17, 1  ;;  %v5517_v27 = vadd.f32 %v5516_v63, %v5515_v43  ;;  %v5543_v11 = vadd.f32 %v5542_v40, %v5541_v0  ;;  %v6038_v41 = vrot.slane %v13902_v56, 7  ;;  %v14022_v0 = vpop.permute.xlu2 %3055 }
 0x5a6   : > { %v6033_v2 = vrot.slane %v13902_v56, 2  ;;  %v3951_v21 = vmul.f32 %v9075_v13, %v2979_v19  ;;  %v5590_v25 = vsel %vm3986_vm3, %v3959_v30, 0.0  ;;  %v5554_v10 = vadd.f32 %v5553_v39, %v5552_v7 }
 0x5a7   : > { %v5526_v44 = vadd.f32 %v5525_v12, %v5524_v17  ;;  %v5518_v46 = vrot.slane %v5517_v27, 1  ;;  %v5544_v16 = vrot.slane %v5543_v11, 2  ;;  %v5572_v38 = vrot.slane %v5571_v1, 2  ;;  %v14033_v12 = vld [vmem:[%s10704_s7 + $0x3a0] sm:$0xff]  }
 0x5a8   : > { %v5534_v60 = vsel %vm3986_vm3, %v3951_v21, 0.0  ;;  %v9083_v37 = vunpack.c.h.bf16 %v9255_v42  ;;  %v5591_v45 = vrot.slane %v5590_v25, 4  ;;  %v7220_v20 = vrot.slane %v13927_v3, 7 }
 0x5a9   : > { %v6542_v35 = vadd.f32 %v6034_v61, %v5526_v44  ;;  %v5519_v23 = vadd.f32 %v5518_v46, %v5517_v27  ;;  %v5545_v52 = vadd.f32 %v5544_v16, %v5543_v11  ;;  %v5535_v54 = vrot.slane %v5534_v60, 4  ;;  %v3000_v15 = vpop.permute.xlu1 %2999 }
 0x5aa   : > { %v3955_v53 = vmul.f32 %v9083_v37, %v3007_v49  ;;  %v5573_v14 = vadd.f32 %v5572_v38, %v5571_v1  ;;  %v7226_v9 = vrot.slane %v13996_v36, 4  ;;  %v8319_v31 = vrot.slane %v7643_v8, 4 }
 0x5ab   : > { %v6541_v57 = vadd.f32 %v6033_v2, %v5519_v23  ;;  %v5546_v32 = vrot.slane %v5545_v52, 1  ;;  %v7642_v50 = vmul.f32 %v6542_v35, %v6542_v35  ;;  %v5536_v4 = vadd.f32 %v5535_v54, %v5534_v60 }
 0x5ac   : > { %v5562_v47 = vsel %vm3986_vm3, %v3955_v53, 0.0  ;;  %v14015_v58 = vadd.f32 %v6038_v41, %v5554_v10  ;;  %v5592_v7 = vadd.f32 %v5591_v45, %v5590_v25  ;;  %v6037_v3 = vrot.slane %v13902_v56, 6 }
 0x5ad   : > { %v7641_v55 = vmul.f32 %v6541_v57, %v6541_v57  ;;  %v7222_v26 = vrot.slane %v6541_v57, 6  ;;  %v5537_v51 = vrot.slane %v5536_v4, 2  ;;  %v5547_v6 = vadd.f32 %v5546_v32, %v5545_v52 }
 0x5ae   : > { %v5563_v33 = vrot.slane %v5562_v47, 4  ;;  %v9082_v28 = vunpack.c.l.bf16 %v9255_v42  ;;  %v6040_v43 = vrot.slane %v14018_v62, 2  ;;  %v5574_v36 = vrot.slane %v5573_v14, 1 }
 0x5af   : > { %v8315_v29 = vrot.slane %v7641_v55, 6  ;;  %v8317_v5 = vrot.slane %v7642_v50, 5  ;;  %v5538_v30 = vadd.f32 %v5537_v51, %v5536_v4  ;;  %v7232_v17 = vrot.slane %v14015_v58, 1 }
 0x5b0   : > { %v7221_v63 = vsel %vm6836_vm0, %v7220_v20, %v13965_v22  ;;  %v6036_v19 = vrot.slane %v13902_v56, 5  ;;  %v5593_v13 = vrot.slane %v5592_v7, 2  ;;  %v6545_v27 = vadd.f32 %v6037_v3, %v5547_v6  ;;  %v3028_v56 = vpop.permute.xlu0 %3027 }
 0x5b1   : > { %v8316_v40 = vsel %vm6839_vm4, %v8315_v29, %v13977_v18  ;;  %v7223_v39 = vsel %vm6839_vm4, %v7222_v26, %v7221_v63  ;;  %v5539_v61 = vrot.slane %v5538_v30, 1  ;;  %v5564_v42 = vadd.f32 %v5563_v33, %v5562_v47  ;;  %v14053_v29 = vld [vmem:[%s10704_s7 + $0x3a8] sm:$0xff]  }
 0x5b2   : > { %v8318_v1 = vsel %vm6842_vm5, %v8317_v5, %v8316_v40  ;;  %v3954_v8 = vmul.f32 %v9082_v28, %v3000_v15  ;;  %v7646_v22 = vmul.f32 %v14015_v58, %v14015_v58  ;;  %v5575_v41 = vadd.f32 %v5574_v36, %v5573_v14  ;;  %v9258_v40 = vld [vmem:[%s10704_s7 + $0x398] sm:$0xff]  }
 0x5b3   : > { %v8320_v11 = vsel %vm6845_vm6, %v8319_v31, %v8318_v1  ;;  %v7224_v18 = vrot.slane %v6542_v35, 5  ;;  %v5540_v2 = vadd.f32 %v5539_v61, %v5538_v30  ;;  %v9098_v21 = vunpack.c.l.bf16 %v14033_v12  ;;  %v3021_v35 = vpop.permute.xlu1 %3020  ;;  %v3077_v31 = vpop.permute.xlu2 %3076 }
 0x5b4   : > { %v5565_v44 = vrot.slane %v5564_v42, 2  ;;  %v5555_v46 = vsel %vm3986_vm3, %v3954_v8, 0.0  ;;  %v9090_v25 = vunpack.c.l.bf16 %v13980_v24  ;;  %v5594_v49 = vadd.f32 %v5593_v13, %v5592_v7 }
 0x5b5   : > { %v7225_v16 = vsel %vm6842_vm5, %v7224_v18, %v7223_v39  ;;  %v6544_v10 = vadd.f32 %v6036_v19, %v5540_v2  ;;  %v5556_v38 = vrot.slane %v5555_v46, 4  ;;  %v7645_v60 = vmul.f32 %v6545_v27, %v6545_v27 }
 0x5b6   : > { %v5566_v37 = vadd.f32 %v5565_v44, %v5564_v42  ;;  %v3958_v23 = vmul.f32 %v9090_v25, %v3028_v56  ;;  %v9087_v52 = vunpack.c.h.bf16 %v13953_v48  ;;  %v6039_v53 = vrot.slane %v14018_v62, 1 }
 0x5b7   : > { %v7228_v54 = vrot.slane %v6544_v10, 3  ;;  %v7644_v45 = vmul.f32 %v6544_v10, %v6544_v10  ;;  %v5557_v20 = vadd.f32 %v5556_v38, %v5555_v46  ;;  %v7230_v57 = vrot.slane %v6545_v27, 2 }
 0x5b8   : > { %v7227_v32 = vsel %vm6845_vm6, %v7226_v9, %v7225_v16  ;;  %v5567_v24 = vrot.slane %v5566_v37, 1  ;;  %v5583_v14 = vsel %vm3986_vm3, %v3958_v23, 0.0  ;;  %v3957_v48 = vmul.f32 %v9087_v52, %v3021_v35  ;;  %v3049_v27 = vpop.permute.xlu0 %3048 }
 0x5b9   : > { %v7229_v50 = vsel %vm6848_vm7, %v7228_v54, %v7227_v32  ;;  %v8321_v4 = vrot.slane %v7644_v45, 3  ;;  %v5558_v47 = vrot.slane %v5557_v20, 2  ;;  %v8323_v58 = vrot.slane %v7645_v60, 2 }
 0x5ba   : > { %v7231_v55 = vsel %vm6851_vm8, %v7230_v57, %v7229_v50  ;;  %v5568_v15 = vadd.f32 %v5567_v24, %v5566_v37  ;;  %v5584_v26 = vrot.slane %v5583_v14, 4  ;;  %v8325_v7 = vrot.slane %v7646_v22, 1  ;;  %v14086_v50 = vld [vmem:[%s10704_s7 + $0x3b8] sm:$0xff]  }
 0x5bb   : > { %v14049_v9 = vsel %vm6854_vm9, %v7232_v17, %v7231_v55  ;;  %v8322_v3 = vsel %vm6848_vm7, %v8321_v4, %v8320_v11  ;;  %v5559_v51 = vadd.f32 %v5558_v47, %v5557_v20  ;;  %v14055_v6 = vadd.f32 %v6040_v43, %v5575_v41  ;;  %v3098_v10 = vpop.permute.xlu2 %3097  ;;  %v3042_v52 = vpop.permute.xlu1 %3041 }
 0x5bc   : > { %v5595_v33 = vrot.slane %v5594_v49, 1  ;;  %7349 = vst.msk [vmem:[%s11055_s13 + $0xd8] sm:$0xff] %vm3986_vm3, %v14049_v9  ;;  %v8324_v28 = vsel %vm6851_vm8, %v8323_v58, %v8322_v3  ;;  %v14061_v36 = vadd.f32 %v6039_v53, %v5568_v15  ;;  %v5585_v17 = vadd.f32 %v5584_v26, %v5583_v14 }
 0x5bd   : > { %v14064_v5 = vsel %vm6854_vm9, %v8325_v7, %v8324_v28  ;;  %v5560_v30 = vrot.slane %v5559_v51, 1  ;;  %v5576_v63 = vsel %vm3986_vm3, %v3957_v48, 0.0  ;;  %v3962_v19 = vmul.f32 %v9098_v21, %v14022_v0 }
 0x5be   : > { %v7648_v43 = vmul.f32 %v14061_v36, %v14061_v36  ;;  %v9103_v39 = vunpack.c.h.bf16 %v14053_v29  ;;  %v5586_v13 = vrot.slane %v5585_v17, 2  ;;  %v5577_v61 = vrot.slane %v5576_v63, 4 }
 0x5bf   : > { %v5561_v1 = vadd.f32 %v5560_v30, %v5559_v51  ;;  %v7649_v11 = vmul.f32 %v14055_v6, %v14055_v6  ;;  %v6043_v42 = vrot.slane %v14018_v62, 5  ;;  %v5596_v8 = vadd.f32 %v5595_v33, %v5594_v49 }
 0x5c0   : > { %v9095_v22 = vunpack.c.h.bf16 %v9258_v40  ;;  %v5587_v18 = vadd.f32 %v5586_v13, %v5585_v17  ;;  %v5578_v0 = vadd.f32 %v5577_v61, %v5576_v63  ;;  %v5611_v2 = vsel %vm3986_vm3, %v3962_v19, 0.0  ;;  %v3070_v30 = vpop.permute.xlu0 %3069  ;;  %v14100_v61 = vld [vmem:[%s10704_s7 + $0x3c0] sm:$0xff]  }
 0x5c1   : > { %v6547_v41 = vadd.f32 %v14018_v62, %v5561_v1  ;;  %v8327_v56 = vrot.slane %v7648_v43, 7  ;;  %v3965_v21 = vmul.f32 %v9103_v39, %v3077_v31  ;;  %v9094_v38 = vunpack.c.l.bf16 %v9258_v40 }
 0x5c2   : > { %v3961_v44 = vmul.f32 %v9095_v22, %v3049_v27  ;;  %v5588_v25 = vrot.slane %v5587_v18, 1  ;;  %v5579_v16 = vrot.slane %v5578_v0, 2  ;;  %v8329_v60 = vrot.slane %v7649_v11, 6 }
 0x5c3   : > { %v7647_v46 = vmul.f32 %v6547_v41, %v6547_v41  ;;  %v14077_v37 = vadd.f32 %v6043_v42, %v5596_v8  ;;  %v6042_v49 = vrot.slane %v14018_v62, 4  ;;  %v5612_v35 = vrot.slane %v5611_v2, 4  ;;  %v3119_v27 = vpop.permute.xlu2 %3118 }
 0x5c4   : > { %v5604_v23 = vsel %vm3986_vm3, %v3961_v44, 0.0  ;;  %v5589_v45 = vadd.f32 %v5588_v25, %v5587_v18  ;;  %v5580_v53 = vadd.f32 %v5579_v16, %v5578_v0  ;;  %v5632_v32 = vsel %vm3986_vm3, %v3965_v21, 0.0 }
 0x5c5   : > { %v8328_v54 = vsel %vm6836_vm0, %v8327_v56, %v7647_v46  ;;  %v5605_v57 = vrot.slane %v5604_v23, 4  ;;  %v6041_v24 = vrot.slane %v14018_v62, 3  ;;  %v3960_v4 = vmul.f32 %v9094_v38, %v3042_v52  ;;  %v3063_v56 = vpop.permute.xlu1 %3062 }
 0x5c6   : > { %v8330_v20 = vsel %vm6839_vm4, %v8329_v60, %v8328_v54  ;;  %v5581_v14 = vrot.slane %v5580_v53, 1  ;;  %v7652_v47 = vmul.f32 %v14077_v37, %v14077_v37  ;;  %v14090_v31 = vadd.f32 %v6042_v49, %v5589_v45  ;;  %v14114_v45 = vld [vmem:[%s10704_s7 + $0x3e0] sm:$0xff]  }
 0x5c7   : > { %v5606_v48 = vadd.f32 %v5605_v57, %v5604_v23  ;;  %v5613_v58 = vadd.f32 %v5612_v35, %v5611_v2  ;;  %v5633_v15 = vrot.slane %v5632_v32, 4  ;;  %v9110_v26 = vunpack.c.l.bf16 %v14086_v50 }
 0x5c8   : > { %v5582_v55 = vadd.f32 %v5581_v14, %v5580_v53  ;;  %v5597_v3 = vsel %vm3986_vm3, %v3960_v4, 0.0  ;;  %v7236_v51 = vrot.slane %v14055_v6, 6  ;;  %v8335_v17 = vrot.slane %v7652_v47, 3 }
 0x5c9   : > { %v5607_v7 = vrot.slane %v5606_v48, 2  ;;  %v5598_v28 = vrot.slane %v5597_v3, 4  ;;  %v7651_v63 = vmul.f32 %v14090_v31, %v14090_v31  ;;  %v9102_v19 = vunpack.c.l.bf16 %v14053_v29 }
 0x5ca   : > { %v6550_v33 = vadd.f32 %v6041_v24, %v5582_v55  ;;  %v5614_v43 = vrot.slane %v5613_v58, 2  ;;  %v7234_v39 = vrot.slane %v14061_v36, 7  ;;  %v5634_v11 = vadd.f32 %v5633_v15, %v5632_v32  ;;  %v9261_v32 = vld [vmem:[%s10704_s7 + $0x3b0] sm:$0xff]   ;;  %v3091_v15 = vpop.permute.xlu0 %3090 }
 0x5cb   : > { %v5608_v40 = vadd.f32 %v5607_v7, %v5606_v48  ;;  %v5599_v13 = vadd.f32 %v5598_v28, %v5597_v3  ;;  %v3968_v6 = vmul.f32 %v9110_v26, %v3098_v10  ;;  %v3964_v8 = vmul.f32 %v9102_v19, %v3070_v30 }
 0x5cc   : > { %v7650_v1 = vmul.f32 %v6550_v33, %v6550_v33  ;;  %v7235_v22 = vsel %vm6836_vm0, %v7234_v39, %v6547_v41  ;;  %v6045_v0 = vrot.slane %v14018_v62, 7  ;;  %v8333_v29 = vrot.slane %v7651_v63, 4 }
 0x5cd   : > { %v5609_v42 = vrot.slane %v5608_v40, 1  ;;  %v5600_v2 = vrot.slane %v5599_v13, 2  ;;  %v7238_v21 = vrot.slane %v6550_v33, 5  ;;  %v9115_v44 = vunpack.c.h.bf16 %v14100_v61 }
 0x5ce   : > { %v8331_v18 = vrot.slane %v7650_v1, 5  ;;  %v5625_v16 = vsel %vm3986_vm3, %v3964_v8, 0.0  ;;  %v9099_v10 = vunpack.c.h.bf16 %v14033_v12  ;;  %v5615_v41 = vadd.f32 %v5614_v43, %v5613_v58  ;;  %v3084_v43 = vpop.permute.xlu1 %3083 }
 0x5cf   : > { %v5610_v36 = vadd.f32 %v5609_v42, %v5608_v40  ;;  %v5601_v25 = vadd.f32 %v5600_v2, %v5599_v13  ;;  %v5635_v38 = vrot.slane %v5634_v11, 2  ;;  %v5653_v49 = vsel %vm3986_vm3, %v3968_v6, 0.0 }
 0x5d0   : > { %v8332_v46 = vsel %vm6842_vm5, %v8331_v18, %v8330_v20  ;;  %v7237_v23 = vsel %vm6839_vm4, %v7236_v51, %v7235_v22  ;;  %v6044_v52 = vrot.slane %v14018_v62, 6  ;;  %v3971_v57 = vmul.f32 %v9115_v44, %v3119_v27  ;;  %v3175_v51 = vpop.permute.xlu2 %3174 }
 0x5d1   : > { %v8334_v60 = vsel %vm6845_vm6, %v8333_v29, %v8332_v46  ;;  %v5602_v35 = vrot.slane %v5601_v25, 1  ;;  %v7239_v53 = vsel %vm6842_vm5, %v7238_v21, %v7237_v23  ;;  %v6554_v20 = vadd.f32 %v6045_v0, %v5610_v36  ;;  %v14132_v36 = vld [vmem:[%s10785_s10 + $0xe8] sm:$0xff] }
 0x5d2   : > { %v8336_v54 = vsel %vm6848_vm7, %v8335_v17, %v8334_v60  ;;  %v5626_v12 = vrot.slane %v5625_v16, 4  ;;  %v7240_v24 = vrot.slane %v14090_v31, 4  ;;  %v5654_v14 = vrot.slane %v5653_v49, 4 }
 0x5d3   : > { %v5603_v4 = vadd.f32 %v5602_v35, %v5601_v25  ;;  %v3963_v47 = vmul.f32 %v9099_v10, %v3063_v56  ;;  %v7242_v48 = vrot.slane %v14077_v37, 3  ;;  %v5616_v58 = vrot.slane %v5615_v41, 1 }
 0x5d4   : > { %v5636_v62 = vadd.f32 %v5635_v38, %v5634_v11  ;;  %v9131_v55 = vunpack.c.h.bf16 %v14114_v45  ;;  %v7241_v26 = vsel %vm6845_vm6, %v7240_v24, %v7239_v53  ;;  %v9107_v33 = vunpack.c.h.bf16 %v9261_v32 }
 0x5d5   : > { %v6553_v7 = vadd.f32 %v6044_v52, %v5603_v4  ;;  %v5618_v3 = vsel %vm3986_vm3, %v3963_v47, 0.0  ;;  %v7654_v28 = vmul.f32 %v6554_v20, %v6554_v20  ;;  %v5674_v31 = vsel %vm3986_vm3, %v3971_v57, 0.0  ;;  %v14137_v52 = vld [vmem:[%s10704_s7 + $0x3d0] sm:$0xff]  }
 0x5d6   : > { %v5627_v30 = vadd.f32 %v5626_v12, %v5625_v16  ;;  %v5619_v17 = vrot.slane %v5618_v3, 4  ;;  %v5655_v63 = vadd.f32 %v5654_v14, %v5653_v49  ;;  %v3967_v19 = vmul.f32 %v9107_v33, %v3091_v15 }
 0x5d7   : > { %v7244_v40 = vrot.slane %v6553_v7, 2  ;;  %v7653_v37 = vmul.f32 %v6553_v7, %v6553_v7  ;;  %v7246_v39 = vrot.slane %v6554_v20, 1  ;;  %v7243_v1 = vsel %vm6848_vm7, %v7242_v48, %v7241_v26  ;;  %v3112_v20 = vpop.permute.xlu0 %3111 }
 0x5d8   : > { %v5620_v13 = vadd.f32 %v5619_v17, %v5618_v3  ;;  %v3979_v27 = vmul.f32 %v9131_v55, %v3175_v51  ;;  %v5675_v42 = vrot.slane %v5674_v31, 4  ;;  %v5646_v8 = vsel %vm3986_vm3, %v3967_v19, 0.0  ;;  %v3147_v7 = vpop.permute.xlu2 %3146 }
 0x5d9   : > { %v7245_v11 = vsel %vm6851_vm8, %v7244_v40, %v7243_v1  ;;  %v8337_v6 = vrot.slane %v7653_v37, 2  ;;  %v8339_v22 = vrot.slane %v7654_v28, 1  ;;  %v5628_v0 = vrot.slane %v5627_v30, 2 }
 0x5da   : > { %v7247_v18 = vsel %vm6854_vm9, %v7246_v39, %v7245_v11  ;;  %v5621_v2 = vrot.slane %v5620_v13, 2  ;;  %v5617_v56 = vadd.f32 %v5616_v58, %v5615_v41  ;;  %v5647_v21 = vrot.slane %v5646_v8, 4  ;;  %v3105_v58 = vpop.permute.xlu1 %3104 }
 0x5db   : > { %7350 = vst.msk [vmem:[%s11055_s13 + $0xe0] sm:$0xff] %vm3986_vm3, %v7247_v18  ;;  %v8338_v29 = vsel %vm6851_vm8, %v8337_v6, %v8336_v54  ;;  %v5637_v44 = vrot.slane %v5636_v62, 1  ;;  %v5656_v46 = vrot.slane %v5655_v63, 2  ;;  %v5730_v16 = vsel %vm3986_vm3, %v3979_v27, 0.0 }
 0x5dc   : > { %v8340_v25 = vsel %vm6854_vm9, %v8339_v22, %v8338_v29  ;;  %v5622_v10 = vadd.f32 %v5621_v2, %v5620_v13  ;;  %v5648_v38 = vadd.f32 %v5647_v21, %v5646_v8  ;;  %v5676_v60 = vadd.f32 %v5675_v42, %v5674_v31 }
 0x5dd   : > { %v5629_v49 = vadd.f32 %v5628_v0, %v5627_v30  ;;  %v9106_v23 = vunpack.c.l.bf16 %v9261_v32  ;;  %v6555_v41 = vadd.f32 %v14132_v36, %v5617_v56  ;;  %v6048_v35 = vrot.slane %v14132_v36, 3 }
 0x5de   : > { %v5623_v54 = vrot.slane %v5622_v10, 1  ;;  %v5731_v53 = vrot.slane %v5730_v16, 4  ;;  %v7407_v57 = vsel %vm3986_vm3, %v14049_v9, 0.0  ;;  %v5638_v12 = vadd.f32 %v5637_v44, %v5636_v62 }
 0x5df   : > { %v5657_v24 = vadd.f32 %v5656_v46, %v5655_v63  ;;  %v3966_v14 = vmul.f32 %v9106_v23, %v3084_v43  ;;  %v6046_v4 = vrot.slane %v14132_v36, 1  ;;  %v5649_v48 = vrot.slane %v5648_v38, 2  ;;  %v3133_v56 = vpop.permute.xlu0 %3132 }
 0x5e0   : > { %v5624_v47 = vadd.f32 %v5623_v54, %v5622_v10  ;;  %v9123_v32 = vunpack.c.h.bf16 %v14137_v52  ;;  %v5677_v55 = vrot.slane %v5676_v60, 2  ;;  %v5630_v15 = vrot.slane %v5629_v49, 1 }
 0x5e1   : > { %v5639_v26 = vsel %vm3986_vm3, %v3966_v14, 0.0  ;;  %v9111_v3 = vunpack.c.h.bf16 %v14086_v50  ;;  %v5732_v51 = vadd.f32 %v5731_v53, %v5730_v16  ;;  %v9114_v9 = vunpack.c.l.bf16 %v14100_v61 }
 0x5e2   : > { %v5640_v33 = vrot.slane %v5639_v26, 4  ;;  %v14148_v62 = vadd.f32 %v6048_v35, %v5638_v12  ;;  %v5658_v28 = vrot.slane %v5657_v24, 1  ;;  %v7408_v30 = vadd.f32 %v7407_v57, %v13993_v34  ;;  %v14178_v12 = vld [vmem:[%s10704_s7 + $0x3d8] sm:$0xff]  }
 0x5e3   : > { %v3969_v31 = vmul.f32 %v9111_v3, %v3105_v58  ;;  %v14151_v17 = vmul.f32 %v6555_v41, %v6555_v41  ;;  %v6556_v63 = vadd.f32 %v6046_v4, %v5624_v47  ;;  %v5650_v40 = vadd.f32 %v5649_v48, %v5648_v38 }
 0x5e4   : > { %v3975_v37 = vmul.f32 %v9123_v32, %v3147_v7  ;;  %v5678_v19 = vadd.f32 %v5677_v55, %v5676_v60  ;;  %v6047_v43 = vrot.slane %v14132_v36, 2  ;;  %v5631_v39 = vadd.f32 %v5630_v15, %v5629_v49  ;;  %v14190_v55 = vld [vmem:[%s10785_s10 + $0xf8] sm:$0xff] }
 0x5e5   : > { %v5641_v50 = vadd.f32 %v5640_v33, %v5639_v26  ;;  %v8468_v1 = vsel %vm3986_vm3, %v14064_v5, 0.0  ;;  %v6051_v61 = vrot.slane %v14132_v36, 6  ;;  %v5733_v13 = vrot.slane %v5732_v51, 2 }
 0x5e6   : > { %v3970_v27 = vmul.f32 %v9114_v9, %v3112_v20  ;;  %v7252_v11 = vrot.slane %v14148_v62, 5  ;;  %v5659_v34 = vadd.f32 %v5658_v28, %v5657_v24  ;;  %v5660_v42 = vsel %vm3986_vm3, %v3969_v31, 0.0  ;;  %v3126_v28 = vpop.permute.xlu1 %3125 }
 0x5e7   : > { %v5642_v6 = vrot.slane %v5641_v50, 2  ;;  %v7409_v8 = vsel %vm3986_vm3, %v7247_v18, 0.0  ;;  %v7248_v22 = vrot.slane %v6556_v63, 7  ;;  %v5651_v0 = vrot.slane %v5650_v40, 1  ;;  %v14167_v18 = vld [vmem:[%s10704_s7 + $0x3c8] sm:$0xff]  }
 0x5e8   : > { %v5702_v2 = vsel %vm3986_vm3, %v3975_v37, 0.0  ;;  %v8470_v5 = vsel %vm3986_vm3, %v8340_v25, 0.0  ;;  %v5679_v29 = vrot.slane %v5678_v19, 1  ;;  %v14162_v21 = vadd.f32 %v6047_v43, %v5631_v39  ;;  %v14173_v25 = vld [vmem:[%s10785_s10 + $0xf0] sm:$0xff] }
 0x5e9   : > { %v5643_v44 = vadd.f32 %v5642_v6, %v5641_v50  ;;  %v5734_v46 = vadd.f32 %v5733_v13, %v5732_v51  ;;  %v6049_v16 = vrot.slane %v14132_v36, 4  ;;  %v5667_v10 = vsel %vm3986_vm3, %v3970_v27, 0.0  ;;  %v3182_v13 = vpop.permute.xlu0 %3181 }
 0x5ea   : > { %v5661_v38 = vrot.slane %v5660_v42, 4  ;;  %v5703_v49 = vrot.slane %v5702_v2, 4  ;;  %v14169_v23 = vadd.f32 %v7409_v8, %v7408_v30  ;;  %v8469_v35 = vadd.f32 %v8468_v1, %v14001_v59 }
 0x5eb   : > { %v5644_v60 = vrot.slane %v5643_v44, 1  ;;  %v7249_v54 = vsel %vm6836_vm0, %v7248_v22, %v6555_v41  ;;  %v6050_v53 = vrot.slane %v14132_v36, 5  ;;  %v5652_v20 = vadd.f32 %v5651_v0, %v5650_v40 }
 0x5ec   : > { %v5662_v57 = vadd.f32 %v5661_v38, %v5660_v42  ;;  %v5668_v14 = vrot.slane %v5667_v10, 4  ;;  %v14180_v4 = vadd.f32 %v8470_v5, %v8469_v35  ;;  %v9119_v47 = vunpack.c.h.bf16 %v14167_v18  ;;  %v9268_v38 = vld [vmem:[%s10704_s7 + $0x3e8] sm:$0xff]  }
 0x5ed   : > { %v5645_v24 = vadd.f32 %v5644_v60, %v5643_v44  ;;  %v14185_v59 = vmul.f32 %v14148_v62, %v14148_v62  ;;  %v7250_v48 = vrot.slane %v14162_v21, 6  ;;  %v5735_v32 = vrot.slane %v5734_v46, 1  ;;  %v3154_v62 = vpop.permute.xlu2 %3153 }
 0x5ee   : > { %v5663_v41 = vrot.slane %v5662_v57, 2  ;;  %v6053_v58 = vrot.slane %v14173_v25, 1  ;;  %v5704_v26 = vadd.f32 %v5703_v49, %v5702_v2  ;;  %v9126_v7 = vunpack.c.l.bf16 %v14178_v12 }
 0x5ef   : > { %v14192_v15 = vadd.f32 %v6049_v16, %v5645_v24  ;;  %v6561_v3 = vadd.f32 %v6051_v61, %v5659_v34  ;;  %v5680_v51 = vadd.f32 %v5679_v29, %v5678_v19  ;;  %v7251_v33 = vsel %vm6839_vm4, %v7250_v48, %v7249_v54 }
 0x5f0   : > { %v5664_v9 = vadd.f32 %v5663_v41, %v5662_v57  ;;  %v6560_v31 = vadd.f32 %v6050_v53, %v5652_v20  ;;  %v5669_v40 = vadd.f32 %v5668_v14, %v5667_v10  ;;  %v3973_v37 = vmul.f32 %v9119_v47, %v3133_v56 }
 0x5f1   : > { %v7254_v30 = vrot.slane %v14192_v15, 4  ;;  %v7656_v43 = vmul.f32 %v6556_v63, %v6556_v63  ;;  %v6060_v39 = vrot.slane %v14190_v55, 1  ;;  %v5736_v50 = vadd.f32 %v5735_v32, %v5734_v46 }
 0x5f2   : > { %v5665_v1 = vrot.slane %v5664_v9, 1  ;;  %v7253_v27 = vsel %vm6842_vm5, %v7252_v11, %v7251_v33  ;;  %v5705_v61 = vrot.slane %v5704_v26, 2  ;;  %v6052_v19 = vrot.slane %v14132_v36, 7 }
 0x5f3   : > { %v3976_v34 = vmul.f32 %v9126_v7, %v3154_v62  ;;  %v14200_v6 = vmul.f32 %v6561_v3, %v6561_v3  ;;  %v14202_v42 = vadd.f32 %v6053_v58, %v5680_v51  ;;  %v7255_v8 = vsel %vm6845_vm6, %v7254_v30, %v7253_v27 }
 0x5f4   : > { %v9118_v63 = vunpack.c.l.bf16 %v14167_v18  ;;  %v7256_v22 = vrot.slane %v6560_v31, 3  ;;  %v5670_v0 = vrot.slane %v5669_v40, 2  ;;  %v5666_v2 = vadd.f32 %v5665_v1, %v5664_v9  ;;  %v3189_v9 = vpop.permute.xlu0 %3188 }
 0x5f5   : > { %v5688_v56 = vsel %vm3986_vm3, %v3973_v37, 0.0  ;;  %v8345_v11 = vrot.slane %v14185_v59, 5  ;;  %v7258_v5 = vrot.slane %v6561_v3, 2  ;;  %v8341_v29 = vrot.slane %v7656_v43, 7 }
 0x5f6   : > { %v14208_v36 = vadd.f32 %v6060_v39, %v5736_v50  ;;  %v7257_v44 = vsel %vm6848_vm7, %v7256_v22, %v7255_v8  ;;  %v5706_v46 = vadd.f32 %v5705_v61, %v5704_v26  ;;  %v14211_v16 = vadd.f32 %v6052_v19, %v5666_v2  ;;  %v14236_v26 = vld [vmem:[%s10704_s7 + $0x3f0] sm:$0xff]   ;;  %v3203_v61 = vpop.permute.xlu2 %3202 }
 0x5f7   : > { %v5709_v10 = vsel %vm3986_vm3, %v3976_v34, 0.0  ;;  %v8351_v18 = vrot.slane %v14200_v6, 2  ;;  %v7657_v60 = vmul.f32 %v14162_v21, %v14162_v21  ;;  %v5689_v49 = vrot.slane %v5688_v56, 4  ;;  %v3140_v21 = vpop.permute.xlu1 %3139 }
 0x5f8   : > { %v3972_v35 = vmul.f32 %v9118_v63, %v3126_v28  ;;  %v7262_v54 = vrot.slane %v14202_v42, 7  ;;  %v14221_v53 = vmul.f32 %v14202_v42, %v14202_v42  ;;  %v5671_v20 = vadd.f32 %v5670_v0, %v5669_v40 }
 0x5f9   : > { %v7260_v57 = vrot.slane %v14211_v16, 1  ;;  %v7259_v24 = vsel %vm6851_vm8, %v7258_v5, %v7257_v44  ;;  %v5710_v14 = vrot.slane %v5709_v10, 4  ;;  %v9134_v59 = vunpack.c.l.bf16 %v9268_v38 }
 0x5fa   : > { %v5681_v47 = vsel %vm3986_vm3, %v3972_v35, 0.0  ;;  %v8342_v48 = vsel %vm6836_vm0, %v8341_v29, %v14151_v17  ;;  %v14230_v32 = vmul.f32 %v14208_v36, %v14208_v36  ;;  %v5707_v41 = vrot.slane %v5706_v46, 1 }
 0x5fb   : > { %v14233_v58 = vsel %vm6854_vm9, %v7260_v57, %v7259_v24  ;;  %v8343_v7 = vrot.slane %v7657_v60, 6  ;;  %v5690_v3 = vadd.f32 %v5689_v49, %v5688_v56  ;;  %v5682_v51 = vrot.slane %v5681_v47, 4 }
 0x5fc   : > { %7351 = vst.msk [vmem:[%s11055_s13 + $0xe8] sm:$0xff] %vm3986_vm3, %v14233_v58  ;;  %v3980_v33 = vmul.f32 %v9134_v59, %v3182_v13  ;;  %v8355_v17 = vrot.slane %v14221_v53, 7  ;;  %v14242_v62 = vmul.f32 %v6560_v31, %v6560_v31  ;;  %v6057_v28 = vrot.slane %v14173_v25, 5 }
 0x5fd   : > { %v5672_v30 = vrot.slane %v5671_v20, 1  ;;  %v8344_v40 = vsel %vm6839_vm4, %v8343_v7, %v8342_v48  ;;  %v5711_v37 = vadd.f32 %v5710_v14, %v5709_v10  ;;  %v5683_v43 = vadd.f32 %v5682_v51, %v5681_v47 }
 0x5fe   : > { %v9139_v39 = vunpack.c.h.bf16 %v14236_v26  ;;  %v7276_v50 = vrot.slane %v14208_v36, 7  ;;  %v8369_v1 = vrot.slane %v14230_v32, 7  ;;  %v7659_v13 = vmul.f32 %v14192_v15, %v14192_v15 }
 0x5ff   : > { %v5708_v27 = vadd.f32 %v5707_v41, %v5706_v46  ;;  %v5691_v31 = vrot.slane %v5690_v3, 2  ;;  %v5684_v19 = vrot.slane %v5683_v43, 2  ;;  %v5737_v34 = vsel %vm3986_vm3, %v3980_v33, 0.0  ;;  %v3168_v24 = vpop.permute.xlu1 %3167  ;;  %v3161_v41 = vpop.permute.xlu0 %3160 }
 0x600   : > { %v9122_v8 = vunpack.c.l.bf16 %v14137_v52  ;;  %v8349_v63 = vrot.slane %v14242_v62, 3  ;;  %v8346_v22 = vsel %vm6842_vm5, %v8345_v11, %v8344_v40  ;;  %v5673_v0 = vadd.f32 %v5672_v30, %v5671_v20 }
 0x601   : > { %v9135_v2 = vunpack.c.h.bf16 %v9268_v38  ;;  %v5712_v56 = vrot.slane %v5711_v37, 2  ;;  %v5685_v5 = vadd.f32 %v5684_v19, %v5683_v43  ;;  %v3983_v29 = vmul.f32 %v9139_v39, %v3203_v61 }
 0x602   : > { %v3974_v44 = vmul.f32 %v9122_v8, %v3140_v21  ;;  %v14255_v10 = vadd.f32 %v6057_v28, %v5708_v27  ;;  %v6058_v15 = vrot.slane %v14173_v25, 6  ;;  %v5738_v46 = vrot.slane %v5737_v34, 4 }
 0x603   : > { %v3981_v60 = vmul.f32 %v9135_v2, %v3189_v9  ;;  %v8347_v49 = vrot.slane %v7659_v13, 4  ;;  %v5692_v35 = vadd.f32 %v5691_v31, %v5690_v3  ;;  %v5686_v57 = vrot.slane %v5685_v5, 1 }
 0x604   : > { %v5695_v52 = vsel %vm3986_vm3, %v3974_v44, 0.0  ;;  %v6055_v11 = vrot.slane %v14173_v25, 3  ;;  %v6054_v38 = vrot.slane %v14173_v25, 2  ;;  %v9130_v14 = vunpack.c.l.bf16 %v14114_v45 }
 0x605   : > { %v5696_v20 = vrot.slane %v5695_v52, 4  ;;  %v6563_v47 = vadd.f32 %v14173_v25, %v5673_v0  ;;  %v5713_v59 = vadd.f32 %v5712_v56, %v5711_v37  ;;  %v5758_v21 = vsel %vm3986_vm3, %v3983_v29, 0.0 }
 0x606   : > { %v5744_v48 = vsel %vm3986_vm3, %v3981_v60, 0.0  ;;  %v5739_v7 = vadd.f32 %v5738_v46, %v5737_v34  ;;  %v3978_v51 = vmul.f32 %v9130_v14, %v3168_v24  ;;  %v9127_v33 = vunpack.c.h.bf16 %v14178_v12  ;;  %v9270_v24 = vld [vmem:[%s10704_s7 + $0x3f8] sm:$0xff]  }
 0x607   : > { %v5697_v3 = vadd.f32 %v5696_v20, %v5695_v52  ;;  %v8348_v9 = vsel %vm6845_vm6, %v8347_v49, %v8346_v22  ;;  %v14269_v62 = vmul.f32 %v14255_v10, %v14255_v10  ;;  %v5693_v45 = vrot.slane %v5692_v35, 1  ;;  %v3196_v52 = vpop.permute.xlu1 %3195 }
 0x608   : > { %v5687_v28 = vadd.f32 %v5686_v57, %v5685_v5  ;;  %v5745_v40 = vrot.slane %v5744_v48, 4  ;;  %v5723_v37 = vsel %vm3986_vm3, %v3978_v51, 0.0  ;;  %v3977_v43 = vmul.f32 %v9127_v33, %v3161_v41 }
 0x609   : > { %v5698_v30 = vrot.slane %v5697_v3, 2  ;;  %v7270_v39 = vrot.slane %v14255_v10, 3  ;;  %v7663_v13 = vmul.f32 %v6563_v47, %v6563_v47  ;;  %v5714_v27 = vrot.slane %v5713_v59, 1 }
 0x60a   : > { %v5759_v61 = vrot.slane %v5758_v21, 4  ;;  %v5740_v31 = vrot.slane %v5739_v7, 2  ;;  %v5724_v19 = vrot.slane %v5723_v37, 4  ;;  %v5716_v34 = vsel %vm3986_vm3, %v3977_v43, 0.0 }
 0x60b   : > { %v5699_v12 = vadd.f32 %v5698_v30, %v5697_v3  ;;  %v14275_v8 = vsel %vm6848_vm7, %v8349_v63, %v8348_v9  ;;  %v8363_v22 = vrot.slane %v14269_v62, 3  ;;  %v5694_v0 = vadd.f32 %v5693_v45, %v5692_v35 }
 0x60c   : > { %v6565_v2 = vadd.f32 %v6054_v38, %v5687_v28  ;;  %v6056_v56 = vrot.slane %v14173_v25, 4  ;;  %v5746_v29 = vadd.f32 %v5745_v40, %v5744_v48  ;;  %v9138_v44 = vunpack.c.l.bf16 %v14236_v26 }
 0x60d   : > { %v5700_v5 = vrot.slane %v5699_v12, 1  ;;  %v5715_v46 = vadd.f32 %v5714_v27, %v5713_v59  ;;  %v5760_v60 = vadd.f32 %v5759_v61, %v5758_v21  ;;  %v5725_v49 = vadd.f32 %v5724_v19, %v5723_v37  ;;  %v3217_v21 = vpop.permute.xlu0 %3216 }
 0x60e   : > { %v5717_v57 = vrot.slane %v5716_v34, 4  ;;  %v7263_v63 = vsel %vm6836_vm0, %v7262_v54, %v6563_v47  ;;  %v14287_v35 = vsel %vm6836_vm0, %v8355_v17, %v7663_v13  ;;  %v5741_v38 = vadd.f32 %v5740_v31, %v5739_v7 }
 0x60f   : > { %v5701_v20 = vadd.f32 %v5700_v5, %v5699_v12  ;;  %v6566_v14 = vadd.f32 %v6055_v11, %v5694_v0  ;;  %v7264_v48 = vrot.slane %v6565_v2, 6  ;;  %v5726_v26 = vrot.slane %v5725_v49, 2 }
 0x610   : > { %v5718_v59 = vadd.f32 %v5717_v57, %v5716_v34  ;;  %v5747_v3 = vrot.slane %v5746_v29, 2  ;;  %v3982_v51 = vmul.f32 %v9138_v44, %v3196_v52  ;;  %v9143_v33 = vunpack.c.h.bf16 %v9270_v24 }
 0x611   : > { %v6567_v41 = vadd.f32 %v6056_v56, %v5701_v20  ;;  %v14291_v42 = vadd.f32 %v6058_v15, %v5715_v46  ;;  %v5761_v54 = vrot.slane %v5760_v60, 2  ;;  %v5727_v53 = vadd.f32 %v5726_v26, %v5725_v49 }
 0x612   : > { %v5719_v47 = vrot.slane %v5718_v59, 2  ;;  %v14295_v17 = vmul.f32 %v14211_v16, %v14211_v16  ;;  %v5742_v11 = vrot.slane %v5741_v38, 1  ;;  %v5751_v7 = vsel %vm3986_vm3, %v3982_v51, 0.0 }
 0x613   : > { %v3985_v9 = vmul.f32 %v9143_v33, %v3217_v21  ;;  %v7265_v45 = vsel %vm6839_vm4, %v7264_v48, %v7263_v63  ;;  %v7268_v28 = vrot.slane %v6567_v41, 4  ;;  %v5752_v40 = vrot.slane %v5751_v7, 4  ;;  %v3210_v63 = vpop.permute.xlu1 %3209 }
 0x614   : > { %v5720_v30 = vadd.f32 %v5719_v47, %v5718_v59  ;;  %v7266_v37 = vrot.slane %v6566_v14, 5  ;;  %v6061_v15 = vrot.slane %v14190_v55, 2  ;;  %v5748_v43 = vadd.f32 %v5747_v3, %v5746_v29 }
 0x615   : > { %v5772_v13 = vsel %vm3986_vm3, %v3985_v9, 0.0  ;;  %v7272_v27 = vrot.slane %v14291_v42, 2  ;;  %v5762_v61 = vadd.f32 %v5761_v54, %v5760_v60  ;;  %v5728_v16 = vrot.slane %v5727_v53, 1 }
 0x616   : > { %v6059_v31 = vrot.slane %v14173_v25, 7  ;;  %v7665_v12 = vmul.f32 %v6565_v2, %v6565_v2  ;;  %v7267_v19 = vsel %vm6842_vm5, %v7266_v37, %v7265_v45  ;;  %v5721_v34 = vrot.slane %v5720_v30, 1 }
 0x617   : > { %v5753_v0 = vadd.f32 %v5752_v40, %v5751_v7  ;;  %v5743_v56 = vadd.f32 %v5742_v11, %v5741_v38  ;;  %v7269_v5 = vsel %vm6845_vm6, %v7268_v28, %v7267_v19  ;;  %v5773_v44 = vrot.slane %v5772_v13, 4 }
 0x618   : > { %v9142_v46 = vunpack.c.l.bf16 %v9270_v24  ;;  %v7666_v49 = vmul.f32 %v6566_v14, %v6566_v14  ;;  %v5749_v29 = vrot.slane %v5748_v43, 1  ;;  %v5722_v57 = vadd.f32 %v5721_v34, %v5720_v30 }
 0x619   : > { %v5754_v52 = vrot.slane %v5753_v0, 2  ;;  %v5763_v20 = vrot.slane %v5762_v61, 1  ;;  %v6062_v60 = vrot.slane %v14190_v55, 3  ;;  %v5729_v48 = vadd.f32 %v5728_v16, %v5727_v53 }
 0x61a   : > { %v5774_v25 = vadd.f32 %v5773_v44, %v5772_v13  ;;  %v8357_v2 = vrot.slane %v7665_v12, 6  ;;  %v7271_v26 = vsel %vm6848_vm7, %v7270_v39, %v7269_v5  ;;  %v6570_v38 = vadd.f32 %v6059_v31, %v5722_v57 }
 0x61b   : > { %v5755_v59 = vadd.f32 %v5754_v52, %v5753_v0  ;;  %v6573_v21 = vadd.f32 %v6061_v15, %v5743_v56  ;;  %v6063_v24 = vrot.slane %v14190_v55, 4  ;;  %v3984_v3 = vmul.f32 %v9142_v46, %v3210_v63 }
 0x61c   : > { %v5775_v14 = vrot.slane %v5774_v25, 2  ;;  %v7667_v51 = vmul.f32 %v6567_v41, %v6567_v41  ;;  %v5750_v33 = vadd.f32 %v5749_v29, %v5748_v43  ;;  %v7274_v54 = vrot.slane %v6570_v38, 1 }
 0x61d   : > { %v5756_v47 = vrot.slane %v5755_v59, 1  ;;  %v6571_v53 = vadd.f32 %v14190_v55, %v5729_v48  ;;  %v7273_v11 = vsel %vm6851_vm8, %v7272_v27, %v7271_v26  ;;  %v5765_v10 = vsel %vm3986_vm3, %v3984_v3, 0.0 }
 0x61e   : > { %v5776_v7 = vadd.f32 %v5775_v14, %v5774_v25  ;;  %v8353_v39 = vrot.slane %v14295_v17, 1  ;;  %v7275_v9 = vsel %vm6854_vm9, %v7274_v54, %v7273_v11  ;;  %v5766_v28 = vrot.slane %v5765_v10, 4 }
 0x61f   : > { %v5757_v45 = vadd.f32 %v5756_v47, %v5755_v59  ;;  %v8352_v41 = vsel %vm6851_vm8, %v8351_v18, %v14275_v8  ;;  %v8358_v30 = vsel %vm6839_vm4, %v8357_v2, %v14287_v35  ;;  %v6064_v40 = vrot.slane %v14190_v55, 5  ;;  %7352 = vst.msk [vmem:[%s11055_s13 + $0xf0] sm:$0xff] %vm3986_vm3, %v7275_v9 }
 0x620   : > { %v5777_v37 = vrot.slane %v5776_v7, 1  ;;  %v8359_v15 = vrot.slane %v7666_v49, 5  ;;  %v8361_v43 = vrot.slane %v7667_v51, 4  ;;  %v5767_v13 = vadd.f32 %v5766_v28, %v5765_v10 }
 0x621   : > { %v6575_v17 = vadd.f32 %v6063_v24, %v5757_v45  ;;  %v5764_v27 = vadd.f32 %v5763_v20, %v5762_v61  ;;  %v7673_v16 = vmul.f32 %v6573_v21, %v6573_v21  ;;  %v6574_v31 = vadd.f32 %v6062_v60, %v5750_v33 }
 0x622   : > { %v7671_v12 = vmul.f32 %v6571_v53, %v6571_v53  ;;  %v8354_v6 = vsel %vm6854_vm9, %v8353_v39, %v8352_v41  ;;  %v7669_v18 = vmul.f32 %v14291_v42, %v14291_v42  ;;  %v8360_v8 = vsel %vm6842_vm5, %v8359_v15, %v8358_v30 }
 0x623   : > { %v5768_v35 = vrot.slane %v5767_v13, 2  ;;  %v7277_v19 = vsel %vm6836_vm0, %v7276_v50, %v6571_v53  ;;  %v7670_v34 = vmul.f32 %v6570_v38, %v6570_v38  ;;  %v6066_v0 = vrot.slane %v14190_v55, 7 }
 0x624   : > { %v5778_v56 = vadd.f32 %v5777_v37, %v5776_v7  ;;  %v7278_v61 = vrot.slane %v6573_v21, 6  ;;  %v8362_v5 = vsel %vm6845_vm6, %v8361_v43, %v8360_v8  ;;  %v7675_v44 = vmul.f32 %v6575_v17, %v6575_v17 }
 0x625   : > { %v5769_v46 = vadd.f32 %v5768_v35, %v5767_v13  ;;  %v6576_v49 = vadd.f32 %v6064_v40, %v5764_v27  ;;  %v8371_v29 = vrot.slane %v7673_v16, 6  ;;  %v7674_v57 = vmul.f32 %v6574_v31, %v6574_v31 }
 0x626   : > { %v8370_v42 = vsel %vm6836_vm0, %v8369_v1, %v7671_v12  ;;  %v7279_v36 = vsel %vm6839_vm4, %v7278_v61, %v7277_v19  ;;  %v7282_v52 = vrot.slane %v6575_v17, 4  ;;  %v6065_v50 = vrot.slane %v14190_v55, 6 }
 0x627   : > { %v5770_v63 = vrot.slane %v5769_v46, 1  ;;  %v8364_v20 = vsel %vm6848_vm7, %v8363_v22, %v8362_v5  ;;  %v7280_v60 = vrot.slane %v6574_v31, 5  ;;  %v8367_v48 = vrot.slane %v7670_v34, 1 }
 0x628   : > { %v6578_v25 = vadd.f32 %v6066_v0, %v5778_v56  ;;  %v8365_v2 = vrot.slane %v7669_v18, 2  ;;  %v8372_v26 = vsel %vm6839_vm4, %v8371_v29, %v8370_v42  ;;  %v8375_v38 = vrot.slane %v7675_v44, 4 }
 0x629   : > { %v5771_v32 = vadd.f32 %v5770_v63, %v5769_v46  ;;  %v7411_v1 = vsel %vm3986_vm3, %v14233_v58, 0.0  ;;  %v7676_v59 = vmul.f32 %v6576_v49, %v6576_v49  ;;  %v8373_v21 = vrot.slane %v7674_v57, 5 }
 0x62a   : > { %v7281_v55 = vsel %vm6842_vm5, %v7280_v60, %v7279_v36  ;;  %v8472_v24 = vsel %vm3986_vm3, %v8354_v6, 0.0  ;;  %v8366_v62 = vsel %vm6851_vm8, %v8365_v2, %v8364_v20  ;;  %v7284_v3 = vrot.slane %v6576_v49, 3 }
 0x62b   : > { %v7283_v22 = vsel %vm6845_vm6, %v7282_v52, %v7281_v55  ;;  %v6577_v14 = vadd.f32 %v6065_v50, %v5771_v32  ;;  %v8368_v51 = vsel %vm6854_vm9, %v8367_v48, %v8366_v62  ;;  %v8374_v33 = vsel %vm6842_vm5, %v8373_v21, %v8372_v26 }
 0x62c   : > { %v7678_v54 = vmul.f32 %v6578_v25, %v6578_v25  ;;  %v7413_v47 = vsel %vm3986_vm3, %v7275_v9, 0.0  ;;  %v8376_v58 = vsel %vm6845_vm6, %v8375_v38, %v8374_v33  ;;  %v7412_v7 = vadd.f32 %v7411_v1, %v14169_v23 }
 0x62d   : > { %v7286_v53 = vrot.slane %v6577_v14, 2  ;;  %v7677_v11 = vmul.f32 %v6577_v14, %v6577_v14  ;;  %v8377_v10 = vrot.slane %v7676_v59, 3  ;;  %v7288_v39 = vrot.slane %v6578_v25, 1 }
 0x62e   : > { %v7285_v45 = vsel %vm6848_vm7, %v7284_v3, %v7283_v22  ;;  %v8473_v28 = vadd.f32 %v8472_v24, %v14180_v4  ;;  %v8474_v41 = vsel %vm3986_vm3, %v8368_v51, 0.0  ;;  %v7414_v9 = vadd.f32 %v7413_v47, %v7412_v7 }
 0x62f   : > { %v7287_v30 = vsel %vm6851_vm8, %v7286_v53, %v7285_v45  ;;  %v8379_v40 = vrot.slane %v7677_v11, 2  ;;  %v8381_v37 = vrot.slane %v7678_v54, 1  ;;  %v8378_v43 = vsel %vm6848_vm7, %v8377_v10, %v8376_v58 }
 0x630   : > { %v7289_v15 = vsel %vm6854_vm9, %v7288_v39, %v7287_v30  ;;  %v8475_v4 = vadd.f32 %v8474_v41, %v8473_v28 }
 0x631   : > { %7353 = vst.msk [vmem:[%s11055_s13 + $0xf8] sm:$0xff] %vm3986_vm3, %v7289_v15  ;;  %v7415_v23 = vsel %vm3986_vm3, %v7289_v15, 0.0  ;;  %v8380_v17 = vsel %vm6851_vm8, %v8379_v40, %v8378_v43 }
 0x632   : > { %v7416_v13 = vadd.f32 %v7415_v23, %v7414_v9  ;;  %v8382_v27 = vsel %vm6854_vm9, %v8381_v37, %v8380_v17 }
 0x633   : > { %v8476_v16 = vsel %vm3986_vm3, %v8382_v27, 0.0 }
 0x634   : > { %v7417_v31 = vrot.slane %v7416_v13, 4  ;;  %v8477_v12 = vadd.f32 %v8476_v16, %v8475_v4 }
 0x636   : > { %v7418_v6 = vadd.f32 %v7417_v31, %v7416_v13  ;;  %v8478_v18 = vrot.slane %v8477_v12, 4 }
 0x638   : > { %v7419_v8 = vrot.slane %v7418_v6, 2  ;;  %v8479_v35 = vadd.f32 %v8478_v18, %v8477_v12 }
 0x63a   : > { %v7420_v19 = vadd.f32 %v7419_v8, %v7418_v6  ;;  %v8480_v34 = vrot.slane %v8479_v35, 2 }
 0x63c   : > { %v8481_v0 = vadd.f32 %v8480_v34, %v8479_v35  ;;  %v7421_v56 = vrot.slane %v7420_v19, 1 }
 0x63e   : > { %v8482_v61 = vrot.slane %v8481_v0, 1  ;;  %v7422_v44 = vadd.f32 %v7421_v56, %v7420_v19 }
 0x640   : > { %v8483_v5 = vadd.f32 %v8482_v61, %v8481_v0 }
 0x642   : > { %v8485_v46 = vrot.slane %v8483_v5, 7 }
 0x644   : > { %v8488_v49 = vsel %vm8487_vm10, %v7422_v44, %v8485_v46 }
 0x645   : > { %8490 = vst.msk [vmem:[%s304_s17] sm:$0x3] %vm8489_vm11, %v8488_v49 }
 0x646 PF: > { %s16_s18 = sadd.s32 1, %s9420_s18  }
 0x647   : > { %p13_p6 = scmp.ge.s32.totalorder %s16_s18, 6  }
 0x649   :  { %15 = sbr.rel (!%p13_p6) target bundleno = 1 (0x1), region = 87 }

</bundles_post_ra>
